<compile_context>
chip_gen: v6e
topology: v6e:2x2x1
jax: 0.10.0
libtpu: 0.0.40
codegen_flags: <defaults>
</compile_context>

<pallas_src>
import functools

import jax
import jax.numpy as jnp
from jax.experimental import pallas as pl
from jax.experimental.pallas import tpu as pltpu


def _round_up(x, m):
    return (x + m - 1) // m * m


def _pick_tm(M):
    # Track the real M (padded to the 8-row sublane granule), capped at 128.
    return min(128, _round_up(M, 8))


def _pick_tn(N):
    # Conv output channels in ResNet-18 are one of {64, 128, 256, 512}.
    if N <= 128:
        return N          # full-width block, zero N padding
    if N >= 512:
        return 256        # 256-wide lane-dense tiles (matches v6e/v7x MXU width)
    return 128            # Cout=256 -> 2 parallel N blocks (feeds both v7x TCs)


def _pick_tk(Kp):
    # Largest multiple of 128 that divides Kp and is <= 512 (bounded K pipeline).
    for cand in (512, 384, 256, 128):
        if Kp % cand == 0:
            return cand
    return 128


# ----------------------------------------------------------------------------
# Fused GEMM kernel:  out = relu?((A @ B) * scale + bias [+ residual])
# A/B are bf16, accumulation and epilogue are f32.
# ----------------------------------------------------------------------------
def _fused_mm_kernel(*refs, do_relu, has_residual):
    if has_residual:
        a_ref, b_ref, s_ref, c_ref, r_ref, o_ref, acc_ref = refs
    else:
        a_ref, b_ref, s_ref, c_ref, o_ref, acc_ref = refs
        r_ref = None

    k = pl.program_id(2)

    @pl.when(k == 0)
    def _():
        acc_ref[...] = jnp.zeros_like(acc_ref)

    acc_ref[...] += jnp.dot(a_ref[...], b_ref[...],
                            preferred_element_type=jnp.float32)

    @pl.when(k == pl.num_programs(2) - 1)
    def _():
        out = acc_ref[...] * s_ref[...] + c_ref[...]
        if r_ref is not None:
            out = out + r_ref[...]
        if do_relu:
            out = jnp.maximum(out, 0.0)
        o_ref[...] = out.astype(o_ref.dtype)


def fused_matmul(a, b, scale, bias, residual=None, relu=False):
    """A:(M,K), B:(K,N), scale/bias:(N,), residual:(M,N) f32 or None -> (M,N) f32."""
    M, K = a.shape
    K2, N = b.shape
    assert K == K2

    tm = _pick_tm(M)
    tn = _pick_tn(N)
    Kp = _round_up(K, 128)
    tk = _pick_tk(Kp)
    Mp = _round_up(M, tm)
    Np = _round_up(N, tn)

    # bf16 operands into the MXU; f32 scale/bias (and residual) in the epilogue.
    a_p = jnp.pad(a.astype(jnp.bfloat16), ((0, Mp - M), (0, Kp - K)))
    b_p = jnp.pad(b.astype(jnp.bfloat16), ((0, Kp - K), (0, Np - N)))
    s_p = jnp.pad(scale.astype(jnp.float32).reshape(1, N), ((0, 0), (0, Np - N)))
    c_p = jnp.pad(bias.astype(jnp.float32).reshape(1, N), ((0, 0), (0, Np - N)))

    in_specs = [
        pl.BlockSpec((tm, tk), lambda i, j, k: (i, k)),
        pl.BlockSpec((tk, tn), lambda i, j, k: (k, j)),
        pl.BlockSpec((1, tn), lambda i, j, k: (0, j)),
        pl.BlockSpec((1, tn), lambda i, j, k: (0, j)),
    ]
    operands = [a_p, b_p, s_p, c_p]

    has_residual = residual is not None
    if has_residual:
        r_p = jnp.pad(residual.astype(jnp.float32), ((0, Mp - M), (0, Np - N)))
        in_specs.append(pl.BlockSpec((tm, tn), lambda i, j, k: (i, j)))
        operands.append(r_p)

    grid = (Mp // tm, Np // tn, Kp // tk)
    out = pl.pallas_call(
        functools.partial(_fused_mm_kernel, do_relu=relu,
                          has_residual=has_residual),
        out_shape=jax.ShapeDtypeStruct((Mp, Np), jnp.float32),
        grid_spec=pltpu.PrefetchScalarGridSpec(
            num_scalar_prefetch=0,
            grid=grid,
            in_specs=in_specs,
            out_specs=pl.BlockSpec((tm, tn), lambda i, j, k: (i, j)),
            scratch_shapes=[pltpu.VMEM((tm, tn), jnp.float32)],
        ),
        compiler_params=pltpu.CompilerParams(
            dimension_semantics=("parallel", "parallel", "arbitrary"),
        ),
    )(*operands)

    if Mp == M and Np == N:
        return out
    return out[:M, :N]


# ----------------------------------------------------------------------------
# Max-pool: pairwise maximum over the 9 shifted views (plain JAX / VPU, per
# perf review — avoids the 9x stacked HBM copy and the un-pipelined Pallas DMA).
# ----------------------------------------------------------------------------
def maxpool2d(x, ksize=3, stride=2, pad=1):
    N, H, W, C = x.shape
    x_p = jnp.pad(x, ((0, 0), (pad, pad), (pad, pad), (0, 0)),
                  constant_values=-jnp.inf)
    OH = (H + 2 * pad - ksize) // stride + 1
    OW = (W + 2 * pad - ksize) // stride + 1
    out = None
    for dy in range(ksize):
        for dx in range(ksize):
            win = x_p[:, dy:dy + stride * (OH - 1) + 1:stride,
                        dx:dx + stride * (OW - 1) + 1:stride, :]
            out = win if out is None else jnp.maximum(out, win)
    return out


# ----------------------------------------------------------------------------
# Convolution (im2col glue) + fused BN/ReLU/residual via the Pallas GEMM kernel.
# ----------------------------------------------------------------------------
def conv_bn(x, w, scale, bias, stride, pad, relu, residual=None):
    # x: (N, H, W, Cin) NHWC ; w: (Cout, Cin, KH, KW) (PyTorch layout)
    N, H, W, Cin = x.shape
    Cout, _, KH, KW = w.shape
    x_p = jnp.pad(x, ((0, 0), (pad, pad), (pad, pad), (0, 0)))
    OH = (H + 2 * pad - KH) // stride + 1
    OW = (W + 2 * pad - KW) // stride + 1
    if KH == 1 and KW == 1:
        patches = x_p[:, ::stride, ::stride, :].reshape(N * OH * OW, Cin)
    else:
        cols = []
        for dy in range(KH):
            for dx in range(KW):
                cols.append(
                    x_p[:, dy:dy + stride * (OH - 1) + 1:stride,
                          dx:dx + stride * (OW - 1) + 1:stride, :])
        patches = jnp.concatenate(cols, axis=-1).reshape(N * OH * OW, KH * KW * Cin)
    w2d = jnp.transpose(w, (2, 3, 1, 0)).reshape(KH * KW * Cin, Cout)
    res2d = None if residual is None else residual.reshape(N * OH * OW, Cout)
    out = fused_matmul(patches, w2d, scale, bias, residual=res2d, relu=relu)
    return out.reshape(N, OH, OW, Cout)


# ----------------------------------------------------------------------------
# Parameter init (deterministic, synthetic) — torchvision resnet18 shapes.
# ----------------------------------------------------------------------------
def _bn_fold(gamma, beta, mean, var, eps=1e-5):
    scale = gamma / jnp.sqrt(var + eps)
    bias = beta - mean * scale
    return scale, bias


def _conv_bn_params(key, cout, cin, k):
    k1, k2, k3, k4, k5 = jax.random.split(key, 5)
    w = jax.random.normal(k1, (cout, cin, k, k), jnp.float32) / jnp.sqrt(k * k * cin)
    gamma = jax.random.uniform(k2, (cout,), jnp.float32, 0.5, 1.5)
    beta = jax.random.normal(k3, (cout,), jnp.float32) * 0.1
    mean = jax.random.normal(k4, (cout,), jnp.float32) * 0.1
    var = jax.random.uniform(k5, (cout,), jnp.float32, 0.5, 1.5)
    scale, bias = _bn_fold(gamma, beta, mean, var)
    return {"w": w, "scale": scale, "bias": bias}


def init_params(key, num_classes):
    keys = iter(jax.random.split(key, 64))
    params = {"conv1": _conv_bn_params(next(keys), 64, 3, 7)}
    layer_specs = [(64, 64, 1), (128, 64, 2), (256, 128, 2), (512, 256, 2)]
    for li, (cout, cin, stride) in enumerate(layer_specs, start=1):
        blocks = []
        for bi in range(2):
            in_c = cin if bi == 0 else cout
            s = stride if bi == 0 else 1
            blk = {
                "conv1": _conv_bn_params(next(keys), cout, in_c, 3),
                "conv2": _conv_bn_params(next(keys), cout, cout, 3),
                "stride": s,
            }
            if s != 1 or in_c != cout:
                blk["down"] = _conv_bn_params(next(keys), cout, in_c, 1)
            blocks.append(blk)
        params[f"layer{li}"] = blocks
    kf1, kf2 = jax.random.split(next(keys))
    params["fc_w"] = jax.random.normal(kf1, (num_classes, 512), jnp.float32) / jnp.sqrt(512.0)
    params["fc_b"] = jax.random.normal(kf2, (num_classes,), jnp.float32) * 0.1
    return params


# ----------------------------------------------------------------------------
# ResNet-18 forward.
# ----------------------------------------------------------------------------
def basic_block(x, blk):
    s = blk["stride"]
    if "down" in blk:
        d = blk["down"]
        identity = conv_bn(x, d["w"], d["scale"], d["bias"],
                           stride=s, pad=0, relu=False)
    else:
        identity = x
    c1, c2 = blk["conv1"], blk["conv2"]
    out = conv_bn(x, c1["w"], c1["scale"], c1["bias"], stride=s, pad=1, relu=True)
    out = conv_bn(out, c2["w"], c2["scale"], c2["bias"], stride=1, pad=1,
                  relu=True, residual=identity)
    return out


def resnet18_forward(params, x_nchw):
    x = jnp.transpose(x_nchw, (0, 2, 3, 1))  # NCHW -> NHWC
    p = params["conv1"]
    x = conv_bn(x, p["w"], p["scale"], p["bias"], stride=2, pad=3, relu=True)
    x = maxpool2d(x, 3, 2, 1)
    for li in range(1, 5):
        for blk in params[f"layer{li}"]:
            x = basic_block(x, blk)
    x = jnp.mean(x, axis=(1, 2))  # global average pool -> (N, 512)
    # Tiny FC (M=batch, N=num_classes): plain XLA dot per perf review —
    # a padded 128x128 Pallas tile would be >99% dead MXU work.
    logits = jnp.dot(x, params["fc_w"].T) + params["fc_b"]
    return logits


if __name__ == "__main__":
    num_classes = 10
    key = jax.random.PRNGKey(0)
    kp, kx = jax.random.split(key)
    params = init_params(kp, num_classes)
    x = jax.random.normal(kx, (2, 3, 32, 32), jnp.float32)  # NCHW, like PyTorch

    fwd = jax.jit(lambda inp: resnet18_forward(params, inp))
    out = fwd(x)
    jax.block_until_ready(out)
    assert out.shape == (2, num_classes)
    assert bool(jnp.all(jnp.isfinite(out)))
    print("KERNEL_OK")
</pallas_src>

<mosaic_0001>
module attributes {stable_mosaic.version = 11 : i64} {
  func.func @_fused_mm_kernel(%arg0: i32, %arg1: i32, %arg2: i32, %arg3: memref<128x256xbf16, #tpu.memory_space<vmem>>, %arg4: memref<256x64xbf16, #tpu.memory_space<vmem>>, %arg5: memref<1x64xf32, #tpu.memory_space<vmem>>, %arg6: memref<1x64xf32, #tpu.memory_space<vmem>>, %arg7: memref<128x64xf32, #tpu.memory_space<vmem>>, %arg8: memref<128x64xf32, #tpu.memory_space<vmem>>) attributes {dimension_semantics = [#tpu.dimension_semantics<parallel>, #tpu.dimension_semantics<parallel>, #tpu.dimension_semantics<arbitrary>], iteration_bounds = array<i64: 4, 1, 1>, scalar_prefetch = 0 : i64, scratch_operands = 1 : i64, tpu.core_type = #tpu.core_type<tc>, window_params = [{transform_indices = @transform_0, window_bounds = array<i64: 128, 256>}, {transform_indices = @transform_1, window_bounds = array<i64: 256, 64>}, {transform_indices = @transform_2, window_bounds = array<i64: 1, 64>}, {transform_indices = @transform_3, window_bounds = array<i64: 1, 64>}, {transform_indices = @transform_4, window_bounds = array<i64: 128, 64>}]} {
    %c0_i32 = arith.constant 0 : i32
    %0 = arith.cmpi eq, %arg2, %c0_i32 : i32
    %1 = arith.extui %0 : i1 to i32
    %c0_i32_0 = arith.constant 0 : i32
    %2 = arith.cmpi ne, %1, %c0_i32_0 : i32
    scf.if %2 {
      %cst_10 = arith.constant 0.000000e+00 : f32
      %12 = vector.broadcast %cst_10 : f32 to vector<128x64xf32>
      %c0_11 = arith.constant 0 : index
      %c0_12 = arith.constant 0 : index
      %13 = vector.load %arg8[%c0_11, %c0_12] : memref<128x64xf32, #tpu.memory_space<vmem>>, vector<128x64xf32>
      tpu.vector_store %arg8[%c0_11, %c0_12], %12 {strides = array<i32>} : memref<128x64xf32, #tpu.memory_space<vmem>>, vector<128x64xf32>,
    } else {
    }
    %c0 = arith.constant 0 : index
    %c0_1 = arith.constant 0 : index
    %3 = vector.load %arg8[%c0, %c0_1] : memref<128x64xf32, #tpu.memory_space<vmem>>, vector<128x64xf32>
    %c0_2 = arith.constant 0 : index
    %c0_3 = arith.constant 0 : index
    %4 = vector.load %arg3[%c0_2, %c0_3] : memref<128x256xbf16, #tpu.memory_space<vmem>>, vector<128x256xbf16>
    %c0_4 = arith.constant 0 : index
    %c0_5 = arith.constant 0 : index
    %5 = vector.load %arg4[%c0_4, %c0_5] : memref<256x64xbf16, #tpu.memory_space<vmem>>, vector<256x64xbf16>
    %cst = arith.constant dense<0.000000e+00> : vector<128x64xf32>
    %6 = tpu.matmul %4, %5, %cst {dimension_numbers = #tpu.dot_dimension_numbers<[1], [0], [0], [1], [0, 0, 1, 1], [], []>} : vector<128x256xbf16>, vector<256x64xbf16>, vector<128x64xf32> -> vector<128x64xf32>
    %7 = arith.addf %3, %6 : vector<128x64xf32>
    %c0_6 = arith.constant 0 : index
    %c0_7 = arith.constant 0 : index
    %8 = vector.load %arg8[%c0_6, %c0_7] : memref<128x64xf32, #tpu.memory_space<vmem>>, vector<128x64xf32>
    tpu.vector_store %arg8[%c0_6, %c0_7], %7 {strides = array<i32>} : memref<128x64xf32, #tpu.memory_space<vmem>>, vector<128x64xf32>,
    %c0_i32_8 = arith.constant 0 : i32
    %9 = arith.cmpi eq, %arg2, %c0_i32_8 : i32
    %10 = arith.extui %9 : i1 to i32
    %c0_i32_9 = arith.constant 0 : i32
    %11 = arith.cmpi ne, %10, %c0_i32_9 : i32
    scf.if %11 {
      %c0_10 = arith.constant 0 : index
      %c0_11 = arith.constant 0 : index
      %12 = vector.load %arg8[%c0_10, %c0_11] : memref<128x64xf32, #tpu.memory_space<vmem>>, vector<128x64xf32>
      %c0_12 = arith.constant 0 : index
      %c0_13 = arith.constant 0 : index
      %13 = vector.load %arg5[%c0_12, %c0_13] : memref<1x64xf32, #tpu.memory_space<vmem>>, vector<1x64xf32>
      %14 = vector.broadcast %13 : vector<1x64xf32> to vector<128x64xf32>
      %15 = arith.mulf %12, %14 : vector<128x64xf32>
      %c0_14 = arith.constant 0 : index
      %c0_15 = arith.constant 0 : index
      %16 = vector.load %arg6[%c0_14, %c0_15] : memref<1x64xf32, #tpu.memory_space<vmem>>, vector<1x64xf32>
      %17 = vector.broadcast %16 : vector<1x64xf32> to vector<128x64xf32>
      %18 = arith.addf %15, %17 : vector<128x64xf32>
      %cst_16 = arith.constant 0.000000e+00 : f32
      %19 = vector.broadcast %cst_16 : f32 to vector<128x64xf32>
      %20 = arith.maximumf %18, %19 : vector<128x64xf32>
      %c0_17 = arith.constant 0 : index
      %c0_18 = arith.constant 0 : index
      %21 = vector.load %arg7[%c0_17, %c0_18] : memref<128x64xf32, #tpu.memory_space<vmem>>, vector<128x64xf32>
      tpu.vector_store %arg7[%c0_17, %c0_18], %20 {strides = array<i32>} : memref<128x64xf32, #tpu.memory_space<vmem>>, vector<128x64xf32>,
    } else {
    }
    return
  }
  func.func @transform_0(%arg0: i32, %arg1: i32, %arg2: i32) -> (i32, i32) {
    %c0_i32 = arith.constant 0 : i32
    return %arg0, %arg2 : i32, i32
  }
  func.func @transform_1(%arg0: i32, %arg1: i32, %arg2: i32) -> (i32, i32) {
    %c0_i32 = arith.constant 0 : i32
    return %arg2, %arg1 : i32, i32
  }
  func.func @transform_2(%arg0: i32, %arg1: i32, %arg2: i32) -> (i32, i32) {
    %c0_i32 = arith.constant 0 : i32
    %c0_i32_0 = arith.constant 0 : i32
    return %c0_i32, %arg1 : i32, i32
  }
  func.func @transform_3(%arg0: i32, %arg1: i32, %arg2: i32) -> (i32, i32) {
    %c0_i32 = arith.constant 0 : i32
    %c0_i32_0 = arith.constant 0 : i32
    return %c0_i32, %arg1 : i32, i32
  }
  func.func @transform_4(%arg0: i32, %arg1: i32, %arg2: i32) -> (i32, i32) {
    %c0_i32 = arith.constant 0 : i32
    return %arg0, %arg1 : i32, i32
  }
}

module attributes {stable_mosaic.version = 11 : i64} {
  func.func @_fused_mm_kernel(%arg0: i32, %arg1: i32, %arg2: i32, %arg3: memref<128x128xbf16, #tpu.memory_space<vmem>>, %arg4: memref<128x64xbf16, #tpu.memory_space<vmem>>, %arg5: memref<1x64xf32, #tpu.memory_space<vmem>>, %arg6: memref<1x64xf32, #tpu.memory_space<vmem>>, %arg7: memref<128x64xf32, #tpu.memory_space<vmem>>, %arg8: memref<128x64xf32, #tpu.memory_space<vmem>>) attributes {dimension_semantics = [#tpu.dimension_semantics<parallel>, #tpu.dimension_semantics<parallel>, #tpu.dimension_semantics<arbitrary>], iteration_bounds = array<i64: 1, 1, 5>, scalar_prefetch = 0 : i64, scratch_operands = 1 : i64, tpu.core_type = #tpu.core_type<tc>, window_params = [{transform_indices = @transform_0, window_bounds = array<i64: 128, 128>}, {transform_indices = @transform_1, window_bounds = array<i64: 128, 64>}, {transform_indices = @transform_2, window_bounds = array<i64: 1, 64>}, {transform_indices = @transform_3, window_bounds = array<i64: 1, 64>}, {transform_indices = @transform_4, window_bounds = array<i64: 128, 64>}]} {
    %c0_i32 = arith.constant 0 : i32
    %0 = arith.cmpi eq, %arg2, %c0_i32 : i32
    %1 = arith.extui %0 : i1 to i32
    %c0_i32_0 = arith.constant 0 : i32
    %2 = arith.cmpi ne, %1, %c0_i32_0 : i32
    scf.if %2 {
      %cst_9 = arith.constant 0.000000e+00 : f32
      %12 = vector.broadcast %cst_9 : f32 to vector<128x64xf32>
      %c0_10 = arith.constant 0 : index
      %c0_11 = arith.constant 0 : index
      %13 = vector.load %arg8[%c0_10, %c0_11] : memref<128x64xf32, #tpu.memory_space<vmem>>, vector<128x64xf32>
      tpu.vector_store %arg8[%c0_10, %c0_11], %12 {strides = array<i32>} : memref<128x64xf32, #tpu.memory_space<vmem>>, vector<128x64xf32>,
    } else {
    }
    %c0 = arith.constant 0 : index
    %c0_1 = arith.constant 0 : index
    %3 = vector.load %arg8[%c0, %c0_1] : memref<128x64xf32, #tpu.memory_space<vmem>>, vector<128x64xf32>
    %c0_2 = arith.constant 0 : index
    %c0_3 = arith.constant 0 : index
    %4 = vector.load %arg3[%c0_2, %c0_3] : memref<128x128xbf16, #tpu.memory_space<vmem>>, vector<128x128xbf16>
    %c0_4 = arith.constant 0 : index
    %c0_5 = arith.constant 0 : index
    %5 = vector.load %arg4[%c0_4, %c0_5] : memref<128x64xbf16, #tpu.memory_space<vmem>>, vector<128x64xbf16>
    %cst = arith.constant dense<0.000000e+00> : vector<128x64xf32>
    %6 = tpu.matmul %4, %5, %cst {dimension_numbers = #tpu.dot_dimension_numbers<[1], [0], [0], [1], [0, 0, 1, 1], [], []>} : vector<128x128xbf16>, vector<128x64xbf16>, vector<128x64xf32> -> vector<128x64xf32>
    %7 = arith.addf %3, %6 : vector<128x64xf32>
    %c0_6 = arith.constant 0 : index
    %c0_7 = arith.constant 0 : index
    %8 = vector.load %arg8[%c0_6, %c0_7] : memref<128x64xf32, #tpu.memory_space<vmem>>, vector<128x64xf32>
    tpu.vector_store %arg8[%c0_6, %c0_7], %7 {strides = array<i32>} : memref<128x64xf32, #tpu.memory_space<vmem>>, vector<128x64xf32>,
    %c4_i32 = arith.constant 4 : i32
    %9 = arith.cmpi eq, %arg2, %c4_i32 : i32
    %10 = arith.extui %9 : i1 to i32
    %c0_i32_8 = arith.constant 0 : i32
    %11 = arith.cmpi ne, %10, %c0_i32_8 : i32
    scf.if %11 {
      %c0_9 = arith.constant 0 : index
      %c0_10 = arith.constant 0 : index
      %12 = vector.load %arg8[%c0_9, %c0_10] : memref<128x64xf32, #tpu.memory_space<vmem>>, vector<128x64xf32>
      %c0_11 = arith.constant 0 : index
      %c0_12 = arith.constant 0 : index
      %13 = vector.load %arg5[%c0_11, %c0_12] : memref<1x64xf32, #tpu.memory_space<vmem>>, vector<1x64xf32>
      %14 = vector.broadcast %13 : vector<1x64xf32> to vector<128x64xf32>
      %15 = arith.mulf %12, %14 : vector<128x64xf32>
      %c0_13 = arith.constant 0 : index
      %c0_14 = arith.constant 0 : index
      %16 = vector.load %arg6[%c0_13, %c0_14] : memref<1x64xf32, #tpu.memory_space<vmem>>, vector<1x64xf32>
      %17 = vector.broadcast %16 : vector<1x64xf32> to vector<128x64xf32>
      %18 = arith.addf %15, %17 : vector<128x64xf32>
      %cst_15 = arith.constant 0.000000e+00 : f32
      %19 = vector.broadcast %cst_15 : f32 to vector<128x64xf32>
      %20 = arith.maximumf %18, %19 : vector<128x64xf32>
      %c0_16 = arith.constant 0 : index
      %c0_17 = arith.constant 0 : index
      %21 = vector.load %arg7[%c0_16, %c0_17] : memref<128x64xf32, #tpu.memory_space<vmem>>, vector<128x64xf32>
      tpu.vector_store %arg7[%c0_16, %c0_17], %20 {strides = array<i32>} : memref<128x64xf32, #tpu.memory_space<vmem>>, vector<128x64xf32>,
    } else {
    }
    return
  }
  func.func @transform_0(%arg0: i32, %arg1: i32, %arg2: i32) -> (i32, i32) {
    %c0_i32 = arith.constant 0 : i32
    return %arg0, %arg2 : i32, i32
  }
  func.func @transform_1(%arg0: i32, %arg1: i32, %arg2: i32) -> (i32, i32) {
    %c0_i32 = arith.constant 0 : i32
    return %arg2, %arg1 : i32, i32
  }
  func.func @transform_2(%arg0: i32, %arg1: i32, %arg2: i32) -> (i32, i32) {
    %c0_i32 = arith.constant 0 : i32
    %c0_i32_0 = arith.constant 0 : i32
    return %c0_i32, %arg1 : i32, i32
  }
  func.func @transform_3(%arg0: i32, %arg1: i32, %arg2: i32) -> (i32, i32) {
    %c0_i32 = arith.constant 0 : i32
    %c0_i32_0 = arith.constant 0 : i32
    return %c0_i32, %arg1 : i32, i32
  }
  func.func @transform_4(%arg0: i32, %arg1: i32, %arg2: i32) -> (i32, i32) {
    %c0_i32 = arith.constant 0 : i32
    return %arg0, %arg1 : i32, i32
  }
}

module attributes {stable_mosaic.version = 11 : i64} {
  func.func @_fused_mm_kernel(%arg0: i32, %arg1: i32, %arg2: i32, %arg3: memref<128x128xbf16, #tpu.memory_space<vmem>>, %arg4: memref<128x64xbf16, #tpu.memory_space<vmem>>, %arg5: memref<1x64xf32, #tpu.memory_space<vmem>>, %arg6: memref<1x64xf32, #tpu.memory_space<vmem>>, %arg7: memref<128x64xf32, #tpu.memory_space<vmem>>, %arg8: memref<128x64xf32, #tpu.memory_space<vmem>>, %arg9: memref<128x64xf32, #tpu.memory_space<vmem>>) attributes {dimension_semantics = [#tpu.dimension_semantics<parallel>, #tpu.dimension_semantics<parallel>, #tpu.dimension_semantics<arbitrary>], iteration_bounds = array<i64: 1, 1, 5>, scalar_prefetch = 0 : i64, scratch_operands = 1 : i64, tpu.core_type = #tpu.core_type<tc>, window_params = [{transform_indices = @transform_0, window_bounds = array<i64: 128, 128>}, {transform_indices = @transform_1, window_bounds = array<i64: 128, 64>}, {transform_indices = @transform_2, window_bounds = array<i64: 1, 64>}, {transform_indices = @transform_3, window_bounds = array<i64: 1, 64>}, {transform_indices = @transform_4, window_bounds = array<i64: 128, 64>}, {transform_indices = @transform_5, window_bounds = array<i64: 128, 64>}]} {
    %c0_i32 = arith.constant 0 : i32
    %0 = arith.cmpi eq, %arg2, %c0_i32 : i32
    %1 = arith.extui %0 : i1 to i32
    %c0_i32_0 = arith.constant 0 : i32
    %2 = arith.cmpi ne, %1, %c0_i32_0 : i32
    scf.if %2 {
      %cst_9 = arith.constant 0.000000e+00 : f32
      %12 = vector.broadcast %cst_9 : f32 to vector<128x64xf32>
      %c0_10 = arith.constant 0 : index
      %c0_11 = arith.constant 0 : index
      %13 = vector.load %arg9[%c0_10, %c0_11] : memref<128x64xf32, #tpu.memory_space<vmem>>, vector<128x64xf32>
      tpu.vector_store %arg9[%c0_10, %c0_11], %12 {strides = array<i32>} : memref<128x64xf32, #tpu.memory_space<vmem>>, vector<128x64xf32>,
    } else {
    }
    %c0 = arith.constant 0 : index
    %c0_1 = arith.constant 0 : index
    %3 = vector.load %arg9[%c0, %c0_1] : memref<128x64xf32, #tpu.memory_space<vmem>>, vector<128x64xf32>
    %c0_2 = arith.constant 0 : index
    %c0_3 = arith.constant 0 : index
    %4 = vector.load %arg3[%c0_2, %c0_3] : memref<128x128xbf16, #tpu.memory_space<vmem>>, vector<128x128xbf16>
    %c0_4 = arith.constant 0 : index
    %c0_5 = arith.constant 0 : index
    %5 = vector.load %arg4[%c0_4, %c0_5] : memref<128x64xbf16, #tpu.memory_space<vmem>>, vector<128x64xbf16>
    %cst = arith.constant dense<0.000000e+00> : vector<128x64xf32>
    %6 = tpu.matmul %4, %5, %cst {dimension_numbers = #tpu.dot_dimension_numbers<[1], [0], [0], [1], [0, 0, 1, 1], [], []>} : vector<128x128xbf16>, vector<128x64xbf16>, vector<128x64xf32> -> vector<128x64xf32>
    %7 = arith.addf %3, %6 : vector<128x64xf32>
    %c0_6 = arith.constant 0 : index
    %c0_7 = arith.constant 0 : index
    %8 = vector.load %arg9[%c0_6, %c0_7] : memref<128x64xf32, #tpu.memory_space<vmem>>, vector<128x64xf32>
    tpu.vector_store %arg9[%c0_6, %c0_7], %7 {strides = array<i32>} : memref<128x64xf32, #tpu.memory_space<vmem>>, vector<128x64xf32>,
    %c4_i32 = arith.constant 4 : i32
    %9 = arith.cmpi eq, %arg2, %c4_i32 : i32
    %10 = arith.extui %9 : i1 to i32
    %c0_i32_8 = arith.constant 0 : i32
    %11 = arith.cmpi ne, %10, %c0_i32_8 : i32
    scf.if %11 {
      %c0_9 = arith.constant 0 : index
      %c0_10 = arith.constant 0 : index
      %12 = vector.load %arg9[%c0_9, %c0_10] : memref<128x64xf32, #tpu.memory_space<vmem>>, vector<128x64xf32>
      %c0_11 = arith.constant 0 : index
      %c0_12 = arith.constant 0 : index
      %13 = vector.load %arg5[%c0_11, %c0_12] : memref<1x64xf32, #tpu.memory_space<vmem>>, vector<1x64xf32>
      %14 = vector.broadcast %13 : vector<1x64xf32> to vector<128x64xf32>
      %15 = arith.mulf %12, %14 : vector<128x64xf32>
      %c0_13 = arith.constant 0 : index
      %c0_14 = arith.constant 0 : index
      %16 = vector.load %arg6[%c0_13, %c0_14] : memref<1x64xf32, #tpu.memory_space<vmem>>, vector<1x64xf32>
      %17 = vector.broadcast %16 : vector<1x64xf32> to vector<128x64xf32>
      %18 = arith.addf %15, %17 : vector<128x64xf32>
      %c0_15 = arith.constant 0 : index
      %c0_16 = arith.constant 0 : index
      %19 = vector.load %arg7[%c0_15, %c0_16] : memref<128x64xf32, #tpu.memory_space<vmem>>, vector<128x64xf32>
      %20 = arith.addf %18, %19 : vector<128x64xf32>
      %cst_17 = arith.constant 0.000000e+00 : f32
      %21 = vector.broadcast %cst_17 : f32 to vector<128x64xf32>
      %22 = arith.maximumf %20, %21 : vector<128x64xf32>
      %c0_18 = arith.constant 0 : index
      %c0_19 = arith.constant 0 : index
      %23 = vector.load %arg8[%c0_18, %c0_19] : memref<128x64xf32, #tpu.memory_space<vmem>>, vector<128x64xf32>
      tpu.vector_store %arg8[%c0_18, %c0_19], %22 {strides = array<i32>} : memref<128x64xf32, #tpu.memory_space<vmem>>, vector<128x64xf32>,
    } else {
    }
    return
  }
  func.func @transform_0(%arg0: i32, %arg1: i32, %arg2: i32) -> (i32, i32) {
    %c0_i32 = arith.constant 0 : i32
    return %arg0, %arg2 : i32, i32
  }
  func.func @transform_1(%arg0: i32, %arg1: i32, %arg2: i32) -> (i32, i32) {
    %c0_i32 = arith.constant 0 : i32
    return %arg2, %arg1 : i32, i32
  }
  func.func @transform_2(%arg0: i32, %arg1: i32, %arg2: i32) -> (i32, i32) {
    %c0_i32 = arith.constant 0 : i32
    %c0_i32_0 = arith.constant 0 : i32
    return %c0_i32, %arg1 : i32, i32
  }
  func.func @transform_3(%arg0: i32, %arg1: i32, %arg2: i32) -> (i32, i32) {
    %c0_i32 = arith.constant 0 : i32
    %c0_i32_0 = arith.constant 0 : i32
    return %c0_i32, %arg1 : i32, i32
  }
  func.func @transform_4(%arg0: i32, %arg1: i32, %arg2: i32) -> (i32, i32) {
    %c0_i32 = arith.constant 0 : i32
    return %arg0, %arg1 : i32, i32
  }
  func.func @transform_5(%arg0: i32, %arg1: i32, %arg2: i32) -> (i32, i32) {
    %c0_i32 = arith.constant 0 : i32
    return %arg0, %arg1 : i32, i32
  }
}

module attributes {stable_mosaic.version = 11 : i64} {
  func.func @_fused_mm_kernel(%arg0: i32, %arg1: i32, %arg2: i32, %arg3: memref<32x128xbf16, #tpu.memory_space<vmem>>, %arg4: memref<128x128xbf16, #tpu.memory_space<vmem>>, %arg5: memref<1x128xf32, #tpu.memory_space<vmem>>, %arg6: memref<1x128xf32, #tpu.memory_space<vmem>>, %arg7: memref<32x128xf32, #tpu.memory_space<vmem>>, %arg8: memref<32x128xf32, #tpu.memory_space<vmem>>) attributes {dimension_semantics = [#tpu.dimension_semantics<parallel>, #tpu.dimension_semantics<parallel>, #tpu.dimension_semantics<arbitrary>], iteration_bounds = array<i64: 1, 1, 5>, scalar_prefetch = 0 : i64, scratch_operands = 1 : i64, tpu.core_type = #tpu.core_type<tc>, window_params = [{transform_indices = @transform_0, window_bounds = array<i64: 32, 128>}, {transform_indices = @transform_1, window_bounds = array<i64: 128, 128>}, {transform_indices = @transform_2, window_bounds = array<i64: 1, 128>}, {transform_indices = @transform_3, window_bounds = array<i64: 1, 128>}, {transform_indices = @transform_4, window_bounds = array<i64: 32, 128>}]} {
    %c0_i32 = arith.constant 0 : i32
    %0 = arith.cmpi eq, %arg2, %c0_i32 : i32
    %1 = arith.extui %0 : i1 to i32
    %c0_i32_0 = arith.constant 0 : i32
    %2 = arith.cmpi ne, %1, %c0_i32_0 : i32
    scf.if %2 {
      %cst_9 = arith.constant 0.000000e+00 : f32
      %12 = vector.broadcast %cst_9 : f32 to vector<32x128xf32>
      %c0_10 = arith.constant 0 : index
      %c0_11 = arith.constant 0 : index
      %13 = vector.load %arg8[%c0_10, %c0_11] : memref<32x128xf32, #tpu.memory_space<vmem>>, vector<32x128xf32>
      tpu.vector_store %arg8[%c0_10, %c0_11], %12 {strides = array<i32>} : memref<32x128xf32, #tpu.memory_space<vmem>>, vector<32x128xf32>,
    } else {
    }
    %c0 = arith.constant 0 : index
    %c0_1 = arith.constant 0 : index
    %3 = vector.load %arg8[%c0, %c0_1] : memref<32x128xf32, #tpu.memory_space<vmem>>, vector<32x128xf32>
    %c0_2 = arith.constant 0 : index
    %c0_3 = arith.constant 0 : index
    %4 = vector.load %arg3[%c0_2, %c0_3] : memref<32x128xbf16, #tpu.memory_space<vmem>>, vector<32x128xbf16>
    %c0_4 = arith.constant 0 : index
    %c0_5 = arith.constant 0 : index
    %5 = vector.load %arg4[%c0_4, %c0_5] : memref<128x128xbf16, #tpu.memory_space<vmem>>, vector<128x128xbf16>
    %cst = arith.constant dense<0.000000e+00> : vector<32x128xf32>
    %6 = tpu.matmul %4, %5, %cst {dimension_numbers = #tpu.dot_dimension_numbers<[1], [0], [0], [1], [0, 0, 1, 1], [], []>} : vector<32x128xbf16>, vector<128x128xbf16>, vector<32x128xf32> -> vector<32x128xf32>
    %7 = arith.addf %3, %6 : vector<32x128xf32>
    %c0_6 = arith.constant 0 : index
    %c0_7 = arith.constant 0 : index
    %8 = vector.load %arg8[%c0_6, %c0_7] : memref<32x128xf32, #tpu.memory_space<vmem>>, vector<32x128xf32>
    tpu.vector_store %arg8[%c0_6, %c0_7], %7 {strides = array<i32>} : memref<32x128xf32, #tpu.memory_space<vmem>>, vector<32x128xf32>,
    %c4_i32 = arith.constant 4 : i32
    %9 = arith.cmpi eq, %arg2, %c4_i32 : i32
    %10 = arith.extui %9 : i1 to i32
    %c0_i32_8 = arith.constant 0 : i32
    %11 = arith.cmpi ne, %10, %c0_i32_8 : i32
    scf.if %11 {
      %c0_9 = arith.constant 0 : index
      %c0_10 = arith.constant 0 : index
      %12 = vector.load %arg8[%c0_9, %c0_10] : memref<32x128xf32, #tpu.memory_space<vmem>>, vector<32x128xf32>
      %c0_11 = arith.constant 0 : index
      %c0_12 = arith.constant 0 : index
      %13 = vector.load %arg5[%c0_11, %c0_12] : memref<1x128xf32, #tpu.memory_space<vmem>>, vector<1x128xf32>
      %14 = vector.broadcast %13 : vector<1x128xf32> to vector<32x128xf32>
      %15 = arith.mulf %12, %14 : vector<32x128xf32>
      %c0_13 = arith.constant 0 : index
      %c0_14 = arith.constant 0 : index
      %16 = vector.load %arg6[%c0_13, %c0_14] : memref<1x128xf32, #tpu.memory_space<vmem>>, vector<1x128xf32>
      %17 = vector.broadcast %16 : vector<1x128xf32> to vector<32x128xf32>
      %18 = arith.addf %15, %17 : vector<32x128xf32>
      %cst_15 = arith.constant 0.000000e+00 : f32
      %19 = vector.broadcast %cst_15 : f32 to vector<32x128xf32>
      %20 = arith.maximumf %18, %19 : vector<32x128xf32>
      %c0_16 = arith.constant 0 : index
      %c0_17 = arith.constant 0 : index
      %21 = vector.load %arg7[%c0_16, %c0_17] : memref<32x128xf32, #tpu.memory_space<vmem>>, vector<32x128xf32>
      tpu.vector_store %arg7[%c0_16, %c0_17], %20 {strides = array<i32>} : memref<32x128xf32, #tpu.memory_space<vmem>>, vector<32x128xf32>,
    } else {
    }
    return
  }
  func.func @transform_0(%arg0: i32, %arg1: i32, %arg2: i32) -> (i32, i32) {
    %c0_i32 = arith.constant 0 : i32
    return %arg0, %arg2 : i32, i32
  }
  func.func @transform_1(%arg0: i32, %arg1: i32, %arg2: i32) -> (i32, i32) {
    %c0_i32 = arith.constant 0 : i32
    return %arg2, %arg1 : i32, i32
  }
  func.func @transform_2(%arg0: i32, %arg1: i32, %arg2: i32) -> (i32, i32) {
    %c0_i32 = arith.constant 0 : i32
    %c0_i32_0 = arith.constant 0 : i32
    return %c0_i32, %arg1 : i32, i32
  }
  func.func @transform_3(%arg0: i32, %arg1: i32, %arg2: i32) -> (i32, i32) {
    %c0_i32 = arith.constant 0 : i32
    %c0_i32_0 = arith.constant 0 : i32
    return %c0_i32, %arg1 : i32, i32
  }
  func.func @transform_4(%arg0: i32, %arg1: i32, %arg2: i32) -> (i32, i32) {
    %c0_i32 = arith.constant 0 : i32
    return %arg0, %arg1 : i32, i32
  }
}

module attributes {stable_mosaic.version = 11 : i64} {
  func.func @_fused_mm_kernel(%arg0: i32, %arg1: i32, %arg2: i32, %arg3: memref<32x128xbf16, #tpu.memory_space<vmem>>, %arg4: memref<128x128xbf16, #tpu.memory_space<vmem>>, %arg5: memref<1x128xf32, #tpu.memory_space<vmem>>, %arg6: memref<1x128xf32, #tpu.memory_space<vmem>>, %arg7: memref<32x128xf32, #tpu.memory_space<vmem>>, %arg8: memref<32x128xf32, #tpu.memory_space<vmem>>) attributes {dimension_semantics = [#tpu.dimension_semantics<parallel>, #tpu.dimension_semantics<parallel>, #tpu.dimension_semantics<arbitrary>], iteration_bounds = array<i64: 1, 1, 1>, scalar_prefetch = 0 : i64, scratch_operands = 1 : i64, tpu.core_type = #tpu.core_type<tc>, window_params = [{transform_indices = @transform_0, window_bounds = array<i64: 32, 128>}, {transform_indices = @transform_1, window_bounds = array<i64: 128, 128>}, {transform_indices = @transform_2, window_bounds = array<i64: 1, 128>}, {transform_indices = @transform_3, window_bounds = array<i64: 1, 128>}, {transform_indices = @transform_4, window_bounds = array<i64: 32, 128>}]} {
    %c0_i32 = arith.constant 0 : i32
    %0 = arith.cmpi eq, %arg2, %c0_i32 : i32
    %1 = arith.extui %0 : i1 to i32
    %c0_i32_0 = arith.constant 0 : i32
    %2 = arith.cmpi ne, %1, %c0_i32_0 : i32
    scf.if %2 {
      %cst_10 = arith.constant 0.000000e+00 : f32
      %12 = vector.broadcast %cst_10 : f32 to vector<32x128xf32>
      %c0_11 = arith.constant 0 : index
      %c0_12 = arith.constant 0 : index
      %13 = vector.load %arg8[%c0_11, %c0_12] : memref<32x128xf32, #tpu.memory_space<vmem>>, vector<32x128xf32>
      tpu.vector_store %arg8[%c0_11, %c0_12], %12 {strides = array<i32>} : memref<32x128xf32, #tpu.memory_space<vmem>>, vector<32x128xf32>,
    } else {
    }
    %c0 = arith.constant 0 : index
    %c0_1 = arith.constant 0 : index
    %3 = vector.load %arg8[%c0, %c0_1] : memref<32x128xf32, #tpu.memory_space<vmem>>, vector<32x128xf32>
    %c0_2 = arith.constant 0 : index
    %c0_3 = arith.constant 0 : index
    %4 = vector.load %arg3[%c0_2, %c0_3] : memref<32x128xbf16, #tpu.memory_space<vmem>>, vector<32x128xbf16>
    %c0_4 = arith.constant 0 : index
    %c0_5 = arith.constant 0 : index
    %5 = vector.load %arg4[%c0_4, %c0_5] : memref<128x128xbf16, #tpu.memory_space<vmem>>, vector<128x128xbf16>
    %cst = arith.constant dense<0.000000e+00> : vector<32x128xf32>
    %6 = tpu.matmul %4, %5, %cst {dimension_numbers = #tpu.dot_dimension_numbers<[1], [0], [0], [1], [0, 0, 1, 1], [], []>} : vector<32x128xbf16>, vector<128x128xbf16>, vector<32x128xf32> -> vector<32x128xf32>
    %7 = arith.addf %3, %6 : vector<32x128xf32>
    %c0_6 = arith.constant 0 : index
    %c0_7 = arith.constant 0 : index
    %8 = vector.load %arg8[%c0_6, %c0_7] : memref<32x128xf32, #tpu.memory_space<vmem>>, vector<32x128xf32>
    tpu.vector_store %arg8[%c0_6, %c0_7], %7 {strides = array<i32>} : memref<32x128xf32, #tpu.memory_space<vmem>>, vector<32x128xf32>,
    %c0_i32_8 = arith.constant 0 : i32
    %9 = arith.cmpi eq, %arg2, %c0_i32_8 : i32
    %10 = arith.extui %9 : i1 to i32
    %c0_i32_9 = arith.constant 0 : i32
    %11 = arith.cmpi ne, %10, %c0_i32_9 : i32
    scf.if %11 {
      %c0_10 = arith.constant 0 : index
      %c0_11 = arith.constant 0 : index
      %12 = vector.load %arg8[%c0_10, %c0_11] : memref<32x128xf32, #tpu.memory_space<vmem>>, vector<32x128xf32>
      %c0_12 = arith.constant 0 : index
      %c0_13 = arith.constant 0 : index
      %13 = vector.load %arg5[%c0_12, %c0_13] : memref<1x128xf32, #tpu.memory_space<vmem>>, vector<1x128xf32>
      %14 = vector.broadcast %13 : vector<1x128xf32> to vector<32x128xf32>
      %15 = arith.mulf %12, %14 : vector<32x128xf32>
      %c0_14 = arith.constant 0 : index
      %c0_15 = arith.constant 0 : index
      %16 = vector.load %arg6[%c0_14, %c0_15] : memref<1x128xf32, #tpu.memory_space<vmem>>, vector<1x128xf32>
      %17 = vector.broadcast %16 : vector<1x128xf32> to vector<32x128xf32>
      %18 = arith.addf %15, %17 : vector<32x128xf32>
      %c0_16 = arith.constant 0 : index
      %c0_17 = arith.constant 0 : index
      %19 = vector.load %arg7[%c0_16, %c0_17] : memref<32x128xf32, #tpu.memory_space<vmem>>, vector<32x128xf32>
      tpu.vector_store %arg7[%c0_16, %c0_17], %18 {strides = array<i32>} : memref<32x128xf32, #tpu.memory_space<vmem>>, vector<32x128xf32>,
    } else {
    }
    return
  }
  func.func @transform_0(%arg0: i32, %arg1: i32, %arg2: i32) -> (i32, i32) {
    %c0_i32 = arith.constant 0 : i32
    return %arg0, %arg2 : i32, i32
  }
  func.func @transform_1(%arg0: i32, %arg1: i32, %arg2: i32) -> (i32, i32) {
    %c0_i32 = arith.constant 0 : i32
    return %arg2, %arg1 : i32, i32
  }
  func.func @transform_2(%arg0: i32, %arg1: i32, %arg2: i32) -> (i32, i32) {
    %c0_i32 = arith.constant 0 : i32
    %c0_i32_0 = arith.constant 0 : i32
    return %c0_i32, %arg1 : i32, i32
  }
  func.func @transform_3(%arg0: i32, %arg1: i32, %arg2: i32) -> (i32, i32) {
    %c0_i32 = arith.constant 0 : i32
    %c0_i32_0 = arith.constant 0 : i32
    return %c0_i32, %arg1 : i32, i32
  }
  func.func @transform_4(%arg0: i32, %arg1: i32, %arg2: i32) -> (i32, i32) {
    %c0_i32 = arith.constant 0 : i32
    return %arg0, %arg1 : i32, i32
  }
}

module attributes {stable_mosaic.version = 11 : i64} {
  func.func @_fused_mm_kernel(%arg0: i32, %arg1: i32, %arg2: i32, %arg3: memref<32x384xbf16, #tpu.memory_space<vmem>>, %arg4: memref<384x128xbf16, #tpu.memory_space<vmem>>, %arg5: memref<1x128xf32, #tpu.memory_space<vmem>>, %arg6: memref<1x128xf32, #tpu.memory_space<vmem>>, %arg7: memref<32x128xf32, #tpu.memory_space<vmem>>, %arg8: memref<32x128xf32, #tpu.memory_space<vmem>>) attributes {dimension_semantics = [#tpu.dimension_semantics<parallel>, #tpu.dimension_semantics<parallel>, #tpu.dimension_semantics<arbitrary>], iteration_bounds = array<i64: 1, 1, 3>, scalar_prefetch = 0 : i64, scratch_operands = 1 : i64, tpu.core_type = #tpu.core_type<tc>, window_params = [{transform_indices = @transform_0, window_bounds = array<i64: 32, 384>}, {transform_indices = @transform_1, window_bounds = array<i64: 384, 128>}, {transform_indices = @transform_2, window_bounds = array<i64: 1, 128>}, {transform_indices = @transform_3, window_bounds = array<i64: 1, 128>}, {transform_indices = @transform_4, window_bounds = array<i64: 32, 128>}]} {
    %c0_i32 = arith.constant 0 : i32
    %0 = arith.cmpi eq, %arg2, %c0_i32 : i32
    %1 = arith.extui %0 : i1 to i32
    %c0_i32_0 = arith.constant 0 : i32
    %2 = arith.cmpi ne, %1, %c0_i32_0 : i32
    scf.if %2 {
      %cst_9 = arith.constant 0.000000e+00 : f32
      %12 = vector.broadcast %cst_9 : f32 to vector<32x128xf32>
      %c0_10 = arith.constant 0 : index
      %c0_11 = arith.constant 0 : index
      %13 = vector.load %arg8[%c0_10, %c0_11] : memref<32x128xf32, #tpu.memory_space<vmem>>, vector<32x128xf32>
      tpu.vector_store %arg8[%c0_10, %c0_11], %12 {strides = array<i32>} : memref<32x128xf32, #tpu.memory_space<vmem>>, vector<32x128xf32>,
    } else {
    }
    %c0 = arith.constant 0 : index
    %c0_1 = arith.constant 0 : index
    %3 = vector.load %arg8[%c0, %c0_1] : memref<32x128xf32, #tpu.memory_space<vmem>>, vector<32x128xf32>
    %c0_2 = arith.constant 0 : index
    %c0_3 = arith.constant 0 : index
    %4 = vector.load %arg3[%c0_2, %c0_3] : memref<32x384xbf16, #tpu.memory_space<vmem>>, vector<32x384xbf16>
    %c0_4 = arith.constant 0 : index
    %c0_5 = arith.constant 0 : index
    %5 = vector.load %arg4[%c0_4, %c0_5] : memref<384x128xbf16, #tpu.memory_space<vmem>>, vector<384x128xbf16>
    %cst = arith.constant dense<0.000000e+00> : vector<32x128xf32>
    %6 = tpu.matmul %4, %5, %cst {dimension_numbers = #tpu.dot_dimension_numbers<[1], [0], [0], [1], [0, 0, 1, 1], [], []>} : vector<32x384xbf16>, vector<384x128xbf16>, vector<32x128xf32> -> vector<32x128xf32>
    %7 = arith.addf %3, %6 : vector<32x128xf32>
    %c0_6 = arith.constant 0 : index
    %c0_7 = arith.constant 0 : index
    %8 = vector.load %arg8[%c0_6, %c0_7] : memref<32x128xf32, #tpu.memory_space<vmem>>, vector<32x128xf32>
    tpu.vector_store %arg8[%c0_6, %c0_7], %7 {strides = array<i32>} : memref<32x128xf32, #tpu.memory_space<vmem>>, vector<32x128xf32>,
    %c2_i32 = arith.constant 2 : i32
    %9 = arith.cmpi eq, %arg2, %c2_i32 : i32
    %10 = arith.extui %9 : i1 to i32
    %c0_i32_8 = arith.constant 0 : i32
    %11 = arith.cmpi ne, %10, %c0_i32_8 : i32
    scf.if %11 {
      %c0_9 = arith.constant 0 : index
      %c0_10 = arith.constant 0 : index
      %12 = vector.load %arg8[%c0_9, %c0_10] : memref<32x128xf32, #tpu.memory_space<vmem>>, vector<32x128xf32>
      %c0_11 = arith.constant 0 : index
      %c0_12 = arith.constant 0 : index
      %13 = vector.load %arg5[%c0_11, %c0_12] : memref<1x128xf32, #tpu.memory_space<vmem>>, vector<1x128xf32>
      %14 = vector.broadcast %13 : vector<1x128xf32> to vector<32x128xf32>
      %15 = arith.mulf %12, %14 : vector<32x128xf32>
      %c0_13 = arith.constant 0 : index
      %c0_14 = arith.constant 0 : index
      %16 = vector.load %arg6[%c0_13, %c0_14] : memref<1x128xf32, #tpu.memory_space<vmem>>, vector<1x128xf32>
      %17 = vector.broadcast %16 : vector<1x128xf32> to vector<32x128xf32>
      %18 = arith.addf %15, %17 : vector<32x128xf32>
      %cst_15 = arith.constant 0.000000e+00 : f32
      %19 = vector.broadcast %cst_15 : f32 to vector<32x128xf32>
      %20 = arith.maximumf %18, %19 : vector<32x128xf32>
      %c0_16 = arith.constant 0 : index
      %c0_17 = arith.constant 0 : index
      %21 = vector.load %arg7[%c0_16, %c0_17] : memref<32x128xf32, #tpu.memory_space<vmem>>, vector<32x128xf32>
      tpu.vector_store %arg7[%c0_16, %c0_17], %20 {strides = array<i32>} : memref<32x128xf32, #tpu.memory_space<vmem>>, vector<32x128xf32>,
    } else {
    }
    return
  }
  func.func @transform_0(%arg0: i32, %arg1: i32, %arg2: i32) -> (i32, i32) {
    %c0_i32 = arith.constant 0 : i32
    return %arg0, %arg2 : i32, i32
  }
  func.func @transform_1(%arg0: i32, %arg1: i32, %arg2: i32) -> (i32, i32) {
    %c0_i32 = arith.constant 0 : i32
    return %arg2, %arg1 : i32, i32
  }
  func.func @transform_2(%arg0: i32, %arg1: i32, %arg2: i32) -> (i32, i32) {
    %c0_i32 = arith.constant 0 : i32
    %c0_i32_0 = arith.constant 0 : i32
    return %c0_i32, %arg1 : i32, i32
  }
  func.func @transform_3(%arg0: i32, %arg1: i32, %arg2: i32) -> (i32, i32) {
    %c0_i32 = arith.constant 0 : i32
    %c0_i32_0 = arith.constant 0 : i32
    return %c0_i32, %arg1 : i32, i32
  }
  func.func @transform_4(%arg0: i32, %arg1: i32, %arg2: i32) -> (i32, i32) {
    %c0_i32 = arith.constant 0 : i32
    return %arg0, %arg1 : i32, i32
  }
}

module attributes {stable_mosaic.version = 11 : i64} {
  func.func @_fused_mm_kernel(%arg0: i32, %arg1: i32, %arg2: i32, %arg3: memref<32x384xbf16, #tpu.memory_space<vmem>>, %arg4: memref<384x128xbf16, #tpu.memory_space<vmem>>, %arg5: memref<1x128xf32, #tpu.memory_space<vmem>>, %arg6: memref<1x128xf32, #tpu.memory_space<vmem>>, %arg7: memref<32x128xf32, #tpu.memory_space<vmem>>, %arg8: memref<32x128xf32, #tpu.memory_space<vmem>>, %arg9: memref<32x128xf32, #tpu.memory_space<vmem>>) attributes {dimension_semantics = [#tpu.dimension_semantics<parallel>, #tpu.dimension_semantics<parallel>, #tpu.dimension_semantics<arbitrary>], iteration_bounds = array<i64: 1, 1, 3>, scalar_prefetch = 0 : i64, scratch_operands = 1 : i64, tpu.core_type = #tpu.core_type<tc>, window_params = [{transform_indices = @transform_0, window_bounds = array<i64: 32, 384>}, {transform_indices = @transform_1, window_bounds = array<i64: 384, 128>}, {transform_indices = @transform_2, window_bounds = array<i64: 1, 128>}, {transform_indices = @transform_3, window_bounds = array<i64: 1, 128>}, {transform_indices = @transform_4, window_bounds = array<i64: 32, 128>}, {transform_indices = @transform_5, window_bounds = array<i64: 32, 128>}]} {
    %c0_i32 = arith.constant 0 : i32
    %0 = arith.cmpi eq, %arg2, %c0_i32 : i32
    %1 = arith.extui %0 : i1 to i32
    %c0_i32_0 = arith.constant 0 : i32
    %2 = arith.cmpi ne, %1, %c0_i32_0 : i32
    scf.if %2 {
      %cst_9 = arith.constant 0.000000e+00 : f32
      %12 = vector.broadcast %cst_9 : f32 to vector<32x128xf32>
      %c0_10 = arith.constant 0 : index
      %c0_11 = arith.constant 0 : index
      %13 = vector.load %arg9[%c0_10, %c0_11] : memref<32x128xf32, #tpu.memory_space<vmem>>, vector<32x128xf32>
      tpu.vector_store %arg9[%c0_10, %c0_11], %12 {strides = array<i32>} : memref<32x128xf32, #tpu.memory_space<vmem>>, vector<32x128xf32>,
    } else {
    }
    %c0 = arith.constant 0 : index
    %c0_1 = arith.constant 0 : index
    %3 = vector.load %arg9[%c0, %c0_1] : memref<32x128xf32, #tpu.memory_space<vmem>>, vector<32x128xf32>
    %c0_2 = arith.constant 0 : index
    %c0_3 = arith.constant 0 : index
    %4 = vector.load %arg3[%c0_2, %c0_3] : memref<32x384xbf16, #tpu.memory_space<vmem>>, vector<32x384xbf16>
    %c0_4 = arith.constant 0 : index
    %c0_5 = arith.constant 0 : index
    %5 = vector.load %arg4[%c0_4, %c0_5] : memref<384x128xbf16, #tpu.memory_space<vmem>>, vector<384x128xbf16>
    %cst = arith.constant dense<0.000000e+00> : vector<32x128xf32>
    %6 = tpu.matmul %4, %5, %cst {dimension_numbers = #tpu.dot_dimension_numbers<[1], [0], [0], [1], [0, 0, 1, 1], [], []>} : vector<32x384xbf16>, vector<384x128xbf16>, vector<32x128xf32> -> vector<32x128xf32>
    %7 = arith.addf %3, %6 : vector<32x128xf32>
    %c0_6 = arith.constant 0 : index
    %c0_7 = arith.constant 0 : index
    %8 = vector.load %arg9[%c0_6, %c0_7] : memref<32x128xf32, #tpu.memory_space<vmem>>, vector<32x128xf32>
    tpu.vector_store %arg9[%c0_6, %c0_7], %7 {strides = array<i32>} : memref<32x128xf32, #tpu.memory_space<vmem>>, vector<32x128xf32>,
    %c2_i32 = arith.constant 2 : i32
    %9 = arith.cmpi eq, %arg2, %c2_i32 : i32
    %10 = arith.extui %9 : i1 to i32
    %c0_i32_8 = arith.constant 0 : i32
    %11 = arith.cmpi ne, %10, %c0_i32_8 : i32
    scf.if %11 {
      %c0_9 = arith.constant 0 : index
      %c0_10 = arith.constant 0 : index
      %12 = vector.load %arg9[%c0_9, %c0_10] : memref<32x128xf32, #tpu.memory_space<vmem>>, vector<32x128xf32>
      %c0_11 = arith.constant 0 : index
      %c0_12 = arith.constant 0 : index
      %13 = vector.load %arg5[%c0_11, %c0_12] : memref<1x128xf32, #tpu.memory_space<vmem>>, vector<1x128xf32>
      %14 = vector.broadcast %13 : vector<1x128xf32> to vector<32x128xf32>
      %15 = arith.mulf %12, %14 : vector<32x128xf32>
      %c0_13 = arith.constant 0 : index
      %c0_14 = arith.constant 0 : index
      %16 = vector.load %arg6[%c0_13, %c0_14] : memref<1x128xf32, #tpu.memory_space<vmem>>, vector<1x128xf32>
      %17 = vector.broadcast %16 : vector<1x128xf32> to vector<32x128xf32>
      %18 = arith.addf %15, %17 : vector<32x128xf32>
      %c0_15 = arith.constant 0 : index
      %c0_16 = arith.constant 0 : index
      %19 = vector.load %arg7[%c0_15, %c0_16] : memref<32x128xf32, #tpu.memory_space<vmem>>, vector<32x128xf32>
      %20 = arith.addf %18, %19 : vector<32x128xf32>
      %cst_17 = arith.constant 0.000000e+00 : f32
      %21 = vector.broadcast %cst_17 : f32 to vector<32x128xf32>
      %22 = arith.maximumf %20, %21 : vector<32x128xf32>
      %c0_18 = arith.constant 0 : index
      %c0_19 = arith.constant 0 : index
      %23 = vector.load %arg8[%c0_18, %c0_19] : memref<32x128xf32, #tpu.memory_space<vmem>>, vector<32x128xf32>
      tpu.vector_store %arg8[%c0_18, %c0_19], %22 {strides = array<i32>} : memref<32x128xf32, #tpu.memory_space<vmem>>, vector<32x128xf32>,
    } else {
    }
    return
  }
  func.func @transform_0(%arg0: i32, %arg1: i32, %arg2: i32) -> (i32, i32) {
    %c0_i32 = arith.constant 0 : i32
    return %arg0, %arg2 : i32, i32
  }
  func.func @transform_1(%arg0: i32, %arg1: i32, %arg2: i32) -> (i32, i32) {
    %c0_i32 = arith.constant 0 : i32
    return %arg2, %arg1 : i32, i32
  }
  func.func @transform_2(%arg0: i32, %arg1: i32, %arg2: i32) -> (i32, i32) {
    %c0_i32 = arith.constant 0 : i32
    %c0_i32_0 = arith.constant 0 : i32
    return %c0_i32, %arg1 : i32, i32
  }
  func.func @transform_3(%arg0: i32, %arg1: i32, %arg2: i32) -> (i32, i32) {
    %c0_i32 = arith.constant 0 : i32
    %c0_i32_0 = arith.constant 0 : i32
    return %c0_i32, %arg1 : i32, i32
  }
  func.func @transform_4(%arg0: i32, %arg1: i32, %arg2: i32) -> (i32, i32) {
    %c0_i32 = arith.constant 0 : i32
    return %arg0, %arg1 : i32, i32
  }
  func.func @transform_5(%arg0: i32, %arg1: i32, %arg2: i32) -> (i32, i32) {
    %c0_i32 = arith.constant 0 : i32
    return %arg0, %arg1 : i32, i32
  }
}

module attributes {stable_mosaic.version = 11 : i64} {
  func.func @_fused_mm_kernel(%arg0: i32, %arg1: i32, %arg2: i32, %arg3: memref<8x384xbf16, #tpu.memory_space<vmem>>, %arg4: memref<384x128xbf16, #tpu.memory_space<vmem>>, %arg5: memref<1x128xf32, #tpu.memory_space<vmem>>, %arg6: memref<1x128xf32, #tpu.memory_space<vmem>>, %arg7: memref<8x128xf32, #tpu.memory_space<vmem>>, %arg8: memref<8x128xf32, #tpu.memory_space<vmem>>) attributes {dimension_semantics = [#tpu.dimension_semantics<parallel>, #tpu.dimension_semantics<parallel>, #tpu.dimension_semantics<arbitrary>], iteration_bounds = array<i64: 1, 2, 3>, scalar_prefetch = 0 : i64, scratch_operands = 1 : i64, tpu.core_type = #tpu.core_type<tc>, window_params = [{transform_indices = @transform_0, window_bounds = array<i64: 8, 384>}, {transform_indices = @transform_1, window_bounds = array<i64: 384, 128>}, {transform_indices = @transform_2, window_bounds = array<i64: 1, 128>}, {transform_indices = @transform_3, window_bounds = array<i64: 1, 128>}, {transform_indices = @transform_4, window_bounds = array<i64: 8, 128>}]} {
    %c0_i32 = arith.constant 0 : i32
    %0 = arith.cmpi eq, %arg2, %c0_i32 : i32
    %1 = arith.extui %0 : i1 to i32
    %c0_i32_0 = arith.constant 0 : i32
    %2 = arith.cmpi ne, %1, %c0_i32_0 : i32
    scf.if %2 {
      %cst_9 = arith.constant 0.000000e+00 : f32
      %12 = vector.broadcast %cst_9 : f32 to vector<8x128xf32>
      %c0_10 = arith.constant 0 : index
      %c0_11 = arith.constant 0 : index
      %13 = vector.load %arg8[%c0_10, %c0_11] : memref<8x128xf32, #tpu.memory_space<vmem>>, vector<8x128xf32>
      tpu.vector_store %arg8[%c0_10, %c0_11], %12 {strides = array<i32>} : memref<8x128xf32, #tpu.memory_space<vmem>>, vector<8x128xf32>,
    } else {
    }
    %c0 = arith.constant 0 : index
    %c0_1 = arith.constant 0 : index
    %3 = vector.load %arg8[%c0, %c0_1] : memref<8x128xf32, #tpu.memory_space<vmem>>, vector<8x128xf32>
    %c0_2 = arith.constant 0 : index
    %c0_3 = arith.constant 0 : index
    %4 = vector.load %arg3[%c0_2, %c0_3] : memref<8x384xbf16, #tpu.memory_space<vmem>>, vector<8x384xbf16>
    %c0_4 = arith.constant 0 : index
    %c0_5 = arith.constant 0 : index
    %5 = vector.load %arg4[%c0_4, %c0_5] : memref<384x128xbf16, #tpu.memory_space<vmem>>, vector<384x128xbf16>
    %cst = arith.constant dense<0.000000e+00> : vector<8x128xf32>
    %6 = tpu.matmul %4, %5, %cst {dimension_numbers = #tpu.dot_dimension_numbers<[1], [0], [0], [1], [0, 0, 1, 1], [], []>} : vector<8x384xbf16>, vector<384x128xbf16>, vector<8x128xf32> -> vector<8x128xf32>
    %7 = arith.addf %3, %6 : vector<8x128xf32>
    %c0_6 = arith.constant 0 : index
    %c0_7 = arith.constant 0 : index
    %8 = vector.load %arg8[%c0_6, %c0_7] : memref<8x128xf32, #tpu.memory_space<vmem>>, vector<8x128xf32>
    tpu.vector_store %arg8[%c0_6, %c0_7], %7 {strides = array<i32>} : memref<8x128xf32, #tpu.memory_space<vmem>>, vector<8x128xf32>,
    %c2_i32 = arith.constant 2 : i32
    %9 = arith.cmpi eq, %arg2, %c2_i32 : i32
    %10 = arith.extui %9 : i1 to i32
    %c0_i32_8 = arith.constant 0 : i32
    %11 = arith.cmpi ne, %10, %c0_i32_8 : i32
    scf.if %11 {
      %c0_9 = arith.constant 0 : index
      %c0_10 = arith.constant 0 : index
      %12 = vector.load %arg8[%c0_9, %c0_10] : memref<8x128xf32, #tpu.memory_space<vmem>>, vector<8x128xf32>
      %c0_11 = arith.constant 0 : index
      %c0_12 = arith.constant 0 : index
      %13 = vector.load %arg5[%c0_11, %c0_12] : memref<1x128xf32, #tpu.memory_space<vmem>>, vector<1x128xf32>
      %14 = vector.broadcast %13 : vector<1x128xf32> to vector<8x128xf32>
      %15 = arith.mulf %12, %14 : vector<8x128xf32>
      %c0_13 = arith.constant 0 : index
      %c0_14 = arith.constant 0 : index
      %16 = vector.load %arg6[%c0_13, %c0_14] : memref<1x128xf32, #tpu.memory_space<vmem>>, vector<1x128xf32>
      %17 = vector.broadcast %16 : vector<1x128xf32> to vector<8x128xf32>
      %18 = arith.addf %15, %17 : vector<8x128xf32>
      %cst_15 = arith.constant 0.000000e+00 : f32
      %19 = vector.broadcast %cst_15 : f32 to vector<8x128xf32>
      %20 = arith.maximumf %18, %19 : vector<8x128xf32>
      %c0_16 = arith.constant 0 : index
      %c0_17 = arith.constant 0 : index
      %21 = vector.load %arg7[%c0_16, %c0_17] : memref<8x128xf32, #tpu.memory_space<vmem>>, vector<8x128xf32>
      tpu.vector_store %arg7[%c0_16, %c0_17], %20 {strides = array<i32>} : memref<8x128xf32, #tpu.memory_space<vmem>>, vector<8x128xf32>,
    } else {
    }
    return
  }
  func.func @transform_0(%arg0: i32, %arg1: i32, %arg2: i32) -> (i32, i32) {
    %c0_i32 = arith.constant 0 : i32
    return %arg0, %arg2 : i32, i32
  }
  func.func @transform_1(%arg0: i32, %arg1: i32, %arg2: i32) -> (i32, i32) {
    %c0_i32 = arith.constant 0 : i32
    return %arg2, %arg1 : i32, i32
  }
  func.func @transform_2(%arg0: i32, %arg1: i32, %arg2: i32) -> (i32, i32) {
    %c0_i32 = arith.constant 0 : i32
    %c0_i32_0 = arith.constant 0 : i32
    return %c0_i32, %arg1 : i32, i32
  }
  func.func @transform_3(%arg0: i32, %arg1: i32, %arg2: i32) -> (i32, i32) {
    %c0_i32 = arith.constant 0 : i32
    %c0_i32_0 = arith.constant 0 : i32
    return %c0_i32, %arg1 : i32, i32
  }
  func.func @transform_4(%arg0: i32, %arg1: i32, %arg2: i32) -> (i32, i32) {
    %c0_i32 = arith.constant 0 : i32
    return %arg0, %arg1 : i32, i32
  }
}

module attributes {stable_mosaic.version = 11 : i64} {
  func.func @_fused_mm_kernel(%arg0: i32, %arg1: i32, %arg2: i32, %arg3: memref<8x128xbf16, #tpu.memory_space<vmem>>, %arg4: memref<128x128xbf16, #tpu.memory_space<vmem>>, %arg5: memref<1x128xf32, #tpu.memory_space<vmem>>, %arg6: memref<1x128xf32, #tpu.memory_space<vmem>>, %arg7: memref<8x128xf32, #tpu.memory_space<vmem>>, %arg8: memref<8x128xf32, #tpu.memory_space<vmem>>) attributes {dimension_semantics = [#tpu.dimension_semantics<parallel>, #tpu.dimension_semantics<parallel>, #tpu.dimension_semantics<arbitrary>], iteration_bounds = array<i64: 1, 2, 1>, scalar_prefetch = 0 : i64, scratch_operands = 1 : i64, tpu.core_type = #tpu.core_type<tc>, window_params = [{transform_indices = @transform_0, window_bounds = array<i64: 8, 128>}, {transform_indices = @transform_1, window_bounds = array<i64: 128, 128>}, {transform_indices = @transform_2, window_bounds = array<i64: 1, 128>}, {transform_indices = @transform_3, window_bounds = array<i64: 1, 128>}, {transform_indices = @transform_4, window_bounds = array<i64: 8, 128>}]} {
    %c0_i32 = arith.constant 0 : i32
    %0 = arith.cmpi eq, %arg2, %c0_i32 : i32
    %1 = arith.extui %0 : i1 to i32
    %c0_i32_0 = arith.constant 0 : i32
    %2 = arith.cmpi ne, %1, %c0_i32_0 : i32
    scf.if %2 {
      %cst_10 = arith.constant 0.000000e+00 : f32
      %12 = vector.broadcast %cst_10 : f32 to vector<8x128xf32>
      %c0_11 = arith.constant 0 : index
      %c0_12 = arith.constant 0 : index
      %13 = vector.load %arg8[%c0_11, %c0_12] : memref<8x128xf32, #tpu.memory_space<vmem>>, vector<8x128xf32>
      tpu.vector_store %arg8[%c0_11, %c0_12], %12 {strides = array<i32>} : memref<8x128xf32, #tpu.memory_space<vmem>>, vector<8x128xf32>,
    } else {
    }
    %c0 = arith.constant 0 : index
    %c0_1 = arith.constant 0 : index
    %3 = vector.load %arg8[%c0, %c0_1] : memref<8x128xf32, #tpu.memory_space<vmem>>, vector<8x128xf32>
    %c0_2 = arith.constant 0 : index
    %c0_3 = arith.constant 0 : index
    %4 = vector.load %arg3[%c0_2, %c0_3] : memref<8x128xbf16, #tpu.memory_space<vmem>>, vector<8x128xbf16>
    %c0_4 = arith.constant 0 : index
    %c0_5 = arith.constant 0 : index
    %5 = vector.load %arg4[%c0_4, %c0_5] : memref<128x128xbf16, #tpu.memory_space<vmem>>, vector<128x128xbf16>
    %cst = arith.constant dense<0.000000e+00> : vector<8x128xf32>
    %6 = tpu.matmul %4, %5, %cst {dimension_numbers = #tpu.dot_dimension_numbers<[1], [0], [0], [1], [0, 0, 1, 1], [], []>} : vector<8x128xbf16>, vector<128x128xbf16>, vector<8x128xf32> -> vector<8x128xf32>
    %7 = arith.addf %3, %6 : vector<8x128xf32>
    %c0_6 = arith.constant 0 : index
    %c0_7 = arith.constant 0 : index
    %8 = vector.load %arg8[%c0_6, %c0_7] : memref<8x128xf32, #tpu.memory_space<vmem>>, vector<8x128xf32>
    tpu.vector_store %arg8[%c0_6, %c0_7], %7 {strides = array<i32>} : memref<8x128xf32, #tpu.memory_space<vmem>>, vector<8x128xf32>,
    %c0_i32_8 = arith.constant 0 : i32
    %9 = arith.cmpi eq, %arg2, %c0_i32_8 : i32
    %10 = arith.extui %9 : i1 to i32
    %c0_i32_9 = arith.constant 0 : i32
    %11 = arith.cmpi ne, %10, %c0_i32_9 : i32
    scf.if %11 {
      %c0_10 = arith.constant 0 : index
      %c0_11 = arith.constant 0 : index
      %12 = vector.load %arg8[%c0_10, %c0_11] : memref<8x128xf32, #tpu.memory_space<vmem>>, vector<8x128xf32>
      %c0_12 = arith.constant 0 : index
      %c0_13 = arith.constant 0 : index
      %13 = vector.load %arg5[%c0_12, %c0_13] : memref<1x128xf32, #tpu.memory_space<vmem>>, vector<1x128xf32>
      %14 = vector.broadcast %13 : vector<1x128xf32> to vector<8x128xf32>
      %15 = arith.mulf %12, %14 : vector<8x128xf32>
      %c0_14 = arith.constant 0 : index
      %c0_15 = arith.constant 0 : index
      %16 = vector.load %arg6[%c0_14, %c0_15] : memref<1x128xf32, #tpu.memory_space<vmem>>, vector<1x128xf32>
      %17 = vector.broadcast %16 : vector<1x128xf32> to vector<8x128xf32>
      %18 = arith.addf %15, %17 : vector<8x128xf32>
      %c0_16 = arith.constant 0 : index
      %c0_17 = arith.constant 0 : index
      %19 = vector.load %arg7[%c0_16, %c0_17] : memref<8x128xf32, #tpu.memory_space<vmem>>, vector<8x128xf32>
      tpu.vector_store %arg7[%c0_16, %c0_17], %18 {strides = array<i32>} : memref<8x128xf32, #tpu.memory_space<vmem>>, vector<8x128xf32>,
    } else {
    }
    return
  }
  func.func @transform_0(%arg0: i32, %arg1: i32, %arg2: i32) -> (i32, i32) {
    %c0_i32 = arith.constant 0 : i32
    return %arg0, %arg2 : i32, i32
  }
  func.func @transform_1(%arg0: i32, %arg1: i32, %arg2: i32) -> (i32, i32) {
    %c0_i32 = arith.constant 0 : i32
    return %arg2, %arg1 : i32, i32
  }
  func.func @transform_2(%arg0: i32, %arg1: i32, %arg2: i32) -> (i32, i32) {
    %c0_i32 = arith.constant 0 : i32
    %c0_i32_0 = arith.constant 0 : i32
    return %c0_i32, %arg1 : i32, i32
  }
  func.func @transform_3(%arg0: i32, %arg1: i32, %arg2: i32) -> (i32, i32) {
    %c0_i32 = arith.constant 0 : i32
    %c0_i32_0 = arith.constant 0 : i32
    return %c0_i32, %arg1 : i32, i32
  }
  func.func @transform_4(%arg0: i32, %arg1: i32, %arg2: i32) -> (i32, i32) {
    %c0_i32 = arith.constant 0 : i32
    return %arg0, %arg1 : i32, i32
  }
}

module attributes {stable_mosaic.version = 11 : i64} {
  func.func @_fused_mm_kernel(%arg0: i32, %arg1: i32, %arg2: i32, %arg3: memref<8x384xbf16, #tpu.memory_space<vmem>>, %arg4: memref<384x128xbf16, #tpu.memory_space<vmem>>, %arg5: memref<1x128xf32, #tpu.memory_space<vmem>>, %arg6: memref<1x128xf32, #tpu.memory_space<vmem>>, %arg7: memref<8x128xf32, #tpu.memory_space<vmem>>, %arg8: memref<8x128xf32, #tpu.memory_space<vmem>>, %arg9: memref<8x128xf32, #tpu.memory_space<vmem>>) attributes {dimension_semantics = [#tpu.dimension_semantics<parallel>, #tpu.dimension_semantics<parallel>, #tpu.dimension_semantics<arbitrary>], iteration_bounds = array<i64: 1, 2, 6>, scalar_prefetch = 0 : i64, scratch_operands = 1 : i64, tpu.core_type = #tpu.core_type<tc>, window_params = [{transform_indices = @transform_0, window_bounds = array<i64: 8, 384>}, {transform_indices = @transform_1, window_bounds = array<i64: 384, 128>}, {transform_indices = @transform_2, window_bounds = array<i64: 1, 128>}, {transform_indices = @transform_3, window_bounds = array<i64: 1, 128>}, {transform_indices = @transform_4, window_bounds = array<i64: 8, 128>}, {transform_indices = @transform_5, window_bounds = array<i64: 8, 128>}]} {
    %c0_i32 = arith.constant 0 : i32
    %0 = arith.cmpi eq, %arg2, %c0_i32 : i32
    %1 = arith.extui %0 : i1 to i32
    %c0_i32_0 = arith.constant 0 : i32
    %2 = arith.cmpi ne, %1, %c0_i32_0 : i32
    scf.if %2 {
      %cst_9 = arith.constant 0.000000e+00 : f32
      %12 = vector.broadcast %cst_9 : f32 to vector<8x128xf32>
      %c0_10 = arith.constant 0 : index
      %c0_11 = arith.constant 0 : index
      %13 = vector.load %arg9[%c0_10, %c0_11] : memref<8x128xf32, #tpu.memory_space<vmem>>, vector<8x128xf32>
      tpu.vector_store %arg9[%c0_10, %c0_11], %12 {strides = array<i32>} : memref<8x128xf32, #tpu.memory_space<vmem>>, vector<8x128xf32>,
    } else {
    }
    %c0 = arith.constant 0 : index
    %c0_1 = arith.constant 0 : index
    %3 = vector.load %arg9[%c0, %c0_1] : memref<8x128xf32, #tpu.memory_space<vmem>>, vector<8x128xf32>
    %c0_2 = arith.constant 0 : index
    %c0_3 = arith.constant 0 : index
    %4 = vector.load %arg3[%c0_2, %c0_3] : memref<8x384xbf16, #tpu.memory_space<vmem>>, vector<8x384xbf16>
    %c0_4 = arith.constant 0 : index
    %c0_5 = arith.constant 0 : index
    %5 = vector.load %arg4[%c0_4, %c0_5] : memref<384x128xbf16, #tpu.memory_space<vmem>>, vector<384x128xbf16>
    %cst = arith.constant dense<0.000000e+00> : vector<8x128xf32>
    %6 = tpu.matmul %4, %5, %cst {dimension_numbers = #tpu.dot_dimension_numbers<[1], [0], [0], [1], [0, 0, 1, 1], [], []>} : vector<8x384xbf16>, vector<384x128xbf16>, vector<8x128xf32> -> vector<8x128xf32>
    %7 = arith.addf %3, %6 : vector<8x128xf32>
    %c0_6 = arith.constant 0 : index
    %c0_7 = arith.constant 0 : index
    %8 = vector.load %arg9[%c0_6, %c0_7] : memref<8x128xf32, #tpu.memory_space<vmem>>, vector<8x128xf32>
    tpu.vector_store %arg9[%c0_6, %c0_7], %7 {strides = array<i32>} : memref<8x128xf32, #tpu.memory_space<vmem>>, vector<8x128xf32>,
    %c5_i32 = arith.constant 5 : i32
    %9 = arith.cmpi eq, %arg2, %c5_i32 : i32
    %10 = arith.extui %9 : i1 to i32
    %c0_i32_8 = arith.constant 0 : i32
    %11 = arith.cmpi ne, %10, %c0_i32_8 : i32
    scf.if %11 {
      %c0_9 = arith.constant 0 : index
      %c0_10 = arith.constant 0 : index
      %12 = vector.load %arg9[%c0_9, %c0_10] : memref<8x128xf32, #tpu.memory_space<vmem>>, vector<8x128xf32>
      %c0_11 = arith.constant 0 : index
      %c0_12 = arith.constant 0 : index
      %13 = vector.load %arg5[%c0_11, %c0_12] : memref<1x128xf32, #tpu.memory_space<vmem>>, vector<1x128xf32>
      %14 = vector.broadcast %13 : vector<1x128xf32> to vector<8x128xf32>
      %15 = arith.mulf %12, %14 : vector<8x128xf32>
      %c0_13 = arith.constant 0 : index
      %c0_14 = arith.constant 0 : index
      %16 = vector.load %arg6[%c0_13, %c0_14] : memref<1x128xf32, #tpu.memory_space<vmem>>, vector<1x128xf32>
      %17 = vector.broadcast %16 : vector<1x128xf32> to vector<8x128xf32>
      %18 = arith.addf %15, %17 : vector<8x128xf32>
      %c0_15 = arith.constant 0 : index
      %c0_16 = arith.constant 0 : index
      %19 = vector.load %arg7[%c0_15, %c0_16] : memref<8x128xf32, #tpu.memory_space<vmem>>, vector<8x128xf32>
      %20 = arith.addf %18, %19 : vector<8x128xf32>
      %cst_17 = arith.constant 0.000000e+00 : f32
      %21 = vector.broadcast %cst_17 : f32 to vector<8x128xf32>
      %22 = arith.maximumf %20, %21 : vector<8x128xf32>
      %c0_18 = arith.constant 0 : index
      %c0_19 = arith.constant 0 : index
      %23 = vector.load %arg8[%c0_18, %c0_19] : memref<8x128xf32, #tpu.memory_space<vmem>>, vector<8x128xf32>
      tpu.vector_store %arg8[%c0_18, %c0_19], %22 {strides = array<i32>} : memref<8x128xf32, #tpu.memory_space<vmem>>, vector<8x128xf32>,
    } else {
    }
    return
  }
  func.func @transform_0(%arg0: i32, %arg1: i32, %arg2: i32) -> (i32, i32) {
    %c0_i32 = arith.constant 0 : i32
    return %arg0, %arg2 : i32, i32
  }
  func.func @transform_1(%arg0: i32, %arg1: i32, %arg2: i32) -> (i32, i32) {
    %c0_i32 = arith.constant 0 : i32
    return %arg2, %arg1 : i32, i32
  }
  func.func @transform_2(%arg0: i32, %arg1: i32, %arg2: i32) -> (i32, i32) {
    %c0_i32 = arith.constant 0 : i32
    %c0_i32_0 = arith.constant 0 : i32
    return %c0_i32, %arg1 : i32, i32
  }
  func.func @transform_3(%arg0: i32, %arg1: i32, %arg2: i32) -> (i32, i32) {
    %c0_i32 = arith.constant 0 : i32
    %c0_i32_0 = arith.constant 0 : i32
    return %c0_i32, %arg1 : i32, i32
  }
  func.func @transform_4(%arg0: i32, %arg1: i32, %arg2: i32) -> (i32, i32) {
    %c0_i32 = arith.constant 0 : i32
    return %arg0, %arg1 : i32, i32
  }
  func.func @transform_5(%arg0: i32, %arg1: i32, %arg2: i32) -> (i32, i32) {
    %c0_i32 = arith.constant 0 : i32
    return %arg0, %arg1 : i32, i32
  }
}

module attributes {stable_mosaic.version = 11 : i64} {
  func.func @_fused_mm_kernel(%arg0: i32, %arg1: i32, %arg2: i32, %arg3: memref<8x384xbf16, #tpu.memory_space<vmem>>, %arg4: memref<384x128xbf16, #tpu.memory_space<vmem>>, %arg5: memref<1x128xf32, #tpu.memory_space<vmem>>, %arg6: memref<1x128xf32, #tpu.memory_space<vmem>>, %arg7: memref<8x128xf32, #tpu.memory_space<vmem>>, %arg8: memref<8x128xf32, #tpu.memory_space<vmem>>) attributes {dimension_semantics = [#tpu.dimension_semantics<parallel>, #tpu.dimension_semantics<parallel>, #tpu.dimension_semantics<arbitrary>], iteration_bounds = array<i64: 1, 2, 6>, scalar_prefetch = 0 : i64, scratch_operands = 1 : i64, tpu.core_type = #tpu.core_type<tc>, window_params = [{transform_indices = @transform_0, window_bounds = array<i64: 8, 384>}, {transform_indices = @transform_1, window_bounds = array<i64: 384, 128>}, {transform_indices = @transform_2, window_bounds = array<i64: 1, 128>}, {transform_indices = @transform_3, window_bounds = array<i64: 1, 128>}, {transform_indices = @transform_4, window_bounds = array<i64: 8, 128>}]} {
    %c0_i32 = arith.constant 0 : i32
    %0 = arith.cmpi eq, %arg2, %c0_i32 : i32
    %1 = arith.extui %0 : i1 to i32
    %c0_i32_0 = arith.constant 0 : i32
    %2 = arith.cmpi ne, %1, %c0_i32_0 : i32
    scf.if %2 {
      %cst_9 = arith.constant 0.000000e+00 : f32
      %12 = vector.broadcast %cst_9 : f32 to vector<8x128xf32>
      %c0_10 = arith.constant 0 : index
      %c0_11 = arith.constant 0 : index
      %13 = vector.load %arg8[%c0_10, %c0_11] : memref<8x128xf32, #tpu.memory_space<vmem>>, vector<8x128xf32>
      tpu.vector_store %arg8[%c0_10, %c0_11], %12 {strides = array<i32>} : memref<8x128xf32, #tpu.memory_space<vmem>>, vector<8x128xf32>,
    } else {
    }
    %c0 = arith.constant 0 : index
    %c0_1 = arith.constant 0 : index
    %3 = vector.load %arg8[%c0, %c0_1] : memref<8x128xf32, #tpu.memory_space<vmem>>, vector<8x128xf32>
    %c0_2 = arith.constant 0 : index
    %c0_3 = arith.constant 0 : index
    %4 = vector.load %arg3[%c0_2, %c0_3] : memref<8x384xbf16, #tpu.memory_space<vmem>>, vector<8x384xbf16>
    %c0_4 = arith.constant 0 : index
    %c0_5 = arith.constant 0 : index
    %5 = vector.load %arg4[%c0_4, %c0_5] : memref<384x128xbf16, #tpu.memory_space<vmem>>, vector<384x128xbf16>
    %cst = arith.constant dense<0.000000e+00> : vector<8x128xf32>
    %6 = tpu.matmul %4, %5, %cst {dimension_numbers = #tpu.dot_dimension_numbers<[1], [0], [0], [1], [0, 0, 1, 1], [], []>} : vector<8x384xbf16>, vector<384x128xbf16>, vector<8x128xf32> -> vector<8x128xf32>
    %7 = arith.addf %3, %6 : vector<8x128xf32>
    %c0_6 = arith.constant 0 : index
    %c0_7 = arith.constant 0 : index
    %8 = vector.load %arg8[%c0_6, %c0_7] : memref<8x128xf32, #tpu.memory_space<vmem>>, vector<8x128xf32>
    tpu.vector_store %arg8[%c0_6, %c0_7], %7 {strides = array<i32>} : memref<8x128xf32, #tpu.memory_space<vmem>>, vector<8x128xf32>,
    %c5_i32 = arith.constant 5 : i32
    %9 = arith.cmpi eq, %arg2, %c5_i32 : i32
    %10 = arith.extui %9 : i1 to i32
    %c0_i32_8 = arith.constant 0 : i32
    %11 = arith.cmpi ne, %10, %c0_i32_8 : i32
    scf.if %11 {
      %c0_9 = arith.constant 0 : index
      %c0_10 = arith.constant 0 : index
      %12 = vector.load %arg8[%c0_9, %c0_10] : memref<8x128xf32, #tpu.memory_space<vmem>>, vector<8x128xf32>
      %c0_11 = arith.constant 0 : index
      %c0_12 = arith.constant 0 : index
      %13 = vector.load %arg5[%c0_11, %c0_12] : memref<1x128xf32, #tpu.memory_space<vmem>>, vector<1x128xf32>
      %14 = vector.broadcast %13 : vector<1x128xf32> to vector<8x128xf32>
      %15 = arith.mulf %12, %14 : vector<8x128xf32>
      %c0_13 = arith.constant 0 : index
      %c0_14 = arith.constant 0 : index
      %16 = vector.load %arg6[%c0_13, %c0_14] : memref<1x128xf32, #tpu.memory_space<vmem>>, vector<1x128xf32>
      %17 = vector.broadcast %16 : vector<1x128xf32> to vector<8x128xf32>
      %18 = arith.addf %15, %17 : vector<8x128xf32>
      %cst_15 = arith.constant 0.000000e+00 : f32
      %19 = vector.broadcast %cst_15 : f32 to vector<8x128xf32>
      %20 = arith.maximumf %18, %19 : vector<8x128xf32>
      %c0_16 = arith.constant 0 : index
      %c0_17 = arith.constant 0 : index
      %21 = vector.load %arg7[%c0_16, %c0_17] : memref<8x128xf32, #tpu.memory_space<vmem>>, vector<8x128xf32>
      tpu.vector_store %arg7[%c0_16, %c0_17], %20 {strides = array<i32>} : memref<8x128xf32, #tpu.memory_space<vmem>>, vector<8x128xf32>,
    } else {
    }
    return
  }
  func.func @transform_0(%arg0: i32, %arg1: i32, %arg2: i32) -> (i32, i32) {
    %c0_i32 = arith.constant 0 : i32
    return %arg0, %arg2 : i32, i32
  }
  func.func @transform_1(%arg0: i32, %arg1: i32, %arg2: i32) -> (i32, i32) {
    %c0_i32 = arith.constant 0 : i32
    return %arg2, %arg1 : i32, i32
  }
  func.func @transform_2(%arg0: i32, %arg1: i32, %arg2: i32) -> (i32, i32) {
    %c0_i32 = arith.constant 0 : i32
    %c0_i32_0 = arith.constant 0 : i32
    return %c0_i32, %arg1 : i32, i32
  }
  func.func @transform_3(%arg0: i32, %arg1: i32, %arg2: i32) -> (i32, i32) {
    %c0_i32 = arith.constant 0 : i32
    %c0_i32_0 = arith.constant 0 : i32
    return %c0_i32, %arg1 : i32, i32
  }
  func.func @transform_4(%arg0: i32, %arg1: i32, %arg2: i32) -> (i32, i32) {
    %c0_i32 = arith.constant 0 : i32
    return %arg0, %arg1 : i32, i32
  }
}

module attributes {stable_mosaic.version = 11 : i64} {
  func.func @_fused_mm_kernel(%arg0: i32, %arg1: i32, %arg2: i32, %arg3: memref<8x384xbf16, #tpu.memory_space<vmem>>, %arg4: memref<384x256xbf16, #tpu.memory_space<vmem>>, %arg5: memref<1x256xf32, #tpu.memory_space<vmem>>, %arg6: memref<1x256xf32, #tpu.memory_space<vmem>>, %arg7: memref<8x256xf32, #tpu.memory_space<vmem>>, %arg8: memref<8x256xf32, #tpu.memory_space<vmem>>) attributes {dimension_semantics = [#tpu.dimension_semantics<parallel>, #tpu.dimension_semantics<parallel>, #tpu.dimension_semantics<arbitrary>], iteration_bounds = array<i64: 1, 2, 6>, scalar_prefetch = 0 : i64, scratch_operands = 1 : i64, tpu.core_type = #tpu.core_type<tc>, window_params = [{transform_indices = @transform_0, window_bounds = array<i64: 8, 384>}, {transform_indices = @transform_1, window_bounds = array<i64: 384, 256>}, {transform_indices = @transform_2, window_bounds = array<i64: 1, 256>}, {transform_indices = @transform_3, window_bounds = array<i64: 1, 256>}, {transform_indices = @transform_4, window_bounds = array<i64: 8, 256>}]} {
    %c0_i32 = arith.constant 0 : i32
    %0 = arith.cmpi eq, %arg2, %c0_i32 : i32
    %1 = arith.extui %0 : i1 to i32
    %c0_i32_0 = arith.constant 0 : i32
    %2 = arith.cmpi ne, %1, %c0_i32_0 : i32
    scf.if %2 {
      %cst_9 = arith.constant 0.000000e+00 : f32
      %12 = vector.broadcast %cst_9 : f32 to vector<8x256xf32>
      %c0_10 = arith.constant 0 : index
      %c0_11 = arith.constant 0 : index
      %13 = vector.load %arg8[%c0_10, %c0_11] : memref<8x256xf32, #tpu.memory_space<vmem>>, vector<8x256xf32>
      tpu.vector_store %arg8[%c0_10, %c0_11], %12 {strides = array<i32>} : memref<8x256xf32, #tpu.memory_space<vmem>>, vector<8x256xf32>,
    } else {
    }
    %c0 = arith.constant 0 : index
    %c0_1 = arith.constant 0 : index
    %3 = vector.load %arg8[%c0, %c0_1] : memref<8x256xf32, #tpu.memory_space<vmem>>, vector<8x256xf32>
    %c0_2 = arith.constant 0 : index
    %c0_3 = arith.constant 0 : index
    %4 = vector.load %arg3[%c0_2, %c0_3] : memref<8x384xbf16, #tpu.memory_space<vmem>>, vector<8x384xbf16>
    %c0_4 = arith.constant 0 : index
    %c0_5 = arith.constant 0 : index
    %5 = vector.load %arg4[%c0_4, %c0_5] : memref<384x256xbf16, #tpu.memory_space<vmem>>, vector<384x256xbf16>
    %cst = arith.constant dense<0.000000e+00> : vector<8x256xf32>
    %6 = tpu.matmul %4, %5, %cst {dimension_numbers = #tpu.dot_dimension_numbers<[1], [0], [0], [1], [0, 0, 1, 1], [], []>} : vector<8x384xbf16>, vector<384x256xbf16>, vector<8x256xf32> -> vector<8x256xf32>
    %7 = arith.addf %3, %6 : vector<8x256xf32>
    %c0_6 = arith.constant 0 : index
    %c0_7 = arith.constant 0 : index
    %8 = vector.load %arg8[%c0_6, %c0_7] : memref<8x256xf32, #tpu.memory_space<vmem>>, vector<8x256xf32>
    tpu.vector_store %arg8[%c0_6, %c0_7], %7 {strides = array<i32>} : memref<8x256xf32, #tpu.memory_space<vmem>>, vector<8x256xf32>,
    %c5_i32 = arith.constant 5 : i32
    %9 = arith.cmpi eq, %arg2, %c5_i32 : i32
    %10 = arith.extui %9 : i1 to i32
    %c0_i32_8 = arith.constant 0 : i32
    %11 = arith.cmpi ne, %10, %c0_i32_8 : i32
    scf.if %11 {
      %c0_9 = arith.constant 0 : index
      %c0_10 = arith.constant 0 : index
      %12 = vector.load %arg8[%c0_9, %c0_10] : memref<8x256xf32, #tpu.memory_space<vmem>>, vector<8x256xf32>
      %c0_11 = arith.constant 0 : index
      %c0_12 = arith.constant 0 : index
      %13 = vector.load %arg5[%c0_11, %c0_12] : memref<1x256xf32, #tpu.memory_space<vmem>>, vector<1x256xf32>
      %14 = vector.broadcast %13 : vector<1x256xf32> to vector<8x256xf32>
      %15 = arith.mulf %12, %14 : vector<8x256xf32>
      %c0_13 = arith.constant 0 : index
      %c0_14 = arith.constant 0 : index
      %16 = vector.load %arg6[%c0_13, %c0_14] : memref<1x256xf32, #tpu.memory_space<vmem>>, vector<1x256xf32>
      %17 = vector.broadcast %16 : vector<1x256xf32> to vector<8x256xf32>
      %18 = arith.addf %15, %17 : vector<8x256xf32>
      %cst_15 = arith.constant 0.000000e+00 : f32
      %19 = vector.broadcast %cst_15 : f32 to vector<8x256xf32>
      %20 = arith.maximumf %18, %19 : vector<8x256xf32>
      %c0_16 = arith.constant 0 : index
      %c0_17 = arith.constant 0 : index
      %21 = vector.load %arg7[%c0_16, %c0_17] : memref<8x256xf32, #tpu.memory_space<vmem>>, vector<8x256xf32>
      tpu.vector_store %arg7[%c0_16, %c0_17], %20 {strides = array<i32>} : memref<8x256xf32, #tpu.memory_space<vmem>>, vector<8x256xf32>,
    } else {
    }
    return
  }
  func.func @transform_0(%arg0: i32, %arg1: i32, %arg2: i32) -> (i32, i32) {
    %c0_i32 = arith.constant 0 : i32
    return %arg0, %arg2 : i32, i32
  }
  func.func @transform_1(%arg0: i32, %arg1: i32, %arg2: i32) -> (i32, i32) {
    %c0_i32 = arith.constant 0 : i32
    return %arg2, %arg1 : i32, i32
  }
  func.func @transform_2(%arg0: i32, %arg1: i32, %arg2: i32) -> (i32, i32) {
    %c0_i32 = arith.constant 0 : i32
    %c0_i32_0 = arith.constant 0 : i32
    return %c0_i32, %arg1 : i32, i32
  }
  func.func @transform_3(%arg0: i32, %arg1: i32, %arg2: i32) -> (i32, i32) {
    %c0_i32 = arith.constant 0 : i32
    %c0_i32_0 = arith.constant 0 : i32
    return %c0_i32, %arg1 : i32, i32
  }
  func.func @transform_4(%arg0: i32, %arg1: i32, %arg2: i32) -> (i32, i32) {
    %c0_i32 = arith.constant 0 : i32
    return %arg0, %arg1 : i32, i32
  }
}

module attributes {stable_mosaic.version = 11 : i64} {
  func.func @_fused_mm_kernel(%arg0: i32, %arg1: i32, %arg2: i32, %arg3: memref<8x512xbf16, #tpu.memory_space<vmem>>, %arg4: memref<512x256xbf16, #tpu.memory_space<vmem>>, %arg5: memref<1x256xf32, #tpu.memory_space<vmem>>, %arg6: memref<1x256xf32, #tpu.memory_space<vmem>>, %arg7: memref<8x256xf32, #tpu.memory_space<vmem>>, %arg8: memref<8x256xf32, #tpu.memory_space<vmem>>, %arg9: memref<8x256xf32, #tpu.memory_space<vmem>>) attributes {dimension_semantics = [#tpu.dimension_semantics<parallel>, #tpu.dimension_semantics<parallel>, #tpu.dimension_semantics<arbitrary>], iteration_bounds = array<i64: 1, 2, 9>, scalar_prefetch = 0 : i64, scratch_operands = 1 : i64, tpu.core_type = #tpu.core_type<tc>, window_params = [{transform_indices = @transform_0, window_bounds = array<i64: 8, 512>}, {transform_indices = @transform_1, window_bounds = array<i64: 512, 256>}, {transform_indices = @transform_2, window_bounds = array<i64: 1, 256>}, {transform_indices = @transform_3, window_bounds = array<i64: 1, 256>}, {transform_indices = @transform_4, window_bounds = array<i64: 8, 256>}, {transform_indices = @transform_5, window_bounds = array<i64: 8, 256>}]} {
    %c0_i32 = arith.constant 0 : i32
    %0 = arith.cmpi eq, %arg2, %c0_i32 : i32
    %1 = arith.extui %0 : i1 to i32
    %c0_i32_0 = arith.constant 0 : i32
    %2 = arith.cmpi ne, %1, %c0_i32_0 : i32
    scf.if %2 {
      %cst_9 = arith.constant 0.000000e+00 : f32
      %12 = vector.broadcast %cst_9 : f32 to vector<8x256xf32>
      %c0_10 = arith.constant 0 : index
      %c0_11 = arith.constant 0 : index
      %13 = vector.load %arg9[%c0_10, %c0_11] : memref<8x256xf32, #tpu.memory_space<vmem>>, vector<8x256xf32>
      tpu.vector_store %arg9[%c0_10, %c0_11], %12 {strides = array<i32>} : memref<8x256xf32, #tpu.memory_space<vmem>>, vector<8x256xf32>,
    } else {
    }
    %c0 = arith.constant 0 : index
    %c0_1 = arith.constant 0 : index
    %3 = vector.load %arg9[%c0, %c0_1] : memref<8x256xf32, #tpu.memory_space<vmem>>, vector<8x256xf32>
    %c0_2 = arith.constant 0 : index
    %c0_3 = arith.constant 0 : index
    %4 = vector.load %arg3[%c0_2, %c0_3] : memref<8x512xbf16, #tpu.memory_space<vmem>>, vector<8x512xbf16>
    %c0_4 = arith.constant 0 : index
    %c0_5 = arith.constant 0 : index
    %5 = vector.load %arg4[%c0_4, %c0_5] : memref<512x256xbf16, #tpu.memory_space<vmem>>, vector<512x256xbf16>
    %cst = arith.constant dense<0.000000e+00> : vector<8x256xf32>
    %6 = tpu.matmul %4, %5, %cst {dimension_numbers = #tpu.dot_dimension_numbers<[1], [0], [0], [1], [0, 0, 1, 1], [], []>} : vector<8x512xbf16>, vector<512x256xbf16>, vector<8x256xf32> -> vector<8x256xf32>
    %7 = arith.addf %3, %6 : vector<8x256xf32>
    %c0_6 = arith.constant 0 : index
    %c0_7 = arith.constant 0 : index
    %8 = vector.load %arg9[%c0_6, %c0_7] : memref<8x256xf32, #tpu.memory_space<vmem>>, vector<8x256xf32>
    tpu.vector_store %arg9[%c0_6, %c0_7], %7 {strides = array<i32>} : memref<8x256xf32, #tpu.memory_space<vmem>>, vector<8x256xf32>,
    %c8_i32 = arith.constant 8 : i32
    %9 = arith.cmpi eq, %arg2, %c8_i32 : i32
    %10 = arith.extui %9 : i1 to i32
    %c0_i32_8 = arith.constant 0 : i32
    %11 = arith.cmpi ne, %10, %c0_i32_8 : i32
    scf.if %11 {
      %c0_9 = arith.constant 0 : index
      %c0_10 = arith.constant 0 : index
      %12 = vector.load %arg9[%c0_9, %c0_10] : memref<8x256xf32, #tpu.memory_space<vmem>>, vector<8x256xf32>
      %c0_11 = arith.constant 0 : index
      %c0_12 = arith.constant 0 : index
      %13 = vector.load %arg5[%c0_11, %c0_12] : memref<1x256xf32, #tpu.memory_space<vmem>>, vector<1x256xf32>
      %14 = vector.broadcast %13 : vector<1x256xf32> to vector<8x256xf32>
      %15 = arith.mulf %12, %14 : vector<8x256xf32>
      %c0_13 = arith.constant 0 : index
      %c0_14 = arith.constant 0 : index
      %16 = vector.load %arg6[%c0_13, %c0_14] : memref<1x256xf32, #tpu.memory_space<vmem>>, vector<1x256xf32>
      %17 = vector.broadcast %16 : vector<1x256xf32> to vector<8x256xf32>
      %18 = arith.addf %15, %17 : vector<8x256xf32>
      %c0_15 = arith.constant 0 : index
      %c0_16 = arith.constant 0 : index
      %19 = vector.load %arg7[%c0_15, %c0_16] : memref<8x256xf32, #tpu.memory_space<vmem>>, vector<8x256xf32>
      %20 = arith.addf %18, %19 : vector<8x256xf32>
      %cst_17 = arith.constant 0.000000e+00 : f32
      %21 = vector.broadcast %cst_17 : f32 to vector<8x256xf32>
      %22 = arith.maximumf %20, %21 : vector<8x256xf32>
      %c0_18 = arith.constant 0 : index
      %c0_19 = arith.constant 0 : index
      %23 = vector.load %arg8[%c0_18, %c0_19] : memref<8x256xf32, #tpu.memory_space<vmem>>, vector<8x256xf32>
      tpu.vector_store %arg8[%c0_18, %c0_19], %22 {strides = array<i32>} : memref<8x256xf32, #tpu.memory_space<vmem>>, vector<8x256xf32>,
    } else {
    }
    return
  }
  func.func @transform_0(%arg0: i32, %arg1: i32, %arg2: i32) -> (i32, i32) {
    %c0_i32 = arith.constant 0 : i32
    return %arg0, %arg2 : i32, i32
  }
  func.func @transform_1(%arg0: i32, %arg1: i32, %arg2: i32) -> (i32, i32) {
    %c0_i32 = arith.constant 0 : i32
    return %arg2, %arg1 : i32, i32
  }
  func.func @transform_2(%arg0: i32, %arg1: i32, %arg2: i32) -> (i32, i32) {
    %c0_i32 = arith.constant 0 : i32
    %c0_i32_0 = arith.constant 0 : i32
    return %c0_i32, %arg1 : i32, i32
  }
  func.func @transform_3(%arg0: i32, %arg1: i32, %arg2: i32) -> (i32, i32) {
    %c0_i32 = arith.constant 0 : i32
    %c0_i32_0 = arith.constant 0 : i32
    return %c0_i32, %arg1 : i32, i32
  }
  func.func @transform_4(%arg0: i32, %arg1: i32, %arg2: i32) -> (i32, i32) {
    %c0_i32 = arith.constant 0 : i32
    return %arg0, %arg1 : i32, i32
  }
  func.func @transform_5(%arg0: i32, %arg1: i32, %arg2: i32) -> (i32, i32) {
    %c0_i32 = arith.constant 0 : i32
    return %arg0, %arg1 : i32, i32
  }
}

module attributes {stable_mosaic.version = 11 : i64} {
  func.func @_fused_mm_kernel(%arg0: i32, %arg1: i32, %arg2: i32, %arg3: memref<8x512xbf16, #tpu.memory_space<vmem>>, %arg4: memref<512x256xbf16, #tpu.memory_space<vmem>>, %arg5: memref<1x256xf32, #tpu.memory_space<vmem>>, %arg6: memref<1x256xf32, #tpu.memory_space<vmem>>, %arg7: memref<8x256xf32, #tpu.memory_space<vmem>>, %arg8: memref<8x256xf32, #tpu.memory_space<vmem>>) attributes {dimension_semantics = [#tpu.dimension_semantics<parallel>, #tpu.dimension_semantics<parallel>, #tpu.dimension_semantics<arbitrary>], iteration_bounds = array<i64: 1, 2, 9>, scalar_prefetch = 0 : i64, scratch_operands = 1 : i64, tpu.core_type = #tpu.core_type<tc>, window_params = [{transform_indices = @transform_0, window_bounds = array<i64: 8, 512>}, {transform_indices = @transform_1, window_bounds = array<i64: 512, 256>}, {transform_indices = @transform_2, window_bounds = array<i64: 1, 256>}, {transform_indices = @transform_3, window_bounds = array<i64: 1, 256>}, {transform_indices = @transform_4, window_bounds = array<i64: 8, 256>}]} {
    %c0_i32 = arith.constant 0 : i32
    %0 = arith.cmpi eq, %arg2, %c0_i32 : i32
    %1 = arith.extui %0 : i1 to i32
    %c0_i32_0 = arith.constant 0 : i32
    %2 = arith.cmpi ne, %1, %c0_i32_0 : i32
    scf.if %2 {
      %cst_9 = arith.constant 0.000000e+00 : f32
      %12 = vector.broadcast %cst_9 : f32 to vector<8x256xf32>
      %c0_10 = arith.constant 0 : index
      %c0_11 = arith.constant 0 : index
      %13 = vector.load %arg8[%c0_10, %c0_11] : memref<8x256xf32, #tpu.memory_space<vmem>>, vector<8x256xf32>
      tpu.vector_store %arg8[%c0_10, %c0_11], %12 {strides = array<i32>} : memref<8x256xf32, #tpu.memory_space<vmem>>, vector<8x256xf32>,
    } else {
    }
    %c0 = arith.constant 0 : index
    %c0_1 = arith.constant 0 : index
    %3 = vector.load %arg8[%c0, %c0_1] : memref<8x256xf32, #tpu.memory_space<vmem>>, vector<8x256xf32>
    %c0_2 = arith.constant 0 : index
    %c0_3 = arith.constant 0 : index
    %4 = vector.load %arg3[%c0_2, %c0_3] : memref<8x512xbf16, #tpu.memory_space<vmem>>, vector<8x512xbf16>
    %c0_4 = arith.constant 0 : index
    %c0_5 = arith.constant 0 : index
    %5 = vector.load %arg4[%c0_4, %c0_5] : memref<512x256xbf16, #tpu.memory_space<vmem>>, vector<512x256xbf16>
    %cst = arith.constant dense<0.000000e+00> : vector<8x256xf32>
    %6 = tpu.matmul %4, %5, %cst {dimension_numbers = #tpu.dot_dimension_numbers<[1], [0], [0], [1], [0, 0, 1, 1], [], []>} : vector<8x512xbf16>, vector<512x256xbf16>, vector<8x256xf32> -> vector<8x256xf32>
    %7 = arith.addf %3, %6 : vector<8x256xf32>
    %c0_6 = arith.constant 0 : index
    %c0_7 = arith.constant 0 : index
    %8 = vector.load %arg8[%c0_6, %c0_7] : memref<8x256xf32, #tpu.memory_space<vmem>>, vector<8x256xf32>
    tpu.vector_store %arg8[%c0_6, %c0_7], %7 {strides = array<i32>} : memref<8x256xf32, #tpu.memory_space<vmem>>, vector<8x256xf32>,
    %c8_i32 = arith.constant 8 : i32
    %9 = arith.cmpi eq, %arg2, %c8_i32 : i32
    %10 = arith.extui %9 : i1 to i32
    %c0_i32_8 = arith.constant 0 : i32
    %11 = arith.cmpi ne, %10, %c0_i32_8 : i32
    scf.if %11 {
      %c0_9 = arith.constant 0 : index
      %c0_10 = arith.constant 0 : index
      %12 = vector.load %arg8[%c0_9, %c0_10] : memref<8x256xf32, #tpu.memory_space<vmem>>, vector<8x256xf32>
      %c0_11 = arith.constant 0 : index
      %c0_12 = arith.constant 0 : index
      %13 = vector.load %arg5[%c0_11, %c0_12] : memref<1x256xf32, #tpu.memory_space<vmem>>, vector<1x256xf32>
      %14 = vector.broadcast %13 : vector<1x256xf32> to vector<8x256xf32>
      %15 = arith.mulf %12, %14 : vector<8x256xf32>
      %c0_13 = arith.constant 0 : index
      %c0_14 = arith.constant 0 : index
      %16 = vector.load %arg6[%c0_13, %c0_14] : memref<1x256xf32, #tpu.memory_space<vmem>>, vector<1x256xf32>
      %17 = vector.broadcast %16 : vector<1x256xf32> to vector<8x256xf32>
      %18 = arith.addf %15, %17 : vector<8x256xf32>
      %cst_15 = arith.constant 0.000000e+00 : f32
      %19 = vector.broadcast %cst_15 : f32 to vector<8x256xf32>
      %20 = arith.maximumf %18, %19 : vector<8x256xf32>
      %c0_16 = arith.constant 0 : index
      %c0_17 = arith.constant 0 : index
      %21 = vector.load %arg7[%c0_16, %c0_17] : memref<8x256xf32, #tpu.memory_space<vmem>>, vector<8x256xf32>
      tpu.vector_store %arg7[%c0_16, %c0_17], %20 {strides = array<i32>} : memref<8x256xf32, #tpu.memory_space<vmem>>, vector<8x256xf32>,
    } else {
    }
    return
  }
  func.func @transform_0(%arg0: i32, %arg1: i32, %arg2: i32) -> (i32, i32) {
    %c0_i32 = arith.constant 0 : i32
    return %arg0, %arg2 : i32, i32
  }
  func.func @transform_1(%arg0: i32, %arg1: i32, %arg2: i32) -> (i32, i32) {
    %c0_i32 = arith.constant 0 : i32
    return %arg2, %arg1 : i32, i32
  }
  func.func @transform_2(%arg0: i32, %arg1: i32, %arg2: i32) -> (i32, i32) {
    %c0_i32 = arith.constant 0 : i32
    %c0_i32_0 = arith.constant 0 : i32
    return %c0_i32, %arg1 : i32, i32
  }
  func.func @transform_3(%arg0: i32, %arg1: i32, %arg2: i32) -> (i32, i32) {
    %c0_i32 = arith.constant 0 : i32
    %c0_i32_0 = arith.constant 0 : i32
    return %c0_i32, %arg1 : i32, i32
  }
  func.func @transform_4(%arg0: i32, %arg1: i32, %arg2: i32) -> (i32, i32) {
    %c0_i32 = arith.constant 0 : i32
    return %arg0, %arg1 : i32, i32
  }
}

module attributes {stable_mosaic.version = 11 : i64} {
  func.func @_fused_mm_kernel(%arg0: i32, %arg1: i32, %arg2: i32, %arg3: memref<8x256xbf16, #tpu.memory_space<vmem>>, %arg4: memref<256x256xbf16, #tpu.memory_space<vmem>>, %arg5: memref<1x256xf32, #tpu.memory_space<vmem>>, %arg6: memref<1x256xf32, #tpu.memory_space<vmem>>, %arg7: memref<8x256xf32, #tpu.memory_space<vmem>>, %arg8: memref<8x256xf32, #tpu.memory_space<vmem>>) attributes {dimension_semantics = [#tpu.dimension_semantics<parallel>, #tpu.dimension_semantics<parallel>, #tpu.dimension_semantics<arbitrary>], iteration_bounds = array<i64: 1, 2, 1>, scalar_prefetch = 0 : i64, scratch_operands = 1 : i64, tpu.core_type = #tpu.core_type<tc>, window_params = [{transform_indices = @transform_0, window_bounds = array<i64: 8, 256>}, {transform_indices = @transform_1, window_bounds = array<i64: 256, 256>}, {transform_indices = @transform_2, window_bounds = array<i64: 1, 256>}, {transform_indices = @transform_3, window_bounds = array<i64: 1, 256>}, {transform_indices = @transform_4, window_bounds = array<i64: 8, 256>}]} {
    %c0_i32 = arith.constant 0 : i32
    %0 = arith.cmpi eq, %arg2, %c0_i32 : i32
    %1 = arith.extui %0 : i1 to i32
    %c0_i32_0 = arith.constant 0 : i32
    %2 = arith.cmpi ne, %1, %c0_i32_0 : i32
    scf.if %2 {
      %cst_10 = arith.constant 0.000000e+00 : f32
      %12 = vector.broadcast %cst_10 : f32 to vector<8x256xf32>
      %c0_11 = arith.constant 0 : index
      %c0_12 = arith.constant 0 : index
      %13 = vector.load %arg8[%c0_11, %c0_12] : memref<8x256xf32, #tpu.memory_space<vmem>>, vector<8x256xf32>
      tpu.vector_store %arg8[%c0_11, %c0_12], %12 {strides = array<i32>} : memref<8x256xf32, #tpu.memory_space<vmem>>, vector<8x256xf32>,
    } else {
    }
    %c0 = arith.constant 0 : index
    %c0_1 = arith.constant 0 : index
    %3 = vector.load %arg8[%c0, %c0_1] : memref<8x256xf32, #tpu.memory_space<vmem>>, vector<8x256xf32>
    %c0_2 = arith.constant 0 : index
    %c0_3 = arith.constant 0 : index
    %4 = vector.load %arg3[%c0_2, %c0_3] : memref<8x256xbf16, #tpu.memory_space<vmem>>, vector<8x256xbf16>
    %c0_4 = arith.constant 0 : index
    %c0_5 = arith.constant 0 : index
    %5 = vector.load %arg4[%c0_4, %c0_5] : memref<256x256xbf16, #tpu.memory_space<vmem>>, vector<256x256xbf16>
    %cst = arith.constant dense<0.000000e+00> : vector<8x256xf32>
    %6 = tpu.matmul %4, %5, %cst {dimension_numbers = #tpu.dot_dimension_numbers<[1], [0], [0], [1], [0, 0, 1, 1], [], []>} : vector<8x256xbf16>, vector<256x256xbf16>, vector<8x256xf32> -> vector<8x256xf32>
    %7 = arith.addf %3, %6 : vector<8x256xf32>
    %c0_6 = arith.constant 0 : index
    %c0_7 = arith.constant 0 : index
    %8 = vector.load %arg8[%c0_6, %c0_7] : memref<8x256xf32, #tpu.memory_space<vmem>>, vector<8x256xf32>
    tpu.vector_store %arg8[%c0_6, %c0_7], %7 {strides = array<i32>} : memref<8x256xf32, #tpu.memory_space<vmem>>, vector<8x256xf32>,
    %c0_i32_8 = arith.constant 0 : i32
    %9 = arith.cmpi eq, %arg2, %c0_i32_8 : i32
    %10 = arith.extui %9 : i1 to i32
    %c0_i32_9 = arith.constant 0 : i32
    %11 = arith.cmpi ne, %10, %c0_i32_9 : i32
    scf.if %11 {
      %c0_10 = arith.constant 0 : index
      %c0_11 = arith.constant 0 : index
      %12 = vector.load %arg8[%c0_10, %c0_11] : memref<8x256xf32, #tpu.memory_space<vmem>>, vector<8x256xf32>
      %c0_12 = arith.constant 0 : index
      %c0_13 = arith.constant 0 : index
      %13 = vector.load %arg5[%c0_12, %c0_13] : memref<1x256xf32, #tpu.memory_space<vmem>>, vector<1x256xf32>
      %14 = vector.broadcast %13 : vector<1x256xf32> to vector<8x256xf32>
      %15 = arith.mulf %12, %14 : vector<8x256xf32>
      %c0_14 = arith.constant 0 : index
      %c0_15 = arith.constant 0 : index
      %16 = vector.load %arg6[%c0_14, %c0_15] : memref<1x256xf32, #tpu.memory_space<vmem>>, vector<1x256xf32>
      %17 = vector.broadcast %16 : vector<1x256xf32> to vector<8x256xf32>
      %18 = arith.addf %15, %17 : vector<8x256xf32>
      %c0_16 = arith.constant 0 : index
      %c0_17 = arith.constant 0 : index
      %19 = vector.load %arg7[%c0_16, %c0_17] : memref<8x256xf32, #tpu.memory_space<vmem>>, vector<8x256xf32>
      tpu.vector_store %arg7[%c0_16, %c0_17], %18 {strides = array<i32>} : memref<8x256xf32, #tpu.memory_space<vmem>>, vector<8x256xf32>,
    } else {
    }
    return
  }
  func.func @transform_0(%arg0: i32, %arg1: i32, %arg2: i32) -> (i32, i32) {
    %c0_i32 = arith.constant 0 : i32
    return %arg0, %arg2 : i32, i32
  }
  func.func @transform_1(%arg0: i32, %arg1: i32, %arg2: i32) -> (i32, i32) {
    %c0_i32 = arith.constant 0 : i32
    return %arg2, %arg1 : i32, i32
  }
  func.func @transform_2(%arg0: i32, %arg1: i32, %arg2: i32) -> (i32, i32) {
    %c0_i32 = arith.constant 0 : i32
    %c0_i32_0 = arith.constant 0 : i32
    return %c0_i32, %arg1 : i32, i32
  }
  func.func @transform_3(%arg0: i32, %arg1: i32, %arg2: i32) -> (i32, i32) {
    %c0_i32 = arith.constant 0 : i32
    %c0_i32_0 = arith.constant 0 : i32
    return %c0_i32, %arg1 : i32, i32
  }
  func.func @transform_4(%arg0: i32, %arg1: i32, %arg2: i32) -> (i32, i32) {
    %c0_i32 = arith.constant 0 : i32
    return %arg0, %arg1 : i32, i32
  }
}

</mosaic_0001>

<bundles_post_ra>
// kernel: _lambda_.20
= control target key start
LH: loop header
LB: loop body
LE: loop exit
PB: predicated region body
PF: predicated region fallthrough
CT: control target
= control target key end

     0   :  { %s1168_s15 = smov 0   ;;  %s1170_s16 = smov 0   ;;  %s1382_s0 = inlined_call_operand.vmem [shape: bf16[512,256], index: 0, kind: input, shape index: {}]   ;;  %s1383_s1 = inlined_call_operand.vmem [shape: bf16[256,64], index: 1, kind: input, shape index: {}]   ;;  %s1384_s2 = inlined_call_operand.vmem [shape: f32[1,64], index: 2, kind: input, shape index: {}]   ;;  %s1385_s3 = inlined_call_operand.vmem [shape: f32[1,64], index: 3, kind: input, shape index: {}]   ;;  %s1386_s4 = inlined_call_operand.vmem [shape: f32[512,64], index: 4, kind: output, shape index: {}]  }
   0x1   :  { %s1172_s17 = smov 0  }
   0x2 LB: > { %s33_s18 = sadd.s32 1, %s1136_s16  ;;  %p930_p0 = scmp.ge.s32.totalorder %s1140_s17, 1  ;;  %s1140_s17 = sphi %s1172_s17, %s14_s17   ;;  %s1136_s16 = sphi %s1170_s16, %s1388_s16   ;;  %s1132_s15 = sphi %s1168_s15, %s1387_s15  }
   0x3   : > { %p35_p1 = scmp.ge.s32.totalorder %s33_s18, 4  ;;  %p224_p2 = scmp.lt.s32.totalorder %s1140_s17, 5 }
   0x5   : > { %s1390_s18 = smov (%p35_p1, %s33_s18), 0  ;;  %p225_p3 = pnand %p930_p0, %p224_p2 }
   0x6   : > { %s931_s21 = sshll.u32 (!%p225_p3), %s1132_s15, 4 }
   0x7   : > { %228 = sbr.rel (%p225_p3) target bundleno = 288 (0x120), region = 36  ;;  %p274_p4 = scmp.lt.s32.totalorder (!%p225_p3), %s931_s21, 63 }
   0xc   : > { %v1078_v0 = vld [vmem:[%s1383_s1 + $0x78] sm:$0xff]   ;;  %v1080_v2 = vld [vmem:[%s1383_s1 + $0x70] sm:$0xff]   ;;  %v1082_v4 = vld [vmem:[%s1383_s1 + $0x68] sm:$0xff]   ;;  %s1392_s21 = smov (!%p274_p4, %s931_s21), 63  ;;  %vm313_vm0 = vcmask 523264   ;;  %v1142_v32 = vmov 0.0  }
   0xd   : > { %v1079_v1 = vld [vmem:[%s1383_s1 + $0x38] sm:$0xff]   ;;  %973 = vmatprep.subr.bf16.mxu0 %v1078_v0  ;;  %1037 = vmatprep.subr.bf16.mxu1 %v1078_v0  ;;  %v1081_v3 = vld [vmem:[%s1383_s1 + $0x30] sm:$0xff]   ;;  %v1083_v5 = vld [vmem:[%s1383_s1 + $0x28] sm:$0xff]   ;;  %s972_s10 = sshll.u32 %s1392_s21, 3  ;;  %314 = vst.msk [vmem:[#allocation2] sm:$0xff] %vm313_vm0, %v1142_v32 }
   0xe   : > { %974 = vmatpush3.bf16.msra.mxu0 %v1079_v1  ;;  %1045 = vmatpush3.bf16.msra.mxu1 %v1079_v1  ;;  %v1084_v6 = vld [vmem:[%s1383_s1 + $0x60] sm:$0xff]   ;;  %v1086_v8 = vld [vmem:[%s1383_s1 + $0x58] sm:$0xff]   ;;  %s1221_s15 = scalar_lea.vmem %s1382_s0, %s972_s10  ;;  %v1088_v10 = vld [vmem:[%s1383_s1 + $0x50] sm:$0xff]   ;;  %315 = vst.msk [vmem:[#allocation2 + $0x8] sm:$0xff] %vm313_vm0, %v1142_v32 }
   0xf   : > { %975 = vmatprep.subr.bf16.mxu0 %v1080_v2  ;;  %1038 = vmatprep.subr.bf16.mxu1 %v1080_v2  ;;  %v1085_v7 = vld [vmem:[%s1383_s1 + $0x20] sm:$0xff]   ;;  %v1087_v9 = vld [vmem:[%s1383_s1 + $0x18] sm:$0xff]   ;;  %v1089_v13 = vld [vmem:[%s1383_s1 + $0x10] sm:$0xff]   ;;  %316 = vst.msk [vmem:[#allocation2 + $0x10] sm:$0xff] %vm313_vm0, %v1142_v32 }
  0x10   : > { %v1096_v11 = vld [vmem:[%s1221_s15 + $0x4] ss:$8 sps:$4 sm:$0xff]   ;;  %v1094_v18 = vld [vmem:[%s1221_s15] ss:$8 sps:$4 sm:$0xff]   ;;  %v1100_v20 = vld [vmem:[%s1221_s15 + $0x14] ss:$8 sps:$4 sm:$0xff]  }
  0x11   : > { %v1099_v12 = vld [vmem:[%s1221_s15 + $0x44] ss:$8 sps:$4 sm:$0xff]   ;;  %602 = vmatprep.mubr.bf16.mxu0 %v1096_v11  ;;  %v1097_v19 = vld [vmem:[%s1221_s15 + $0x40] ss:$8 sps:$4 sm:$0xff]   ;;  %v1102_v21 = vld [vmem:[%s1221_s15 + $0x54] ss:$8 sps:$4 sm:$0xff]  }
  0x12   : > { %976 = vmatpush3.bf16.msra.mxu0 %v1081_v3  ;;  %1046 = vmatpush3.bf16.msra.mxu1 %v1081_v3  ;;  %v1090_v14 = vld [vmem:[%s1383_s1 + $0x48] sm:$0xff]   ;;  %v1092_v16 = vld [vmem:[%s1383_s1 + $0x40] sm:$0xff]   ;;  %v1104_v22 = vld [vmem:[%s1221_s15 + $0x10] ss:$8 sps:$4 sm:$0xff]   ;;  %317 = vst.msk [vmem:[#allocation2 + $0x18] sm:$0xff] %vm313_vm0, %v1142_v32 }
  0x13   : > { %977 = vmatprep.subr.bf16.mxu0 %v1082_v4  ;;  %1039 = vmatprep.subr.bf16.mxu1 %v1082_v4  ;;  %v1091_v15 = vld [vmem:[%s1383_s1 + $0x8] sm:$0xff]   ;;  %v1093_v17 = vld [vmem:[%s1383_s1] sm:$0xff]   ;;  %v1105_v23 = vld [vmem:[%s1221_s15 + $0x50] ss:$8 sps:$4 sm:$0xff]   ;;  %318 = vst.msk [vmem:[#allocation2 + $0x20] sm:$0xff] %vm313_vm0, %v1142_v32 }
  0x14   : > { %634 = vmatprep.mubr.bf16.mxu1 %v1099_v12  ;;  %v1106_v24 = vld [vmem:[%s1221_s15 + $0x24] ss:$8 sps:$4 sm:$0xff]   ;;  %v1110_v26 = vld [vmem:[%s1221_s15 + $0x20] ss:$8 sps:$4 sm:$0xff]   ;;  %v1112_v28 = vld [vmem:[%s1221_s15 + $0x34] ss:$8 sps:$4 sm:$0xff]  }
  0x15   : > { %v1108_v25 = vld [vmem:[%s1221_s15 + $0x64] ss:$8 sps:$4 sm:$0xff]   ;;  %v1111_v27 = vld [vmem:[%s1221_s15 + $0x60] ss:$8 sps:$4 sm:$0xff]   ;;  %v1114_v29 = vld [vmem:[%s1221_s15 + $0x74] ss:$8 sps:$4 sm:$0xff]  }
  0x16   : > { %978 = vmatpush3.bf16.msra.mxu0 %v1083_v5  ;;  %1047 = vmatpush3.bf16.msra.mxu1 %v1083_v5  ;;  %v1116_v30 = vld [vmem:[%s1221_s15 + $0x30] ss:$8 sps:$4 sm:$0xff]   ;;  %319 = vst.msk [vmem:[#allocation2 + $0x28] sm:$0xff] %vm313_vm0, %v1142_v32  ;;  %320 = vst.msk [vmem:[#allocation2 + $0x30] sm:$0xff] %vm313_vm0, %v1142_v32  ;;  %v330_v35 = vld [vmem:[#allocation2] sm:$0xff] }
  0x17   : > { %979 = vmatprep.subr.bf16.mxu0 %v1084_v6  ;;  %1040 = vmatprep.subr.bf16.mxu1 %v1084_v6  ;;  %v1117_v31 = vld [vmem:[%s1221_s15 + $0x70] ss:$8 sps:$4 sm:$0xff]   ;;  %321 = vst.msk [vmem:[#allocation2 + $0x38] sm:$0xff] %vm313_vm0, %v1142_v32  ;;  %322 = vst.msk [vmem:[#allocation2 + $0x40] sm:$0xff] %vm313_vm0, %v1142_v32  ;;  %v331_v45 = vld [vmem:[#allocation2 + $0x8] sm:$0xff]  ;;  %s1301_s15 = scalar_lea.vmem %s1386_s4, %s972_s10 }
  0x18   : > { %323 = vst.msk [vmem:[#allocation2 + $0x48] sm:$0xff] %vm313_vm0, %v1142_v32  ;;  %324 = vst.msk [vmem:[#allocation2 + $0x50] sm:$0xff] %vm313_vm0, %v1142_v32  ;;  %v332_v55 = vld [vmem:[#allocation2 + $0x10] sm:$0xff]  ;;  %v1283_v61 = vld [vmem:[%s1384_s2] ss:$0 sm:$0xff] }
  0x19   : > { %325 = vst.msk [vmem:[#allocation2 + $0x58] sm:$0xff] %vm313_vm0, %v1142_v32  ;;  %326 = vst.msk [vmem:[#allocation2 + $0x60] sm:$0xff] %vm313_vm0, %v1142_v32  ;;  %v1288_v0 = vld [vmem:[%s1385_s3] ss:$0 sm:$0xff]  ;;  %v333_v3 = vld [vmem:[#allocation2 + $0x18] sm:$0xff] }
  0x1a   : > { %980 = vmatpush3.bf16.msra.mxu0 %v1085_v7  ;;  %1048 = vmatpush3.bf16.msra.mxu1 %v1085_v7  ;;  %327 = vst.msk [vmem:[#allocation2 + $0x68] sm:$0xff] %vm313_vm0, %v1142_v32  ;;  %328 = vst.msk [vmem:[#allocation2 + $0x70] sm:$0xff] %vm313_vm0, %v1142_v32 }
  0x1b   : > { %981 = vmatprep.subr.bf16.mxu0 %v1086_v8  ;;  %1041 = vmatprep.subr.bf16.mxu1 %v1086_v8  ;;  %329 = vst.msk [vmem:[#allocation2 + $0x78] sm:$0xff] %vm313_vm0, %v1142_v32 }
  0x1e   : > { %982 = vmatpush3.bf16.msra.mxu0 %v1087_v9  ;;  %1049 = vmatpush3.bf16.msra.mxu1 %v1087_v9  ;;  %v338_v37 = vld [vmem:[#allocation2 + $0x40] sm:$0xff] }
  0x1f   : > { %983 = vmatprep.subr.bf16.mxu0 %v1088_v10  ;;  %1042 = vmatprep.subr.bf16.mxu1 %v1088_v10  ;;  %v339_v47 = vld [vmem:[#allocation2 + $0x48] sm:$0xff]  ;;  %v340_v57 = vld [vmem:[#allocation2 + $0x50] sm:$0xff] }
  0x20   : > { %v341_v7 = vld [vmem:[#allocation2 + $0x58] sm:$0xff] }
  0x22   : > { %984 = vmatpush3.bf16.msra.mxu0 %v1089_v13  ;;  %1050 = vmatpush3.bf16.msra.mxu1 %v1089_v13 }
  0x23   : > { %985 = vmatprep.subr.bf16.mxu0 %v1090_v14  ;;  %1043 = vmatprep.subr.bf16.mxu1 %v1090_v14 }
  0x26   : > { %986 = vmatpush3.bf16.msra.mxu0 %v1091_v15  ;;  %1051 = vmatpush3.bf16.msra.mxu1 %v1091_v15 }
  0x27   : > { %987 = vmatprep.subr.bf16.mxu0 %v1092_v16  ;;  %1044 = vmatprep.subr.bf16.mxu1 %v1092_v16 }
  0x2a   : > { %988 = vmatpush3.bf16.msra.mxu0 %v1093_v17  ;;  %1052 = vmatpush3.bf16.msra.mxu1 %v1093_v17 }
  0x2d   : > { %603 = vmatmul.mubr.bf16.vlgmr.msra.gmra.mxu0 %v1094_v18  ;;  %635 = vmatmul.mubr.bf16.vlgmr.msra.gmra.mxu1 %v1097_v19 }
  0x2e   : > { %610 = vmatprep.mubr.bf16.mxu0 %v1100_v20  ;;  %642 = vmatprep.mubr.bf16.mxu1 %v1102_v21 }
  0x35   : > { %611 = vmatmul.mubr.bf16.gmra.mxu0 %v1104_v22  ;;  %643 = vmatmul.mubr.bf16.gmra.mxu1 %v1105_v23 }
  0x36   : > { %618 = vmatprep.mubr.bf16.mxu0 %v1106_v24  ;;  %650 = vmatprep.mubr.bf16.mxu1 %v1108_v25 }
  0x3d   : > { %619 = vmatmul.mubr.bf16.gmra.mxu0 %v1110_v26  ;;  %651 = vmatmul.mubr.bf16.gmra.mxu1 %v1111_v27  ;;  %v334_v27 = vld [vmem:[#allocation2 + $0x20] sm:$0xff] }
  0x3e   : > { %626 = vmatprep.mubr.bf16.mxu0 %v1112_v28  ;;  %658 = vmatprep.mubr.bf16.mxu1 %v1114_v29  ;;  %v342_v28 = vld [vmem:[#allocation2 + $0x60] sm:$0xff] }
  0x45   : > { %627 = vmatmul.mubr.bf16.gmra.mxu0 %v1116_v30  ;;  %659 = vmatmul.mubr.bf16.gmra.mxu1 %v1117_v31 }
  0xed   : > { %v989_v33 = vpop.f32.mrf.mxu0  ;;  %v1013_v34 = vpop.f32.mrf.mxu1 }
  0xef   : > { %v990_v36 = vpop.f32.mrf.mxu0  ;;  %v1014_v38 = vpop.f32.mrf.mxu1 }
  0xf0   : > { %v991_v39 = vadd.f32 %v990_v36, %v989_v33  ;;  %v1015_v40 = vadd.f32 %v1014_v38, %v1013_v34 }
  0xf1   : > { %v992_v41 = vpop.f32.mrf.mxu0  ;;  %v1016_v42 = vpop.f32.mrf.mxu1 }
  0xf2   : > { %v667_v43 = vadd.f32 %v991_v39, %v330_v35  ;;  %v675_v44 = vadd.f32 %v1015_v40, %v338_v37 }
  0xf3   : > { %v993_v46 = vpop.f32.mrf.mxu0  ;;  %v1017_v48 = vpop.f32.mrf.mxu1 }
  0xf4   : > { %684 = vst.msk [vmem:[#allocation2] sm:$0xff] %vm313_vm0, %v667_v43  ;;  %692 = vst.msk [vmem:[#allocation2 + $0x40] sm:$0xff] %vm313_vm0, %v675_v44  ;;  %v994_v49 = vadd.f32 %v993_v46, %v992_v41  ;;  %v1018_v50 = vadd.f32 %v1017_v48, %v1016_v42  ;;  %v343_v46 = vld [vmem:[#allocation2 + $0x68] sm:$0xff] }
  0xf5   : > { %v995_v51 = vpop.f32.mrf.mxu0  ;;  %v1019_v52 = vpop.f32.mrf.mxu1 }
  0xf6   : > { %v668_v53 = vadd.f32 %v994_v49, %v331_v45  ;;  %v676_v54 = vadd.f32 %v1018_v50, %v339_v47  ;;  %v335_v45 = vld [vmem:[#allocation2 + $0x28] sm:$0xff] }
  0xf7   : > { %v996_v56 = vpop.f32.mrf.mxu0  ;;  %v1020_v58 = vpop.f32.mrf.mxu1 }
  0xf8   : > { %685 = vst.msk [vmem:[#allocation2 + $0x8] sm:$0xff] %vm313_vm0, %v668_v53  ;;  %693 = vst.msk [vmem:[#allocation2 + $0x48] sm:$0xff] %vm313_vm0, %v676_v54  ;;  %v997_v59 = vadd.f32 %v996_v56, %v995_v51  ;;  %v1021_v60 = vadd.f32 %v1020_v58, %v1019_v52 }
  0xf9   : > { %v998_v62 = vpop.f32.mrf.mxu0  ;;  %v1022_v63 = vpop.f32.mrf.mxu1 }
  0xfa   : > { %v669_v1 = vadd.f32 %v997_v59, %v332_v55  ;;  %v677_v2 = vadd.f32 %v1021_v60, %v340_v57 }
  0xfb   : > { %v703_v4 = vld [vmem:[#allocation2] sm:$0xff]  ;;  %v999_v6 = vpop.f32.mrf.mxu0  ;;  %v1023_v8 = vpop.f32.mrf.mxu1 }
  0xfc   : > { %v711_v5 = vld [vmem:[#allocation2 + $0x40] sm:$0xff]  ;;  %v726_v9 = vmul.f32 %v1283_v61, %v703_v4  ;;  %686 = vst.msk [vmem:[#allocation2 + $0x10] sm:$0xff] %vm313_vm0, %v669_v1  ;;  %694 = vst.msk [vmem:[#allocation2 + $0x50] sm:$0xff] %vm313_vm0, %v677_v2  ;;  %v1000_v11 = vadd.f32 %v999_v6, %v998_v62  ;;  %v1024_v12 = vadd.f32 %v1023_v8, %v1022_v63  ;;  %v336_v1 = vld [vmem:[#allocation2 + $0x30] sm:$0xff] }
  0xfd   : > { %v734_v10 = vmul.f32 %v1283_v61, %v711_v5  ;;  %v1001_v13 = vpop.f32.mrf.mxu0  ;;  %v1025_v14 = vpop.f32.mrf.mxu1  ;;  %v344_v2 = vld [vmem:[#allocation2 + $0x70] sm:$0xff] }
  0xfe   : > { %v749_v15 = vadd.f32 %v1288_v0, %v726_v9  ;;  %v670_v17 = vadd.f32 %v1000_v11, %v333_v3  ;;  %v678_v18 = vadd.f32 %v1024_v12, %v341_v7  ;;  %v337_v11 = vld [vmem:[#allocation2 + $0x38] sm:$0xff] }
  0xff   : > { %v757_v16 = vadd.f32 %v1288_v0, %v734_v10  ;;  %v704_v19 = vld [vmem:[#allocation2 + $0x8] sm:$0xff]  ;;  %v1002_v21 = vpop.f32.mrf.mxu0  ;;  %v1026_v22 = vpop.f32.mrf.mxu1 }
 0x100   : > { %v712_v20 = vld [vmem:[#allocation2 + $0x48] sm:$0xff]  ;;  %v765_v23 = vmax.f32 %v749_v15, 0.0  ;;  %v727_v25 = vmul.f32 %v1283_v61, %v704_v19  ;;  %687 = vst.msk [vmem:[#allocation2 + $0x18] sm:$0xff] %vm313_vm0, %v670_v17  ;;  %695 = vst.msk [vmem:[#allocation2 + $0x58] sm:$0xff] %vm313_vm0, %v678_v18  ;;  %v1003_v29 = vadd.f32 %v1002_v21, %v1001_v13  ;;  %v1027_v30 = vadd.f32 %v1026_v22, %v1025_v14  ;;  %v345_v13 = vld [vmem:[#allocation2 + $0x78] sm:$0xff] }
 0x101   : > { %v773_v24 = vmax.f32 %v757_v16, 0.0  ;;  %v735_v26 = vmul.f32 %v1283_v61, %v712_v20  ;;  %v1004_v31 = vpop.f32.mrf.mxu0  ;;  %v1028_v32 = vpop.f32.mrf.mxu1 }
 0x102   : > { %781 = vst.msk [vmem:[%s1301_s15] sm:$0xff] %vm313_vm0, %v765_v23  ;;  %v750_v33 = vadd.f32 %v1288_v0, %v727_v25  ;;  %v671_v37 = vadd.f32 %v1003_v29, %v334_v27  ;;  %v679_v38 = vadd.f32 %v1027_v30, %v342_v28 }
 0x103   : > { %789 = vst.msk [vmem:[%s1301_s15 + $0x40] sm:$0xff] %vm313_vm0, %v773_v24  ;;  %v758_v34 = vadd.f32 %v1288_v0, %v735_v26  ;;  %v705_v35 = vld [vmem:[#allocation2 + $0x10] sm:$0xff]  ;;  %v1005_v39 = vpop.f32.mrf.mxu0  ;;  %v1029_v40 = vpop.f32.mrf.mxu1 }
 0x104   : > { %v713_v36 = vld [vmem:[#allocation2 + $0x50] sm:$0xff]  ;;  %v766_v41 = vmax.f32 %v750_v33, 0.0  ;;  %v728_v43 = vmul.f32 %v1283_v61, %v705_v35  ;;  %688 = vst.msk [vmem:[#allocation2 + $0x20] sm:$0xff] %vm313_vm0, %v671_v37  ;;  %696 = vst.msk [vmem:[#allocation2 + $0x60] sm:$0xff] %vm313_vm0, %v679_v38  ;;  %v1006_v47 = vadd.f32 %v1005_v39, %v1004_v31  ;;  %v1030_v48 = vadd.f32 %v1029_v40, %v1028_v32 }
 0x105   : > { %v774_v42 = vmax.f32 %v758_v34, 0.0  ;;  %v736_v44 = vmul.f32 %v1283_v61, %v713_v36  ;;  %v1007_v49 = vpop.f32.mrf.mxu0  ;;  %v1031_v50 = vpop.f32.mrf.mxu1 }
 0x106   : > { %782 = vst.msk [vmem:[%s1301_s15 + $0x8] sm:$0xff] %vm313_vm0, %v766_v41  ;;  %v751_v51 = vadd.f32 %v1288_v0, %v728_v43  ;;  %v672_v55 = vadd.f32 %v1006_v47, %v335_v45  ;;  %v680_v56 = vadd.f32 %v1030_v48, %v343_v46 }
 0x107   : > { %790 = vst.msk [vmem:[%s1301_s15 + $0x48] sm:$0xff] %vm313_vm0, %v774_v42  ;;  %v759_v52 = vadd.f32 %v1288_v0, %v736_v44  ;;  %v706_v53 = vld [vmem:[#allocation2 + $0x18] sm:$0xff]  ;;  %v1008_v57 = vpop.f32.mrf.mxu0  ;;  %v1032_v58 = vpop.f32.mrf.mxu1 }
 0x108   : > { %v714_v54 = vld [vmem:[#allocation2 + $0x58] sm:$0xff]  ;;  %v767_v59 = vmax.f32 %v751_v51, 0.0  ;;  %v729_v62 = vmul.f32 %v1283_v61, %v706_v53  ;;  %689 = vst.msk [vmem:[#allocation2 + $0x28] sm:$0xff] %vm313_vm0, %v672_v55  ;;  %697 = vst.msk [vmem:[#allocation2 + $0x68] sm:$0xff] %vm313_vm0, %v680_v56  ;;  %v1009_v3 = vadd.f32 %v1008_v57, %v1007_v49  ;;  %v1033_v4 = vadd.f32 %v1032_v58, %v1031_v50 }
 0x109   : > { %v775_v60 = vmax.f32 %v759_v52, 0.0  ;;  %v737_v63 = vmul.f32 %v1283_v61, %v714_v54  ;;  %v1010_v5 = vpop.f32.mrf.mxu0  ;;  %v1034_v6 = vpop.f32.mrf.mxu1 }
 0x10a   : > { %783 = vst.msk [vmem:[%s1301_s15 + $0x10] sm:$0xff] %vm313_vm0, %v767_v59  ;;  %v752_v7 = vadd.f32 %v1288_v0, %v729_v62  ;;  %v673_v9 = vadd.f32 %v1009_v3, %v336_v1  ;;  %v681_v10 = vadd.f32 %v1033_v4, %v344_v2 }
 0x10b   : > { %791 = vst.msk [vmem:[%s1301_s15 + $0x50] sm:$0xff] %vm313_vm0, %v775_v60  ;;  %v760_v8 = vadd.f32 %v1288_v0, %v737_v63  ;;  %v1011_v12 = vpop.f32.mrf.mxu0  ;;  %v1035_v14 = vpop.f32.mrf.mxu1  ;;  %v707_v17 = vld [vmem:[#allocation2 + $0x20] sm:$0xff] }
 0x10c   : > { %v768_v15 = vmax.f32 %v752_v7, 0.0  ;;  %v715_v18 = vld [vmem:[#allocation2 + $0x60] sm:$0xff]  ;;  %v1012_v19 = vadd.f32 %v1011_v12, %v1010_v5  ;;  %v1036_v20 = vadd.f32 %v1035_v14, %v1034_v6  ;;  %v730_v21 = vmul.f32 %v1283_v61, %v707_v17  ;;  %690 = vst.msk [vmem:[#allocation2 + $0x30] sm:$0xff] %vm313_vm0, %v673_v9  ;;  %698 = vst.msk [vmem:[#allocation2 + $0x70] sm:$0xff] %vm313_vm0, %v681_v10 }
 0x10d   : > { %v776_v16 = vmax.f32 %v760_v8, 0.0  ;;  %v738_v22 = vmul.f32 %v1283_v61, %v715_v18 }
 0x10e   : > { %784 = vst.msk [vmem:[%s1301_s15 + $0x18] sm:$0xff] %vm313_vm0, %v768_v15  ;;  %v674_v23 = vadd.f32 %v1012_v19, %v337_v11  ;;  %v682_v24 = vadd.f32 %v1036_v20, %v345_v13  ;;  %v753_v25 = vadd.f32 %v1288_v0, %v730_v21 }
 0x10f   : > { %792 = vst.msk [vmem:[%s1301_s15 + $0x58] sm:$0xff] %vm313_vm0, %v776_v16  ;;  %v761_v26 = vadd.f32 %v1288_v0, %v738_v22  ;;  %v708_v27 = vld [vmem:[#allocation2 + $0x28] sm:$0xff] }
 0x110   : > { %v716_v28 = vld [vmem:[#allocation2 + $0x68] sm:$0xff]  ;;  %691 = vst.msk [vmem:[#allocation2 + $0x38] sm:$0xff] %vm313_vm0, %v674_v23  ;;  %699 = vst.msk [vmem:[#allocation2 + $0x78] sm:$0xff] %vm313_vm0, %v682_v24  ;;  %v769_v29 = vmax.f32 %v753_v25, 0.0  ;;  %v731_v31 = vmul.f32 %v1283_v61, %v708_v27 }
 0x111   : > { %v777_v30 = vmax.f32 %v761_v26, 0.0  ;;  %v739_v32 = vmul.f32 %v1283_v61, %v716_v28 }
 0x112   : > { %785 = vst.msk [vmem:[%s1301_s15 + $0x20] sm:$0xff] %vm313_vm0, %v769_v29  ;;  %v754_v33 = vadd.f32 %v1288_v0, %v731_v31 }
 0x113   : > { %793 = vst.msk [vmem:[%s1301_s15 + $0x60] sm:$0xff] %vm313_vm0, %v777_v30  ;;  %v762_v34 = vadd.f32 %v1288_v0, %v739_v32  ;;  %v709_v35 = vld [vmem:[#allocation2 + $0x30] sm:$0xff] }
 0x114   : > { %v717_v36 = vld [vmem:[#allocation2 + $0x70] sm:$0xff]  ;;  %v770_v37 = vmax.f32 %v754_v33, 0.0  ;;  %v732_v39 = vmul.f32 %v1283_v61, %v709_v35 }
 0x115   : > { %v778_v38 = vmax.f32 %v762_v34, 0.0  ;;  %v740_v40 = vmul.f32 %v1283_v61, %v717_v36 }
 0x116   : > { %786 = vst.msk [vmem:[%s1301_s15 + $0x28] sm:$0xff] %vm313_vm0, %v770_v37  ;;  %v755_v41 = vadd.f32 %v1288_v0, %v732_v39 }
 0x117   : > { %794 = vst.msk [vmem:[%s1301_s15 + $0x68] sm:$0xff] %vm313_vm0, %v778_v38  ;;  %v763_v42 = vadd.f32 %v1288_v0, %v740_v40  ;;  %v710_v43 = vld [vmem:[#allocation2 + $0x38] sm:$0xff] }
 0x118   : > { %v718_v44 = vld [vmem:[#allocation2 + $0x78] sm:$0xff]  ;;  %v733_v45 = vmul.f32 %v1283_v61, %v710_v43  ;;  %v771_v47 = vmax.f32 %v755_v41, 0.0 }
 0x119   : > { %v741_v46 = vmul.f32 %v1283_v61, %v718_v44  ;;  %v779_v48 = vmax.f32 %v763_v42, 0.0 }
 0x11a   : > { %v756_v49 = vadd.f32 %v1288_v0, %v733_v45  ;;  %787 = vst.msk [vmem:[%s1301_s15 + $0x30] sm:$0xff] %vm313_vm0, %v771_v47 }
 0x11b   : > { %v764_v50 = vadd.f32 %v1288_v0, %v741_v46  ;;  %795 = vst.msk [vmem:[%s1301_s15 + $0x70] sm:$0xff] %vm313_vm0, %v779_v48 }
 0x11c   : > { %v772_v51 = vmax.f32 %v756_v49, 0.0 }
 0x11d   : > { %v780_v52 = vmax.f32 %v764_v50, 0.0 }
 0x11e   : > { %788 = vst.msk [vmem:[%s1301_s15 + $0x38] sm:$0xff] %vm313_vm0, %v772_v51 }
 0x11f   : > { %796 = vst.msk [vmem:[%s1301_s15 + $0x78] sm:$0xff] %vm313_vm0, %v780_v52 }
 0x120 PF: > { %s14_s17 = sadd.s32 1, %s1140_s17   ;;  %s1387_s15 = smov %s1136_s16 }
 0x121   : > { %p11_p5 = scmp.ge.s32.totalorder %s14_s17, 6   ;;  %s1388_s16 = smov %s1390_s18 }
 0x123   :  { %13 = sbr.rel (!%p11_p5) target bundleno = 2 (0x2), region = 83 }

// kernel: _lambda_.21
= control target key start
LH: loop header
LB: loop body
LE: loop exit
PB: predicated region body
PF: predicated region fallthrough
CT: control target
= control target key end

     0   :  { %s1134_s15 = smov 0   ;;  %s1136_s16 = smov 0   ;;  %s1359_s0 = inlined_call_operand.vmem [shape: bf16[128,640], index: 0, kind: input, shape index: {}]   ;;  %s1360_s1 = inlined_call_operand.vmem [shape: bf16[640,64], index: 1, kind: input, shape index: {}]   ;;  %s1361_s2 = inlined_call_operand.vmem [shape: f32[1,64], index: 2, kind: input, shape index: {}]   ;;  %s1362_s3 = inlined_call_operand.vmem [shape: f32[1,64], index: 3, kind: input, shape index: {}]   ;;  %s1363_s4 = inlined_call_operand.vmem [shape: f32[128,64], index: 4, kind: output, shape index: {}]  }
   0x1   :  { %s1138_s17 = smov 0   ;;  %s1140_s18 = smov 0  }
   0x2   :  { %s1142_s19 = smov 0  }
   0x3 LB: > { %s26_s20 = sadd.s32 1, %s1102_s18  ;;  %p49_p1 = scmp.ne.s32.totalorder %s1094_s16, %s1090_s15  ;;  %s1106_s19 = sphi %s1142_s19, %s14_s19   ;;  %s1102_s18 = sphi %s1140_s18, %s1367_s18   ;;  %s1098_s17 = sphi %s1138_s17, %s1366_s17   ;;  %s1094_s16 = sphi %s1136_s16, %s1365_s16   ;;  %s1090_s15 = sphi %s1134_s15, %s1364_s15  }
   0x4   : > { %p27_p0 = scmp.ge.s32.totalorder %s26_s20, 5  ;;  %p50_p2 = scmp.eq.s32.totalorder %s1106_s19, 0 }
   0x5   : > { %s42_s22 = sadd.s32 1, %s1094_s16  ;;  %p916_p5 = scmp.ge.s32.totalorder %s1106_s19, 5 }
   0x6   : > { %s1369_s20 = smov (%p27_p0, %s26_s20), 0  ;;  %p51_p3 = por %p50_p2, %p49_p1 }
   0x7   : > { %s38_s21 = ssub.s32 %s1102_s18, %s1369_s20  ;;  %195 = sbr.rel (%p916_p5) target bundleno = 26 (0x1a), region = 24 }
   0x8   : > { %p40_p4 = scmp.eq.s32.totalorder %s38_s21, 0 }
   0xa   : > { %s1169_s23 = scalar_select %p40_p4, %s1094_s16, %s42_s22  }
   0xc   : > { %198 = sbr.rel (!%p51_p3) target bundleno = 26 (0x1a), region = 28  ;;  %s200_s24 = sand.u32 (%p51_p3), 1, %s1094_s16  }
   0xd   : > { %s918_s25 = sshll.u32 (%p51_p3), %s1102_s18, 2  ;;  %s917_s26 = sshll.u32 (%p51_p3), %s200_s24, 6 }
   0xe   : > { %s1177_s29 = scalar_lea.vmem (%p51_p3), %s1359_s0, %s918_s25  ;;  %s202_s30 = scalar_lea.vmem (%p51_p3), [#allocation3], %s917_s26 }
   0xf   : > { %v224_v0 = vld [vmem:[%s1177_s29] sm:$0xf] (%p51_p3)  ;;  %v226_v1 = vld [vmem:[%s1177_s29 + $0x14] sm:$0xf] (%p51_p3)  ;;  %v228_v2 = vld [vmem:[%s1177_s29 + $0x28] sm:$0xf] (%p51_p3) }
  0x10   : > { %225 = vst [vmem:[%s202_s30] sm:$0xf] (%p51_p3), %v224_v0  ;;  %227 = vst [vmem:[%s202_s30 + $0x4] sm:$0xf] (%p51_p3), %v226_v1  ;;  %v230_v3 = vld [vmem:[%s1177_s29 + $0x3c] sm:$0xf] (%p51_p3) }
  0x11   : > { %v232_v4 = vld [vmem:[%s1177_s29 + $0x50] sm:$0xf]  ;;  %229 = vst [vmem:[%s202_s30 + $0x8] sm:$0xf] %v228_v2  ;;  %231 = vst [vmem:[%s202_s30 + $0xc] sm:$0xf] %v230_v3 }
  0x12   : > { %233 = vst [vmem:[%s202_s30 + $0x10] sm:$0xf] %v232_v4  ;;  %v234_v5 = vld [vmem:[%s1177_s29 + $0x64] sm:$0xf]  ;;  %v236_v6 = vld [vmem:[%s1177_s29 + $0x78] sm:$0xf] }
  0x13   : > { %v238_v7 = vld [vmem:[%s1177_s29 + $0x8c] sm:$0xf]  ;;  %235 = vst [vmem:[%s202_s30 + $0x14] sm:$0xf] %v234_v5  ;;  %237 = vst [vmem:[%s202_s30 + $0x18] sm:$0xf] %v236_v6 }
  0x14   : > { %239 = vst [vmem:[%s202_s30 + $0x1c] sm:$0xf] %v238_v7  ;;  %v240_v8 = vld [vmem:[%s1177_s29 + $0xa0] sm:$0xf]  ;;  %v242_v9 = vld [vmem:[%s1177_s29 + $0xb4] sm:$0xf] }
  0x15   : > { %v244_v10 = vld [vmem:[%s1177_s29 + $0xc8] sm:$0xf]  ;;  %241 = vst [vmem:[%s202_s30 + $0x20] sm:$0xf] %v240_v8  ;;  %243 = vst [vmem:[%s202_s30 + $0x24] sm:$0xf] %v242_v9 }
  0x16   : > { %245 = vst [vmem:[%s202_s30 + $0x28] sm:$0xf] %v244_v10  ;;  %v246_v11 = vld [vmem:[%s1177_s29 + $0xdc] sm:$0xf]  ;;  %v248_v12 = vld [vmem:[%s1177_s29 + $0xf0] sm:$0xf] }
  0x17   : > { %v250_v13 = vld [vmem:[%s1177_s29 + $0x104] sm:$0xf]  ;;  %247 = vst [vmem:[%s202_s30 + $0x2c] sm:$0xf] %v246_v11  ;;  %249 = vst [vmem:[%s202_s30 + $0x30] sm:$0xf] %v248_v12 }
  0x18   : > { %251 = vst [vmem:[%s202_s30 + $0x34] sm:$0xf] %v250_v13  ;;  %v252_v14 = vld [vmem:[%s1177_s29 + $0x118] sm:$0xf]  ;;  %v254_v15 = vld [vmem:[%s1177_s29 + $0x12c] sm:$0xf] }
  0x19   : > { %253 = vst [vmem:[%s202_s30 + $0x38] sm:$0xf] %v252_v14  ;;  %255 = vst [vmem:[%s202_s30 + $0x3c] sm:$0xf] %v254_v15 }
  0x1a PF: > { %p919_p6 = scmp.ge.s32.totalorder %s1106_s19, 1  ;;  %p322_p7 = scmp.lt.s32.totalorder %s1106_s19, 6 }
  0x1c   : > { %p323_p8 = pnand %p919_p6, %p322_p7 }
  0x1d   : > { %s329_s5 = sand.u32 (!%p323_p8), 1, %s1090_s15   ;;  %s921_s6 = sshll.u32 (!%p323_p8), %s1098_s17, 4 }
  0x1e   : > { %326 = sbr.rel (%p323_p8) target bundleno = 310 (0x136), region = 73  ;;  %s920_s7 = sshll.u32 (!%p323_p8), %s329_s5, 6 }
  0x1f   : > { %p373_p9 = scmp.lt.s32.totalorder (!%p323_p8), %s921_s6, 79  ;;  %s1204_s12 = scalar_lea.vmem (!%p323_p8), [#allocation3], %s920_s7 }
  0x20   : > { %p923_p10 = scmp.ne.s32.totalorder (!%p323_p8), %s1098_s17, 0 }
  0x23   : > { %s1371_s6 = smov (!%p373_p9, %s921_s6), 79  ;;  %400 = sbr.rel (%p923_p10) target bundleno = 49 (0x31), region = 81 }
  0x24   : > { %s922_s8 = sshll.u32 %s1371_s6, 2 }
  0x25   : > { %s1202_s11 = scalar_lea.vmem %s1360_s1, %s922_s8 }
  0x28   : > { %vm401_vm0 = vcmask 523264   ;;  %v1108_v16 = vmov 0.0  }
  0x29   : > { %402 = vst.msk [vmem:[#allocation2] sm:$0xff] %vm401_vm0, %v1108_v16  ;;  %403 = vst.msk [vmem:[#allocation2 + $0x8] sm:$0xff] %vm401_vm0, %v1108_v16 }
  0x2a   : > { %404 = vst.msk [vmem:[#allocation2 + $0x10] sm:$0xff] %vm401_vm0, %v1108_v16  ;;  %405 = vst.msk [vmem:[#allocation2 + $0x18] sm:$0xff] %vm401_vm0, %v1108_v16 }
  0x2b   : > { %406 = vst.msk [vmem:[#allocation2 + $0x20] sm:$0xff] %vm401_vm0, %v1108_v16  ;;  %407 = vst.msk [vmem:[#allocation2 + $0x28] sm:$0xff] %vm401_vm0, %v1108_v16 }
  0x2c   : > { %408 = vst.msk [vmem:[#allocation2 + $0x30] sm:$0xff] %vm401_vm0, %v1108_v16  ;;  %409 = vst.msk [vmem:[#allocation2 + $0x38] sm:$0xff] %vm401_vm0, %v1108_v16 }
  0x2d   : > { %410 = vst.msk [vmem:[#allocation2 + $0x40] sm:$0xff] %vm401_vm0, %v1108_v16  ;;  %411 = vst.msk [vmem:[#allocation2 + $0x48] sm:$0xff] %vm401_vm0, %v1108_v16 }
  0x2e   : > { %412 = vst.msk [vmem:[#allocation2 + $0x50] sm:$0xff] %vm401_vm0, %v1108_v16  ;;  %413 = vst.msk [vmem:[#allocation2 + $0x58] sm:$0xff] %vm401_vm0, %v1108_v16 }
  0x2f   : > { %414 = vst.msk [vmem:[#allocation2 + $0x60] sm:$0xff] %vm401_vm0, %v1108_v16  ;;  %415 = vst.msk [vmem:[#allocation2 + $0x68] sm:$0xff] %vm401_vm0, %v1108_v16 }
  0x30   : > { %416 = vst.msk [vmem:[#allocation2 + $0x70] sm:$0xff] %vm401_vm0, %v1108_v16  ;;  %417 = vst.msk [vmem:[#allocation2 + $0x78] sm:$0xff] %vm401_vm0, %v1108_v16 }
  0x31 PF: > { %v1052_v17 = vld [vmem:[%s1202_s11 + $0x38] sm:$0xff]   ;;  %v1053_v18 = vld [vmem:[%s1202_s11 + $0x30] sm:$0xff]   ;;  %v1054_v19 = vld [vmem:[%s1202_s11 + $0x28] sm:$0xff]   ;;  %vm675_vm1 = vcmask 523264   ;;  %p940_p11 = scmp.ne.s32.totalorder %s1098_s17, 4 }
  0x32   : > { %963 = vmatprep.subr.bf16.mxu0 %v1052_v17  ;;  %995 = vmatprep.subr.bf16.mxu1 %v1052_v17  ;;  %v1055_v20 = vld [vmem:[%s1202_s11 + $0x20] sm:$0xff]   ;;  %v1056_v23 = vld [vmem:[%s1202_s11 + $0x18] sm:$0xff]   ;;  %v1057_v24 = vld [vmem:[%s1202_s11 + $0x10] sm:$0xff]  }
  0x33   : > { %964 = vmatpush3.bf16.msra.mxu0 %v1052_v17  ;;  %1003 = vmatpush3.bf16.msra.mxu1 %v1052_v17  ;;  %v1060_v21 = vld [vmem:[%s1204_s12] sm:$0xff]   ;;  %v1058_v25 = vld [vmem:[%s1202_s11 + $0x8] sm:$0xff]   ;;  %v1064_v29 = vld [vmem:[%s1204_s12 + $0x10] sm:$0xff]  }
  0x34   : > { %965 = vmatprep.subr.bf16.mxu0 %v1053_v18  ;;  %996 = vmatprep.subr.bf16.mxu1 %v1053_v18  ;;  %v1061_v22 = vld [vmem:[%s1204_s12 + $0x20] sm:$0xff]   ;;  %v1062_v27 = vld [vmem:[%s1204_s12 + $0x8] sm:$0xff]   ;;  %v1065_v30 = vld [vmem:[%s1204_s12 + $0x30] sm:$0xff]  }
  0x35   : > { %979 = vmatprep.mubr.bf16.mxu0 %v1060_v21  ;;  %987 = vmatprep.mubr.bf16.mxu1 %v1061_v22  ;;  %v1059_v26 = vld [vmem:[%s1202_s11] sm:$0xff]   ;;  %v1063_v28 = vld [vmem:[%s1204_s12 + $0x28] sm:$0xff]   ;;  %v1066_v31 = vld [vmem:[%s1204_s12 + $0x18] sm:$0xff]  }
  0x36   : > { %v1067_v32 = vld [vmem:[%s1204_s12 + $0x38] sm:$0xff]   ;;  %v420_v33 = vld [vmem:[#allocation2 + $0x10] sm:$0xff]  ;;  %v418_v37 = vld [vmem:[#allocation2] sm:$0xff] }
  0x37   : > { %966 = vmatpush3.bf16.msra.mxu0 %v1053_v18  ;;  %1004 = vmatpush3.bf16.msra.mxu1 %v1053_v18  ;;  %v428_v34 = vld [vmem:[#allocation2 + $0x50] sm:$0xff]  ;;  %v426_v38 = vld [vmem:[#allocation2 + $0x40] sm:$0xff]  ;;  %v421_v43 = vld [vmem:[#allocation2 + $0x18] sm:$0xff] }
  0x38   : > { %967 = vmatprep.subr.bf16.mxu0 %v1054_v19  ;;  %997 = vmatprep.subr.bf16.mxu1 %v1054_v19  ;;  %v429_v44 = vld [vmem:[#allocation2 + $0x58] sm:$0xff]  ;;  %v419_v49 = vld [vmem:[#allocation2 + $0x8] sm:$0xff]  ;;  %v424_v55 = vld [vmem:[#allocation2 + $0x30] sm:$0xff] }
  0x39   : > { %v427_v50 = vld [vmem:[#allocation2 + $0x48] sm:$0xff]  ;;  %v432_v56 = vld [vmem:[#allocation2 + $0x70] sm:$0xff]  ;;  %v422_v61 = vld [vmem:[#allocation2 + $0x20] sm:$0xff] }
  0x3a   : > { %v430_v62 = vld [vmem:[#allocation2 + $0x60] sm:$0xff]  ;;  %v425_v3 = vld [vmem:[#allocation2 + $0x38] sm:$0xff]  ;;  %v423_v9 = vld [vmem:[#allocation2 + $0x28] sm:$0xff] }
  0x3b   : > { %968 = vmatpush3.bf16.msra.mxu0 %v1054_v19  ;;  %1005 = vmatpush3.bf16.msra.mxu1 %v1054_v19  ;;  %v433_v4 = vld [vmem:[#allocation2 + $0x78] sm:$0xff]  ;;  %v431_v10 = vld [vmem:[#allocation2 + $0x68] sm:$0xff] }
  0x3c   : > { %969 = vmatprep.subr.bf16.mxu0 %v1055_v20  ;;  %998 = vmatprep.subr.bf16.mxu1 %v1055_v20 }
  0x3f   : > { %970 = vmatpush3.bf16.msra.mxu0 %v1055_v20  ;;  %1006 = vmatpush3.bf16.msra.mxu1 %v1055_v20 }
  0x40   : > { %971 = vmatprep.subr.bf16.mxu0 %v1056_v23  ;;  %999 = vmatprep.subr.bf16.mxu1 %v1056_v23 }
  0x43   : > { %972 = vmatpush3.bf16.msra.mxu0 %v1056_v23  ;;  %1007 = vmatpush3.bf16.msra.mxu1 %v1056_v23 }
  0x44   : > { %973 = vmatprep.subr.bf16.mxu0 %v1057_v24  ;;  %1000 = vmatprep.subr.bf16.mxu1 %v1057_v24 }
  0x47   : > { %974 = vmatpush3.bf16.msra.mxu0 %v1057_v24  ;;  %1008 = vmatpush3.bf16.msra.mxu1 %v1057_v24 }
  0x48   : > { %975 = vmatprep.subr.bf16.mxu0 %v1058_v25  ;;  %1001 = vmatprep.subr.bf16.mxu1 %v1058_v25 }
  0x4b   : > { %976 = vmatpush3.bf16.msra.mxu0 %v1058_v25  ;;  %1009 = vmatpush3.bf16.msra.mxu1 %v1058_v25 }
  0x4c   : > { %977 = vmatprep.subr.bf16.mxu0 %v1059_v26  ;;  %1002 = vmatprep.subr.bf16.mxu1 %v1059_v26 }
  0x4f   : > { %978 = vmatpush3.bf16.msra.mxu0 %v1059_v26  ;;  %1010 = vmatpush3.bf16.msra.mxu1 %v1059_v26 }
  0x52   : > { %980 = vmatmul.mubr.bf16.vlgmr.msra.gmra.mxu0 %v1062_v27  ;;  %988 = vmatmul.mubr.bf16.vlgmr.msra.gmra.mxu1 %v1063_v28 }
  0x53   : > { %983 = vmatprep.mubr.bf16.mxu0 %v1064_v29  ;;  %991 = vmatprep.mubr.bf16.mxu1 %v1065_v30 }
  0x5a   : > { %984 = vmatmul.mubr.bf16.gmra.mxu0 %v1066_v31  ;;  %992 = vmatmul.mubr.bf16.gmra.mxu1 %v1067_v32 }
 0x112   : > { %v981_v35 = vpop.f32.mrf.mxu0  ;;  %v989_v36 = vpop.f32.mrf.mxu1 }
 0x113   : > { %v661_v39 = vadd.f32 %v981_v35, %v420_v33  ;;  %v669_v40 = vadd.f32 %v989_v36, %v428_v34 }
 0x114   : > { %v596_v41 = vpop.f32.mrf.mxu0  ;;  %v628_v42 = vpop.f32.mrf.mxu1 }
 0x115   : > { %678 = vst.msk [vmem:[#allocation2 + $0x10] sm:$0xff] %vm675_vm1, %v661_v39  ;;  %686 = vst.msk [vmem:[#allocation2 + $0x50] sm:$0xff] %vm675_vm1, %v669_v40  ;;  %v659_v45 = vadd.f32 %v596_v41, %v418_v37  ;;  %v667_v46 = vadd.f32 %v628_v42, %v426_v38 }
 0x116   : > { %v982_v47 = vpop.f32.mrf.mxu0  ;;  %v990_v48 = vpop.f32.mrf.mxu1 }
 0x117   : > { %676 = vst.msk [vmem:[#allocation2] sm:$0xff] %vm675_vm1, %v659_v45  ;;  %684 = vst.msk [vmem:[#allocation2 + $0x40] sm:$0xff] %vm675_vm1, %v667_v46  ;;  %v662_v51 = vadd.f32 %v982_v47, %v421_v43  ;;  %v670_v52 = vadd.f32 %v990_v48, %v429_v44 }
 0x118   : > { %v599_v53 = vpop.f32.mrf.mxu0  ;;  %v631_v54 = vpop.f32.mrf.mxu1 }
 0x119   : > { %679 = vst.msk [vmem:[#allocation2 + $0x18] sm:$0xff] %vm675_vm1, %v662_v51  ;;  %687 = vst.msk [vmem:[#allocation2 + $0x58] sm:$0xff] %vm675_vm1, %v670_v52  ;;  %v660_v57 = vadd.f32 %v599_v53, %v419_v49  ;;  %v668_v58 = vadd.f32 %v631_v54, %v427_v50 }
 0x11a   : > { %v985_v59 = vpop.f32.mrf.mxu0  ;;  %v993_v60 = vpop.f32.mrf.mxu1 }
 0x11b   : > { %677 = vst.msk [vmem:[#allocation2 + $0x8] sm:$0xff] %vm675_vm1, %v660_v57  ;;  %685 = vst.msk [vmem:[#allocation2 + $0x48] sm:$0xff] %vm675_vm1, %v668_v58  ;;  %v665_v63 = vadd.f32 %v985_v59, %v424_v55  ;;  %v673_v0 = vadd.f32 %v993_v60, %v432_v56 }
 0x11c   : > { %v612_v1 = vpop.f32.mrf.mxu0  ;;  %v644_v2 = vpop.f32.mrf.mxu1 }
 0x11d   : > { %682 = vst.msk [vmem:[#allocation2 + $0x30] sm:$0xff] %vm675_vm1, %v665_v63  ;;  %690 = vst.msk [vmem:[#allocation2 + $0x70] sm:$0xff] %vm675_vm1, %v673_v0  ;;  %v663_v5 = vadd.f32 %v612_v1, %v422_v61  ;;  %v671_v6 = vadd.f32 %v644_v2, %v430_v62 }
 0x11e   : > { %v986_v7 = vpop.f32.mrf.mxu0  ;;  %v994_v8 = vpop.f32.mrf.mxu1 }
 0x11f   : > { %680 = vst.msk [vmem:[#allocation2 + $0x20] sm:$0xff] %vm675_vm1, %v663_v5  ;;  %688 = vst.msk [vmem:[#allocation2 + $0x60] sm:$0xff] %vm675_vm1, %v671_v6  ;;  %v666_v11 = vadd.f32 %v986_v7, %v425_v3  ;;  %v674_v12 = vadd.f32 %v994_v8, %v433_v4  ;;  %695 = sbr.rel (%p940_p11) target bundleno = 310 (0x136), region = 85 }
 0x120   : > { %v615_v13 = vpop.f32.mrf.mxu0  ;;  %v647_v14 = vpop.f32.mrf.mxu1 }
 0x121   : > { %683 = vst.msk [vmem:[#allocation2 + $0x38] sm:$0xff] %vm675_vm1, %v666_v11  ;;  %691 = vst.msk [vmem:[#allocation2 + $0x78] sm:$0xff] %vm675_vm1, %v674_v12  ;;  %v664_v15 = vadd.f32 %v615_v13, %v423_v9  ;;  %v672_v16 = vadd.f32 %v647_v14, %v431_v10 }
 0x123   : > { %681 = vst.msk [vmem:[#allocation2 + $0x28] sm:$0xff] %vm675_vm1, %v664_v15  ;;  %689 = vst.msk [vmem:[#allocation2 + $0x68] sm:$0xff] %vm675_vm1, %v672_v16 }
 0x124   : > { %v696_v17 = vld [vmem:[#allocation2] sm:$0xff]  ;;  %v697_v21 = vld [vmem:[#allocation2 + $0x8] sm:$0xff]  ;;  %v698_v22 = vld [vmem:[#allocation2 + $0x10] sm:$0xff] }
 0x125   : > { %v941_v18 = vld [vmem:[%s1361_s2] ss:$0 sm:$0xff]  ;;  %v699_v23 = vld [vmem:[#allocation2 + $0x18] sm:$0xff]  ;;  %v702_v29 = vld [vmem:[#allocation2 + $0x30] sm:$0xff] }
 0x126   : > { %v1262_v19 = vld [vmem:[%s1362_s3] ss:$0 sm:$0xff]  ;;  %v719_v20 = vmul.f32 %v941_v18, %v696_v17  ;;  %v720_v24 = vmul.f32 %v941_v18, %v697_v21  ;;  %v721_v25 = vmul.f32 %v941_v18, %v698_v22  ;;  %v722_v26 = vmul.f32 %v941_v18, %v699_v23  ;;  %v705_v44 = vld [vmem:[#allocation2 + $0x48] sm:$0xff]  ;;  %v706_v45 = vld [vmem:[#allocation2 + $0x50] sm:$0xff] }
 0x127   : > { %v700_v27 = vld [vmem:[#allocation2 + $0x20] sm:$0xff]  ;;  %v725_v33 = vmul.f32 %v941_v18, %v702_v29  ;;  %v707_v46 = vld [vmem:[#allocation2 + $0x58] sm:$0xff]  ;;  %v710_v53 = vld [vmem:[#allocation2 + $0x70] sm:$0xff]  ;;  %v728_v60 = vmul.f32 %v941_v18, %v705_v44  ;;  %v729_v61 = vmul.f32 %v941_v18, %v706_v45 }
 0x128   : > { %v742_v30 = vadd.f32 %v1262_v19, %v719_v20  ;;  %v723_v31 = vmul.f32 %v941_v18, %v700_v27  ;;  %v703_v34 = vld [vmem:[#allocation2 + $0x38] sm:$0xff]  ;;  %v743_v35 = vadd.f32 %v1262_v19, %v720_v24  ;;  %v744_v36 = vadd.f32 %v1262_v19, %v721_v25  ;;  %v704_v39 = vld [vmem:[#allocation2 + $0x40] sm:$0xff] }
 0x129   : > { %v745_v37 = vadd.f32 %v1262_v19, %v722_v26  ;;  %v726_v38 = vmul.f32 %v941_v18, %v703_v34  ;;  %v748_v43 = vadd.f32 %v1262_v19, %v725_v33  ;;  %v708_v51 = vld [vmem:[#allocation2 + $0x60] sm:$0xff]  ;;  %v727_v57 = vmul.f32 %v941_v18, %v704_v39  ;;  %v711_v58 = vld [vmem:[#allocation2 + $0x78] sm:$0xff] }
 0x12a   : > { %v701_v28 = vld [vmem:[#allocation2 + $0x28] sm:$0xff]  ;;  %v758_v40 = vmax.f32 %v742_v30, 0.0  ;;  %v746_v41 = vadd.f32 %v1262_v19, %v723_v31  ;;  %v759_v47 = vmax.f32 %v743_v35, 0.0  ;;  %v760_v48 = vmax.f32 %v744_v36, 0.0 }
 0x12b   : > { %v724_v32 = vmul.f32 %v941_v18, %v701_v28  ;;  %v761_v49 = vmax.f32 %v745_v37, 0.0  ;;  %v749_v50 = vadd.f32 %v1262_v19, %v726_v38  ;;  %v709_v52 = vld [vmem:[#allocation2 + $0x68] sm:$0xff]  ;;  %v764_v56 = vmax.f32 %v748_v43, 0.0 }
 0x12c   : > { %774 = vst.msk [vmem:[%s1363_s4] sm:$0xff] %vm675_vm1, %v758_v40  ;;  %v762_v54 = vmax.f32 %v746_v41, 0.0  ;;  %775 = vst.msk [vmem:[%s1363_s4 + $0x8] sm:$0xff] %vm675_vm1, %v759_v47  ;;  %v730_v62 = vmul.f32 %v941_v18, %v707_v46  ;;  %v750_v63 = vadd.f32 %v1262_v19, %v727_v57  ;;  %v731_v0 = vmul.f32 %v941_v18, %v708_v51 }
 0x12d   : > { %v747_v42 = vadd.f32 %v1262_v19, %v724_v32  ;;  %776 = vst.msk [vmem:[%s1363_s4 + $0x10] sm:$0xff] %vm675_vm1, %v760_v48  ;;  %777 = vst.msk [vmem:[%s1363_s4 + $0x18] sm:$0xff] %vm675_vm1, %v761_v49  ;;  %v765_v59 = vmax.f32 %v749_v50, 0.0  ;;  %v732_v1 = vmul.f32 %v941_v18, %v709_v52  ;;  %v733_v2 = vmul.f32 %v941_v18, %v710_v53 }
 0x12e   : > { %778 = vst.msk [vmem:[%s1363_s4 + $0x20] sm:$0xff] %vm675_vm1, %v762_v54  ;;  %780 = vst.msk [vmem:[%s1363_s4 + $0x30] sm:$0xff] %vm675_vm1, %v764_v56  ;;  %v751_v3 = vadd.f32 %v1262_v19, %v728_v60  ;;  %v752_v4 = vadd.f32 %v1262_v19, %v729_v61  ;;  %v753_v5 = vadd.f32 %v1262_v19, %v730_v62  ;;  %v766_v7 = vmax.f32 %v750_v63, 0.0 }
 0x12f   : > { %v763_v55 = vmax.f32 %v747_v42, 0.0  ;;  %781 = vst.msk [vmem:[%s1363_s4 + $0x38] sm:$0xff] %vm675_vm1, %v765_v59  ;;  %v734_v6 = vmul.f32 %v941_v18, %v711_v58  ;;  %v754_v8 = vadd.f32 %v1262_v19, %v731_v0  ;;  %v755_v9 = vadd.f32 %v1262_v19, %v732_v1 }
 0x130   : > { %v756_v10 = vadd.f32 %v1262_v19, %v733_v2  ;;  %v767_v11 = vmax.f32 %v751_v3, 0.0  ;;  %v768_v12 = vmax.f32 %v752_v4, 0.0  ;;  %v769_v13 = vmax.f32 %v753_v5, 0.0  ;;  %782 = vst.msk [vmem:[%s1363_s4 + $0x40] sm:$0xff] %vm675_vm1, %v766_v7 }
 0x131   : > { %779 = vst.msk [vmem:[%s1363_s4 + $0x28] sm:$0xff] %vm675_vm1, %v763_v55  ;;  %v757_v14 = vadd.f32 %v1262_v19, %v734_v6  ;;  %v770_v15 = vmax.f32 %v754_v8, 0.0  ;;  %v771_v16 = vmax.f32 %v755_v9, 0.0 }
 0x132   : > { %v772_v17 = vmax.f32 %v756_v10, 0.0  ;;  %783 = vst.msk [vmem:[%s1363_s4 + $0x48] sm:$0xff] %vm675_vm1, %v767_v11  ;;  %784 = vst.msk [vmem:[%s1363_s4 + $0x50] sm:$0xff] %vm675_vm1, %v768_v12 }
 0x133   : > { %785 = vst.msk [vmem:[%s1363_s4 + $0x58] sm:$0xff] %vm675_vm1, %v769_v13  ;;  %v773_v18 = vmax.f32 %v757_v14, 0.0  ;;  %786 = vst.msk [vmem:[%s1363_s4 + $0x60] sm:$0xff] %vm675_vm1, %v770_v15 }
 0x134   : > { %787 = vst.msk [vmem:[%s1363_s4 + $0x68] sm:$0xff] %vm675_vm1, %v771_v16  ;;  %788 = vst.msk [vmem:[%s1363_s4 + $0x70] sm:$0xff] %vm675_vm1, %v772_v17 }
 0x135   : > { %789 = vst.msk [vmem:[%s1363_s4 + $0x78] sm:$0xff] %vm675_vm1, %v773_v18 }
 0x136 PF: > { %s14_s19 = sadd.s32 1, %s1106_s19   ;;  %s1364_s15 = smov %s1094_s16 }
 0x137   : > { %p11_p12 = scmp.ge.s32.totalorder %s14_s19, 7   ;;  %s1365_s16 = smov %s1169_s23 }
 0x138   : > { %s1366_s17 = smov %s1102_s18  ;;  %s1367_s18 = smov %s1369_s20 }
 0x139   :  { %13 = sbr.rel (!%p11_p12) target bundleno = 3 (0x3), region = 129 }

// kernel: _lambda_.22
= control target key start
LH: loop header
LB: loop body
LE: loop exit
PB: predicated region body
PF: predicated region fallthrough
CT: control target
= control target key end

     0   :  { %s1250_s18 = smov 0   ;;  %s1252_s19 = smov 0   ;;  %s1541_s0 = inlined_call_operand.vmem [shape: bf16[128,640], index: 0, kind: input, shape index: {}]   ;;  %s1542_s1 = inlined_call_operand.vmem [shape: bf16[640,64], index: 1, kind: input, shape index: {}]   ;;  %s1543_s2 = inlined_call_operand.vmem [shape: f32[1,64], index: 2, kind: input, shape index: {}]   ;;  %s1544_s3 = inlined_call_operand.vmem [shape: f32[1,64], index: 3, kind: input, shape index: {}]   ;;  %s1545_s4 = inlined_call_operand.vmem [shape: f32[128,64], index: 4, kind: input, shape index: {}]   ;;  %s1546_s5 = inlined_call_operand.vmem [shape: f32[128,64], index: 5, kind: output, shape index: {}]  }
   0x1   :  { %s1254_s20 = smov 0   ;;  %s1256_s21 = smov 0  }
   0x2   :  { %s1258_s22 = smov 0  }
   0x3 LB: > { %s27_s23 = sadd.s32 1, %s1213_s21  ;;  %p50_p1 = scmp.ne.s32.totalorder %s1205_s19, %s1201_s18  ;;  %s1217_s22 = sphi %s1258_s22, %s15_s22   ;;  %s1213_s21 = sphi %s1256_s21, %s1550_s21   ;;  %s1209_s20 = sphi %s1254_s20, %s1549_s20   ;;  %s1205_s19 = sphi %s1252_s19, %s1548_s19   ;;  %s1201_s18 = sphi %s1250_s18, %s1547_s18  }
   0x4   : > { %p28_p0 = scmp.ge.s32.totalorder %s27_s23, 5  ;;  %p51_p2 = scmp.eq.s32.totalorder %s1217_s22, 0 }
   0x5   : > { %s43_s25 = sadd.s32 1, %s1205_s19  ;;  %p1027_p5 = scmp.ge.s32.totalorder %s1217_s22, 5 }
   0x6   : > { %s1552_s23 = smov (%p28_p0, %s27_s23), 0  ;;  %p52_p3 = por %p51_p2, %p50_p1 }
   0x7   : > { %s39_s24 = ssub.s32 %s1213_s21, %s1552_s23  ;;  %236 = sbr.rel (%p1027_p5) target bundleno = 26 (0x1a), region = 28 }
   0x8   : > { %p41_p4 = scmp.eq.s32.totalorder %s39_s24, 0 }
   0xa   : > { %s1285_s26 = scalar_select %p41_p4, %s1205_s19, %s43_s25  }
   0xc   : > { %239 = sbr.rel (!%p52_p3) target bundleno = 26 (0x1a), region = 32  ;;  %s241_s27 = sand.u32 (%p52_p3), 1, %s1205_s19  }
   0xd   : > { %s1029_s28 = sshll.u32 (%p52_p3), %s1213_s21, 2  ;;  %s1028_s29 = sshll.u32 (%p52_p3), %s241_s27, 6 }
   0xe   : > { %s1293_s7 = scalar_lea.vmem (%p52_p3), %s1541_s0, %s1029_s28  ;;  %s243_s8 = scalar_lea.vmem (%p52_p3), [#allocation3], %s1028_s29 }
   0xf   : > { %v265_v0 = vld [vmem:[%s1293_s7] sm:$0xf] (%p52_p3)  ;;  %v267_v1 = vld [vmem:[%s1293_s7 + $0x14] sm:$0xf] (%p52_p3)  ;;  %v269_v2 = vld [vmem:[%s1293_s7 + $0x28] sm:$0xf] (%p52_p3) }
  0x10   : > { %266 = vst [vmem:[%s243_s8] sm:$0xf] (%p52_p3), %v265_v0  ;;  %268 = vst [vmem:[%s243_s8 + $0x4] sm:$0xf] (%p52_p3), %v267_v1  ;;  %v271_v3 = vld [vmem:[%s1293_s7 + $0x3c] sm:$0xf] (%p52_p3) }
  0x11   : > { %v273_v4 = vld [vmem:[%s1293_s7 + $0x50] sm:$0xf]  ;;  %270 = vst [vmem:[%s243_s8 + $0x8] sm:$0xf] %v269_v2  ;;  %272 = vst [vmem:[%s243_s8 + $0xc] sm:$0xf] %v271_v3 }
  0x12   : > { %274 = vst [vmem:[%s243_s8 + $0x10] sm:$0xf] %v273_v4  ;;  %v275_v5 = vld [vmem:[%s1293_s7 + $0x64] sm:$0xf]  ;;  %v277_v6 = vld [vmem:[%s1293_s7 + $0x78] sm:$0xf] }
  0x13   : > { %v279_v7 = vld [vmem:[%s1293_s7 + $0x8c] sm:$0xf]  ;;  %276 = vst [vmem:[%s243_s8 + $0x14] sm:$0xf] %v275_v5  ;;  %278 = vst [vmem:[%s243_s8 + $0x18] sm:$0xf] %v277_v6 }
  0x14   : > { %280 = vst [vmem:[%s243_s8 + $0x1c] sm:$0xf] %v279_v7  ;;  %v281_v8 = vld [vmem:[%s1293_s7 + $0xa0] sm:$0xf]  ;;  %v283_v9 = vld [vmem:[%s1293_s7 + $0xb4] sm:$0xf] }
  0x15   : > { %v285_v10 = vld [vmem:[%s1293_s7 + $0xc8] sm:$0xf]  ;;  %282 = vst [vmem:[%s243_s8 + $0x20] sm:$0xf] %v281_v8  ;;  %284 = vst [vmem:[%s243_s8 + $0x24] sm:$0xf] %v283_v9 }
  0x16   : > { %286 = vst [vmem:[%s243_s8 + $0x28] sm:$0xf] %v285_v10  ;;  %v287_v11 = vld [vmem:[%s1293_s7 + $0xdc] sm:$0xf]  ;;  %v289_v12 = vld [vmem:[%s1293_s7 + $0xf0] sm:$0xf] }
  0x17   : > { %v291_v13 = vld [vmem:[%s1293_s7 + $0x104] sm:$0xf]  ;;  %288 = vst [vmem:[%s243_s8 + $0x2c] sm:$0xf] %v287_v11  ;;  %290 = vst [vmem:[%s243_s8 + $0x30] sm:$0xf] %v289_v12 }
  0x18   : > { %292 = vst [vmem:[%s243_s8 + $0x34] sm:$0xf] %v291_v13  ;;  %v293_v14 = vld [vmem:[%s1293_s7 + $0x118] sm:$0xf]  ;;  %v295_v15 = vld [vmem:[%s1293_s7 + $0x12c] sm:$0xf] }
  0x19   : > { %294 = vst [vmem:[%s243_s8 + $0x38] sm:$0xf] %v293_v14  ;;  %296 = vst [vmem:[%s243_s8 + $0x3c] sm:$0xf] %v295_v15 }
  0x1a PF: > { %p1030_p6 = scmp.ge.s32.totalorder %s1217_s22, 1  ;;  %p363_p7 = scmp.lt.s32.totalorder %s1217_s22, 6 }
  0x1c   : > { %p364_p8 = pnand %p1030_p6, %p363_p7 }
  0x1d   : > { %s370_s9 = sand.u32 (!%p364_p8), 1, %s1201_s18   ;;  %s1032_s10 = sshll.u32 (!%p364_p8), %s1209_s20, 4 }
  0x1e   : > { %367 = sbr.rel (%p364_p8) target bundleno = 316 (0x13c), region = 77  ;;  %s1031_s11 = sshll.u32 (!%p364_p8), %s370_s9, 6 }
  0x1f   : > { %p424_p9 = scmp.lt.s32.totalorder (!%p364_p8), %s1032_s10, 79  ;;  %s1320_s16 = scalar_lea.vmem (!%p364_p8), [#allocation3], %s1031_s11 }
  0x20   : > { %p1034_p10 = scmp.ne.s32.totalorder (!%p364_p8), %s1209_s20, 0 }
  0x23   : > { %s1554_s10 = smov (!%p424_p9, %s1032_s10), 79  ;;  %460 = sbr.rel (%p1034_p10) target bundleno = 49 (0x31), region = 85 }
  0x24   : > { %s1033_s12 = sshll.u32 %s1554_s10, 2 }
  0x25   : > { %s1318_s15 = scalar_lea.vmem %s1542_s1, %s1033_s12 }
  0x28   : > { %vm461_vm0 = vcmask 523264   ;;  %v1219_v16 = vmov 0.0  }
  0x29   : > { %462 = vst.msk [vmem:[#allocation2] sm:$0xff] %vm461_vm0, %v1219_v16  ;;  %463 = vst.msk [vmem:[#allocation2 + $0x8] sm:$0xff] %vm461_vm0, %v1219_v16 }
  0x2a   : > { %464 = vst.msk [vmem:[#allocation2 + $0x10] sm:$0xff] %vm461_vm0, %v1219_v16  ;;  %465 = vst.msk [vmem:[#allocation2 + $0x18] sm:$0xff] %vm461_vm0, %v1219_v16 }
  0x2b   : > { %466 = vst.msk [vmem:[#allocation2 + $0x20] sm:$0xff] %vm461_vm0, %v1219_v16  ;;  %467 = vst.msk [vmem:[#allocation2 + $0x28] sm:$0xff] %vm461_vm0, %v1219_v16 }
  0x2c   : > { %468 = vst.msk [vmem:[#allocation2 + $0x30] sm:$0xff] %vm461_vm0, %v1219_v16  ;;  %469 = vst.msk [vmem:[#allocation2 + $0x38] sm:$0xff] %vm461_vm0, %v1219_v16 }
  0x2d   : > { %470 = vst.msk [vmem:[#allocation2 + $0x40] sm:$0xff] %vm461_vm0, %v1219_v16  ;;  %471 = vst.msk [vmem:[#allocation2 + $0x48] sm:$0xff] %vm461_vm0, %v1219_v16 }
  0x2e   : > { %472 = vst.msk [vmem:[#allocation2 + $0x50] sm:$0xff] %vm461_vm0, %v1219_v16  ;;  %473 = vst.msk [vmem:[#allocation2 + $0x58] sm:$0xff] %vm461_vm0, %v1219_v16 }
  0x2f   : > { %474 = vst.msk [vmem:[#allocation2 + $0x60] sm:$0xff] %vm461_vm0, %v1219_v16  ;;  %475 = vst.msk [vmem:[#allocation2 + $0x68] sm:$0xff] %vm461_vm0, %v1219_v16 }
  0x30   : > { %476 = vst.msk [vmem:[#allocation2 + $0x70] sm:$0xff] %vm461_vm0, %v1219_v16  ;;  %477 = vst.msk [vmem:[#allocation2 + $0x78] sm:$0xff] %vm461_vm0, %v1219_v16 }
  0x31 PF: > { %v1163_v17 = vld [vmem:[%s1318_s15 + $0x38] sm:$0xff]   ;;  %v1164_v18 = vld [vmem:[%s1318_s15 + $0x30] sm:$0xff]   ;;  %v1165_v19 = vld [vmem:[%s1318_s15 + $0x28] sm:$0xff]   ;;  %vm735_vm1 = vcmask 523264   ;;  %p1051_p11 = scmp.ne.s32.totalorder %s1209_s20, 4 }
  0x32   : > { %1074 = vmatprep.subr.bf16.mxu0 %v1163_v17  ;;  %1106 = vmatprep.subr.bf16.mxu1 %v1163_v17  ;;  %v1166_v20 = vld [vmem:[%s1318_s15 + $0x20] sm:$0xff]   ;;  %v1167_v23 = vld [vmem:[%s1318_s15 + $0x18] sm:$0xff]   ;;  %v1168_v24 = vld [vmem:[%s1318_s15 + $0x10] sm:$0xff]  }
  0x33   : > { %1075 = vmatpush3.bf16.msra.mxu0 %v1163_v17  ;;  %1114 = vmatpush3.bf16.msra.mxu1 %v1163_v17  ;;  %v1171_v21 = vld [vmem:[%s1320_s16] sm:$0xff]   ;;  %v1169_v25 = vld [vmem:[%s1318_s15 + $0x8] sm:$0xff]   ;;  %v1175_v29 = vld [vmem:[%s1320_s16 + $0x10] sm:$0xff]  }
  0x34   : > { %1076 = vmatprep.subr.bf16.mxu0 %v1164_v18  ;;  %1107 = vmatprep.subr.bf16.mxu1 %v1164_v18  ;;  %v1172_v22 = vld [vmem:[%s1320_s16 + $0x20] sm:$0xff]   ;;  %v1173_v27 = vld [vmem:[%s1320_s16 + $0x8] sm:$0xff]   ;;  %v1176_v30 = vld [vmem:[%s1320_s16 + $0x30] sm:$0xff]  }
  0x35   : > { %1090 = vmatprep.mubr.bf16.mxu0 %v1171_v21  ;;  %1098 = vmatprep.mubr.bf16.mxu1 %v1172_v22  ;;  %v1170_v26 = vld [vmem:[%s1318_s15] sm:$0xff]   ;;  %v1174_v28 = vld [vmem:[%s1320_s16 + $0x28] sm:$0xff]   ;;  %v1177_v31 = vld [vmem:[%s1320_s16 + $0x18] sm:$0xff]  }
  0x36   : > { %v1178_v32 = vld [vmem:[%s1320_s16 + $0x38] sm:$0xff]   ;;  %v480_v33 = vld [vmem:[#allocation2 + $0x10] sm:$0xff]  ;;  %v478_v37 = vld [vmem:[#allocation2] sm:$0xff] }
  0x37   : > { %1077 = vmatpush3.bf16.msra.mxu0 %v1164_v18  ;;  %1115 = vmatpush3.bf16.msra.mxu1 %v1164_v18  ;;  %v488_v34 = vld [vmem:[#allocation2 + $0x50] sm:$0xff]  ;;  %v486_v38 = vld [vmem:[#allocation2 + $0x40] sm:$0xff]  ;;  %v481_v43 = vld [vmem:[#allocation2 + $0x18] sm:$0xff] }
  0x38   : > { %1078 = vmatprep.subr.bf16.mxu0 %v1165_v19  ;;  %1108 = vmatprep.subr.bf16.mxu1 %v1165_v19  ;;  %v489_v44 = vld [vmem:[#allocation2 + $0x58] sm:$0xff]  ;;  %v479_v49 = vld [vmem:[#allocation2 + $0x8] sm:$0xff]  ;;  %v484_v55 = vld [vmem:[#allocation2 + $0x30] sm:$0xff] }
  0x39   : > { %v487_v50 = vld [vmem:[#allocation2 + $0x48] sm:$0xff]  ;;  %v492_v56 = vld [vmem:[#allocation2 + $0x70] sm:$0xff]  ;;  %v482_v61 = vld [vmem:[#allocation2 + $0x20] sm:$0xff] }
  0x3a   : > { %v490_v62 = vld [vmem:[#allocation2 + $0x60] sm:$0xff]  ;;  %v485_v3 = vld [vmem:[#allocation2 + $0x38] sm:$0xff]  ;;  %v483_v9 = vld [vmem:[#allocation2 + $0x28] sm:$0xff] }
  0x3b   : > { %1079 = vmatpush3.bf16.msra.mxu0 %v1165_v19  ;;  %1116 = vmatpush3.bf16.msra.mxu1 %v1165_v19  ;;  %v493_v4 = vld [vmem:[#allocation2 + $0x78] sm:$0xff]  ;;  %v491_v10 = vld [vmem:[#allocation2 + $0x68] sm:$0xff] }
  0x3c   : > { %1080 = vmatprep.subr.bf16.mxu0 %v1166_v20  ;;  %1109 = vmatprep.subr.bf16.mxu1 %v1166_v20 }
  0x3f   : > { %1081 = vmatpush3.bf16.msra.mxu0 %v1166_v20  ;;  %1117 = vmatpush3.bf16.msra.mxu1 %v1166_v20 }
  0x40   : > { %1082 = vmatprep.subr.bf16.mxu0 %v1167_v23  ;;  %1110 = vmatprep.subr.bf16.mxu1 %v1167_v23 }
  0x43   : > { %1083 = vmatpush3.bf16.msra.mxu0 %v1167_v23  ;;  %1118 = vmatpush3.bf16.msra.mxu1 %v1167_v23 }
  0x44   : > { %1084 = vmatprep.subr.bf16.mxu0 %v1168_v24  ;;  %1111 = vmatprep.subr.bf16.mxu1 %v1168_v24 }
  0x47   : > { %1085 = vmatpush3.bf16.msra.mxu0 %v1168_v24  ;;  %1119 = vmatpush3.bf16.msra.mxu1 %v1168_v24 }
  0x48   : > { %1086 = vmatprep.subr.bf16.mxu0 %v1169_v25  ;;  %1112 = vmatprep.subr.bf16.mxu1 %v1169_v25 }
  0x4b   : > { %1087 = vmatpush3.bf16.msra.mxu0 %v1169_v25  ;;  %1120 = vmatpush3.bf16.msra.mxu1 %v1169_v25 }
  0x4c   : > { %1088 = vmatprep.subr.bf16.mxu0 %v1170_v26  ;;  %1113 = vmatprep.subr.bf16.mxu1 %v1170_v26 }
  0x4f   : > { %1089 = vmatpush3.bf16.msra.mxu0 %v1170_v26  ;;  %1121 = vmatpush3.bf16.msra.mxu1 %v1170_v26 }
  0x52   : > { %1091 = vmatmul.mubr.bf16.vlgmr.msra.gmra.mxu0 %v1173_v27  ;;  %1099 = vmatmul.mubr.bf16.vlgmr.msra.gmra.mxu1 %v1174_v28 }
  0x53   : > { %1094 = vmatprep.mubr.bf16.mxu0 %v1175_v29  ;;  %1102 = vmatprep.mubr.bf16.mxu1 %v1176_v30 }
  0x5a   : > { %1095 = vmatmul.mubr.bf16.gmra.mxu0 %v1177_v31  ;;  %1103 = vmatmul.mubr.bf16.gmra.mxu1 %v1178_v32 }
 0x112   : > { %v1092_v35 = vpop.f32.mrf.mxu0  ;;  %v1100_v36 = vpop.f32.mrf.mxu1 }
 0x113   : > { %v721_v39 = vadd.f32 %v1092_v35, %v480_v33  ;;  %v729_v40 = vadd.f32 %v1100_v36, %v488_v34 }
 0x114   : > { %v656_v41 = vpop.f32.mrf.mxu0  ;;  %v688_v42 = vpop.f32.mrf.mxu1 }
 0x115   : > { %738 = vst.msk [vmem:[#allocation2 + $0x10] sm:$0xff] %vm735_vm1, %v721_v39  ;;  %746 = vst.msk [vmem:[#allocation2 + $0x50] sm:$0xff] %vm735_vm1, %v729_v40  ;;  %v719_v45 = vadd.f32 %v656_v41, %v478_v37  ;;  %v727_v46 = vadd.f32 %v688_v42, %v486_v38 }
 0x116   : > { %v1093_v47 = vpop.f32.mrf.mxu0  ;;  %v1101_v48 = vpop.f32.mrf.mxu1 }
 0x117   : > { %736 = vst.msk [vmem:[#allocation2] sm:$0xff] %vm735_vm1, %v719_v45  ;;  %744 = vst.msk [vmem:[#allocation2 + $0x40] sm:$0xff] %vm735_vm1, %v727_v46  ;;  %v722_v51 = vadd.f32 %v1093_v47, %v481_v43  ;;  %v730_v52 = vadd.f32 %v1101_v48, %v489_v44 }
 0x118   : > { %v659_v53 = vpop.f32.mrf.mxu0  ;;  %v691_v54 = vpop.f32.mrf.mxu1 }
 0x119   : > { %739 = vst.msk [vmem:[#allocation2 + $0x18] sm:$0xff] %vm735_vm1, %v722_v51  ;;  %747 = vst.msk [vmem:[#allocation2 + $0x58] sm:$0xff] %vm735_vm1, %v730_v52  ;;  %v720_v57 = vadd.f32 %v659_v53, %v479_v49  ;;  %v728_v58 = vadd.f32 %v691_v54, %v487_v50 }
 0x11a   : > { %v1096_v59 = vpop.f32.mrf.mxu0  ;;  %v1104_v60 = vpop.f32.mrf.mxu1 }
 0x11b   : > { %737 = vst.msk [vmem:[#allocation2 + $0x8] sm:$0xff] %vm735_vm1, %v720_v57  ;;  %745 = vst.msk [vmem:[#allocation2 + $0x48] sm:$0xff] %vm735_vm1, %v728_v58  ;;  %v725_v63 = vadd.f32 %v1096_v59, %v484_v55  ;;  %v733_v0 = vadd.f32 %v1104_v60, %v492_v56 }
 0x11c   : > { %v672_v1 = vpop.f32.mrf.mxu0  ;;  %v704_v2 = vpop.f32.mrf.mxu1 }
 0x11d   : > { %742 = vst.msk [vmem:[#allocation2 + $0x30] sm:$0xff] %vm735_vm1, %v725_v63  ;;  %750 = vst.msk [vmem:[#allocation2 + $0x70] sm:$0xff] %vm735_vm1, %v733_v0  ;;  %v723_v5 = vadd.f32 %v672_v1, %v482_v61  ;;  %v731_v6 = vadd.f32 %v704_v2, %v490_v62 }
 0x11e   : > { %v1097_v7 = vpop.f32.mrf.mxu0  ;;  %v1105_v8 = vpop.f32.mrf.mxu1 }
 0x11f   : > { %740 = vst.msk [vmem:[#allocation2 + $0x20] sm:$0xff] %vm735_vm1, %v723_v5  ;;  %748 = vst.msk [vmem:[#allocation2 + $0x60] sm:$0xff] %vm735_vm1, %v731_v6  ;;  %v726_v11 = vadd.f32 %v1097_v7, %v485_v3  ;;  %v734_v12 = vadd.f32 %v1105_v8, %v493_v4  ;;  %755 = sbr.rel (%p1051_p11) target bundleno = 316 (0x13c), region = 89 }
 0x120   : > { %v675_v13 = vpop.f32.mrf.mxu0  ;;  %v707_v14 = vpop.f32.mrf.mxu1 }
 0x121   : > { %743 = vst.msk [vmem:[#allocation2 + $0x38] sm:$0xff] %vm735_vm1, %v726_v11  ;;  %751 = vst.msk [vmem:[#allocation2 + $0x78] sm:$0xff] %vm735_vm1, %v734_v12  ;;  %v724_v15 = vadd.f32 %v675_v13, %v483_v9  ;;  %v732_v16 = vadd.f32 %v707_v14, %v491_v10 }
 0x123   : > { %741 = vst.msk [vmem:[#allocation2 + $0x28] sm:$0xff] %vm735_vm1, %v724_v15  ;;  %749 = vst.msk [vmem:[#allocation2 + $0x68] sm:$0xff] %vm735_vm1, %v732_v16 }
 0x124   : > { %v756_v17 = vld [vmem:[#allocation2] sm:$0xff]  ;;  %v757_v21 = vld [vmem:[#allocation2 + $0x8] sm:$0xff]  ;;  %v758_v24 = vld [vmem:[#allocation2 + $0x10] sm:$0xff] }
 0x125   : > { %v1375_v18 = vld [vmem:[%s1543_s2] ss:$0 sm:$0xff]  ;;  %v759_v25 = vld [vmem:[#allocation2 + $0x18] sm:$0xff]  ;;  %v819_v27 = vld [vmem:[%s1545_s4 + $0x8] sm:$0xff] }
 0x126   : > { %v1380_v19 = vld [vmem:[%s1544_s3] ss:$0 sm:$0xff]  ;;  %v779_v20 = vmul.f32 %v1375_v18, %v756_v17  ;;  %v780_v23 = vmul.f32 %v1375_v18, %v757_v21  ;;  %v781_v28 = vmul.f32 %v1375_v18, %v758_v24  ;;  %v820_v29 = vld [vmem:[%s1545_s4 + $0x10] sm:$0xff]  ;;  %v782_v30 = vmul.f32 %v1375_v18, %v759_v25  ;;  %v821_v33 = vld [vmem:[%s1545_s4 + $0x18] sm:$0xff] }
 0x127   : > { %v818_v22 = vld [vmem:[%s1545_s4] sm:$0xff]  ;;  %v762_v36 = vld [vmem:[#allocation2 + $0x30] sm:$0xff]  ;;  %v823_v45 = vld [vmem:[%s1545_s4 + $0x28] sm:$0xff] }
 0x128   : > { %v802_v26 = vadd.f32 %v1380_v19, %v779_v20  ;;  %v760_v31 = vld [vmem:[#allocation2 + $0x20] sm:$0xff]  ;;  %v803_v32 = vadd.f32 %v1380_v19, %v780_v23  ;;  %v804_v38 = vadd.f32 %v1380_v19, %v781_v28  ;;  %v805_v39 = vadd.f32 %v1380_v19, %v782_v30  ;;  %v763_v42 = vld [vmem:[#allocation2 + $0x38] sm:$0xff]  ;;  %v824_v53 = vld [vmem:[%s1545_s4 + $0x30] sm:$0xff] }
 0x129   : > { %v783_v34 = vmul.f32 %v1375_v18, %v760_v31  ;;  %v822_v40 = vld [vmem:[%s1545_s4 + $0x20] sm:$0xff]  ;;  %v785_v46 = vmul.f32 %v1375_v18, %v762_v36  ;;  %v786_v47 = vmul.f32 %v1375_v18, %v763_v42  ;;  %v825_v54 = vld [vmem:[%s1545_s4 + $0x38] sm:$0xff]  ;;  %v765_v55 = vld [vmem:[#allocation2 + $0x48] sm:$0xff] }
 0x12a   : > { %v761_v35 = vld [vmem:[#allocation2 + $0x28] sm:$0xff]  ;;  %v834_v37 = vadd.f32 %v818_v22, %v802_v26  ;;  %v835_v43 = vadd.f32 %v819_v27, %v803_v32  ;;  %v764_v48 = vld [vmem:[#allocation2 + $0x40] sm:$0xff]  ;;  %v836_v50 = vadd.f32 %v820_v29, %v804_v38  ;;  %v837_v51 = vadd.f32 %v821_v33, %v805_v39  ;;  %v766_v60 = vld [vmem:[#allocation2 + $0x50] sm:$0xff] }
 0x12b   : > { %v784_v41 = vmul.f32 %v1375_v18, %v761_v35  ;;  %v806_v44 = vadd.f32 %v1380_v19, %v783_v34  ;;  %v808_v58 = vadd.f32 %v1380_v19, %v785_v46  ;;  %v809_v59 = vadd.f32 %v1380_v19, %v786_v47  ;;  %v767_v61 = vld [vmem:[#allocation2 + $0x58] sm:$0xff]  ;;  %v768_v2 = vld [vmem:[#allocation2 + $0x60] sm:$0xff]  ;;  %v769_v8 = vld [vmem:[#allocation2 + $0x68] sm:$0xff] }
 0x12c   : > { %v850_v49 = vmax.f32 %v834_v37, 0.0  ;;  %v851_v56 = vmax.f32 %v835_v43, 0.0  ;;  %v852_v62 = vmax.f32 %v836_v50, 0.0  ;;  %v853_v63 = vmax.f32 %v837_v51, 0.0  ;;  %v826_v6 = vld [vmem:[%s1545_s4 + $0x40] sm:$0xff]  ;;  %v827_v11 = vld [vmem:[%s1545_s4 + $0x48] sm:$0xff] }
 0x12d   : > { %v807_v52 = vadd.f32 %v1380_v19, %v784_v41  ;;  %v838_v57 = vadd.f32 %v822_v40, %v806_v44  ;;  %v787_v1 = vmul.f32 %v1375_v18, %v764_v48  ;;  %v840_v4 = vadd.f32 %v824_v53, %v808_v58  ;;  %v770_v14 = vld [vmem:[#allocation2 + $0x70] sm:$0xff]  ;;  %v771_v15 = vld [vmem:[#allocation2 + $0x78] sm:$0xff]  ;;  %v830_v27 = vld [vmem:[%s1545_s4 + $0x60] sm:$0xff] }
 0x12e   : > { %866 = vst.msk [vmem:[%s1546_s5] sm:$0xff] %vm735_vm1, %v850_v49  ;;  %867 = vst.msk [vmem:[%s1546_s5 + $0x8] sm:$0xff] %vm735_vm1, %v851_v56  ;;  %v841_v5 = vadd.f32 %v825_v54, %v809_v59  ;;  %v788_v7 = vmul.f32 %v1375_v18, %v765_v55  ;;  %v789_v12 = vmul.f32 %v1375_v18, %v766_v60  ;;  %v828_v21 = vld [vmem:[%s1545_s4 + $0x50] sm:$0xff]  ;;  %v829_v22 = vld [vmem:[%s1545_s4 + $0x58] sm:$0xff] }
 0x12f   : > { %v839_v0 = vadd.f32 %v823_v45, %v807_v52  ;;  %v854_v3 = vmax.f32 %v838_v57, 0.0  ;;  %868 = vst.msk [vmem:[%s1546_s5 + $0x10] sm:$0xff] %vm735_vm1, %v852_v62  ;;  %869 = vst.msk [vmem:[%s1546_s5 + $0x18] sm:$0xff] %vm735_vm1, %v853_v63  ;;  %v810_v10 = vadd.f32 %v1380_v19, %v787_v1  ;;  %v790_v13 = vmul.f32 %v1375_v18, %v767_v61  ;;  %v831_v31 = vld [vmem:[%s1545_s4 + $0x68] sm:$0xff]  ;;  %v832_v38 = vld [vmem:[%s1545_s4 + $0x70] sm:$0xff] }
 0x130   : > { %v856_v16 = vmax.f32 %v840_v4, 0.0  ;;  %v857_v17 = vmax.f32 %v841_v5, 0.0  ;;  %v811_v20 = vadd.f32 %v1380_v19, %v788_v7  ;;  %v791_v23 = vmul.f32 %v1375_v18, %v768_v2  ;;  %v833_v39 = vld [vmem:[%s1545_s4 + $0x78] sm:$0xff] }
 0x131   : > { %v855_v9 = vmax.f32 %v839_v0, 0.0  ;;  %870 = vst.msk [vmem:[%s1546_s5 + $0x20] sm:$0xff] %vm735_vm1, %v854_v3  ;;  %v842_v24 = vadd.f32 %v826_v6, %v810_v10  ;;  %v812_v25 = vadd.f32 %v1380_v19, %v789_v12  ;;  %v813_v26 = vadd.f32 %v1380_v19, %v790_v13 }
 0x132   : > { %v792_v28 = vmul.f32 %v1375_v18, %v769_v8  ;;  %872 = vst.msk [vmem:[%s1546_s5 + $0x30] sm:$0xff] %vm735_vm1, %v856_v16  ;;  %873 = vst.msk [vmem:[%s1546_s5 + $0x38] sm:$0xff] %vm735_vm1, %v857_v17  ;;  %v843_v29 = vadd.f32 %v827_v11, %v811_v20  ;;  %v814_v30 = vadd.f32 %v1380_v19, %v791_v23 }
 0x133   : > { %871 = vst.msk [vmem:[%s1546_s5 + $0x28] sm:$0xff] %vm735_vm1, %v855_v9  ;;  %v793_v32 = vmul.f32 %v1375_v18, %v770_v14  ;;  %v794_v33 = vmul.f32 %v1375_v18, %v771_v15  ;;  %v858_v34 = vmax.f32 %v842_v24, 0.0  ;;  %v844_v35 = vadd.f32 %v828_v21, %v812_v25 }
 0x134   : > { %v845_v36 = vadd.f32 %v829_v22, %v813_v26  ;;  %v815_v37 = vadd.f32 %v1380_v19, %v792_v28  ;;  %v859_v40 = vmax.f32 %v843_v29, 0.0  ;;  %v846_v41 = vadd.f32 %v830_v27, %v814_v30 }
 0x135   : > { %v816_v42 = vadd.f32 %v1380_v19, %v793_v32  ;;  %v817_v43 = vadd.f32 %v1380_v19, %v794_v33  ;;  %874 = vst.msk [vmem:[%s1546_s5 + $0x40] sm:$0xff] %vm735_vm1, %v858_v34  ;;  %v860_v18 = vmax.f32 %v844_v35, 0.0 }
 0x136   : > { %v861_v44 = vmax.f32 %v845_v36, 0.0  ;;  %v847_v45 = vadd.f32 %v831_v31, %v815_v37  ;;  %875 = vst.msk [vmem:[%s1546_s5 + $0x48] sm:$0xff] %vm735_vm1, %v859_v40  ;;  %v862_v46 = vmax.f32 %v846_v41, 0.0 }
 0x137   : > { %v848_v47 = vadd.f32 %v832_v38, %v816_v42  ;;  %v849_v48 = vadd.f32 %v833_v39, %v817_v43  ;;  %876 = vst.msk [vmem:[%s1546_s5 + $0x50] sm:$0xff] %vm735_vm1, %v860_v18 }
 0x138   : > { %877 = vst.msk [vmem:[%s1546_s5 + $0x58] sm:$0xff] %vm735_vm1, %v861_v44  ;;  %v863_v19 = vmax.f32 %v847_v45, 0.0  ;;  %878 = vst.msk [vmem:[%s1546_s5 + $0x60] sm:$0xff] %vm735_vm1, %v862_v46 }
 0x139   : > { %v864_v49 = vmax.f32 %v848_v47, 0.0  ;;  %v865_v50 = vmax.f32 %v849_v48, 0.0 }
 0x13a   : > { %879 = vst.msk [vmem:[%s1546_s5 + $0x68] sm:$0xff] %vm735_vm1, %v863_v19 }
 0x13b   : > { %880 = vst.msk [vmem:[%s1546_s5 + $0x70] sm:$0xff] %vm735_vm1, %v864_v49  ;;  %881 = vst.msk [vmem:[%s1546_s5 + $0x78] sm:$0xff] %vm735_vm1, %v865_v50 }
 0x13c PF: > { %s15_s22 = sadd.s32 1, %s1217_s22   ;;  %s1547_s18 = smov %s1205_s19 }
 0x13d   : > { %p12_p12 = scmp.ge.s32.totalorder %s15_s22, 7   ;;  %s1548_s19 = smov %s1285_s26 }
 0x13e   : > { %s1549_s20 = smov %s1213_s21  ;;  %s1550_s21 = smov %s1552_s23 }
 0x13f   :  { %14 = sbr.rel (!%p12_p12) target bundleno = 3 (0x3), region = 136 }

// kernel: _lambda_.26
= control target key start
LH: loop header
LB: loop body
LE: loop exit
PB: predicated region body
PF: predicated region fallthrough
CT: control target
= control target key end

     0   :  { %s834_s15 = smov 0   ;;  %s836_s16 = smov 0   ;;  %s936_s0 = inlined_call_operand.vmem [shape: bf16[32,640], index: 0, kind: input, shape index: {}]   ;;  %s937_s1 = inlined_call_operand.vmem [shape: bf16[640,128], index: 1, kind: input, shape index: {}]   ;;  %s938_s2 = inlined_call_operand.vmem [shape: f32[1,128], index: 2, kind: input, shape index: {}]   ;;  %s939_s3 = inlined_call_operand.vmem [shape: f32[1,128], index: 3, kind: input, shape index: {}]   ;;  %s940_s4 = inlined_call_operand.vmem [shape: f32[32,128], index: 4, kind: output, shape index: {}]  }
   0x1   :  { %s838_s17 = smov 0   ;;  %s840_s18 = smov 0  }
   0x2   :  { %s842_s19 = smov 0  }
   0x3 LB: > { %s26_s20 = sadd.s32 1, %s802_s18  ;;  %p49_p1 = scmp.ne.s32.totalorder %s794_s16, %s790_s15  ;;  %s806_s19 = sphi %s842_s19, %s14_s19   ;;  %s802_s18 = sphi %s840_s18, %s944_s18   ;;  %s798_s17 = sphi %s838_s17, %s943_s17   ;;  %s794_s16 = sphi %s836_s16, %s942_s16   ;;  %s790_s15 = sphi %s834_s15, %s941_s15  }
   0x4   : > { %p27_p0 = scmp.ge.s32.totalorder %s26_s20, 5  ;;  %p50_p2 = scmp.eq.s32.totalorder %s806_s19, 0 }
   0x5   : > { %s42_s22 = sadd.s32 1, %s794_s16  ;;  %p662_p5 = scmp.ge.s32.totalorder %s806_s19, 5 }
   0x6   : > { %s946_s20 = smov (%p27_p0, %s26_s20), 0  ;;  %p51_p3 = por %p50_p2, %p49_p1 }
   0x7   : > { %s38_s21 = ssub.s32 %s802_s18, %s946_s20  ;;  %195 = sbr.rel (%p662_p5) target bundleno = 18 (0x12), region = 24 }
   0x8   : > { %p40_p4 = scmp.eq.s32.totalorder %s38_s21, 0 }
   0xa   : > { %s869_s23 = scalar_select %p40_p4, %s794_s16, %s42_s22  }
   0xc   : > { %198 = sbr.rel (!%p51_p3) target bundleno = 18 (0x12), region = 28  ;;  %s200_s24 = sand.u32 (%p51_p3), 1, %s794_s16  }
   0xd   : > { %s664_s25 = sshll.u32 (%p51_p3), %s802_s18, 2  ;;  %s663_s26 = sshll.u32 (%p51_p3), %s200_s24, 4 }
   0xe   : > { %s207_s29 = scalar_lea.vmem (%p51_p3), %s936_s0, %s664_s25  ;;  %s202_s30 = scalar_lea.vmem (%p51_p3), [#allocation3], %s663_s26 }
   0xf   : > { %v224_v0 = vld [vmem:[%s207_s29] sm:$0xf] (%p51_p3)  ;;  %v226_v1 = vld [vmem:[%s207_s29 + $0x14] sm:$0xf] (%p51_p3)  ;;  %v228_v2 = vld [vmem:[%s207_s29 + $0x28] sm:$0xf] (%p51_p3) }
  0x10   : > { %225 = vst [vmem:[%s202_s30] sm:$0xf] (%p51_p3), %v224_v0  ;;  %227 = vst [vmem:[%s202_s30 + $0x4] sm:$0xf] (%p51_p3), %v226_v1  ;;  %v230_v3 = vld [vmem:[%s207_s29 + $0x3c] sm:$0xf] (%p51_p3) }
  0x11   : > { %229 = vst [vmem:[%s202_s30 + $0x8] sm:$0xf] %v228_v2  ;;  %231 = vst [vmem:[%s202_s30 + $0xc] sm:$0xf] %v230_v3 }
  0x12 PF: > { %p665_p6 = scmp.ge.s32.totalorder %s806_s19, 1  ;;  %p274_p7 = scmp.lt.s32.totalorder %s806_s19, 6 }
  0x14   : > { %p275_p8 = pnand %p665_p6, %p274_p7 }
  0x15   : > { %s281_s5 = sand.u32 (!%p275_p8), 1, %s790_s15   ;;  %s667_s6 = sshll.u32 (!%p275_p8), %s798_s17, 4 }
  0x16   : > { %278 = sbr.rel (%p275_p8) target bundleno = 284 (0x11c), region = 73  ;;  %s881_s7 = sshll.u32 (!%p275_p8), %s281_s5, 4 }
  0x17   : > { %p325_p9 = scmp.lt.s32.totalorder (!%p275_p8), %s667_s6, 79  ;;  %s283_s12 = scalar_lea.vmem (!%p275_p8), [#allocation3], %s881_s7 }
  0x18   : > { %p669_p10 = scmp.ne.s32.totalorder (!%p275_p8), %s798_s17, 0 }
  0x1b   : > { %s948_s6 = smov (!%p325_p9, %s667_s6), 79  ;;  %352 = sbr.rel (%p669_p10) target bundleno = 35 (0x23), region = 81 }
  0x1c   : > { %s668_s8 = sshll.u32 %s948_s6, 2 }
  0x1d   : > { %s886_s11 = scalar_lea.vmem %s937_s1, %s668_s8 }
  0x20   : > { %v808_v4 = vmov 0.0  }
  0x21   : > { %353 = vst [vmem:[#allocation2 + $0x10] sm:$0xff] %v808_v4  ;;  %354 = vst [vmem:[#allocation2] sm:$0xff] %v808_v4 }
  0x22   : > { %355 = vst [vmem:[#allocation2 + $0x18] sm:$0xff] %v808_v4  ;;  %356 = vst [vmem:[#allocation2 + $0x8] sm:$0xff] %v808_v4 }
  0x23 PF: > { %v758_v5 = vld [vmem:[%s886_s11 + $0x38] sm:$0xff]   ;;  %v759_v6 = vld [vmem:[%s886_s11 + $0x30] sm:$0xff]   ;;  %v760_v7 = vld [vmem:[%s886_s11 + $0x28] sm:$0xff]   ;;  %p680_p11 = scmp.ne.s32.totalorder %s798_s17, 4 }
  0x24   : > { %697 = vmatprep.subr.bf16.mxu0 %v758_v5  ;;  %v761_v8 = vld [vmem:[%s886_s11 + $0x20] sm:$0xff]   ;;  %v762_v10 = vld [vmem:[%s886_s11 + $0x18] sm:$0xff]   ;;  %v763_v11 = vld [vmem:[%s886_s11 + $0x10] sm:$0xff]  }
  0x25   : > { %698 = vmatpush3.bf16.msra.mxu0 %v758_v5  ;;  %v766_v9 = vld [vmem:[%s283_s12] sm:$0xff]   ;;  %v764_v12 = vld [vmem:[%s886_s11 + $0x8] sm:$0xff]  }
  0x26   : > { %699 = vmatprep.subr.bf16.mxu0 %v759_v6  ;;  %713 = vmatprep.mubr.bf16.mxu0 %v766_v9  ;;  %v765_v13 = vld [vmem:[%s886_s11] sm:$0xff]   ;;  %v767_v14 = vld [vmem:[%s283_s12 + $0x8] sm:$0xff]  }
  0x28   : > { %v357_v17 = vld [vmem:[#allocation2 + $0x10] sm:$0xff]  ;;  %v358_v23 = vld [vmem:[#allocation2] sm:$0xff] }
  0x29   : > { %700 = vmatpush3.bf16.msra.mxu0 %v759_v6  ;;  %v359_v15 = vld [vmem:[#allocation2 + $0x18] sm:$0xff]  ;;  %v360_v20 = vld [vmem:[#allocation2 + $0x8] sm:$0xff] }
  0x2a   : > { %701 = vmatprep.subr.bf16.mxu0 %v760_v7 }
  0x2d   : > { %702 = vmatpush3.bf16.msra.mxu0 %v760_v7 }
  0x2e   : > { %703 = vmatprep.subr.bf16.mxu0 %v761_v8 }
  0x31   : > { %704 = vmatpush3.bf16.msra.mxu0 %v761_v8 }
  0x32   : > { %705 = vmatprep.subr.bf16.mxu0 %v762_v10 }
  0x35   : > { %706 = vmatpush3.bf16.msra.mxu0 %v762_v10 }
  0x36   : > { %707 = vmatprep.subr.bf16.mxu0 %v763_v11 }
  0x39   : > { %708 = vmatpush3.bf16.msra.mxu0 %v763_v11 }
  0x3a   : > { %709 = vmatprep.subr.bf16.mxu0 %v764_v12 }
  0x3d   : > { %710 = vmatpush3.bf16.msra.mxu0 %v764_v12 }
  0x3e   : > { %711 = vmatprep.subr.bf16.mxu0 %v765_v13 }
  0x41   : > { %712 = vmatpush3.bf16.msra.mxu0 %v765_v13 }
  0x44   : > { %714 = vmatmul.mubr.bf16.vlgmr.msra.gmra.mxu0 %v767_v14 }
 0x104   : > { %v715_v16 = vpop.f32.mrf.mxu0 }
 0x105   : > { %v492_v18 = vadd.f32 %v715_v16, %v359_v15 }
 0x106   : > { %v475_v19 = vpop.f32.mrf.mxu0 }
 0x107   : > { %496 = vst [vmem:[#allocation2 + $0x18] sm:$0xff] %v492_v18  ;;  %v490_v21 = vadd.f32 %v475_v19, %v357_v17 }
 0x108   : > { %v716_v22 = vpop.f32.mrf.mxu0 }
 0x109   : > { %494 = vst [vmem:[#allocation2 + $0x10] sm:$0xff] %v490_v21  ;;  %v493_v24 = vadd.f32 %v716_v22, %v360_v20  ;;  %501 = sbr.rel (%p680_p11) target bundleno = 284 (0x11c), region = 85 }
 0x10a   : > { %v478_v25 = vpop.f32.mrf.mxu0 }
 0x10b   : > { %497 = vst [vmem:[#allocation2 + $0x8] sm:$0xff] %v493_v24  ;;  %v491_v26 = vadd.f32 %v478_v25, %v358_v23 }
 0x10d   : > { %495 = vst [vmem:[#allocation2] sm:$0xff] %v491_v26 }
 0x10e   : > { %v681_v28 = vld [vmem:[%s938_s2] ss:$0 sm:$0xff]  ;;  %v504_v32 = vld [vmem:[#allocation2 + $0x18] sm:$0xff] }
 0x10f   : > { %v682_v29 = vld [vmem:[%s939_s3] ss:$0 sm:$0xff]  ;;  %v515_v35 = vmul.f32 %v681_v28, %v504_v32 }
 0x110   : > { %v502_v27 = vld [vmem:[#allocation2 + $0x10] sm:$0xff] }
 0x111   : > { %v513_v30 = vmul.f32 %v681_v28, %v502_v27  ;;  %v526_v39 = vadd.f32 %v682_v29, %v515_v35 }
 0x112   : > { %v505_v33 = vld [vmem:[#allocation2 + $0x8] sm:$0xff] }
 0x113   : > { %v516_v36 = vmul.f32 %v681_v28, %v505_v33  ;;  %v524_v37 = vadd.f32 %v682_v29, %v513_v30  ;;  %v530_v43 = vmax.f32 %v526_v39, 0.0 }
 0x114   : > { %v503_v31 = vld [vmem:[#allocation2] sm:$0xff] }
 0x115   : > { %v514_v34 = vmul.f32 %v681_v28, %v503_v31  ;;  %v527_v40 = vadd.f32 %v682_v29, %v516_v36  ;;  %v528_v41 = vmax.f32 %v524_v37, 0.0  ;;  %534 = vst [vmem:[%s940_s4 + $0x10] sm:$0xff] %v530_v43 }
 0x117   : > { %v525_v38 = vadd.f32 %v682_v29, %v514_v34  ;;  %v531_v44 = vmax.f32 %v527_v40, 0.0  ;;  %532 = vst [vmem:[%s940_s4] sm:$0xff] %v528_v41 }
 0x119   : > { %v529_v42 = vmax.f32 %v525_v38, 0.0  ;;  %535 = vst [vmem:[%s940_s4 + $0x18] sm:$0xff] %v531_v44 }
 0x11b   : > { %533 = vst [vmem:[%s940_s4 + $0x8] sm:$0xff] %v529_v42 }
 0x11c PF: > { %s14_s19 = sadd.s32 1, %s806_s19   ;;  %s941_s15 = smov %s794_s16 }
 0x11d   : > { %p11_p12 = scmp.ge.s32.totalorder %s14_s19, 7   ;;  %s942_s16 = smov %s869_s23 }
 0x11e   : > { %s943_s17 = smov %s802_s18  ;;  %s944_s18 = smov %s946_s20 }
 0x11f   :  { %13 = sbr.rel (!%p11_p12) target bundleno = 3 (0x3), region = 129 }

// kernel: _lambda_.25
= control target key start
LH: loop header
LB: loop body
LE: loop exit
PB: predicated region body
PF: predicated region fallthrough
CT: control target
= control target key end

     0   :  { %s329_s1 = inlined_call_operand.vmem [shape: bf16[128,128], index: 1, kind: input, shape index: {}]   ;;  %s330_s0 = inlined_call_operand.vmem [shape: bf16[32,128], index: 0, kind: input, shape index: {}]   ;;  %s331_s2 = inlined_call_operand.vmem [shape: f32[1,128], index: 2, kind: input, shape index: {}]   ;;  %s332_s3 = inlined_call_operand.vmem [shape: f32[1,128], index: 3, kind: input, shape index: {}]   ;;  %s333_s4 = inlined_call_operand.vmem [shape: f32[32,128], index: 4, kind: output, shape index: {}]  }
   0x1   :  { %v246_v0 = vld [vmem:[%s329_s1 + $0x38] sm:$0xff]   ;;  %v247_v1 = vld [vmem:[%s329_s1 + $0x30] sm:$0xff]   ;;  %v248_v2 = vld [vmem:[%s329_s1 + $0x28] sm:$0xff]  }
   0x2   :  { %226 = vmatprep.subr.bf16.mxu0 %v246_v0  ;;  %v249_v3 = vld [vmem:[%s329_s1 + $0x20] sm:$0xff]   ;;  %v250_v5 = vld [vmem:[%s329_s1 + $0x18] sm:$0xff]   ;;  %v251_v6 = vld [vmem:[%s329_s1 + $0x10] sm:$0xff]  }
   0x3   :  { %227 = vmatpush3.bf16.msra.mxu0 %v246_v0  ;;  %v254_v4 = vld [vmem:[%s330_s0] sm:$0xff]   ;;  %v252_v7 = vld [vmem:[%s329_s1 + $0x8] sm:$0xff]  }
   0x4   :  { %228 = vmatprep.subr.bf16.mxu0 %v247_v1  ;;  %242 = vmatprep.mubr.bf16.mxu0 %v254_v4  ;;  %v253_v8 = vld [vmem:[%s329_s1] sm:$0xff]   ;;  %v255_v9 = vld [vmem:[%s330_s0 + $0x8] sm:$0xff]  }
   0x5   :  { %v214_v10 = vld [vmem:[%s331_s2] ss:$0 sm:$0xff] }
   0x6   :  { %v215_v12 = vld [vmem:[%s332_s3] ss:$0 sm:$0xff] }
   0x7   :  { %229 = vmatpush3.bf16.msra.mxu0 %v247_v1 }
   0x8   :  { %230 = vmatprep.subr.bf16.mxu0 %v248_v2 }
   0xb   :  { %231 = vmatpush3.bf16.msra.mxu0 %v248_v2 }
   0xc   :  { %232 = vmatprep.subr.bf16.mxu0 %v249_v3 }
   0xf   :  { %233 = vmatpush3.bf16.msra.mxu0 %v249_v3 }
  0x10   :  { %234 = vmatprep.subr.bf16.mxu0 %v250_v5 }
  0x13   :  { %235 = vmatpush3.bf16.msra.mxu0 %v250_v5 }
  0x14   :  { %236 = vmatprep.subr.bf16.mxu0 %v251_v6 }
  0x17   :  { %237 = vmatpush3.bf16.msra.mxu0 %v251_v6 }
  0x18   :  { %238 = vmatprep.subr.bf16.mxu0 %v252_v7 }
  0x1b   :  { %239 = vmatpush3.bf16.msra.mxu0 %v252_v7 }
  0x1c   :  { %240 = vmatprep.subr.bf16.mxu0 %v253_v8 }
  0x1f   :  { %241 = vmatpush3.bf16.msra.mxu0 %v253_v8 }
  0x22   :  { %243 = vmatmul.mubr.bf16.vlgmr.msra.gmra.mxu0 %v255_v9 }
  0xe2   :  { %v244_v11 = vpop.f32.mrf.mxu0 }
  0xe3   :  { %v183_v13 = vmul.f32 %v244_v11, %v214_v10 }
  0xe4   :  { %v144_v14 = vpop.f32.mrf.mxu0 }
  0xe5   :  { %v194_v15 = vadd.f32 %v215_v12, %v183_v13  ;;  %v181_v16 = vmul.f32 %v214_v10, %v144_v14 }
  0xe6   :  { %v245_v17 = vpop.f32.mrf.mxu0 }
  0xe7   :  { %198 = vst [vmem:[%s333_s4 + $0x10] sm:$0xff] %v194_v15  ;;  %v192_v18 = vadd.f32 %v215_v12, %v181_v16  ;;  %v184_v19 = vmul.f32 %v245_v17, %v214_v10 }
  0xe8   :  { %v147_v20 = vpop.f32.mrf.mxu0 }
  0xe9   :  { %196 = vst [vmem:[%s333_s4] sm:$0xff] %v192_v18  ;;  %v195_v21 = vadd.f32 %v215_v12, %v184_v19  ;;  %v182_v22 = vmul.f32 %v214_v10, %v147_v20 }
  0xeb   :  { %199 = vst [vmem:[%s333_s4 + $0x18] sm:$0xff] %v195_v21  ;;  %v193_v23 = vadd.f32 %v215_v12, %v182_v22 }
  0xed   :  { %197 = vst [vmem:[%s333_s4 + $0x8] sm:$0xff] %v193_v23 }

// kernel: _lambda_.28
= control target key start
LH: loop header
LB: loop body
LE: loop exit
PB: predicated region body
PF: predicated region fallthrough
CT: control target
= control target key end

     0   :  { %s1108_s15 = smov 0   ;;  %s1110_s16 = smov 0   ;;  %s1227_s0 = inlined_call_operand.vmem [shape: bf16[32,1152], index: 0, kind: input, shape index: {}]   ;;  %s1228_s1 = inlined_call_operand.vmem [shape: bf16[1152,128], index: 1, kind: input, shape index: {}]   ;;  %s1229_s2 = inlined_call_operand.vmem [shape: f32[1,128], index: 2, kind: input, shape index: {}]   ;;  %s1230_s3 = inlined_call_operand.vmem [shape: f32[1,128], index: 3, kind: input, shape index: {}]   ;;  %s1231_s4 = inlined_call_operand.vmem [shape: f32[32,128], index: 4, kind: output, shape index: {}]  }
   0x1   :  { %s1112_s17 = smov 0   ;;  %s1114_s18 = smov 0  }
   0x2   :  { %s1116_s19 = smov 0  }
   0x3 LB: > { %s26_s20 = sadd.s32 1, %s1076_s18  ;;  %p49_p1 = scmp.ne.s32.totalorder %s1068_s16, %s1064_s15  ;;  %s1080_s19 = sphi %s1116_s19, %s14_s19   ;;  %s1076_s18 = sphi %s1114_s18, %s1235_s18   ;;  %s1072_s17 = sphi %s1112_s17, %s1234_s17   ;;  %s1068_s16 = sphi %s1110_s16, %s1233_s16   ;;  %s1064_s15 = sphi %s1108_s15, %s1232_s15  }
   0x4   : > { %p27_p0 = scmp.ge.s32.totalorder %s26_s20, 3  ;;  %p50_p2 = scmp.eq.s32.totalorder %s1080_s19, 0 }
   0x5   : > { %s42_s22 = sadd.s32 1, %s1068_s16  ;;  %p858_p5 = scmp.ge.s32.totalorder %s1080_s19, 3 }
   0x6   : > { %s1237_s20 = smov (%p27_p0, %s26_s20), 0  ;;  %p51_p3 = por %p50_p2, %p49_p1 }
   0x7   : > { %s38_s21 = ssub.s32 %s1076_s18, %s1237_s20  ;;  %195 = sbr.rel (%p858_p5) target bundleno = 21 (0x15), region = 24 }
   0x8   : > { %p40_p4 = scmp.eq.s32.totalorder %s38_s21, 0 }
   0xa   : > { %s1143_s23 = scalar_select %p40_p4, %s1068_s16, %s42_s22  }
   0xc   : > { %198 = sbr.rel (!%p51_p3) target bundleno = 21 (0x15), region = 28  ;;  %s200_s24 = sand.u32 (%p51_p3), 1, %s1068_s16  }
   0xd   : > { %s908_s25 = smul.u32 (%p51_p3), 12, %s1076_s18 }
   0xe   : > { %s967_s26 = smul.u32 (%p51_p3), 48, %s200_s24 }
   0xf   : > { %s208_s29 = scalar_lea.vmem (%p51_p3), %s1227_s0, %s908_s25 }
  0x10   : > { %v223_v0 = vld [vmem:[%s208_s29] sm:$0xff] (%p51_p3)  ;;  %v227_v2 = vld [vmem:[%s208_s29 + $0x48] sm:$0xff] (%p51_p3)  ;;  %s202_s30 = scalar_lea.vmem (%p51_p3), [#allocation3], %s967_s26  ;;  %v864_v6 = vld [vmem:[%s208_s29 + $0x50] sm:$0xf] (%p51_p3) }
  0x11   : > { %v225_v1 = vld [vmem:[%s208_s29 + $0x24] sm:$0xff]  ;;  %224 = vst [vmem:[%s202_s30] sm:$0xff] %v223_v0  ;;  %228 = vst [vmem:[%s202_s30 + $0x18] sm:$0xff] %v227_v2  ;;  %v229_v3 = vld [vmem:[%s208_s29 + $0x6c] sm:$0xff] }
  0x12   : > { %226 = vst [vmem:[%s202_s30 + $0xc] sm:$0xff] %v225_v1  ;;  %v860_v4 = vld [vmem:[%s208_s29 + $0x8] sm:$0xf]  ;;  %v862_v5 = vld [vmem:[%s208_s29 + $0x2c] sm:$0xf]  ;;  %230 = vst [vmem:[%s202_s30 + $0x24] sm:$0xff] %v229_v3 }
  0x13   : > { %861 = vst [vmem:[%s202_s30 + $0x8] sm:$0xf] %v860_v4  ;;  %863 = vst [vmem:[%s202_s30 + $0x14] sm:$0xf] %v862_v5  ;;  %v866_v7 = vld [vmem:[%s208_s29 + $0x74] sm:$0xf] }
  0x14   : > { %865 = vst [vmem:[%s202_s30 + $0x20] sm:$0xf] %v864_v6  ;;  %867 = vst [vmem:[%s202_s30 + $0x2c] sm:$0xf] %v866_v7 }
  0x15 PF: > { %p868_p6 = scmp.ge.s32.totalorder %s1080_s19, 1  ;;  %p263_p7 = scmp.lt.s32.totalorder %s1080_s19, 4 }
  0x17   : > { %p264_p8 = pnand %p868_p6, %p263_p7 }
  0x18   : > { %s270_s5 = sand.u32 (!%p264_p8), 1, %s1064_s15   ;;  %s314_s6 = smul.u32 (!%p264_p8), 48, %s1072_s17 }
  0x19   : > { %267 = sbr.rel (%p264_p8) target bundleno = 299 (0x12b), region = 58  ;;  %p870_p10 = scmp.ne.s32.totalorder (!%p264_p8), %s1072_s17, 0 }
  0x1a   : > { %s968_s7 = smul.u32 (!%p264_p8), 48, %s270_s5  ;;  %p315_p9 = scmp.lt.s32.totalorder (!%p264_p8), %s314_s6, 143 }
  0x1c   : > { %s1160_s12 = scalar_lea.vmem (!%p264_p8), [#allocation3], %s968_s7 }
  0x1e   : > { %s1239_s6 = smov (!%p315_p9, %s314_s6), 143  ;;  %342 = sbr.rel (%p870_p10) target bundleno = 38 (0x26), region = 66 }
  0x1f   : > { %s869_s8 = sshll.u32 %s1239_s6, 2 }
  0x20   : > { %s1158_s11 = scalar_lea.vmem %s1228_s1, %s869_s8 }
  0x23   : > { %v1082_v8 = vmov 0.0  }
  0x24   : > { %343 = vst [vmem:[#allocation2 + $0x10] sm:$0xff] %v1082_v8  ;;  %344 = vst [vmem:[#allocation2] sm:$0xff] %v1082_v8 }
  0x25   : > { %345 = vst [vmem:[#allocation2 + $0x18] sm:$0xff] %v1082_v8  ;;  %346 = vst [vmem:[#allocation2 + $0x8] sm:$0xff] %v1082_v8 }
  0x26 PF: > { %v1010_v9 = vld [vmem:[%s1158_s11 + $0x78] sm:$0xff]   ;;  %v1013_v12 = vld [vmem:[%s1158_s11 + $0x70] sm:$0xff]   ;;  %v1016_v15 = vld [vmem:[%s1158_s11 + $0x68] sm:$0xff]   ;;  %p901_p11 = scmp.ne.s32.totalorder %s1072_s17, 2 }
  0x27   : > { %v1011_v10 = vld [vmem:[%s1158_s11 + $0x38] sm:$0xff]   ;;  %909 = vmatprep.subr.bf16.mxu0 %v1010_v9  ;;  %v1014_v13 = vld [vmem:[%s1158_s11 + $0x30] sm:$0xff]   ;;  %v1017_v16 = vld [vmem:[%s1158_s11 + $0x28] sm:$0xff]  }
  0x28   : > { %v1012_v11 = vld [vmem:[%s1158_s11 + $0xb8] sm:$0xff]   ;;  %910 = vmatpush3.bf16.msra.mxu0 %v1011_v10  ;;  %v1015_v14 = vld [vmem:[%s1158_s11 + $0xb0] sm:$0xff]   ;;  %v1018_v17 = vld [vmem:[%s1158_s11 + $0xa8] sm:$0xff]  }
  0x29   : > { %947 = vmatprep.subr.bf16.mxu1 %v1012_v11  ;;  %911 = vmatprep.subr.bf16.mxu0 %v1013_v12  ;;  %v1019_v18 = vld [vmem:[%s1158_s11 + $0x60] sm:$0xff]   ;;  %v1022_v21 = vld [vmem:[%s1158_s11 + $0x58] sm:$0xff]   ;;  %v1025_v24 = vld [vmem:[%s1158_s11 + $0x50] sm:$0xff]  }
  0x2a   : > { %948 = vmatpush3.bf16.msra.mxu1 %v1012_v11  ;;  %v1020_v19 = vld [vmem:[%s1158_s11 + $0x20] sm:$0xff]   ;;  %v1024_v22 = vld [vmem:[%s1158_s11 + $0x98] sm:$0xff]   ;;  %v1027_v25 = vld [vmem:[%s1158_s11 + $0x90] sm:$0xff]  }
  0x2b   : > { %949 = vmatprep.subr.bf16.mxu1 %v1015_v14  ;;  %v1021_v20 = vld [vmem:[%s1158_s11 + $0xa0] sm:$0xff]   ;;  %v1023_v23 = vld [vmem:[%s1158_s11 + $0x18] sm:$0xff]   ;;  %v1026_v26 = vld [vmem:[%s1158_s11 + $0x10] sm:$0xff]  }
  0x2c   : > { %912 = vmatpush3.bf16.msra.mxu0 %v1014_v13  ;;  %v1028_v27 = vld [vmem:[%s1158_s11 + $0x48] sm:$0xff]   ;;  %v1031_v30 = vld [vmem:[%s1158_s11 + $0x40] sm:$0xff]   ;;  %v347_v44 = vld [vmem:[#allocation2 + $0x10] sm:$0xff] }
  0x2d   : > { %913 = vmatprep.subr.bf16.mxu0 %v1016_v15  ;;  %v1029_v28 = vld [vmem:[%s1158_s11 + $0x8] sm:$0xff]   ;;  %v1033_v31 = vld [vmem:[%s1158_s11 + $0x80] sm:$0xff]   ;;  %v349_v58 = vld [vmem:[#allocation2 + $0x18] sm:$0xff] }
  0x2e   : > { %950 = vmatpush3.bf16.msra.mxu1 %v1015_v14  ;;  %v1030_v29 = vld [vmem:[%s1158_s11 + $0x88] sm:$0xff]   ;;  %v1036_v32 = vld [vmem:[%s1160_s12 + $0x4] ss:$12 sps:$4 sm:$0xff]  }
  0x2f   : > { %951 = vmatprep.subr.bf16.mxu1 %v1018_v17  ;;  %v1037_v33 = vld [vmem:[%s1160_s12 + $0x8] ss:$12 sps:$4 sm:$0xff]   ;;  %615 = vmatprep.mubr.bf16.mxu0 %v1036_v32  ;;  %v1034_v35 = vld [vmem:[%s1160_s12] ss:$12 sps:$4 sm:$0xff]   ;;  %v1041_v38 = vld [vmem:[%s1160_s12 + $0x18] ss:$12 sps:$4 sm:$0xff]  }
  0x30   : > { %914 = vmatpush3.bf16.msra.mxu0 %v1017_v16  ;;  %v1032_v34 = vld [vmem:[%s1158_s11] sm:$0xff]   ;;  %963 = vmatprep.mubr.bf16.mxu1 %v1037_v33  ;;  %v1039_v36 = vld [vmem:[%s1160_s12 + $0x1c] ss:$12 sps:$4 sm:$0xff]  }
  0x31   : > { %915 = vmatprep.subr.bf16.mxu0 %v1019_v18  ;;  %v1038_v37 = vld [vmem:[%s1160_s12 + $0x20] ss:$12 sps:$4 sm:$0xff]  }
  0x32   : > { %952 = vmatpush3.bf16.msra.mxu1 %v1018_v17  ;;  %v348_v52 = vld [vmem:[#allocation2] sm:$0xff]  ;;  %v350_v0 = vld [vmem:[#allocation2 + $0x8] sm:$0xff] }
  0x33   : > { %953 = vmatprep.subr.bf16.mxu1 %v1021_v20 }
  0x34   : > { %916 = vmatpush3.bf16.msra.mxu0 %v1020_v19 }
  0x35   : > { %917 = vmatprep.subr.bf16.mxu0 %v1022_v21 }
  0x36   : > { %954 = vmatpush3.bf16.msra.mxu1 %v1021_v20 }
  0x37   : > { %955 = vmatprep.subr.bf16.mxu1 %v1024_v22 }
  0x38   : > { %918 = vmatpush3.bf16.msra.mxu0 %v1023_v23 }
  0x39   : > { %919 = vmatprep.subr.bf16.mxu0 %v1025_v24 }
  0x3a   : > { %956 = vmatpush3.bf16.msra.mxu1 %v1024_v22 }
  0x3b   : > { %957 = vmatprep.subr.bf16.mxu1 %v1027_v25 }
  0x3c   : > { %920 = vmatpush3.bf16.msra.mxu0 %v1026_v26 }
  0x3d   : > { %921 = vmatprep.subr.bf16.mxu0 %v1028_v27 }
  0x3e   : > { %958 = vmatpush3.bf16.msra.mxu1 %v1027_v25 }
  0x3f   : > { %959 = vmatprep.subr.bf16.mxu1 %v1030_v29 }
  0x40   : > { %922 = vmatpush3.bf16.msra.mxu0 %v1029_v28 }
  0x41   : > { %923 = vmatprep.subr.bf16.mxu0 %v1031_v30 }
  0x42   : > { %960 = vmatpush3.bf16.msra.mxu1 %v1030_v29 }
  0x43   : > { %961 = vmatprep.subr.bf16.mxu1 %v1033_v31 }
  0x44   : > { %924 = vmatpush3.bf16.msra.mxu0 %v1032_v34 }
  0x46   : > { %962 = vmatpush3.bf16.msra.mxu1 %v1033_v31 }
  0x47   : > { %616 = vmatmul.mubr.bf16.vlgmr.msra.gmra.mxu0 %v1034_v35 }
  0x48   : > { %623 = vmatprep.mubr.bf16.mxu0 %v1039_v36 }
  0x49   : > { %964 = vmatmul.mubr.bf16.vlgmr.msra.gmra.mxu1 %v1038_v37 }
  0x4f   : > { %624 = vmatmul.mubr.bf16.gmra.mxu0 %v1041_v38 }
 0x107   : > { %v925_v39 = vpop.f32.mrf.mxu0 }
 0x109   : > { %v926_v40 = vpop.f32.mrf.mxu0  ;;  %v965_v41 = vpop.f32.mrf.mxu1 }
 0x10a   : > { %v927_v42 = vadd.f32 %v926_v40, %v925_v39 }
 0x10b   : > { %v928_v43 = vpop.f32.mrf.mxu0  ;;  %v666_v45 = vpop.f32.mrf.mxu1 }
 0x10c   : > { %v667_v46 = vadd.f32 %v927_v42, %v666_v45 }
 0x10d   : > { %v929_v47 = vpop.f32.mrf.mxu0  ;;  %v966_v48 = vpop.f32.mrf.mxu1 }
 0x10e   : > { %v681_v49 = vadd.f32 %v667_v46, %v347_v44  ;;  %v930_v50 = vadd.f32 %v929_v47, %v928_v43 }
 0x10f   : > { %v931_v51 = vpop.f32.mrf.mxu0  ;;  %v669_v53 = vpop.f32.mrf.mxu1 }
 0x110   : > { %685 = vst [vmem:[#allocation2 + $0x10] sm:$0xff] %v681_v49  ;;  %v670_v54 = vadd.f32 %v930_v50, %v669_v53 }
 0x111   : > { %v932_v55 = vpop.f32.mrf.mxu0 }
 0x112   : > { %v682_v56 = vadd.f32 %v670_v54, %v348_v52  ;;  %v933_v57 = vadd.f32 %v932_v55, %v931_v51 }
 0x113   : > { %v934_v59 = vpop.f32.mrf.mxu0 }
 0x114   : > { %686 = vst [vmem:[#allocation2] sm:$0xff] %v682_v56  ;;  %v675_v60 = vadd.f32 %v965_v41, %v933_v57 }
 0x115   : > { %v935_v61 = vpop.f32.mrf.mxu0 }
 0x116   : > { %v683_v62 = vadd.f32 %v675_v60, %v349_v58  ;;  %v936_v63 = vadd.f32 %v935_v61, %v934_v59 }
 0x118   : > { %687 = vst [vmem:[#allocation2 + $0x18] sm:$0xff] %v683_v62  ;;  %v678_v1 = vadd.f32 %v966_v48, %v936_v63  ;;  %692 = sbr.rel (%p901_p11) target bundleno = 299 (0x12b), region = 70 }
 0x11a   : > { %v684_v2 = vadd.f32 %v678_v1, %v350_v0 }
 0x11c   : > { %688 = vst [vmem:[#allocation2 + $0x8] sm:$0xff] %v684_v2 }
 0x11d   : > { %v693_v3 = vld [vmem:[#allocation2 + $0x10] sm:$0xff]  ;;  %v902_v4 = vld [vmem:[%s1229_s2] ss:$0 sm:$0xff] }
 0x11e   : > { %v903_v5 = vld [vmem:[%s1230_s3] ss:$0 sm:$0xff]  ;;  %v704_v6 = vmul.f32 %v902_v4, %v693_v3 }
 0x11f   : > { %v694_v7 = vld [vmem:[#allocation2] sm:$0xff]  ;;  %v695_v8 = vld [vmem:[#allocation2 + $0x18] sm:$0xff] }
 0x120   : > { %v705_v10 = vmul.f32 %v902_v4, %v694_v7  ;;  %v706_v11 = vmul.f32 %v902_v4, %v695_v8  ;;  %v715_v13 = vadd.f32 %v903_v5, %v704_v6 }
 0x122   : > { %v716_v14 = vadd.f32 %v903_v5, %v705_v10  ;;  %v717_v15 = vadd.f32 %v903_v5, %v706_v11  ;;  %v719_v17 = vmax.f32 %v715_v13, 0.0 }
 0x123   : > { %v696_v9 = vld [vmem:[#allocation2 + $0x8] sm:$0xff] }
 0x124   : > { %v707_v12 = vmul.f32 %v902_v4, %v696_v9  ;;  %v720_v18 = vmax.f32 %v716_v14, 0.0  ;;  %v721_v19 = vmax.f32 %v717_v15, 0.0  ;;  %723 = vst [vmem:[%s1231_s4] sm:$0xff] %v719_v17 }
 0x126   : > { %v718_v16 = vadd.f32 %v903_v5, %v707_v12  ;;  %724 = vst [vmem:[%s1231_s4 + $0x8] sm:$0xff] %v720_v18  ;;  %725 = vst [vmem:[%s1231_s4 + $0x10] sm:$0xff] %v721_v19 }
 0x128   : > { %v722_v20 = vmax.f32 %v718_v16, 0.0 }
 0x12a   : > { %726 = vst [vmem:[%s1231_s4 + $0x18] sm:$0xff] %v722_v20 }
 0x12b PF: > { %s14_s19 = sadd.s32 1, %s1080_s19   ;;  %s1232_s15 = smov %s1068_s16 }
 0x12c   : > { %p11_p12 = scmp.ge.s32.totalorder %s14_s19, 5   ;;  %s1233_s16 = smov %s1143_s23 }
 0x12d   : > { %s1234_s17 = smov %s1076_s18  ;;  %s1235_s18 = smov %s1237_s20 }
 0x12e   :  { %13 = sbr.rel (!%p11_p12) target bundleno = 3 (0x3), region = 120 }

// kernel: _lambda_.27
= control target key start
LH: loop header
LB: loop body
LE: loop exit
PB: predicated region body
PF: predicated region fallthrough
CT: control target
= control target key end

     0   :  { %s1200_s18 = smov 0   ;;  %s1202_s19 = smov 0   ;;  %s1331_s0 = inlined_call_operand.vmem [shape: bf16[32,1152], index: 0, kind: input, shape index: {}]   ;;  %s1332_s1 = inlined_call_operand.vmem [shape: bf16[1152,128], index: 1, kind: input, shape index: {}]   ;;  %s1333_s2 = inlined_call_operand.vmem [shape: f32[1,128], index: 2, kind: input, shape index: {}]   ;;  %s1334_s3 = inlined_call_operand.vmem [shape: f32[1,128], index: 3, kind: input, shape index: {}]   ;;  %s1335_s4 = inlined_call_operand.vmem [shape: f32[32,128], index: 4, kind: input, shape index: {}]   ;;  %s1336_s5 = inlined_call_operand.vmem [shape: f32[32,128], index: 5, kind: output, shape index: {}]  }
   0x1   :  { %s1204_s20 = smov 0   ;;  %s1206_s21 = smov 0  }
   0x2   :  { %s1208_s22 = smov 0  }
   0x3 LB: > { %s27_s23 = sadd.s32 1, %s1163_s21  ;;  %p50_p1 = scmp.ne.s32.totalorder %s1155_s19, %s1151_s18  ;;  %s1167_s22 = sphi %s1208_s22, %s15_s22   ;;  %s1163_s21 = sphi %s1206_s21, %s1340_s21   ;;  %s1159_s20 = sphi %s1204_s20, %s1339_s20   ;;  %s1155_s19 = sphi %s1202_s19, %s1338_s19   ;;  %s1151_s18 = sphi %s1200_s18, %s1337_s18  }
   0x4   : > { %p28_p0 = scmp.ge.s32.totalorder %s27_s23, 3  ;;  %p51_p2 = scmp.eq.s32.totalorder %s1167_s22, 0 }
   0x5   : > { %s43_s25 = sadd.s32 1, %s1155_s19  ;;  %p945_p5 = scmp.ge.s32.totalorder %s1167_s22, 3 }
   0x6   : > { %s1342_s23 = smov (%p28_p0, %s27_s23), 0  ;;  %p52_p3 = por %p51_p2, %p50_p1 }
   0x7   : > { %s39_s24 = ssub.s32 %s1163_s21, %s1342_s23  ;;  %236 = sbr.rel (%p945_p5) target bundleno = 21 (0x15), region = 28 }
   0x8   : > { %p41_p4 = scmp.eq.s32.totalorder %s39_s24, 0 }
   0xa   : > { %s1235_s26 = scalar_select %p41_p4, %s1155_s19, %s43_s25  }
   0xc   : > { %239 = sbr.rel (!%p52_p3) target bundleno = 21 (0x15), region = 32  ;;  %s241_s27 = sand.u32 (%p52_p3), 1, %s1155_s19  }
   0xd   : > { %s995_s28 = smul.u32 (%p52_p3), 12, %s1163_s21 }
   0xe   : > { %s1054_s29 = smul.u32 (%p52_p3), 48, %s241_s27 }
   0xf   : > { %s249_s7 = scalar_lea.vmem (%p52_p3), %s1331_s0, %s995_s28 }
  0x10   : > { %v264_v0 = vld [vmem:[%s249_s7] sm:$0xff] (%p52_p3)  ;;  %v268_v2 = vld [vmem:[%s249_s7 + $0x48] sm:$0xff] (%p52_p3)  ;;  %s243_s8 = scalar_lea.vmem (%p52_p3), [#allocation3], %s1054_s29  ;;  %v951_v6 = vld [vmem:[%s249_s7 + $0x50] sm:$0xf] (%p52_p3) }
  0x11   : > { %v266_v1 = vld [vmem:[%s249_s7 + $0x24] sm:$0xff]  ;;  %265 = vst [vmem:[%s243_s8] sm:$0xff] %v264_v0  ;;  %269 = vst [vmem:[%s243_s8 + $0x18] sm:$0xff] %v268_v2  ;;  %v270_v3 = vld [vmem:[%s249_s7 + $0x6c] sm:$0xff] }
  0x12   : > { %267 = vst [vmem:[%s243_s8 + $0xc] sm:$0xff] %v266_v1  ;;  %v947_v4 = vld [vmem:[%s249_s7 + $0x8] sm:$0xf]  ;;  %v949_v5 = vld [vmem:[%s249_s7 + $0x2c] sm:$0xf]  ;;  %271 = vst [vmem:[%s243_s8 + $0x24] sm:$0xff] %v270_v3 }
  0x13   : > { %948 = vst [vmem:[%s243_s8 + $0x8] sm:$0xf] %v947_v4  ;;  %950 = vst [vmem:[%s243_s8 + $0x14] sm:$0xf] %v949_v5  ;;  %v953_v7 = vld [vmem:[%s249_s7 + $0x74] sm:$0xf] }
  0x14   : > { %952 = vst [vmem:[%s243_s8 + $0x20] sm:$0xf] %v951_v6  ;;  %954 = vst [vmem:[%s243_s8 + $0x2c] sm:$0xf] %v953_v7 }
  0x15 PF: > { %p955_p6 = scmp.ge.s32.totalorder %s1167_s22, 1  ;;  %p304_p7 = scmp.lt.s32.totalorder %s1167_s22, 4 }
  0x17   : > { %p305_p8 = pnand %p955_p6, %p304_p7 }
  0x18   : > { %s311_s9 = sand.u32 (!%p305_p8), 1, %s1151_s18   ;;  %s365_s10 = smul.u32 (!%p305_p8), 48, %s1159_s20 }
  0x19   : > { %308 = sbr.rel (%p305_p8) target bundleno = 301 (0x12d), region = 62  ;;  %p957_p10 = scmp.ne.s32.totalorder (!%p305_p8), %s1159_s20, 0 }
  0x1a   : > { %s1055_s11 = smul.u32 (!%p305_p8), 48, %s311_s9  ;;  %p366_p9 = scmp.lt.s32.totalorder (!%p305_p8), %s365_s10, 143 }
  0x1c   : > { %s1252_s16 = scalar_lea.vmem (!%p305_p8), [#allocation3], %s1055_s11 }
  0x1e   : > { %s1344_s10 = smov (!%p366_p9, %s365_s10), 143  ;;  %402 = sbr.rel (%p957_p10) target bundleno = 38 (0x26), region = 70 }
  0x1f   : > { %s956_s12 = sshll.u32 %s1344_s10, 2 }
  0x20   : > { %s1250_s15 = scalar_lea.vmem %s1332_s1, %s956_s12 }
  0x23   : > { %v1169_v8 = vmov 0.0  }
  0x24   : > { %403 = vst [vmem:[#allocation2 + $0x10] sm:$0xff] %v1169_v8  ;;  %404 = vst [vmem:[#allocation2] sm:$0xff] %v1169_v8 }
  0x25   : > { %405 = vst [vmem:[#allocation2 + $0x18] sm:$0xff] %v1169_v8  ;;  %406 = vst [vmem:[#allocation2 + $0x8] sm:$0xff] %v1169_v8 }
  0x26 PF: > { %v1097_v9 = vld [vmem:[%s1250_s15 + $0x78] sm:$0xff]   ;;  %v1100_v12 = vld [vmem:[%s1250_s15 + $0x70] sm:$0xff]   ;;  %v1103_v15 = vld [vmem:[%s1250_s15 + $0x68] sm:$0xff]   ;;  %p988_p11 = scmp.ne.s32.totalorder %s1159_s20, 2 }
  0x27   : > { %v1098_v10 = vld [vmem:[%s1250_s15 + $0x38] sm:$0xff]   ;;  %996 = vmatprep.subr.bf16.mxu0 %v1097_v9  ;;  %v1101_v13 = vld [vmem:[%s1250_s15 + $0x30] sm:$0xff]   ;;  %v1104_v16 = vld [vmem:[%s1250_s15 + $0x28] sm:$0xff]  }
  0x28   : > { %v1099_v11 = vld [vmem:[%s1250_s15 + $0xb8] sm:$0xff]   ;;  %997 = vmatpush3.bf16.msra.mxu0 %v1098_v10  ;;  %v1102_v14 = vld [vmem:[%s1250_s15 + $0xb0] sm:$0xff]   ;;  %v1105_v17 = vld [vmem:[%s1250_s15 + $0xa8] sm:$0xff]  }
  0x29   : > { %1034 = vmatprep.subr.bf16.mxu1 %v1099_v11  ;;  %998 = vmatprep.subr.bf16.mxu0 %v1100_v12  ;;  %v1106_v18 = vld [vmem:[%s1250_s15 + $0x60] sm:$0xff]   ;;  %v1109_v21 = vld [vmem:[%s1250_s15 + $0x58] sm:$0xff]   ;;  %v1112_v24 = vld [vmem:[%s1250_s15 + $0x50] sm:$0xff]  }
  0x2a   : > { %1035 = vmatpush3.bf16.msra.mxu1 %v1099_v11  ;;  %v1107_v19 = vld [vmem:[%s1250_s15 + $0x20] sm:$0xff]   ;;  %v1111_v22 = vld [vmem:[%s1250_s15 + $0x98] sm:$0xff]   ;;  %v1114_v25 = vld [vmem:[%s1250_s15 + $0x90] sm:$0xff]  }
  0x2b   : > { %1036 = vmatprep.subr.bf16.mxu1 %v1102_v14  ;;  %v1108_v20 = vld [vmem:[%s1250_s15 + $0xa0] sm:$0xff]   ;;  %v1110_v23 = vld [vmem:[%s1250_s15 + $0x18] sm:$0xff]   ;;  %v1113_v26 = vld [vmem:[%s1250_s15 + $0x10] sm:$0xff]  }
  0x2c   : > { %999 = vmatpush3.bf16.msra.mxu0 %v1101_v13  ;;  %v1115_v27 = vld [vmem:[%s1250_s15 + $0x48] sm:$0xff]   ;;  %v1118_v30 = vld [vmem:[%s1250_s15 + $0x40] sm:$0xff]   ;;  %v407_v44 = vld [vmem:[#allocation2 + $0x10] sm:$0xff] }
  0x2d   : > { %1000 = vmatprep.subr.bf16.mxu0 %v1103_v15  ;;  %v1116_v28 = vld [vmem:[%s1250_s15 + $0x8] sm:$0xff]   ;;  %v1120_v31 = vld [vmem:[%s1250_s15 + $0x80] sm:$0xff]   ;;  %v409_v58 = vld [vmem:[#allocation2 + $0x18] sm:$0xff] }
  0x2e   : > { %1037 = vmatpush3.bf16.msra.mxu1 %v1102_v14  ;;  %v1117_v29 = vld [vmem:[%s1250_s15 + $0x88] sm:$0xff]   ;;  %v1123_v32 = vld [vmem:[%s1252_s16 + $0x4] ss:$12 sps:$4 sm:$0xff]  }
  0x2f   : > { %1038 = vmatprep.subr.bf16.mxu1 %v1105_v17  ;;  %v1124_v33 = vld [vmem:[%s1252_s16 + $0x8] ss:$12 sps:$4 sm:$0xff]   ;;  %675 = vmatprep.mubr.bf16.mxu0 %v1123_v32  ;;  %v1121_v35 = vld [vmem:[%s1252_s16] ss:$12 sps:$4 sm:$0xff]   ;;  %v1128_v38 = vld [vmem:[%s1252_s16 + $0x18] ss:$12 sps:$4 sm:$0xff]  }
  0x30   : > { %1001 = vmatpush3.bf16.msra.mxu0 %v1104_v16  ;;  %v1119_v34 = vld [vmem:[%s1250_s15] sm:$0xff]   ;;  %1050 = vmatprep.mubr.bf16.mxu1 %v1124_v33  ;;  %v1126_v36 = vld [vmem:[%s1252_s16 + $0x1c] ss:$12 sps:$4 sm:$0xff]  }
  0x31   : > { %1002 = vmatprep.subr.bf16.mxu0 %v1106_v18  ;;  %v1125_v37 = vld [vmem:[%s1252_s16 + $0x20] ss:$12 sps:$4 sm:$0xff]  }
  0x32   : > { %1039 = vmatpush3.bf16.msra.mxu1 %v1105_v17  ;;  %v408_v52 = vld [vmem:[#allocation2] sm:$0xff]  ;;  %v410_v0 = vld [vmem:[#allocation2 + $0x8] sm:$0xff] }
  0x33   : > { %1040 = vmatprep.subr.bf16.mxu1 %v1108_v20 }
  0x34   : > { %1003 = vmatpush3.bf16.msra.mxu0 %v1107_v19 }
  0x35   : > { %1004 = vmatprep.subr.bf16.mxu0 %v1109_v21 }
  0x36   : > { %1041 = vmatpush3.bf16.msra.mxu1 %v1108_v20 }
  0x37   : > { %1042 = vmatprep.subr.bf16.mxu1 %v1111_v22 }
  0x38   : > { %1005 = vmatpush3.bf16.msra.mxu0 %v1110_v23 }
  0x39   : > { %1006 = vmatprep.subr.bf16.mxu0 %v1112_v24 }
  0x3a   : > { %1043 = vmatpush3.bf16.msra.mxu1 %v1111_v22 }
  0x3b   : > { %1044 = vmatprep.subr.bf16.mxu1 %v1114_v25 }
  0x3c   : > { %1007 = vmatpush3.bf16.msra.mxu0 %v1113_v26 }
  0x3d   : > { %1008 = vmatprep.subr.bf16.mxu0 %v1115_v27 }
  0x3e   : > { %1045 = vmatpush3.bf16.msra.mxu1 %v1114_v25 }
  0x3f   : > { %1046 = vmatprep.subr.bf16.mxu1 %v1117_v29 }
  0x40   : > { %1009 = vmatpush3.bf16.msra.mxu0 %v1116_v28 }
  0x41   : > { %1010 = vmatprep.subr.bf16.mxu0 %v1118_v30 }
  0x42   : > { %1047 = vmatpush3.bf16.msra.mxu1 %v1117_v29 }
  0x43   : > { %1048 = vmatprep.subr.bf16.mxu1 %v1120_v31 }
  0x44   : > { %1011 = vmatpush3.bf16.msra.mxu0 %v1119_v34 }
  0x46   : > { %1049 = vmatpush3.bf16.msra.mxu1 %v1120_v31 }
  0x47   : > { %676 = vmatmul.mubr.bf16.vlgmr.msra.gmra.mxu0 %v1121_v35 }
  0x48   : > { %683 = vmatprep.mubr.bf16.mxu0 %v1126_v36 }
  0x49   : > { %1051 = vmatmul.mubr.bf16.vlgmr.msra.gmra.mxu1 %v1125_v37 }
  0x4f   : > { %684 = vmatmul.mubr.bf16.gmra.mxu0 %v1128_v38 }
 0x107   : > { %v1012_v39 = vpop.f32.mrf.mxu0 }
 0x109   : > { %v1013_v40 = vpop.f32.mrf.mxu0  ;;  %v1052_v41 = vpop.f32.mrf.mxu1 }
 0x10a   : > { %v1014_v42 = vadd.f32 %v1013_v40, %v1012_v39 }
 0x10b   : > { %v1015_v43 = vpop.f32.mrf.mxu0  ;;  %v726_v45 = vpop.f32.mrf.mxu1 }
 0x10c   : > { %v727_v46 = vadd.f32 %v1014_v42, %v726_v45 }
 0x10d   : > { %v1016_v47 = vpop.f32.mrf.mxu0  ;;  %v1053_v48 = vpop.f32.mrf.mxu1 }
 0x10e   : > { %v741_v49 = vadd.f32 %v727_v46, %v407_v44  ;;  %v1017_v50 = vadd.f32 %v1016_v47, %v1015_v43 }
 0x10f   : > { %v1018_v51 = vpop.f32.mrf.mxu0  ;;  %v729_v53 = vpop.f32.mrf.mxu1 }
 0x110   : > { %745 = vst [vmem:[#allocation2 + $0x10] sm:$0xff] %v741_v49  ;;  %v730_v54 = vadd.f32 %v1017_v50, %v729_v53 }
 0x111   : > { %v1019_v55 = vpop.f32.mrf.mxu0 }
 0x112   : > { %v742_v56 = vadd.f32 %v730_v54, %v408_v52  ;;  %v1020_v57 = vadd.f32 %v1019_v55, %v1018_v51 }
 0x113   : > { %v1021_v59 = vpop.f32.mrf.mxu0 }
 0x114   : > { %746 = vst [vmem:[#allocation2] sm:$0xff] %v742_v56  ;;  %v735_v60 = vadd.f32 %v1052_v41, %v1020_v57 }
 0x115   : > { %v1022_v61 = vpop.f32.mrf.mxu0 }
 0x116   : > { %v743_v62 = vadd.f32 %v735_v60, %v409_v58  ;;  %v1023_v63 = vadd.f32 %v1022_v61, %v1021_v59 }
 0x118   : > { %747 = vst [vmem:[#allocation2 + $0x18] sm:$0xff] %v743_v62  ;;  %v738_v1 = vadd.f32 %v1053_v48, %v1023_v63  ;;  %752 = sbr.rel (%p988_p11) target bundleno = 301 (0x12d), region = 74 }
 0x11a   : > { %v744_v2 = vadd.f32 %v738_v1, %v410_v0 }
 0x11c   : > { %748 = vst [vmem:[#allocation2 + $0x8] sm:$0xff] %v744_v2 }
 0x11d   : > { %v753_v3 = vld [vmem:[#allocation2 + $0x10] sm:$0xff]  ;;  %v989_v4 = vld [vmem:[%s1333_s2] ss:$0 sm:$0xff]  ;;  %v780_v13 = vld [vmem:[%s1335_s4 + $0x8] sm:$0xff] }
 0x11e   : > { %v990_v5 = vld [vmem:[%s1334_s3] ss:$0 sm:$0xff]  ;;  %v764_v6 = vmul.f32 %v989_v4, %v753_v3  ;;  %v781_v17 = vld [vmem:[%s1335_s4 + $0x10] sm:$0xff]  ;;  %v782_v18 = vld [vmem:[%s1335_s4 + $0x18] sm:$0xff] }
 0x11f   : > { %v754_v7 = vld [vmem:[#allocation2] sm:$0xff]  ;;  %v755_v10 = vld [vmem:[#allocation2 + $0x18] sm:$0xff] }
 0x120   : > { %v779_v8 = vld [vmem:[%s1335_s4] sm:$0xff]  ;;  %v765_v9 = vmul.f32 %v989_v4, %v754_v7  ;;  %v775_v12 = vadd.f32 %v990_v5, %v764_v6  ;;  %v766_v14 = vmul.f32 %v989_v4, %v755_v10 }
 0x122   : > { %v776_v16 = vadd.f32 %v990_v5, %v765_v9  ;;  %v783_v19 = vadd.f32 %v779_v8, %v775_v12  ;;  %v777_v20 = vadd.f32 %v990_v5, %v766_v14 }
 0x123   : > { %v756_v11 = vld [vmem:[#allocation2 + $0x8] sm:$0xff] }
 0x124   : > { %v767_v15 = vmul.f32 %v989_v4, %v756_v11  ;;  %v784_v22 = vadd.f32 %v780_v13, %v776_v16  ;;  %v787_v23 = vmax.f32 %v783_v19, 0.0  ;;  %v785_v24 = vadd.f32 %v781_v17, %v777_v20 }
 0x126   : > { %v778_v21 = vadd.f32 %v990_v5, %v767_v15  ;;  %v788_v26 = vmax.f32 %v784_v22, 0.0  ;;  %791 = vst [vmem:[%s1336_s5] sm:$0xff] %v787_v23  ;;  %v789_v27 = vmax.f32 %v785_v24, 0.0 }
 0x128   : > { %v786_v25 = vadd.f32 %v782_v18, %v778_v21  ;;  %792 = vst [vmem:[%s1336_s5 + $0x8] sm:$0xff] %v788_v26  ;;  %793 = vst [vmem:[%s1336_s5 + $0x10] sm:$0xff] %v789_v27 }
 0x12a   : > { %v790_v28 = vmax.f32 %v786_v25, 0.0 }
 0x12c   : > { %794 = vst [vmem:[%s1336_s5 + $0x18] sm:$0xff] %v790_v28 }
 0x12d PF: > { %s15_s22 = sadd.s32 1, %s1167_s22   ;;  %s1337_s18 = smov %s1155_s19 }
 0x12e   : > { %p12_p12 = scmp.ge.s32.totalorder %s15_s22, 5   ;;  %s1338_s19 = smov %s1235_s26 }
 0x12f   : > { %s1339_s20 = smov %s1163_s21  ;;  %s1340_s21 = smov %s1342_s23 }
 0x130   :  { %14 = sbr.rel (!%p12_p12) target bundleno = 3 (0x3), region = 127 }

// kernel: _lambda_.31
= control target key start
LH: loop header
LB: loop body
LE: loop exit
PB: predicated region body
PF: predicated region fallthrough
CT: control target
= control target key end

     0   :  { %s1236_s15 = smov 0   ;;  %s1238_s16 = smov 0   ;;  %s1485_s0 = inlined_call_operand.vmem [shape: bf16[8,1152], index: 0, kind: input, shape index: {}]   ;;  %s1486_s1 = inlined_call_operand.vmem [shape: bf16[1152,256], index: 1, kind: input, shape index: {}]   ;;  %s1487_s2 = inlined_call_operand.vmem [shape: f32[1,256], index: 2, kind: input, shape index: {}]   ;;  %s1488_s3 = inlined_call_operand.vmem [shape: f32[1,256], index: 3, kind: input, shape index: {}]   ;;  %s1489_s4 = inlined_call_operand.vmem [shape: f32[8,256], index: 4, kind: output, shape index: {}]  }
   0x1   :  { %s1240_s17 = smov 0   ;;  %s1242_s18 = smov 0  }
   0x2   :  { %s1244_s19 = smov 0   ;;  %s1246_s20 = smov 0  }
   0x3   :  { %s1248_s21 = smov 0  }
   0x4 LB: > { %s26_s22 = sadd.s32 1, %s1198_s19  ;;  %s29_s23 = sadd.s32 1, %s1202_s20  ;;  %s1206_s21 = sphi %s1248_s21, %s14_s21   ;;  %s1202_s20 = sphi %s1246_s20, %s1495_s20   ;;  %s1198_s19 = sphi %s1244_s19, %s1494_s19   ;;  %s1194_s18 = sphi %s1242_s18, %s1493_s18   ;;  %s1190_s17 = sphi %s1240_s17, %s1492_s17   ;;  %s1186_s16 = sphi %s1238_s16, %s1491_s16   ;;  %s1182_s15 = sphi %s1236_s15, %s1490_s15  }
   0x5   : > { %p27_p0 = scmp.ge.s32.totalorder %s26_s22, 3  ;;  %p77_p1 = scmp.ne.s32.totalorder %s1186_s16, %s1182_s15 }
   0x6   : > { %p78_p2 = scmp.eq.s32.totalorder %s1206_s21, 0  ;;  %s70_s27 = sadd.s32 1, %s1186_s16 }
   0x7   : > { %s1497_s22 = smov (%p27_p0, %s26_s22), 0  ;;  %s1499_s23 = smov (!%p27_p0, %s29_s23), %s1202_s20 }
   0x8   : > { %p79_p3 = por %p78_p2, %p77_p1  ;;  %p31_p4 = scmp.ge.s32.totalorder %s1499_s23, 2 }
   0x9   : > { %s65_s24 = ssub.s32 %s1198_s19, %s1497_s22  ;;  %p973_p6 = scmp.ge.s32.totalorder %s1206_s21, 6 }
   0xa   : > { %s1501_s23 = smov (%p31_p4, %s1499_s23), 0 }
   0xb   : > { %s66_s25 = ssub.s32 %s1202_s20, %s1501_s23  ;;  %183 = sbr.rel (%p973_p6) target bundleno = 55 (0x37), region = 16 }
   0xc   : > { %s67_s26 = sor.u32 %s66_s25, %s65_s24 }
   0xd   : > { %p68_p5 = scmp.eq.s32.totalorder %s67_s26, 0 }
   0xf   : > { %s1287_s28 = scalar_select %p68_p5, %s1186_s16, %s70_s27  }
  0x10   : > { %199 = sbr.rel (!%p79_p3) target bundleno = 55 (0x37), region = 24  ;;  %s201_s29 = sand.u32 (%p79_p3), 1, %s1186_s16  }
  0x11   : > { %s1012_s30 = smul.u32 (%p79_p3), 96, %s1198_s19 }
  0x12   : > { %s1064_s5 = smul.u32 (%p79_p3), 192, %s201_s29 }
  0x13   : > { %s206_s6 = sadd.s32 (%p79_p3), %s1202_s20, %s1012_s30 }
  0x14   : > { %s975_s7 = sshll.u32 (%p79_p3), %s206_s6, 2  ;;  %s1301_s11 = scalar_lea.vmem (%p79_p3), [#allocation3], %s1064_s5 }
  0x15   : > { %s1296_s10 = scalar_lea.vmem %s1486_s1, %s975_s7 }
  0x16   : > { %v225_v0 = vld [vmem:[%s1296_s10] sm:$0xf]  ;;  %v227_v1 = vld [vmem:[%s1296_s10 + $0x8] sm:$0xf]  ;;  %v229_v2 = vld [vmem:[%s1296_s10 + $0x10] sm:$0xf] }
  0x17   : > { %226 = vst [vmem:[%s1301_s11] sm:$0xf] %v225_v0  ;;  %228 = vst [vmem:[%s1301_s11 + $0x4] sm:$0xf] %v227_v1  ;;  %v231_v3 = vld [vmem:[%s1296_s10 + $0x18] sm:$0xf] }
  0x18   : > { %230 = vst [vmem:[%s1301_s11 + $0x8] sm:$0xf] %v229_v2  ;;  %v233_v4 = vld [vmem:[%s1296_s10 + $0x20] sm:$0xf]  ;;  %v235_v5 = vld [vmem:[%s1296_s10 + $0x28] sm:$0xf] }
  0x19   : > { %232 = vst [vmem:[%s1301_s11 + $0xc] sm:$0xf] %v231_v3  ;;  %234 = vst [vmem:[%s1301_s11 + $0x10] sm:$0xf] %v233_v4  ;;  %v237_v6 = vld [vmem:[%s1296_s10 + $0x30] sm:$0xf] }
  0x1a   : > { %236 = vst [vmem:[%s1301_s11 + $0x14] sm:$0xf] %v235_v5  ;;  %v239_v7 = vld [vmem:[%s1296_s10 + $0x38] sm:$0xf]  ;;  %v241_v8 = vld [vmem:[%s1296_s10 + $0x40] sm:$0xf] }
  0x1b   : > { %238 = vst [vmem:[%s1301_s11 + $0x18] sm:$0xf] %v237_v6  ;;  %240 = vst [vmem:[%s1301_s11 + $0x1c] sm:$0xf] %v239_v7  ;;  %v243_v9 = vld [vmem:[%s1296_s10 + $0x48] sm:$0xf] }
  0x1c   : > { %242 = vst [vmem:[%s1301_s11 + $0x20] sm:$0xf] %v241_v8  ;;  %v245_v10 = vld [vmem:[%s1296_s10 + $0x50] sm:$0xf]  ;;  %v247_v11 = vld [vmem:[%s1296_s10 + $0x58] sm:$0xf] }
  0x1d   : > { %244 = vst [vmem:[%s1301_s11 + $0x24] sm:$0xf] %v243_v9  ;;  %246 = vst [vmem:[%s1301_s11 + $0x28] sm:$0xf] %v245_v10  ;;  %v249_v12 = vld [vmem:[%s1296_s10 + $0x60] sm:$0xf] }
  0x1e   : > { %248 = vst [vmem:[%s1301_s11 + $0x2c] sm:$0xf] %v247_v11  ;;  %v251_v13 = vld [vmem:[%s1296_s10 + $0x68] sm:$0xf]  ;;  %v253_v14 = vld [vmem:[%s1296_s10 + $0x70] sm:$0xf] }
  0x1f   : > { %250 = vst [vmem:[%s1301_s11 + $0x30] sm:$0xf] %v249_v12  ;;  %252 = vst [vmem:[%s1301_s11 + $0x34] sm:$0xf] %v251_v13  ;;  %v255_v15 = vld [vmem:[%s1296_s10 + $0x78] sm:$0xf] }
  0x20   : > { %254 = vst [vmem:[%s1301_s11 + $0x38] sm:$0xf] %v253_v14  ;;  %v257_v16 = vld [vmem:[%s1296_s10 + $0x80] sm:$0xf]  ;;  %v259_v17 = vld [vmem:[%s1296_s10 + $0x88] sm:$0xf] }
  0x21   : > { %256 = vst [vmem:[%s1301_s11 + $0x3c] sm:$0xf] %v255_v15  ;;  %258 = vst [vmem:[%s1301_s11 + $0x40] sm:$0xf] %v257_v16  ;;  %v261_v18 = vld [vmem:[%s1296_s10 + $0x90] sm:$0xf] }
  0x22   : > { %260 = vst [vmem:[%s1301_s11 + $0x44] sm:$0xf] %v259_v17  ;;  %v263_v19 = vld [vmem:[%s1296_s10 + $0x98] sm:$0xf]  ;;  %v265_v20 = vld [vmem:[%s1296_s10 + $0xa0] sm:$0xf] }
  0x23   : > { %262 = vst [vmem:[%s1301_s11 + $0x48] sm:$0xf] %v261_v18  ;;  %264 = vst [vmem:[%s1301_s11 + $0x4c] sm:$0xf] %v263_v19  ;;  %v267_v21 = vld [vmem:[%s1296_s10 + $0xa8] sm:$0xf] }
  0x24   : > { %266 = vst [vmem:[%s1301_s11 + $0x50] sm:$0xf] %v265_v20  ;;  %v269_v22 = vld [vmem:[%s1296_s10 + $0xb0] sm:$0xf]  ;;  %v271_v23 = vld [vmem:[%s1296_s10 + $0xb8] sm:$0xf] }
  0x25   : > { %268 = vst [vmem:[%s1301_s11 + $0x54] sm:$0xf] %v267_v21  ;;  %270 = vst [vmem:[%s1301_s11 + $0x58] sm:$0xf] %v269_v22  ;;  %v273_v24 = vld [vmem:[%s1296_s10 + $0xc0] sm:$0xf] }
  0x26   : > { %272 = vst [vmem:[%s1301_s11 + $0x5c] sm:$0xf] %v271_v23  ;;  %v275_v25 = vld [vmem:[%s1296_s10 + $0xc8] sm:$0xf]  ;;  %v277_v26 = vld [vmem:[%s1296_s10 + $0xd0] sm:$0xf] }
  0x27   : > { %274 = vst [vmem:[%s1301_s11 + $0x60] sm:$0xf] %v273_v24  ;;  %276 = vst [vmem:[%s1301_s11 + $0x64] sm:$0xf] %v275_v25  ;;  %v279_v27 = vld [vmem:[%s1296_s10 + $0xd8] sm:$0xf] }
  0x28   : > { %278 = vst [vmem:[%s1301_s11 + $0x68] sm:$0xf] %v277_v26  ;;  %v281_v28 = vld [vmem:[%s1296_s10 + $0xe0] sm:$0xf]  ;;  %v283_v29 = vld [vmem:[%s1296_s10 + $0xe8] sm:$0xf] }
  0x29   : > { %280 = vst [vmem:[%s1301_s11 + $0x6c] sm:$0xf] %v279_v27  ;;  %282 = vst [vmem:[%s1301_s11 + $0x70] sm:$0xf] %v281_v28  ;;  %v285_v30 = vld [vmem:[%s1296_s10 + $0xf0] sm:$0xf] }
  0x2a   : > { %284 = vst [vmem:[%s1301_s11 + $0x74] sm:$0xf] %v283_v29  ;;  %v287_v31 = vld [vmem:[%s1296_s10 + $0xf8] sm:$0xf]  ;;  %v289_v32 = vld [vmem:[%s1296_s10 + $0x100] sm:$0xf] }
  0x2b   : > { %286 = vst [vmem:[%s1301_s11 + $0x78] sm:$0xf] %v285_v30  ;;  %288 = vst [vmem:[%s1301_s11 + $0x7c] sm:$0xf] %v287_v31  ;;  %v291_v33 = vld [vmem:[%s1296_s10 + $0x108] sm:$0xf] }
  0x2c   : > { %290 = vst [vmem:[%s1301_s11 + $0x80] sm:$0xf] %v289_v32  ;;  %v293_v34 = vld [vmem:[%s1296_s10 + $0x110] sm:$0xf]  ;;  %v295_v35 = vld [vmem:[%s1296_s10 + $0x118] sm:$0xf] }
  0x2d   : > { %292 = vst [vmem:[%s1301_s11 + $0x84] sm:$0xf] %v291_v33  ;;  %294 = vst [vmem:[%s1301_s11 + $0x88] sm:$0xf] %v293_v34  ;;  %v297_v36 = vld [vmem:[%s1296_s10 + $0x120] sm:$0xf] }
  0x2e   : > { %296 = vst [vmem:[%s1301_s11 + $0x8c] sm:$0xf] %v295_v35  ;;  %v299_v37 = vld [vmem:[%s1296_s10 + $0x128] sm:$0xf]  ;;  %v301_v38 = vld [vmem:[%s1296_s10 + $0x130] sm:$0xf] }
  0x2f   : > { %298 = vst [vmem:[%s1301_s11 + $0x90] sm:$0xf] %v297_v36  ;;  %300 = vst [vmem:[%s1301_s11 + $0x94] sm:$0xf] %v299_v37  ;;  %v303_v39 = vld [vmem:[%s1296_s10 + $0x138] sm:$0xf] }
  0x30   : > { %302 = vst [vmem:[%s1301_s11 + $0x98] sm:$0xf] %v301_v38  ;;  %v305_v40 = vld [vmem:[%s1296_s10 + $0x140] sm:$0xf]  ;;  %v307_v41 = vld [vmem:[%s1296_s10 + $0x148] sm:$0xf] }
  0x31   : > { %304 = vst [vmem:[%s1301_s11 + $0x9c] sm:$0xf] %v303_v39  ;;  %306 = vst [vmem:[%s1301_s11 + $0xa0] sm:$0xf] %v305_v40  ;;  %v309_v42 = vld [vmem:[%s1296_s10 + $0x150] sm:$0xf] }
  0x32   : > { %308 = vst [vmem:[%s1301_s11 + $0xa4] sm:$0xf] %v307_v41  ;;  %v311_v43 = vld [vmem:[%s1296_s10 + $0x158] sm:$0xf]  ;;  %v313_v44 = vld [vmem:[%s1296_s10 + $0x160] sm:$0xf] }
  0x33   : > { %310 = vst [vmem:[%s1301_s11 + $0xa8] sm:$0xf] %v309_v42  ;;  %312 = vst [vmem:[%s1301_s11 + $0xac] sm:$0xf] %v311_v43  ;;  %v315_v45 = vld [vmem:[%s1296_s10 + $0x168] sm:$0xf] }
  0x34   : > { %314 = vst [vmem:[%s1301_s11 + $0xb0] sm:$0xf] %v313_v44  ;;  %v317_v46 = vld [vmem:[%s1296_s10 + $0x170] sm:$0xf]  ;;  %v319_v47 = vld [vmem:[%s1296_s10 + $0x178] sm:$0xf] }
  0x35   : > { %316 = vst [vmem:[%s1301_s11 + $0xb4] sm:$0xf] %v315_v45  ;;  %318 = vst [vmem:[%s1301_s11 + $0xb8] sm:$0xf] %v317_v46 }
  0x36   : > { %320 = vst [vmem:[%s1301_s11 + $0xbc] sm:$0xf] %v319_v47 }
  0x37 PF: > { %p976_p7 = scmp.ge.s32.totalorder %s1206_s21, 1  ;;  %p451_p8 = scmp.lt.s32.totalorder %s1206_s21, 7 }
  0x39   : > { %p452_p9 = pnand %p976_p7, %p451_p8 }
  0x3a   : > { %s458_s12 = sand.u32 (!%p452_p9), 1, %s1182_s15   ;;  %s501_s13 = smul.u32 (!%p452_p9), 3, %s1190_s17 }
  0x3b   : > { %455 = sbr.rel (%p452_p9) target bundleno = 324 (0x144), region = 73  ;;  %p512_p10 = scmp.lt.s32.totalorder (!%p452_p9), %s1194_s18, 1 }
  0x3c   : > { %s1065_s14 = smul.u32 (!%p452_p9), 192, %s458_s12  ;;  %p504_p11 = scmp.lt.s32.totalorder (!%p452_p9), %s501_s13, 8 }
  0x3d   : > { %p979_p12 = scmp.ne.s32.totalorder (!%p452_p9), %s1190_s17, 0 }
  0x3e   : > { %s1423_s12 = scalar_lea.vmem (!%p452_p9), [#allocation3], %s1065_s14 }
  0x40   : > { %s1503_s13 = smov (!%p504_p11, %s501_s13), 8  ;;  %s1505_s18 = smov (!%p512_p10, %s1194_s18), 1 }
  0x41   : > { %s977_s24 = sshll.u32 %s1503_s13, 2  ;;  %s514_s15 = scalar_lea.vmem %s1487_s2, %s1505_s18 }
  0x42   : > { %s1407_s27 = scalar_lea.vmem %s1485_s0, %s977_s24  ;;  %s517_s7 = scalar_lea.vmem %s1488_s3, %s1505_s18 }
  0x43   : > { %s978_s8 = sshll.u32 %s1505_s18, 3  ;;  %530 = sbr.rel (%p979_p12) target bundleno = 74 (0x4a), region = 81 }
  0x44   : > { %s1421_s11 = scalar_lea.vmem %s1489_s4, %s978_s8 }
  0x48   : > { %v1208_v48 = vmov 0.0  }
  0x49   : > { %531 = vst [vmem:[#allocation2] sm:$0xff] %v1208_v48 }
  0x4a PF: > { %v1125_v49 = vld [vmem:[%s1423_s12 + $0x78] sm:$0xff]   ;;  %v1209_v50 = vmov 0.0   ;;  %vm1210_vm0 = vmmov 0   ;;  %v1128_v53 = vld [vmem:[%s1423_s12 + $0x70] sm:$0xff]   ;;  %v1131_v56 = vld [vmem:[%s1423_s12 + $0x68] sm:$0xff]   ;;  %p1007_p13 = scmp.ne.s32.totalorder %s1190_s17, 2 }
  0x4b   : > { %1044 = vmatprep.subr.bf16.mxu1 %v1209_v50  ;;  %v1126_v51 = vld [vmem:[%s1423_s12 + $0xb8] sm:$0xff]   ;;  %1013 = vmatprep.subr.bf16.mxu0 %v1125_v49  ;;  %v1129_v54 = vld [vmem:[%s1423_s12 + $0xb0] sm:$0xff]   ;;  %v1132_v57 = vld [vmem:[%s1423_s12 + $0xa8] sm:$0xff]  }
  0x4c   : > { %v1127_v52 = vld [vmem:[%s1423_s12 + $0x38] sm:$0xff]   ;;  %1060 = vmatprep.mubr.msk.bf16.mxu1 %vm1210_vm0, %v1209_v50  ;;  %1045 = vmatpush3.bf16.msra.mxu1 %v1126_v51  ;;  %v1130_v55 = vld [vmem:[%s1423_s12 + $0x30] sm:$0xff]   ;;  %v1133_v58 = vld [vmem:[%s1423_s12 + $0x28] sm:$0xff]  }
  0x4d   : > { %1014 = vmatpush3.bf16.msra.mxu0 %v1127_v52  ;;  %1046 = vmatprep.subr.bf16.mxu1 %v1209_v50  ;;  %v1134_v59 = vld [vmem:[%s1423_s12 + $0x60] sm:$0xff]   ;;  %v1137_v62 = vld [vmem:[%s1423_s12 + $0x58] sm:$0xff]   ;;  %v1140_v1 = vld [vmem:[%s1423_s12 + $0x50] sm:$0xff]  }
  0x4e   : > { %1015 = vmatprep.subr.bf16.mxu0 %v1128_v53  ;;  %v1135_v60 = vld [vmem:[%s1423_s12 + $0xa0] sm:$0xff]   ;;  %v1138_v63 = vld [vmem:[%s1423_s12 + $0x98] sm:$0xff]   ;;  %v1141_v2 = vld [vmem:[%s1423_s12 + $0x90] sm:$0xff]  }
  0x4f   : > { %v1136_v61 = vld [vmem:[%s1423_s12 + $0x20] sm:$0xff]   ;;  %v1139_v0 = vld [vmem:[%s1423_s12 + $0x18] sm:$0xff]   ;;  %v1142_v3 = vld [vmem:[%s1423_s12 + $0x10] sm:$0xff]  }
  0x50   : > { %1047 = vmatpush3.bf16.msra.mxu1 %v1129_v54  ;;  %v1143_v4 = vld [vmem:[%s1423_s12 + $0x48] sm:$0xff]   ;;  %v533_v7 = vld [vmem:[%s1407_s27] sm:$0xff]  ;;  %v1146_v8 = vld [vmem:[%s1423_s12 + $0x40] sm:$0xff]  }
  0x51   : > { %1016 = vmatpush3.bf16.msra.mxu0 %v1130_v55  ;;  %1048 = vmatprep.subr.bf16.mxu1 %v1209_v50  ;;  %v1144_v5 = vld [vmem:[%s1423_s12 + $0x88] sm:$0xff]   ;;  %v981_v9 = vcombine.high %v533_v7, %v533_v7  ;;  %v1147_v10 = vld [vmem:[%s1423_s12 + $0x80] sm:$0xff]   ;;  %v980_v13 = vcombine.low %v533_v7, %v533_v7  ;;  %v532_v20 = vld [vmem:[#allocation2] sm:$0xff] }
  0x52   : > { %1017 = vmatprep.subr.bf16.mxu0 %v1131_v56  ;;  %v1145_v6 = vld [vmem:[%s1423_s12 + $0x8] sm:$0xff]   ;;  %v1148_v11 = vld [vmem:[%s1423_s12] sm:$0xff]  }
  0x53   : > { %770 = vmatprep.mubr.bf16.mxu0 %v981_v9  ;;  %v1151_v12 = vld [vmem:[%s1407_s27 + $0x8] ss:$0 sps:$4 sm:$0xff]  }
  0x54   : > { %1049 = vmatpush3.bf16.msra.mxu1 %v1132_v57 }
  0x55   : > { %1018 = vmatpush3.bf16.msra.mxu0 %v1133_v58  ;;  %1050 = vmatprep.subr.bf16.mxu1 %v1209_v50 }
  0x56   : > { %1019 = vmatprep.subr.bf16.mxu0 %v1134_v59 }
  0x58   : > { %1051 = vmatpush3.bf16.msra.mxu1 %v1135_v60 }
  0x59   : > { %1020 = vmatpush3.bf16.msra.mxu0 %v1136_v61  ;;  %1052 = vmatprep.subr.bf16.mxu1 %v1209_v50 }
  0x5a   : > { %1021 = vmatprep.subr.bf16.mxu0 %v1137_v62 }
  0x5c   : > { %1053 = vmatpush3.bf16.msra.mxu1 %v1138_v63 }
  0x5d   : > { %1022 = vmatpush3.bf16.msra.mxu0 %v1139_v0  ;;  %1054 = vmatprep.subr.bf16.mxu1 %v1209_v50 }
  0x5e   : > { %1023 = vmatprep.subr.bf16.mxu0 %v1140_v1 }
  0x60   : > { %1055 = vmatpush3.bf16.msra.mxu1 %v1141_v2 }
  0x61   : > { %1024 = vmatpush3.bf16.msra.mxu0 %v1142_v3  ;;  %1056 = vmatprep.subr.bf16.mxu1 %v1209_v50 }
  0x62   : > { %1025 = vmatprep.subr.bf16.mxu0 %v1143_v4 }
  0x64   : > { %1057 = vmatpush3.bf16.msra.mxu1 %v1144_v5 }
  0x65   : > { %1026 = vmatpush3.bf16.msra.mxu0 %v1145_v6  ;;  %1058 = vmatprep.subr.bf16.mxu1 %v1209_v50 }
  0x66   : > { %1027 = vmatprep.subr.bf16.mxu0 %v1146_v8 }
  0x68   : > { %1059 = vmatpush3.bf16.msra.mxu1 %v1147_v10 }
  0x69   : > { %1028 = vmatpush3.bf16.msra.mxu0 %v1148_v11 }
  0x6b   : > { %1061 = vmatmul.mubr.bf16.vlgmr.msra.gmra.mxu1 %v1151_v12 }
  0x6c   : > { %771 = vmatmul.mubr.bf16.vlgmr.msra.gmra.mxu0 %v980_v13 }
 0x12b   : > { %v812_v14 = vpop.f32.mrf.mxu1 }
 0x12c   : > { %v1029_v15 = vpop.f32.mrf.mxu0 }
 0x12d   : > { %v1062_v16 = vpop.f32.mrf.mxu1 }
 0x12e   : > { %v1030_v17 = vpop.f32.mrf.mxu0 }
 0x12f   : > { %v1031_v18 = vadd.f32 %v1030_v17, %v1029_v15  ;;  %v815_v19 = vpop.f32.mrf.mxu1 }
 0x130   : > { %v1032_v21 = vpop.f32.mrf.mxu0 }
 0x131   : > { %v813_v22 = vadd.f32 %v1031_v18, %v812_v14  ;;  %v1063_v23 = vpop.f32.mrf.mxu1  ;;  %823 = sbr.rel (%p1007_p13) target bundleno = 324 (0x144), region = 85 }
 0x132   : > { %v1033_v24 = vpop.f32.mrf.mxu0 }
 0x133   : > { %v818_v25 = vadd.f32 %v813_v22, %v532_v20 }
 0x135   : > { %819 = vst [vmem:[#allocation2] sm:$0xff] %v818_v25 }
 0x136   : > { %v1008_v27 = vld [vmem:[%s514_s15] ss:$0 sm:$0xff] }
 0x137   : > { %v1009_v28 = vld [vmem:[%s517_s7] ss:$0 sm:$0xff] }
 0x13c   : > { %v824_v26 = vld [vmem:[#allocation2] sm:$0xff] }
 0x13d   : > { %v832_v29 = vmul.f32 %v1008_v27, %v824_v26 }
 0x13f   : > { %v840_v30 = vadd.f32 %v1009_v28, %v832_v29 }
 0x141   : > { %v841_v31 = vmax.f32 %v840_v30, 0.0 }
 0x143   : > { %842 = vst [vmem:[%s1421_s11] sm:$0xff] %v841_v31 }
 0x144 PF: > { %s14_s21 = sadd.s32 1, %s1206_s21   ;;  %s1490_s15 = smov %s1186_s16 }
 0x145   : > { %p11_p0 = scmp.ge.s32.totalorder %s14_s21, 8   ;;  %s1491_s16 = smov %s1287_s28 }
 0x146   : > { %s1492_s17 = smov %s1198_s19  ;;  %s1493_s18 = smov %s1202_s20 }
 0x147   : > { %s1494_s19 = smov %s1497_s22  ;;  %s1495_s20 = smov %s1501_s23 }
 0x148   :  { %13 = sbr.rel (!%p11_p0) target bundleno = 4 (0x4), region = 129 }

// kernel: _lambda_.30
= control target key start
LH: loop header
LB: loop body
LE: loop exit
PB: predicated region body
PF: predicated region fallthrough
CT: control target
= control target key end

     0   :  { %s818_s15 = smov 0   ;;  %s820_s16 = smov 0   ;;  %s911_s0 = inlined_call_operand.vmem [shape: bf16[8,128], index: 0, kind: input, shape index: {}]   ;;  %s912_s1 = inlined_call_operand.vmem [shape: bf16[128,256], index: 1, kind: input, shape index: {}]   ;;  %s913_s2 = inlined_call_operand.vmem [shape: f32[1,256], index: 2, kind: input, shape index: {}]   ;;  %s914_s3 = inlined_call_operand.vmem [shape: f32[1,256], index: 3, kind: input, shape index: {}]   ;;  %s915_s4 = inlined_call_operand.vmem [shape: f32[8,256], index: 4, kind: output, shape index: {}]  }
   0x1   :  { %s822_s17 = smov 0   ;;  %s824_s18 = smov 0  }
   0x2   :  { %s826_s19 = smov 0  }
   0x3 LB: > { %s29_s20 = sadd.s32 1, %s785_s18  ;;  %p77_p1 = scmp.ne.s32.totalorder %s777_s16, %s773_s15  ;;  %s789_s19 = sphi %s826_s19, %s14_s19   ;;  %s785_s18 = sphi %s824_s18, %s919_s18   ;;  %s781_s17 = sphi %s822_s17, %s918_s17   ;;  %s777_s16 = sphi %s820_s16, %s917_s16   ;;  %s773_s15 = sphi %s818_s15, %s916_s15  }
   0x4   : > { %p31_p0 = scmp.ge.s32.totalorder %s29_s20, 2  ;;  %p78_p2 = scmp.eq.s32.totalorder %s789_s19, 0 }
   0x5   : > { %s70_s22 = sadd.s32 1, %s777_s16  ;;  %p654_p5 = scmp.ge.s32.totalorder %s789_s19, 2 }
   0x6   : > { %s921_s20 = smov (%p31_p0, %s29_s20), 0  ;;  %p79_p3 = por %p78_p2, %p77_p1 }
   0x7   : > { %s66_s21 = ssub.s32 %s785_s18, %s921_s20  ;;  %193 = sbr.rel (%p654_p5) target bundleno = 26 (0x1a), region = 20 }
   0x8   : > { %p68_p4 = scmp.eq.s32.totalorder %s66_s21, 0 }
   0xa   : > { %s853_s23 = scalar_select %p68_p4, %s777_s16, %s70_s22  }
   0xc   : > { %196 = sbr.rel (!%p79_p3) target bundleno = 26 (0x1a), region = 24  ;;  %s198_s24 = sand.u32 (%p79_p3), 1, %s777_s16  }
   0xd   : > { %s656_s25 = sshll.u32 (%p79_p3), %s785_s18, 2  ;;  %s655_s26 = sshll.u32 (%p79_p3), %s198_s24, 6 }
   0xe   : > { %s861_s29 = scalar_lea.vmem (%p79_p3), %s912_s1, %s656_s25  ;;  %s200_s30 = scalar_lea.vmem (%p79_p3), [#allocation3], %s655_s26 }
   0xf   : > { %v222_v0 = vld [vmem:[%s861_s29] sm:$0xf] (%p79_p3)  ;;  %v224_v1 = vld [vmem:[%s861_s29 + $0x8] sm:$0xf] (%p79_p3)  ;;  %v226_v2 = vld [vmem:[%s861_s29 + $0x10] sm:$0xf] (%p79_p3) }
  0x10   : > { %223 = vst [vmem:[%s200_s30] sm:$0xf] (%p79_p3), %v222_v0  ;;  %225 = vst [vmem:[%s200_s30 + $0x4] sm:$0xf] (%p79_p3), %v224_v1  ;;  %v228_v3 = vld [vmem:[%s861_s29 + $0x18] sm:$0xf] (%p79_p3) }
  0x11   : > { %v230_v4 = vld [vmem:[%s861_s29 + $0x20] sm:$0xf]  ;;  %227 = vst [vmem:[%s200_s30 + $0x8] sm:$0xf] %v226_v2  ;;  %229 = vst [vmem:[%s200_s30 + $0xc] sm:$0xf] %v228_v3 }
  0x12   : > { %231 = vst [vmem:[%s200_s30 + $0x10] sm:$0xf] %v230_v4  ;;  %v232_v5 = vld [vmem:[%s861_s29 + $0x28] sm:$0xf]  ;;  %v234_v6 = vld [vmem:[%s861_s29 + $0x30] sm:$0xf] }
  0x13   : > { %v236_v7 = vld [vmem:[%s861_s29 + $0x38] sm:$0xf]  ;;  %233 = vst [vmem:[%s200_s30 + $0x14] sm:$0xf] %v232_v5  ;;  %235 = vst [vmem:[%s200_s30 + $0x18] sm:$0xf] %v234_v6 }
  0x14   : > { %237 = vst [vmem:[%s200_s30 + $0x1c] sm:$0xf] %v236_v7  ;;  %v238_v8 = vld [vmem:[%s861_s29 + $0x40] sm:$0xf]  ;;  %v240_v9 = vld [vmem:[%s861_s29 + $0x48] sm:$0xf] }
  0x15   : > { %v242_v10 = vld [vmem:[%s861_s29 + $0x50] sm:$0xf]  ;;  %239 = vst [vmem:[%s200_s30 + $0x20] sm:$0xf] %v238_v8  ;;  %241 = vst [vmem:[%s200_s30 + $0x24] sm:$0xf] %v240_v9 }
  0x16   : > { %243 = vst [vmem:[%s200_s30 + $0x28] sm:$0xf] %v242_v10  ;;  %v244_v11 = vld [vmem:[%s861_s29 + $0x58] sm:$0xf]  ;;  %v246_v12 = vld [vmem:[%s861_s29 + $0x60] sm:$0xf] }
  0x17   : > { %v248_v13 = vld [vmem:[%s861_s29 + $0x68] sm:$0xf]  ;;  %245 = vst [vmem:[%s200_s30 + $0x2c] sm:$0xf] %v244_v11  ;;  %247 = vst [vmem:[%s200_s30 + $0x30] sm:$0xf] %v246_v12 }
  0x18   : > { %249 = vst [vmem:[%s200_s30 + $0x34] sm:$0xf] %v248_v13  ;;  %v250_v14 = vld [vmem:[%s861_s29 + $0x70] sm:$0xf]  ;;  %v252_v15 = vld [vmem:[%s861_s29 + $0x78] sm:$0xf] }
  0x19   : > { %251 = vst [vmem:[%s200_s30 + $0x38] sm:$0xf] %v250_v14  ;;  %253 = vst [vmem:[%s200_s30 + $0x3c] sm:$0xf] %v252_v15 }
  0x1a PF: > { %p657_p6 = scmp.ge.s32.totalorder %s789_s19, 1  ;;  %p320_p7 = scmp.lt.s32.totalorder %s789_s19, 3 }
  0x1c   : > { %p321_p8 = pnand %p657_p6, %p320_p7 }
  0x1d   : > { %s327_s5 = sand.u32 (!%p321_p8), 1, %s773_s15   ;;  %p376_p9 = scmp.lt.s32.totalorder (!%p321_p8), %s781_s17, 1 }
  0x1e   : > { %324 = sbr.rel (%p321_p8) target bundleno = 267 (0x10b), region = 73  ;;  %s658_s6 = sshll.u32 (!%p321_p8), %s327_s5, 6 }
  0x1f   : > { %s329_s7 = scalar_lea.vmem (!%p321_p8), [#allocation3], %s658_s6 }
  0x23   : > { %v791_v16 = vmov 0.0   ;;  %vm792_vm0 = vmmov 0   ;;  %v743_v17 = vld [vmem:[%s329_s7 + $0x38] sm:$0xff]   ;;  %v744_v18 = vld [vmem:[%s329_s7 + $0x30] sm:$0xff]   ;;  %v745_v19 = vld [vmem:[%s329_s7 + $0x28] sm:$0xff]   ;;  %s923_s17 = smov (!%p376_p9, %s781_s17), 1 }
  0x24   : > { %681 = vmatprep.subr.bf16.mxu0 %v791_v16  ;;  %697 = vmatprep.mubr.msk.bf16.mxu0 %vm792_vm0, %v791_v16  ;;  %v746_v20 = vld [vmem:[%s329_s7 + $0x20] sm:$0xff]   ;;  %v747_v21 = vld [vmem:[%s329_s7 + $0x18] sm:$0xff]   ;;  %v748_v22 = vld [vmem:[%s329_s7 + $0x10] sm:$0xff]   ;;  %s378_s12 = scalar_lea.vmem %s913_s2, %s923_s17  ;;  %s381_s15 = scalar_lea.vmem %s914_s3, %s923_s17 }
  0x25   : > { %682 = vmatpush3.bf16.msra.mxu0 %v743_v17  ;;  %v749_v23 = vld [vmem:[%s329_s7 + $0x8] sm:$0xff]   ;;  %v750_v24 = vld [vmem:[%s329_s7] sm:$0xff]   ;;  %s659_s21 = sshll.u32 %s923_s17, 3 }
  0x26   : > { %683 = vmatprep.subr.bf16.mxu0 %v791_v16  ;;  %v397_v25 = vld [vmem:[%s911_s0] sm:$0xf]  ;;  %s389_s25 = scalar_lea.vmem %s915_s4, %s659_s21 }
  0x27   : > { %v668_v26 = vld [vmem:[%s378_s12] ss:$0 sm:$0xff] }
  0x28   : > { %v669_v28 = vld [vmem:[%s381_s15] ss:$0 sm:$0xff] }
  0x29   : > { %684 = vmatpush3.bf16.msra.mxu0 %v744_v18 }
  0x2a   : > { %685 = vmatprep.subr.bf16.mxu0 %v791_v16 }
  0x2d   : > { %686 = vmatpush3.bf16.msra.mxu0 %v745_v19 }
  0x2e   : > { %687 = vmatprep.subr.bf16.mxu0 %v791_v16 }
  0x31   : > { %688 = vmatpush3.bf16.msra.mxu0 %v746_v20 }
  0x32   : > { %689 = vmatprep.subr.bf16.mxu0 %v791_v16 }
  0x35   : > { %690 = vmatpush3.bf16.msra.mxu0 %v747_v21 }
  0x36   : > { %691 = vmatprep.subr.bf16.mxu0 %v791_v16 }
  0x39   : > { %692 = vmatpush3.bf16.msra.mxu0 %v748_v22 }
  0x3a   : > { %693 = vmatprep.subr.bf16.mxu0 %v791_v16 }
  0x3d   : > { %694 = vmatpush3.bf16.msra.mxu0 %v749_v23 }
  0x3e   : > { %695 = vmatprep.subr.bf16.mxu0 %v791_v16 }
  0x41   : > { %696 = vmatpush3.bf16.msra.mxu0 %v750_v24 }
  0x44   : > { %698 = vmatmul.mubr.bf16.vlgmr.msra.gmra.mxu0 %v397_v25 }
 0x104   : > { %v496_v27 = vpop.f32.mrf.mxu0 }
 0x105   : > { %v515_v29 = vmul.f32 %v668_v26, %v496_v27 }
 0x106   : > { %v699_v30 = vpop.f32.mrf.mxu0 }
 0x107   : > { %v523_v31 = vadd.f32 %v669_v28, %v515_v29 }
 0x108   : > { %v499_v32 = vpop.f32.mrf.mxu0 }
 0x109   : > { %524 = vst [vmem:[%s389_s25] sm:$0xff] %v523_v31 }
 0x10a   : > { %v700_v33 = vpop.f32.mrf.mxu0 }
 0x10b PF: > { %s14_s19 = sadd.s32 1, %s789_s19   ;;  %s916_s15 = smov %s777_s16 }
 0x10c   : > { %p11_p10 = scmp.ge.s32.totalorder %s14_s19, 4   ;;  %s917_s16 = smov %s853_s23 }
 0x10d   : > { %s918_s17 = smov %s785_s18  ;;  %s919_s18 = smov %s921_s20 }
 0x10e   :  { %13 = sbr.rel (!%p11_p10) target bundleno = 3 (0x3), region = 129 }

// kernel: _lambda_.32
= control target key start
LH: loop header
LB: loop body
LE: loop exit
PB: predicated region body
PF: predicated region fallthrough
CT: control target
= control target key end

     0   :  { %s1575_s0 = inlined_call_operand.vmem [shape: bf16[8,2304], index: 0, kind: input, shape index: {}]   ;;  %s1576_s1 = inlined_call_operand.vmem [shape: bf16[2304,256], index: 1, kind: input, shape index: {}]   ;;  %s1577_s2 = inlined_call_operand.vmem [shape: f32[1,256], index: 2, kind: input, shape index: {}]   ;;  %s1578_s3 = inlined_call_operand.vmem [shape: f32[1,256], index: 3, kind: input, shape index: {}]   ;;  %s1579_s4 = inlined_call_operand.vmem [shape: f32[8,256], index: 4, kind: input, shape index: {}]   ;;  %s1580_s5 = inlined_call_operand.vmem [shape: f32[8,256], index: 5, kind: output, shape index: {}]  }
   0x1   :  { %1581 = sst [smem:[#allocation4_spill]] %s1576_s1 }
   0x2   :  { %s1320_s18 = smov 0   ;;  %s1322_s19 = smov 0  }
   0x3   :  { %s1324_s20 = smov 0   ;;  %s1326_s21 = smov 0  }
   0x4   :  { %s1328_s22 = smov 0   ;;  %s1330_s23 = smov 0  }
   0x5   :  { %s1332_s24 = smov 0  }
   0x6 LB: > { %s27_s25 = sadd.s32 1, %s1277_s22  ;;  %s30_s26 = sadd.s32 1, %s1281_s23  ;;  %s1285_s24 = sphi %s1332_s24, %s15_s24   ;;  %s1281_s23 = sphi %s1330_s23, %s1588_s23   ;;  %s1277_s22 = sphi %s1328_s22, %s1587_s22   ;;  %s1273_s21 = sphi %s1326_s21, %s1586_s21   ;;  %s1269_s20 = sphi %s1324_s20, %s1585_s20   ;;  %s1265_s19 = sphi %s1322_s19, %s1584_s19   ;;  %s1261_s18 = sphi %s1320_s18, %s1583_s18  }
   0x7   : > { %p28_p0 = scmp.ge.s32.totalorder %s27_s25, 6  ;;  %p78_p1 = scmp.ne.s32.totalorder %s1265_s19, %s1261_s18 }
   0x8   : > { %p79_p2 = scmp.eq.s32.totalorder %s1285_s24, 0  ;;  %s71_s30 = sadd.s32 1, %s1265_s19 }
   0x9   : > { %s1590_s25 = smov (%p28_p0, %s27_s25), 0  ;;  %s1592_s26 = smov (!%p28_p0, %s30_s26), %s1281_s23 }
   0xa   : > { %p80_p3 = por %p79_p2, %p78_p1  ;;  %p32_p4 = scmp.ge.s32.totalorder %s1592_s26, 2 }
   0xb   : > { %s66_s27 = ssub.s32 %s1277_s22, %s1590_s25  ;;  %p1051_p6 = scmp.ge.s32.totalorder %s1285_s24, 12 }
   0xc   : > { %s1594_s26 = smov (%p32_p4, %s1592_s26), 0 }
   0xd   : > { %s67_s28 = ssub.s32 %s1281_s23, %s1594_s26  ;;  %212 = sbr.rel (%p1051_p6) target bundleno = 59 (0x3b), region = 16 }
   0xe   : > { %s68_s29 = sor.u32 %s67_s28, %s66_s27 }
   0xf   : > { %p69_p5 = scmp.eq.s32.totalorder %s68_s29, 0 }
  0x11   : > { %s1371_s6 = scalar_select %p69_p5, %s1265_s19, %s71_s30  }
  0x12   : > { %228 = sbr.rel (!%p80_p3) target bundleno = 59 (0x3b), region = 24  ;;  %s230_s7 = sand.u32 (%p80_p3), 1, %s1265_s19  }
  0x13   : > { %s1091_s8 = smul.u32 (%p80_p3), 96, %s1277_s22  ;;  %s1582_s1 = sld [smem:[#allocation4_spill]] (%p80_p3) }
  0x14   : > { %s1143_s9 = smul.u32 (%p80_p3), 192, %s230_s7 }
  0x15   : > { %s235_s10 = sadd.s32 (%p80_p3), %s1281_s23, %s1091_s8 }
  0x16   : > { %s1053_s11 = sshll.u32 (%p80_p3), %s235_s10, 2  ;;  %s1385_s15 = scalar_lea.vmem (%p80_p3), [#allocation3], %s1143_s9 }
  0x19   : > { %s1380_s14 = scalar_lea.vmem %s1582_s1, %s1053_s11 }
  0x1a   : > { %v254_v0 = vld [vmem:[%s1380_s14] sm:$0xf]  ;;  %v256_v1 = vld [vmem:[%s1380_s14 + $0x8] sm:$0xf]  ;;  %v258_v2 = vld [vmem:[%s1380_s14 + $0x10] sm:$0xf] }
  0x1b   : > { %255 = vst [vmem:[%s1385_s15] sm:$0xf] %v254_v0  ;;  %257 = vst [vmem:[%s1385_s15 + $0x4] sm:$0xf] %v256_v1  ;;  %v260_v3 = vld [vmem:[%s1380_s14 + $0x18] sm:$0xf] }
  0x1c   : > { %259 = vst [vmem:[%s1385_s15 + $0x8] sm:$0xf] %v258_v2  ;;  %v262_v4 = vld [vmem:[%s1380_s14 + $0x20] sm:$0xf]  ;;  %v264_v5 = vld [vmem:[%s1380_s14 + $0x28] sm:$0xf] }
  0x1d   : > { %261 = vst [vmem:[%s1385_s15 + $0xc] sm:$0xf] %v260_v3  ;;  %263 = vst [vmem:[%s1385_s15 + $0x10] sm:$0xf] %v262_v4  ;;  %v266_v6 = vld [vmem:[%s1380_s14 + $0x30] sm:$0xf] }
  0x1e   : > { %265 = vst [vmem:[%s1385_s15 + $0x14] sm:$0xf] %v264_v5  ;;  %v268_v7 = vld [vmem:[%s1380_s14 + $0x38] sm:$0xf]  ;;  %v270_v8 = vld [vmem:[%s1380_s14 + $0x40] sm:$0xf] }
  0x1f   : > { %267 = vst [vmem:[%s1385_s15 + $0x18] sm:$0xf] %v266_v6  ;;  %269 = vst [vmem:[%s1385_s15 + $0x1c] sm:$0xf] %v268_v7  ;;  %v272_v9 = vld [vmem:[%s1380_s14 + $0x48] sm:$0xf] }
  0x20   : > { %271 = vst [vmem:[%s1385_s15 + $0x20] sm:$0xf] %v270_v8  ;;  %v274_v10 = vld [vmem:[%s1380_s14 + $0x50] sm:$0xf]  ;;  %v276_v11 = vld [vmem:[%s1380_s14 + $0x58] sm:$0xf] }
  0x21   : > { %273 = vst [vmem:[%s1385_s15 + $0x24] sm:$0xf] %v272_v9  ;;  %275 = vst [vmem:[%s1385_s15 + $0x28] sm:$0xf] %v274_v10  ;;  %v278_v12 = vld [vmem:[%s1380_s14 + $0x60] sm:$0xf] }
  0x22   : > { %277 = vst [vmem:[%s1385_s15 + $0x2c] sm:$0xf] %v276_v11  ;;  %v280_v13 = vld [vmem:[%s1380_s14 + $0x68] sm:$0xf]  ;;  %v282_v14 = vld [vmem:[%s1380_s14 + $0x70] sm:$0xf] }
  0x23   : > { %279 = vst [vmem:[%s1385_s15 + $0x30] sm:$0xf] %v278_v12  ;;  %281 = vst [vmem:[%s1385_s15 + $0x34] sm:$0xf] %v280_v13  ;;  %v284_v15 = vld [vmem:[%s1380_s14 + $0x78] sm:$0xf] }
  0x24   : > { %283 = vst [vmem:[%s1385_s15 + $0x38] sm:$0xf] %v282_v14  ;;  %v286_v16 = vld [vmem:[%s1380_s14 + $0x80] sm:$0xf]  ;;  %v288_v17 = vld [vmem:[%s1380_s14 + $0x88] sm:$0xf] }
  0x25   : > { %285 = vst [vmem:[%s1385_s15 + $0x3c] sm:$0xf] %v284_v15  ;;  %287 = vst [vmem:[%s1385_s15 + $0x40] sm:$0xf] %v286_v16  ;;  %v290_v18 = vld [vmem:[%s1380_s14 + $0x90] sm:$0xf] }
  0x26   : > { %289 = vst [vmem:[%s1385_s15 + $0x44] sm:$0xf] %v288_v17  ;;  %v292_v19 = vld [vmem:[%s1380_s14 + $0x98] sm:$0xf]  ;;  %v294_v20 = vld [vmem:[%s1380_s14 + $0xa0] sm:$0xf] }
  0x27   : > { %291 = vst [vmem:[%s1385_s15 + $0x48] sm:$0xf] %v290_v18  ;;  %293 = vst [vmem:[%s1385_s15 + $0x4c] sm:$0xf] %v292_v19  ;;  %v296_v21 = vld [vmem:[%s1380_s14 + $0xa8] sm:$0xf] }
  0x28   : > { %295 = vst [vmem:[%s1385_s15 + $0x50] sm:$0xf] %v294_v20  ;;  %v298_v22 = vld [vmem:[%s1380_s14 + $0xb0] sm:$0xf]  ;;  %v300_v23 = vld [vmem:[%s1380_s14 + $0xb8] sm:$0xf] }
  0x29   : > { %297 = vst [vmem:[%s1385_s15 + $0x54] sm:$0xf] %v296_v21  ;;  %299 = vst [vmem:[%s1385_s15 + $0x58] sm:$0xf] %v298_v22  ;;  %v302_v24 = vld [vmem:[%s1380_s14 + $0xc0] sm:$0xf] }
  0x2a   : > { %301 = vst [vmem:[%s1385_s15 + $0x5c] sm:$0xf] %v300_v23  ;;  %v304_v25 = vld [vmem:[%s1380_s14 + $0xc8] sm:$0xf]  ;;  %v306_v26 = vld [vmem:[%s1380_s14 + $0xd0] sm:$0xf] }
  0x2b   : > { %303 = vst [vmem:[%s1385_s15 + $0x60] sm:$0xf] %v302_v24  ;;  %305 = vst [vmem:[%s1385_s15 + $0x64] sm:$0xf] %v304_v25  ;;  %v308_v27 = vld [vmem:[%s1380_s14 + $0xd8] sm:$0xf] }
  0x2c   : > { %307 = vst [vmem:[%s1385_s15 + $0x68] sm:$0xf] %v306_v26  ;;  %v310_v28 = vld [vmem:[%s1380_s14 + $0xe0] sm:$0xf]  ;;  %v312_v29 = vld [vmem:[%s1380_s14 + $0xe8] sm:$0xf] }
  0x2d   : > { %309 = vst [vmem:[%s1385_s15 + $0x6c] sm:$0xf] %v308_v27  ;;  %311 = vst [vmem:[%s1385_s15 + $0x70] sm:$0xf] %v310_v28  ;;  %v314_v30 = vld [vmem:[%s1380_s14 + $0xf0] sm:$0xf] }
  0x2e   : > { %313 = vst [vmem:[%s1385_s15 + $0x74] sm:$0xf] %v312_v29  ;;  %v316_v31 = vld [vmem:[%s1380_s14 + $0xf8] sm:$0xf]  ;;  %v318_v32 = vld [vmem:[%s1380_s14 + $0x100] sm:$0xf] }
  0x2f   : > { %315 = vst [vmem:[%s1385_s15 + $0x78] sm:$0xf] %v314_v30  ;;  %317 = vst [vmem:[%s1385_s15 + $0x7c] sm:$0xf] %v316_v31  ;;  %v320_v33 = vld [vmem:[%s1380_s14 + $0x108] sm:$0xf] }
  0x30   : > { %319 = vst [vmem:[%s1385_s15 + $0x80] sm:$0xf] %v318_v32  ;;  %v322_v34 = vld [vmem:[%s1380_s14 + $0x110] sm:$0xf]  ;;  %v324_v35 = vld [vmem:[%s1380_s14 + $0x118] sm:$0xf] }
  0x31   : > { %321 = vst [vmem:[%s1385_s15 + $0x84] sm:$0xf] %v320_v33  ;;  %323 = vst [vmem:[%s1385_s15 + $0x88] sm:$0xf] %v322_v34  ;;  %v326_v36 = vld [vmem:[%s1380_s14 + $0x120] sm:$0xf] }
  0x32   : > { %325 = vst [vmem:[%s1385_s15 + $0x8c] sm:$0xf] %v324_v35  ;;  %v328_v37 = vld [vmem:[%s1380_s14 + $0x128] sm:$0xf]  ;;  %v330_v38 = vld [vmem:[%s1380_s14 + $0x130] sm:$0xf] }
  0x33   : > { %327 = vst [vmem:[%s1385_s15 + $0x90] sm:$0xf] %v326_v36  ;;  %329 = vst [vmem:[%s1385_s15 + $0x94] sm:$0xf] %v328_v37  ;;  %v332_v39 = vld [vmem:[%s1380_s14 + $0x138] sm:$0xf] }
  0x34   : > { %331 = vst [vmem:[%s1385_s15 + $0x98] sm:$0xf] %v330_v38  ;;  %v334_v40 = vld [vmem:[%s1380_s14 + $0x140] sm:$0xf]  ;;  %v336_v41 = vld [vmem:[%s1380_s14 + $0x148] sm:$0xf] }
  0x35   : > { %333 = vst [vmem:[%s1385_s15 + $0x9c] sm:$0xf] %v332_v39  ;;  %335 = vst [vmem:[%s1385_s15 + $0xa0] sm:$0xf] %v334_v40  ;;  %v338_v42 = vld [vmem:[%s1380_s14 + $0x150] sm:$0xf] }
  0x36   : > { %337 = vst [vmem:[%s1385_s15 + $0xa4] sm:$0xf] %v336_v41  ;;  %v340_v43 = vld [vmem:[%s1380_s14 + $0x158] sm:$0xf]  ;;  %v342_v44 = vld [vmem:[%s1380_s14 + $0x160] sm:$0xf] }
  0x37   : > { %339 = vst [vmem:[%s1385_s15 + $0xa8] sm:$0xf] %v338_v42  ;;  %341 = vst [vmem:[%s1385_s15 + $0xac] sm:$0xf] %v340_v43  ;;  %v344_v45 = vld [vmem:[%s1380_s14 + $0x168] sm:$0xf] }
  0x38   : > { %343 = vst [vmem:[%s1385_s15 + $0xb0] sm:$0xf] %v342_v44  ;;  %v346_v46 = vld [vmem:[%s1380_s14 + $0x170] sm:$0xf]  ;;  %v348_v47 = vld [vmem:[%s1380_s14 + $0x178] sm:$0xf] }
  0x39   : > { %345 = vst [vmem:[%s1385_s15 + $0xb4] sm:$0xf] %v344_v45  ;;  %347 = vst [vmem:[%s1385_s15 + $0xb8] sm:$0xf] %v346_v46 }
  0x3a   : > { %349 = vst [vmem:[%s1385_s15 + $0xbc] sm:$0xf] %v348_v47 }
  0x3b PF: > { %p1054_p7 = scmp.ge.s32.totalorder %s1285_s24, 1  ;;  %p491_p8 = scmp.lt.s32.totalorder %s1285_s24, 13 }
  0x3d   : > { %p492_p9 = pnand %p1054_p7, %p491_p8 }
  0x3e   : > { %s498_s16 = sand.u32 (!%p492_p9), 1, %s1261_s18   ;;  %s551_s17 = smul.u32 (!%p492_p9), 3, %s1269_s20 }
  0x3f   : > { %495 = sbr.rel (%p492_p9) target bundleno = 332 (0x14c), region = 77  ;;  %p562_p10 = scmp.lt.s32.totalorder (!%p492_p9), %s1273_s21, 1 }
  0x40   : > { %s1144_s27 = smul.u32 (!%p492_p9), 192, %s498_s16  ;;  %p554_p11 = scmp.lt.s32.totalorder (!%p492_p9), %s551_s17, 17 }
  0x41   : > { %p1058_p12 = scmp.ne.s32.totalorder (!%p492_p9), %s1269_s20, 0 }
  0x44   : > { %s1596_s17 = smov (!%p554_p11, %s551_s17), 17  ;;  %s1598_s21 = smov (!%p562_p10, %s1273_s21), 1 }
  0x45   : > { %s1055_s28 = sshll.u32 %s1596_s17, 2  ;;  %s564_s18 = scalar_lea.vmem %s1577_s2, %s1598_s21 }
  0x46   : > { %s1491_s7 = scalar_lea.vmem %s1575_s0, %s1055_s28  ;;  %s567_s12 = scalar_lea.vmem %s1578_s3, %s1598_s21 }
  0x47   : > { %s1056_s13 = sshll.u32 %s1598_s21, 3  ;;  %s1512_s28 = scalar_lea.vmem [#allocation3], %s1144_s27 }
  0x48   : > { %s1505_s16 = scalar_lea.vmem %s1579_s4, %s1056_s13  ;;  %s1510_s29 = scalar_lea.vmem %s1580_s5, %s1056_s13 }
  0x49   : > { %588 = sbr.rel (%p1058_p12) target bundleno = 80 (0x50), region = 85 }
  0x4e   : > { %v1287_v48 = vmov 0.0  }
  0x4f   : > { %589 = vst [vmem:[#allocation2] sm:$0xff] %v1287_v48 }
  0x50 PF: > { %v1204_v49 = vld [vmem:[%s1512_s28 + $0x78] sm:$0xff]   ;;  %v1288_v50 = vmov 0.0   ;;  %vm1289_vm0 = vmmov 0   ;;  %v1207_v53 = vld [vmem:[%s1512_s28 + $0x70] sm:$0xff]   ;;  %v1210_v56 = vld [vmem:[%s1512_s28 + $0x68] sm:$0xff]   ;;  %p1086_p13 = scmp.ne.s32.totalorder %s1269_s20, 5 }
  0x51   : > { %1123 = vmatprep.subr.bf16.mxu1 %v1288_v50  ;;  %v1205_v51 = vld [vmem:[%s1512_s28 + $0xb8] sm:$0xff]   ;;  %1092 = vmatprep.subr.bf16.mxu0 %v1204_v49  ;;  %v1208_v54 = vld [vmem:[%s1512_s28 + $0xb0] sm:$0xff]   ;;  %v1211_v57 = vld [vmem:[%s1512_s28 + $0xa8] sm:$0xff]  }
  0x52   : > { %v1206_v52 = vld [vmem:[%s1512_s28 + $0x38] sm:$0xff]   ;;  %1139 = vmatprep.mubr.msk.bf16.mxu1 %vm1289_vm0, %v1288_v50  ;;  %1124 = vmatpush3.bf16.msra.mxu1 %v1205_v51  ;;  %v1209_v55 = vld [vmem:[%s1512_s28 + $0x30] sm:$0xff]   ;;  %v1212_v58 = vld [vmem:[%s1512_s28 + $0x28] sm:$0xff]  }
  0x53   : > { %1093 = vmatpush3.bf16.msra.mxu0 %v1206_v52  ;;  %1125 = vmatprep.subr.bf16.mxu1 %v1288_v50  ;;  %v1213_v59 = vld [vmem:[%s1512_s28 + $0x60] sm:$0xff]   ;;  %v1216_v62 = vld [vmem:[%s1512_s28 + $0x58] sm:$0xff]   ;;  %v1219_v1 = vld [vmem:[%s1512_s28 + $0x50] sm:$0xff]  }
  0x54   : > { %1094 = vmatprep.subr.bf16.mxu0 %v1207_v53  ;;  %v1214_v60 = vld [vmem:[%s1512_s28 + $0xa0] sm:$0xff]   ;;  %v1217_v63 = vld [vmem:[%s1512_s28 + $0x98] sm:$0xff]   ;;  %v1220_v2 = vld [vmem:[%s1512_s28 + $0x90] sm:$0xff]  }
  0x55   : > { %v1215_v61 = vld [vmem:[%s1512_s28 + $0x20] sm:$0xff]   ;;  %v1218_v0 = vld [vmem:[%s1512_s28 + $0x18] sm:$0xff]   ;;  %v1221_v3 = vld [vmem:[%s1512_s28 + $0x10] sm:$0xff]  }
  0x56   : > { %1126 = vmatpush3.bf16.msra.mxu1 %v1208_v54  ;;  %v1222_v4 = vld [vmem:[%s1512_s28 + $0x48] sm:$0xff]   ;;  %v591_v7 = vld [vmem:[%s1491_s7] sm:$0xff]  ;;  %v1225_v8 = vld [vmem:[%s1512_s28 + $0x40] sm:$0xff]  }
  0x57   : > { %1095 = vmatpush3.bf16.msra.mxu0 %v1209_v55  ;;  %1127 = vmatprep.subr.bf16.mxu1 %v1288_v50  ;;  %v1223_v5 = vld [vmem:[%s1512_s28 + $0x88] sm:$0xff]   ;;  %v1060_v9 = vcombine.high %v591_v7, %v591_v7  ;;  %v1226_v10 = vld [vmem:[%s1512_s28 + $0x80] sm:$0xff]   ;;  %v1059_v13 = vcombine.low %v591_v7, %v591_v7  ;;  %v590_v20 = vld [vmem:[#allocation2] sm:$0xff] }
  0x58   : > { %1096 = vmatprep.subr.bf16.mxu0 %v1210_v56  ;;  %v1224_v6 = vld [vmem:[%s1512_s28 + $0x8] sm:$0xff]   ;;  %v1227_v11 = vld [vmem:[%s1512_s28] sm:$0xff]  }
  0x59   : > { %828 = vmatprep.mubr.bf16.mxu0 %v1060_v9  ;;  %v1230_v12 = vld [vmem:[%s1491_s7 + $0x8] ss:$0 sps:$4 sm:$0xff]  }
  0x5a   : > { %1128 = vmatpush3.bf16.msra.mxu1 %v1211_v57 }
  0x5b   : > { %1097 = vmatpush3.bf16.msra.mxu0 %v1212_v58  ;;  %1129 = vmatprep.subr.bf16.mxu1 %v1288_v50 }
  0x5c   : > { %1098 = vmatprep.subr.bf16.mxu0 %v1213_v59 }
  0x5e   : > { %1130 = vmatpush3.bf16.msra.mxu1 %v1214_v60 }
  0x5f   : > { %1099 = vmatpush3.bf16.msra.mxu0 %v1215_v61  ;;  %1131 = vmatprep.subr.bf16.mxu1 %v1288_v50 }
  0x60   : > { %1100 = vmatprep.subr.bf16.mxu0 %v1216_v62 }
  0x62   : > { %1132 = vmatpush3.bf16.msra.mxu1 %v1217_v63 }
  0x63   : > { %1101 = vmatpush3.bf16.msra.mxu0 %v1218_v0  ;;  %1133 = vmatprep.subr.bf16.mxu1 %v1288_v50 }
  0x64   : > { %1102 = vmatprep.subr.bf16.mxu0 %v1219_v1 }
  0x66   : > { %1134 = vmatpush3.bf16.msra.mxu1 %v1220_v2 }
  0x67   : > { %1103 = vmatpush3.bf16.msra.mxu0 %v1221_v3  ;;  %1135 = vmatprep.subr.bf16.mxu1 %v1288_v50 }
  0x68   : > { %1104 = vmatprep.subr.bf16.mxu0 %v1222_v4 }
  0x6a   : > { %1136 = vmatpush3.bf16.msra.mxu1 %v1223_v5 }
  0x6b   : > { %1105 = vmatpush3.bf16.msra.mxu0 %v1224_v6  ;;  %1137 = vmatprep.subr.bf16.mxu1 %v1288_v50 }
  0x6c   : > { %1106 = vmatprep.subr.bf16.mxu0 %v1225_v8 }
  0x6e   : > { %1138 = vmatpush3.bf16.msra.mxu1 %v1226_v10 }
  0x6f   : > { %1107 = vmatpush3.bf16.msra.mxu0 %v1227_v11 }
  0x71   : > { %1140 = vmatmul.mubr.bf16.vlgmr.msra.gmra.mxu1 %v1230_v12 }
  0x72   : > { %829 = vmatmul.mubr.bf16.vlgmr.msra.gmra.mxu0 %v1059_v13 }
 0x131   : > { %v870_v14 = vpop.f32.mrf.mxu1 }
 0x132   : > { %v1108_v15 = vpop.f32.mrf.mxu0 }
 0x133   : > { %v1141_v16 = vpop.f32.mrf.mxu1 }
 0x134   : > { %v1109_v17 = vpop.f32.mrf.mxu0 }
 0x135   : > { %v1110_v18 = vadd.f32 %v1109_v17, %v1108_v15  ;;  %v873_v19 = vpop.f32.mrf.mxu1 }
 0x136   : > { %v1111_v21 = vpop.f32.mrf.mxu0 }
 0x137   : > { %v871_v22 = vadd.f32 %v1110_v18, %v870_v14  ;;  %v1142_v23 = vpop.f32.mrf.mxu1  ;;  %881 = sbr.rel (%p1086_p13) target bundleno = 332 (0x14c), region = 89 }
 0x138   : > { %v1112_v24 = vpop.f32.mrf.mxu0 }
 0x139   : > { %v876_v25 = vadd.f32 %v871_v22, %v590_v20 }
 0x13b   : > { %877 = vst [vmem:[#allocation2] sm:$0xff] %v876_v25 }
 0x13c   : > { %v1087_v27 = vld [vmem:[%s564_s18] ss:$0 sm:$0xff] }
 0x13d   : > { %v1088_v28 = vld [vmem:[%s567_s12] ss:$0 sm:$0xff] }
 0x13e   : > { %v899_v30 = vld [vmem:[%s1505_s16] sm:$0xff] }
 0x142   : > { %v882_v26 = vld [vmem:[#allocation2] sm:$0xff] }
 0x143   : > { %v890_v29 = vmul.f32 %v1087_v27, %v882_v26 }
 0x145   : > { %v898_v31 = vadd.f32 %v1088_v28, %v890_v29 }
 0x147   : > { %v900_v32 = vadd.f32 %v899_v30, %v898_v31 }
 0x149   : > { %v901_v33 = vmax.f32 %v900_v32, 0.0 }
 0x14b   : > { %902 = vst [vmem:[%s1510_s29] sm:$0xff] %v901_v33 }
 0x14c PF: > { %s15_s24 = sadd.s32 1, %s1285_s24   ;;  %s1583_s18 = smov %s1265_s19 }
 0x14d   : > { %p12_p0 = scmp.ge.s32.totalorder %s15_s24, 14   ;;  %s1584_s19 = smov %s1371_s6 }
 0x14e   : > { %s1585_s20 = smov %s1277_s22  ;;  %s1586_s21 = smov %s1281_s23 }
 0x14f   : > { %s1587_s22 = smov %s1590_s25  ;;  %s1588_s23 = smov %s1594_s26 }
 0x150   :  { %14 = sbr.rel (!%p12_p0) target bundleno = 6 (0x6), region = 136 }

// kernel: _lambda_.33
= control target key start
LH: loop header
LB: loop body
LE: loop exit
PB: predicated region body
PF: predicated region fallthrough
CT: control target
= control target key end

     0   :  { %s1236_s15 = smov 0   ;;  %s1238_s16 = smov 0   ;;  %s1485_s0 = inlined_call_operand.vmem [shape: bf16[8,2304], index: 0, kind: input, shape index: {}]   ;;  %s1486_s1 = inlined_call_operand.vmem [shape: bf16[2304,256], index: 1, kind: input, shape index: {}]   ;;  %s1487_s2 = inlined_call_operand.vmem [shape: f32[1,256], index: 2, kind: input, shape index: {}]   ;;  %s1488_s3 = inlined_call_operand.vmem [shape: f32[1,256], index: 3, kind: input, shape index: {}]   ;;  %s1489_s4 = inlined_call_operand.vmem [shape: f32[8,256], index: 4, kind: output, shape index: {}]  }
   0x1   :  { %s1240_s17 = smov 0   ;;  %s1242_s18 = smov 0  }
   0x2   :  { %s1244_s19 = smov 0   ;;  %s1246_s20 = smov 0  }
   0x3   :  { %s1248_s21 = smov 0  }
   0x4 LB: > { %s26_s22 = sadd.s32 1, %s1198_s19  ;;  %s29_s23 = sadd.s32 1, %s1202_s20  ;;  %s1206_s21 = sphi %s1248_s21, %s14_s21   ;;  %s1202_s20 = sphi %s1246_s20, %s1495_s20   ;;  %s1198_s19 = sphi %s1244_s19, %s1494_s19   ;;  %s1194_s18 = sphi %s1242_s18, %s1493_s18   ;;  %s1190_s17 = sphi %s1240_s17, %s1492_s17   ;;  %s1186_s16 = sphi %s1238_s16, %s1491_s16   ;;  %s1182_s15 = sphi %s1236_s15, %s1490_s15  }
   0x5   : > { %p27_p0 = scmp.ge.s32.totalorder %s26_s22, 6  ;;  %p77_p1 = scmp.ne.s32.totalorder %s1186_s16, %s1182_s15 }
   0x6   : > { %p78_p2 = scmp.eq.s32.totalorder %s1206_s21, 0  ;;  %s70_s27 = sadd.s32 1, %s1186_s16 }
   0x7   : > { %s1497_s22 = smov (%p27_p0, %s26_s22), 0  ;;  %s1499_s23 = smov (!%p27_p0, %s29_s23), %s1202_s20 }
   0x8   : > { %p79_p3 = por %p78_p2, %p77_p1  ;;  %p31_p4 = scmp.ge.s32.totalorder %s1499_s23, 2 }
   0x9   : > { %s65_s24 = ssub.s32 %s1198_s19, %s1497_s22  ;;  %p973_p6 = scmp.ge.s32.totalorder %s1206_s21, 12 }
   0xa   : > { %s1501_s23 = smov (%p31_p4, %s1499_s23), 0 }
   0xb   : > { %s66_s25 = ssub.s32 %s1202_s20, %s1501_s23  ;;  %183 = sbr.rel (%p973_p6) target bundleno = 55 (0x37), region = 16 }
   0xc   : > { %s67_s26 = sor.u32 %s66_s25, %s65_s24 }
   0xd   : > { %p68_p5 = scmp.eq.s32.totalorder %s67_s26, 0 }
   0xf   : > { %s1287_s28 = scalar_select %p68_p5, %s1186_s16, %s70_s27  }
  0x10   : > { %199 = sbr.rel (!%p79_p3) target bundleno = 55 (0x37), region = 24  ;;  %s201_s29 = sand.u32 (%p79_p3), 1, %s1186_s16  }
  0x11   : > { %s1012_s30 = smul.u32 (%p79_p3), 96, %s1198_s19 }
  0x12   : > { %s1064_s5 = smul.u32 (%p79_p3), 192, %s201_s29 }
  0x13   : > { %s206_s6 = sadd.s32 (%p79_p3), %s1202_s20, %s1012_s30 }
  0x14   : > { %s975_s7 = sshll.u32 (%p79_p3), %s206_s6, 2  ;;  %s1301_s11 = scalar_lea.vmem (%p79_p3), [#allocation3], %s1064_s5 }
  0x15   : > { %s1296_s10 = scalar_lea.vmem %s1486_s1, %s975_s7 }
  0x16   : > { %v225_v0 = vld [vmem:[%s1296_s10] sm:$0xf]  ;;  %v227_v1 = vld [vmem:[%s1296_s10 + $0x8] sm:$0xf]  ;;  %v229_v2 = vld [vmem:[%s1296_s10 + $0x10] sm:$0xf] }
  0x17   : > { %226 = vst [vmem:[%s1301_s11] sm:$0xf] %v225_v0  ;;  %228 = vst [vmem:[%s1301_s11 + $0x4] sm:$0xf] %v227_v1  ;;  %v231_v3 = vld [vmem:[%s1296_s10 + $0x18] sm:$0xf] }
  0x18   : > { %230 = vst [vmem:[%s1301_s11 + $0x8] sm:$0xf] %v229_v2  ;;  %v233_v4 = vld [vmem:[%s1296_s10 + $0x20] sm:$0xf]  ;;  %v235_v5 = vld [vmem:[%s1296_s10 + $0x28] sm:$0xf] }
  0x19   : > { %232 = vst [vmem:[%s1301_s11 + $0xc] sm:$0xf] %v231_v3  ;;  %234 = vst [vmem:[%s1301_s11 + $0x10] sm:$0xf] %v233_v4  ;;  %v237_v6 = vld [vmem:[%s1296_s10 + $0x30] sm:$0xf] }
  0x1a   : > { %236 = vst [vmem:[%s1301_s11 + $0x14] sm:$0xf] %v235_v5  ;;  %v239_v7 = vld [vmem:[%s1296_s10 + $0x38] sm:$0xf]  ;;  %v241_v8 = vld [vmem:[%s1296_s10 + $0x40] sm:$0xf] }
  0x1b   : > { %238 = vst [vmem:[%s1301_s11 + $0x18] sm:$0xf] %v237_v6  ;;  %240 = vst [vmem:[%s1301_s11 + $0x1c] sm:$0xf] %v239_v7  ;;  %v243_v9 = vld [vmem:[%s1296_s10 + $0x48] sm:$0xf] }
  0x1c   : > { %242 = vst [vmem:[%s1301_s11 + $0x20] sm:$0xf] %v241_v8  ;;  %v245_v10 = vld [vmem:[%s1296_s10 + $0x50] sm:$0xf]  ;;  %v247_v11 = vld [vmem:[%s1296_s10 + $0x58] sm:$0xf] }
  0x1d   : > { %244 = vst [vmem:[%s1301_s11 + $0x24] sm:$0xf] %v243_v9  ;;  %246 = vst [vmem:[%s1301_s11 + $0x28] sm:$0xf] %v245_v10  ;;  %v249_v12 = vld [vmem:[%s1296_s10 + $0x60] sm:$0xf] }
  0x1e   : > { %248 = vst [vmem:[%s1301_s11 + $0x2c] sm:$0xf] %v247_v11  ;;  %v251_v13 = vld [vmem:[%s1296_s10 + $0x68] sm:$0xf]  ;;  %v253_v14 = vld [vmem:[%s1296_s10 + $0x70] sm:$0xf] }
  0x1f   : > { %250 = vst [vmem:[%s1301_s11 + $0x30] sm:$0xf] %v249_v12  ;;  %252 = vst [vmem:[%s1301_s11 + $0x34] sm:$0xf] %v251_v13  ;;  %v255_v15 = vld [vmem:[%s1296_s10 + $0x78] sm:$0xf] }
  0x20   : > { %254 = vst [vmem:[%s1301_s11 + $0x38] sm:$0xf] %v253_v14  ;;  %v257_v16 = vld [vmem:[%s1296_s10 + $0x80] sm:$0xf]  ;;  %v259_v17 = vld [vmem:[%s1296_s10 + $0x88] sm:$0xf] }
  0x21   : > { %256 = vst [vmem:[%s1301_s11 + $0x3c] sm:$0xf] %v255_v15  ;;  %258 = vst [vmem:[%s1301_s11 + $0x40] sm:$0xf] %v257_v16  ;;  %v261_v18 = vld [vmem:[%s1296_s10 + $0x90] sm:$0xf] }
  0x22   : > { %260 = vst [vmem:[%s1301_s11 + $0x44] sm:$0xf] %v259_v17  ;;  %v263_v19 = vld [vmem:[%s1296_s10 + $0x98] sm:$0xf]  ;;  %v265_v20 = vld [vmem:[%s1296_s10 + $0xa0] sm:$0xf] }
  0x23   : > { %262 = vst [vmem:[%s1301_s11 + $0x48] sm:$0xf] %v261_v18  ;;  %264 = vst [vmem:[%s1301_s11 + $0x4c] sm:$0xf] %v263_v19  ;;  %v267_v21 = vld [vmem:[%s1296_s10 + $0xa8] sm:$0xf] }
  0x24   : > { %266 = vst [vmem:[%s1301_s11 + $0x50] sm:$0xf] %v265_v20  ;;  %v269_v22 = vld [vmem:[%s1296_s10 + $0xb0] sm:$0xf]  ;;  %v271_v23 = vld [vmem:[%s1296_s10 + $0xb8] sm:$0xf] }
  0x25   : > { %268 = vst [vmem:[%s1301_s11 + $0x54] sm:$0xf] %v267_v21  ;;  %270 = vst [vmem:[%s1301_s11 + $0x58] sm:$0xf] %v269_v22  ;;  %v273_v24 = vld [vmem:[%s1296_s10 + $0xc0] sm:$0xf] }
  0x26   : > { %272 = vst [vmem:[%s1301_s11 + $0x5c] sm:$0xf] %v271_v23  ;;  %v275_v25 = vld [vmem:[%s1296_s10 + $0xc8] sm:$0xf]  ;;  %v277_v26 = vld [vmem:[%s1296_s10 + $0xd0] sm:$0xf] }
  0x27   : > { %274 = vst [vmem:[%s1301_s11 + $0x60] sm:$0xf] %v273_v24  ;;  %276 = vst [vmem:[%s1301_s11 + $0x64] sm:$0xf] %v275_v25  ;;  %v279_v27 = vld [vmem:[%s1296_s10 + $0xd8] sm:$0xf] }
  0x28   : > { %278 = vst [vmem:[%s1301_s11 + $0x68] sm:$0xf] %v277_v26  ;;  %v281_v28 = vld [vmem:[%s1296_s10 + $0xe0] sm:$0xf]  ;;  %v283_v29 = vld [vmem:[%s1296_s10 + $0xe8] sm:$0xf] }
  0x29   : > { %280 = vst [vmem:[%s1301_s11 + $0x6c] sm:$0xf] %v279_v27  ;;  %282 = vst [vmem:[%s1301_s11 + $0x70] sm:$0xf] %v281_v28  ;;  %v285_v30 = vld [vmem:[%s1296_s10 + $0xf0] sm:$0xf] }
  0x2a   : > { %284 = vst [vmem:[%s1301_s11 + $0x74] sm:$0xf] %v283_v29  ;;  %v287_v31 = vld [vmem:[%s1296_s10 + $0xf8] sm:$0xf]  ;;  %v289_v32 = vld [vmem:[%s1296_s10 + $0x100] sm:$0xf] }
  0x2b   : > { %286 = vst [vmem:[%s1301_s11 + $0x78] sm:$0xf] %v285_v30  ;;  %288 = vst [vmem:[%s1301_s11 + $0x7c] sm:$0xf] %v287_v31  ;;  %v291_v33 = vld [vmem:[%s1296_s10 + $0x108] sm:$0xf] }
  0x2c   : > { %290 = vst [vmem:[%s1301_s11 + $0x80] sm:$0xf] %v289_v32  ;;  %v293_v34 = vld [vmem:[%s1296_s10 + $0x110] sm:$0xf]  ;;  %v295_v35 = vld [vmem:[%s1296_s10 + $0x118] sm:$0xf] }
  0x2d   : > { %292 = vst [vmem:[%s1301_s11 + $0x84] sm:$0xf] %v291_v33  ;;  %294 = vst [vmem:[%s1301_s11 + $0x88] sm:$0xf] %v293_v34  ;;  %v297_v36 = vld [vmem:[%s1296_s10 + $0x120] sm:$0xf] }
  0x2e   : > { %296 = vst [vmem:[%s1301_s11 + $0x8c] sm:$0xf] %v295_v35  ;;  %v299_v37 = vld [vmem:[%s1296_s10 + $0x128] sm:$0xf]  ;;  %v301_v38 = vld [vmem:[%s1296_s10 + $0x130] sm:$0xf] }
  0x2f   : > { %298 = vst [vmem:[%s1301_s11 + $0x90] sm:$0xf] %v297_v36  ;;  %300 = vst [vmem:[%s1301_s11 + $0x94] sm:$0xf] %v299_v37  ;;  %v303_v39 = vld [vmem:[%s1296_s10 + $0x138] sm:$0xf] }
  0x30   : > { %302 = vst [vmem:[%s1301_s11 + $0x98] sm:$0xf] %v301_v38  ;;  %v305_v40 = vld [vmem:[%s1296_s10 + $0x140] sm:$0xf]  ;;  %v307_v41 = vld [vmem:[%s1296_s10 + $0x148] sm:$0xf] }
  0x31   : > { %304 = vst [vmem:[%s1301_s11 + $0x9c] sm:$0xf] %v303_v39  ;;  %306 = vst [vmem:[%s1301_s11 + $0xa0] sm:$0xf] %v305_v40  ;;  %v309_v42 = vld [vmem:[%s1296_s10 + $0x150] sm:$0xf] }
  0x32   : > { %308 = vst [vmem:[%s1301_s11 + $0xa4] sm:$0xf] %v307_v41  ;;  %v311_v43 = vld [vmem:[%s1296_s10 + $0x158] sm:$0xf]  ;;  %v313_v44 = vld [vmem:[%s1296_s10 + $0x160] sm:$0xf] }
  0x33   : > { %310 = vst [vmem:[%s1301_s11 + $0xa8] sm:$0xf] %v309_v42  ;;  %312 = vst [vmem:[%s1301_s11 + $0xac] sm:$0xf] %v311_v43  ;;  %v315_v45 = vld [vmem:[%s1296_s10 + $0x168] sm:$0xf] }
  0x34   : > { %314 = vst [vmem:[%s1301_s11 + $0xb0] sm:$0xf] %v313_v44  ;;  %v317_v46 = vld [vmem:[%s1296_s10 + $0x170] sm:$0xf]  ;;  %v319_v47 = vld [vmem:[%s1296_s10 + $0x178] sm:$0xf] }
  0x35   : > { %316 = vst [vmem:[%s1301_s11 + $0xb4] sm:$0xf] %v315_v45  ;;  %318 = vst [vmem:[%s1301_s11 + $0xb8] sm:$0xf] %v317_v46 }
  0x36   : > { %320 = vst [vmem:[%s1301_s11 + $0xbc] sm:$0xf] %v319_v47 }
  0x37 PF: > { %p976_p7 = scmp.ge.s32.totalorder %s1206_s21, 1  ;;  %p451_p8 = scmp.lt.s32.totalorder %s1206_s21, 13 }
  0x39   : > { %p452_p9 = pnand %p976_p7, %p451_p8 }
  0x3a   : > { %s458_s12 = sand.u32 (!%p452_p9), 1, %s1182_s15   ;;  %s501_s13 = smul.u32 (!%p452_p9), 3, %s1190_s17 }
  0x3b   : > { %455 = sbr.rel (%p452_p9) target bundleno = 324 (0x144), region = 73  ;;  %p512_p10 = scmp.lt.s32.totalorder (!%p452_p9), %s1194_s18, 1 }
  0x3c   : > { %s1065_s14 = smul.u32 (!%p452_p9), 192, %s458_s12  ;;  %p504_p11 = scmp.lt.s32.totalorder (!%p452_p9), %s501_s13, 17 }
  0x3d   : > { %p979_p12 = scmp.ne.s32.totalorder (!%p452_p9), %s1190_s17, 0 }
  0x3e   : > { %s1423_s12 = scalar_lea.vmem (!%p452_p9), [#allocation3], %s1065_s14 }
  0x40   : > { %s1503_s13 = smov (!%p504_p11, %s501_s13), 17  ;;  %s1505_s18 = smov (!%p512_p10, %s1194_s18), 1 }
  0x41   : > { %s977_s24 = sshll.u32 %s1503_s13, 2  ;;  %s514_s15 = scalar_lea.vmem %s1487_s2, %s1505_s18 }
  0x42   : > { %s1407_s27 = scalar_lea.vmem %s1485_s0, %s977_s24  ;;  %s517_s7 = scalar_lea.vmem %s1488_s3, %s1505_s18 }
  0x43   : > { %s978_s8 = sshll.u32 %s1505_s18, 3  ;;  %530 = sbr.rel (%p979_p12) target bundleno = 74 (0x4a), region = 81 }
  0x44   : > { %s1421_s11 = scalar_lea.vmem %s1489_s4, %s978_s8 }
  0x48   : > { %v1208_v48 = vmov 0.0  }
  0x49   : > { %531 = vst [vmem:[#allocation2] sm:$0xff] %v1208_v48 }
  0x4a PF: > { %v1125_v49 = vld [vmem:[%s1423_s12 + $0x78] sm:$0xff]   ;;  %v1209_v50 = vmov 0.0   ;;  %vm1210_vm0 = vmmov 0   ;;  %v1128_v53 = vld [vmem:[%s1423_s12 + $0x70] sm:$0xff]   ;;  %v1131_v56 = vld [vmem:[%s1423_s12 + $0x68] sm:$0xff]   ;;  %p1007_p13 = scmp.ne.s32.totalorder %s1190_s17, 5 }
  0x4b   : > { %1044 = vmatprep.subr.bf16.mxu1 %v1209_v50  ;;  %v1126_v51 = vld [vmem:[%s1423_s12 + $0xb8] sm:$0xff]   ;;  %1013 = vmatprep.subr.bf16.mxu0 %v1125_v49  ;;  %v1129_v54 = vld [vmem:[%s1423_s12 + $0xb0] sm:$0xff]   ;;  %v1132_v57 = vld [vmem:[%s1423_s12 + $0xa8] sm:$0xff]  }
  0x4c   : > { %v1127_v52 = vld [vmem:[%s1423_s12 + $0x38] sm:$0xff]   ;;  %1060 = vmatprep.mubr.msk.bf16.mxu1 %vm1210_vm0, %v1209_v50  ;;  %1045 = vmatpush3.bf16.msra.mxu1 %v1126_v51  ;;  %v1130_v55 = vld [vmem:[%s1423_s12 + $0x30] sm:$0xff]   ;;  %v1133_v58 = vld [vmem:[%s1423_s12 + $0x28] sm:$0xff]  }
  0x4d   : > { %1014 = vmatpush3.bf16.msra.mxu0 %v1127_v52  ;;  %1046 = vmatprep.subr.bf16.mxu1 %v1209_v50  ;;  %v1134_v59 = vld [vmem:[%s1423_s12 + $0x60] sm:$0xff]   ;;  %v1137_v62 = vld [vmem:[%s1423_s12 + $0x58] sm:$0xff]   ;;  %v1140_v1 = vld [vmem:[%s1423_s12 + $0x50] sm:$0xff]  }
  0x4e   : > { %1015 = vmatprep.subr.bf16.mxu0 %v1128_v53  ;;  %v1135_v60 = vld [vmem:[%s1423_s12 + $0xa0] sm:$0xff]   ;;  %v1138_v63 = vld [vmem:[%s1423_s12 + $0x98] sm:$0xff]   ;;  %v1141_v2 = vld [vmem:[%s1423_s12 + $0x90] sm:$0xff]  }
  0x4f   : > { %v1136_v61 = vld [vmem:[%s1423_s12 + $0x20] sm:$0xff]   ;;  %v1139_v0 = vld [vmem:[%s1423_s12 + $0x18] sm:$0xff]   ;;  %v1142_v3 = vld [vmem:[%s1423_s12 + $0x10] sm:$0xff]  }
  0x50   : > { %1047 = vmatpush3.bf16.msra.mxu1 %v1129_v54  ;;  %v1143_v4 = vld [vmem:[%s1423_s12 + $0x48] sm:$0xff]   ;;  %v533_v7 = vld [vmem:[%s1407_s27] sm:$0xff]  ;;  %v1146_v8 = vld [vmem:[%s1423_s12 + $0x40] sm:$0xff]  }
  0x51   : > { %1016 = vmatpush3.bf16.msra.mxu0 %v1130_v55  ;;  %1048 = vmatprep.subr.bf16.mxu1 %v1209_v50  ;;  %v1144_v5 = vld [vmem:[%s1423_s12 + $0x88] sm:$0xff]   ;;  %v981_v9 = vcombine.high %v533_v7, %v533_v7  ;;  %v1147_v10 = vld [vmem:[%s1423_s12 + $0x80] sm:$0xff]   ;;  %v980_v13 = vcombine.low %v533_v7, %v533_v7  ;;  %v532_v20 = vld [vmem:[#allocation2] sm:$0xff] }
  0x52   : > { %1017 = vmatprep.subr.bf16.mxu0 %v1131_v56  ;;  %v1145_v6 = vld [vmem:[%s1423_s12 + $0x8] sm:$0xff]   ;;  %v1148_v11 = vld [vmem:[%s1423_s12] sm:$0xff]  }
  0x53   : > { %770 = vmatprep.mubr.bf16.mxu0 %v981_v9  ;;  %v1151_v12 = vld [vmem:[%s1407_s27 + $0x8] ss:$0 sps:$4 sm:$0xff]  }
  0x54   : > { %1049 = vmatpush3.bf16.msra.mxu1 %v1132_v57 }
  0x55   : > { %1018 = vmatpush3.bf16.msra.mxu0 %v1133_v58  ;;  %1050 = vmatprep.subr.bf16.mxu1 %v1209_v50 }
  0x56   : > { %1019 = vmatprep.subr.bf16.mxu0 %v1134_v59 }
  0x58   : > { %1051 = vmatpush3.bf16.msra.mxu1 %v1135_v60 }
  0x59   : > { %1020 = vmatpush3.bf16.msra.mxu0 %v1136_v61  ;;  %1052 = vmatprep.subr.bf16.mxu1 %v1209_v50 }
  0x5a   : > { %1021 = vmatprep.subr.bf16.mxu0 %v1137_v62 }
  0x5c   : > { %1053 = vmatpush3.bf16.msra.mxu1 %v1138_v63 }
  0x5d   : > { %1022 = vmatpush3.bf16.msra.mxu0 %v1139_v0  ;;  %1054 = vmatprep.subr.bf16.mxu1 %v1209_v50 }
  0x5e   : > { %1023 = vmatprep.subr.bf16.mxu0 %v1140_v1 }
  0x60   : > { %1055 = vmatpush3.bf16.msra.mxu1 %v1141_v2 }
  0x61   : > { %1024 = vmatpush3.bf16.msra.mxu0 %v1142_v3  ;;  %1056 = vmatprep.subr.bf16.mxu1 %v1209_v50 }
  0x62   : > { %1025 = vmatprep.subr.bf16.mxu0 %v1143_v4 }
  0x64   : > { %1057 = vmatpush3.bf16.msra.mxu1 %v1144_v5 }
  0x65   : > { %1026 = vmatpush3.bf16.msra.mxu0 %v1145_v6  ;;  %1058 = vmatprep.subr.bf16.mxu1 %v1209_v50 }
  0x66   : > { %1027 = vmatprep.subr.bf16.mxu0 %v1146_v8 }
  0x68   : > { %1059 = vmatpush3.bf16.msra.mxu1 %v1147_v10 }
  0x69   : > { %1028 = vmatpush3.bf16.msra.mxu0 %v1148_v11 }
  0x6b   : > { %1061 = vmatmul.mubr.bf16.vlgmr.msra.gmra.mxu1 %v1151_v12 }
  0x6c   : > { %771 = vmatmul.mubr.bf16.vlgmr.msra.gmra.mxu0 %v980_v13 }
 0x12b   : > { %v812_v14 = vpop.f32.mrf.mxu1 }
 0x12c   : > { %v1029_v15 = vpop.f32.mrf.mxu0 }
 0x12d   : > { %v1062_v16 = vpop.f32.mrf.mxu1 }
 0x12e   : > { %v1030_v17 = vpop.f32.mrf.mxu0 }
 0x12f   : > { %v1031_v18 = vadd.f32 %v1030_v17, %v1029_v15  ;;  %v815_v19 = vpop.f32.mrf.mxu1 }
 0x130   : > { %v1032_v21 = vpop.f32.mrf.mxu0 }
 0x131   : > { %v813_v22 = vadd.f32 %v1031_v18, %v812_v14  ;;  %v1063_v23 = vpop.f32.mrf.mxu1  ;;  %823 = sbr.rel (%p1007_p13) target bundleno = 324 (0x144), region = 85 }
 0x132   : > { %v1033_v24 = vpop.f32.mrf.mxu0 }
 0x133   : > { %v818_v25 = vadd.f32 %v813_v22, %v532_v20 }
 0x135   : > { %819 = vst [vmem:[#allocation2] sm:$0xff] %v818_v25 }
 0x136   : > { %v1008_v27 = vld [vmem:[%s514_s15] ss:$0 sm:$0xff] }
 0x137   : > { %v1009_v28 = vld [vmem:[%s517_s7] ss:$0 sm:$0xff] }
 0x13c   : > { %v824_v26 = vld [vmem:[#allocation2] sm:$0xff] }
 0x13d   : > { %v832_v29 = vmul.f32 %v1008_v27, %v824_v26 }
 0x13f   : > { %v840_v30 = vadd.f32 %v1009_v28, %v832_v29 }
 0x141   : > { %v841_v31 = vmax.f32 %v840_v30, 0.0 }
 0x143   : > { %842 = vst [vmem:[%s1421_s11] sm:$0xff] %v841_v31 }
 0x144 PF: > { %s14_s21 = sadd.s32 1, %s1206_s21   ;;  %s1490_s15 = smov %s1186_s16 }
 0x145   : > { %p11_p0 = scmp.ge.s32.totalorder %s14_s21, 14   ;;  %s1491_s16 = smov %s1287_s28 }
 0x146   : > { %s1492_s17 = smov %s1198_s19  ;;  %s1493_s18 = smov %s1202_s20 }
 0x147   : > { %s1494_s19 = smov %s1497_s22  ;;  %s1495_s20 = smov %s1501_s23 }
 0x148   :  { %13 = sbr.rel (!%p11_p0) target bundleno = 4 (0x4), region = 129 }

// kernel: _lambda_.38
= control target key start
LH: loop header
LB: loop body
LE: loop exit
PB: predicated region body
PF: predicated region fallthrough
CT: control target
= control target key end

     0   :  { %s1590_s15 = smov 0   ;;  %s1592_s16 = smov 0   ;;  %s1911_s0 = inlined_call_operand.vmem [shape: bf16[8,4608], index: 0, kind: input, shape index: {}]   ;;  %s1912_s1 = inlined_call_operand.vmem [shape: bf16[4608,512], index: 1, kind: input, shape index: {}]   ;;  %s1913_s2 = inlined_call_operand.vmem [shape: f32[1,512], index: 2, kind: input, shape index: {}]   ;;  %s1914_s3 = inlined_call_operand.vmem [shape: f32[1,512], index: 3, kind: input, shape index: {}]   ;;  %s1915_s4 = inlined_call_operand.vmem [shape: f32[8,512], index: 4, kind: output, shape index: {}]  }
   0x1   :  { %s1594_s17 = smov 0   ;;  %s1596_s18 = smov 0  }
   0x2   :  { %s1598_s19 = smov 0   ;;  %s1600_s20 = smov 0  }
   0x3   :  { %s1602_s21 = smov 0  }
   0x4 LB: > { %s26_s22 = sadd.s32 1, %s1554_s19  ;;  %s29_s23 = sadd.s32 1, %s1558_s20  ;;  %s1562_s21 = sphi %s1602_s21, %s14_s21   ;;  %s1558_s20 = sphi %s1600_s20, %s1921_s20   ;;  %s1554_s19 = sphi %s1598_s19, %s1920_s19   ;;  %s1550_s18 = sphi %s1596_s18, %s1919_s18   ;;  %s1546_s17 = sphi %s1594_s17, %s1918_s17   ;;  %s1542_s16 = sphi %s1592_s16, %s1917_s16   ;;  %s1538_s15 = sphi %s1590_s15, %s1916_s15  }
   0x5   : > { %p27_p0 = scmp.ge.s32.totalorder %s26_s22, 9  ;;  %p77_p1 = scmp.ne.s32.totalorder %s1542_s16, %s1538_s15 }
   0x6   : > { %p78_p2 = scmp.eq.s32.totalorder %s1562_s21, 0  ;;  %s70_s27 = sadd.s32 1, %s1542_s16 }
   0x7   : > { %s1923_s22 = smov (%p27_p0, %s26_s22), 0  ;;  %s1925_s23 = smov (!%p27_p0, %s29_s23), %s1558_s20 }
   0x8   : > { %p79_p3 = por %p78_p2, %p77_p1  ;;  %p31_p4 = scmp.ge.s32.totalorder %s1925_s23, 2 }
   0x9   : > { %s65_s24 = ssub.s32 %s1554_s19, %s1923_s22  ;;  %p1264_p6 = scmp.ge.s32.totalorder %s1562_s21, 18 }
   0xa   : > { %s1927_s23 = smov (%p31_p4, %s1925_s23), 0 }
   0xb   : > { %s66_s25 = ssub.s32 %s1558_s20, %s1927_s23  ;;  %183 = sbr.rel (%p1264_p6) target bundleno = 55 (0x37), region = 16 }
   0xc   : > { %s67_s26 = sor.u32 %s66_s25, %s65_s24 }
   0xd   : > { %p68_p5 = scmp.eq.s32.totalorder %s67_s26, 0 }
   0xf   : > { %s1641_s28 = scalar_select %p68_p5, %s1542_s16, %s70_s27  }
  0x10   : > { %199 = sbr.rel (!%p79_p3) target bundleno = 55 (0x37), region = 24  ;;  %s201_s29 = sand.u32 (%p79_p3), 1, %s1542_s16  }
  0x11   : > { %s1267_s30 = sshll.u32 (%p79_p3), %s1558_s20, 1  ;;  %s1265_s5 = sshll.u32 (%p79_p3), %s201_s29, 9 }
  0x12   : > { %s1350_s6 = sshll.u32 (%p79_p3), %s1554_s19, 8  ;;  %s1655_s12 = scalar_lea.vmem (%p79_p3), [#allocation3], %s1265_s5 }
  0x13   : > { %s207_s7 = sadd.s32 (%p79_p3), %s1350_s6, %s1267_s30 }
  0x14   : > { %s1269_s8 = sshll.u32 (%p79_p3), %s207_s7, 2 }
  0x15   : > { %s1650_s11 = scalar_lea.vmem %s1912_s1, %s1269_s8 }
  0x16   : > { %v364_v0 = vld [vmem:[%s1650_s11] sm:$0xff]  ;;  %v366_v1 = vld [vmem:[%s1650_s11 + $0x10] sm:$0xff] }
  0x17   : > { %v368_v2 = vld [vmem:[%s1650_s11 + $0x20] sm:$0xff]  ;;  %365 = vst [vmem:[%s1655_s12] sm:$0xff] %v364_v0  ;;  %367 = vst [vmem:[%s1655_s12 + $0x8] sm:$0xff] %v366_v1  ;;  %v370_v3 = vld [vmem:[%s1650_s11 + $0x30] sm:$0xff] }
  0x18   : > { %369 = vst [vmem:[%s1655_s12 + $0x10] sm:$0xff] %v368_v2  ;;  %v372_v4 = vld [vmem:[%s1650_s11 + $0x40] sm:$0xff]  ;;  %v374_v5 = vld [vmem:[%s1650_s11 + $0x50] sm:$0xff]  ;;  %371 = vst [vmem:[%s1655_s12 + $0x18] sm:$0xff] %v370_v3 }
  0x19   : > { %373 = vst [vmem:[%s1655_s12 + $0x20] sm:$0xff] %v372_v4  ;;  %375 = vst [vmem:[%s1655_s12 + $0x28] sm:$0xff] %v374_v5  ;;  %v376_v6 = vld [vmem:[%s1650_s11 + $0x60] sm:$0xff]  ;;  %v378_v7 = vld [vmem:[%s1650_s11 + $0x70] sm:$0xff] }
  0x1a   : > { %v380_v8 = vld [vmem:[%s1650_s11 + $0x80] sm:$0xff]  ;;  %377 = vst [vmem:[%s1655_s12 + $0x30] sm:$0xff] %v376_v6  ;;  %379 = vst [vmem:[%s1655_s12 + $0x38] sm:$0xff] %v378_v7  ;;  %v382_v9 = vld [vmem:[%s1650_s11 + $0x90] sm:$0xff] }
  0x1b   : > { %381 = vst [vmem:[%s1655_s12 + $0x40] sm:$0xff] %v380_v8  ;;  %v384_v10 = vld [vmem:[%s1650_s11 + $0xa0] sm:$0xff]  ;;  %v386_v11 = vld [vmem:[%s1650_s11 + $0xb0] sm:$0xff]  ;;  %383 = vst [vmem:[%s1655_s12 + $0x48] sm:$0xff] %v382_v9 }
  0x1c   : > { %385 = vst [vmem:[%s1655_s12 + $0x50] sm:$0xff] %v384_v10  ;;  %387 = vst [vmem:[%s1655_s12 + $0x58] sm:$0xff] %v386_v11  ;;  %v388_v12 = vld [vmem:[%s1650_s11 + $0xc0] sm:$0xff]  ;;  %v390_v13 = vld [vmem:[%s1650_s11 + $0xd0] sm:$0xff] }
  0x1d   : > { %v392_v14 = vld [vmem:[%s1650_s11 + $0xe0] sm:$0xff]  ;;  %389 = vst [vmem:[%s1655_s12 + $0x60] sm:$0xff] %v388_v12  ;;  %391 = vst [vmem:[%s1655_s12 + $0x68] sm:$0xff] %v390_v13  ;;  %v394_v15 = vld [vmem:[%s1650_s11 + $0xf0] sm:$0xff] }
  0x1e   : > { %393 = vst [vmem:[%s1655_s12 + $0x70] sm:$0xff] %v392_v14  ;;  %v396_v16 = vld [vmem:[%s1650_s11 + $0x100] sm:$0xff]  ;;  %v398_v17 = vld [vmem:[%s1650_s11 + $0x110] sm:$0xff]  ;;  %395 = vst [vmem:[%s1655_s12 + $0x78] sm:$0xff] %v394_v15 }
  0x1f   : > { %397 = vst [vmem:[%s1655_s12 + $0x80] sm:$0xff] %v396_v16  ;;  %399 = vst [vmem:[%s1655_s12 + $0x88] sm:$0xff] %v398_v17  ;;  %v400_v18 = vld [vmem:[%s1650_s11 + $0x120] sm:$0xff]  ;;  %v402_v19 = vld [vmem:[%s1650_s11 + $0x130] sm:$0xff] }
  0x20   : > { %v404_v20 = vld [vmem:[%s1650_s11 + $0x140] sm:$0xff]  ;;  %401 = vst [vmem:[%s1655_s12 + $0x90] sm:$0xff] %v400_v18  ;;  %403 = vst [vmem:[%s1655_s12 + $0x98] sm:$0xff] %v402_v19  ;;  %v406_v21 = vld [vmem:[%s1650_s11 + $0x150] sm:$0xff] }
  0x21   : > { %405 = vst [vmem:[%s1655_s12 + $0xa0] sm:$0xff] %v404_v20  ;;  %v408_v22 = vld [vmem:[%s1650_s11 + $0x160] sm:$0xff]  ;;  %v410_v23 = vld [vmem:[%s1650_s11 + $0x170] sm:$0xff]  ;;  %407 = vst [vmem:[%s1655_s12 + $0xa8] sm:$0xff] %v406_v21 }
  0x22   : > { %409 = vst [vmem:[%s1655_s12 + $0xb0] sm:$0xff] %v408_v22  ;;  %411 = vst [vmem:[%s1655_s12 + $0xb8] sm:$0xff] %v410_v23  ;;  %v412_v24 = vld [vmem:[%s1650_s11 + $0x180] sm:$0xff]  ;;  %v414_v25 = vld [vmem:[%s1650_s11 + $0x190] sm:$0xff] }
  0x23   : > { %v416_v26 = vld [vmem:[%s1650_s11 + $0x1a0] sm:$0xff]  ;;  %413 = vst [vmem:[%s1655_s12 + $0xc0] sm:$0xff] %v412_v24  ;;  %415 = vst [vmem:[%s1655_s12 + $0xc8] sm:$0xff] %v414_v25  ;;  %v418_v27 = vld [vmem:[%s1650_s11 + $0x1b0] sm:$0xff] }
  0x24   : > { %417 = vst [vmem:[%s1655_s12 + $0xd0] sm:$0xff] %v416_v26  ;;  %v420_v28 = vld [vmem:[%s1650_s11 + $0x1c0] sm:$0xff]  ;;  %v422_v29 = vld [vmem:[%s1650_s11 + $0x1d0] sm:$0xff]  ;;  %419 = vst [vmem:[%s1655_s12 + $0xd8] sm:$0xff] %v418_v27 }
  0x25   : > { %421 = vst [vmem:[%s1655_s12 + $0xe0] sm:$0xff] %v420_v28  ;;  %423 = vst [vmem:[%s1655_s12 + $0xe8] sm:$0xff] %v422_v29  ;;  %v424_v30 = vld [vmem:[%s1650_s11 + $0x1e0] sm:$0xff]  ;;  %v426_v31 = vld [vmem:[%s1650_s11 + $0x1f0] sm:$0xff] }
  0x26   : > { %v428_v32 = vld [vmem:[%s1650_s11 + $0x200] sm:$0xff]  ;;  %425 = vst [vmem:[%s1655_s12 + $0xf0] sm:$0xff] %v424_v30  ;;  %427 = vst [vmem:[%s1655_s12 + $0xf8] sm:$0xff] %v426_v31  ;;  %v430_v33 = vld [vmem:[%s1650_s11 + $0x210] sm:$0xff] }
  0x27   : > { %429 = vst [vmem:[%s1655_s12 + $0x100] sm:$0xff] %v428_v32  ;;  %v432_v34 = vld [vmem:[%s1650_s11 + $0x220] sm:$0xff]  ;;  %v434_v35 = vld [vmem:[%s1650_s11 + $0x230] sm:$0xff]  ;;  %431 = vst [vmem:[%s1655_s12 + $0x108] sm:$0xff] %v430_v33 }
  0x28   : > { %433 = vst [vmem:[%s1655_s12 + $0x110] sm:$0xff] %v432_v34  ;;  %435 = vst [vmem:[%s1655_s12 + $0x118] sm:$0xff] %v434_v35  ;;  %v436_v36 = vld [vmem:[%s1650_s11 + $0x240] sm:$0xff]  ;;  %v438_v37 = vld [vmem:[%s1650_s11 + $0x250] sm:$0xff] }
  0x29   : > { %v440_v38 = vld [vmem:[%s1650_s11 + $0x260] sm:$0xff]  ;;  %437 = vst [vmem:[%s1655_s12 + $0x120] sm:$0xff] %v436_v36  ;;  %439 = vst [vmem:[%s1655_s12 + $0x128] sm:$0xff] %v438_v37  ;;  %v442_v39 = vld [vmem:[%s1650_s11 + $0x270] sm:$0xff] }
  0x2a   : > { %441 = vst [vmem:[%s1655_s12 + $0x130] sm:$0xff] %v440_v38  ;;  %v444_v40 = vld [vmem:[%s1650_s11 + $0x280] sm:$0xff]  ;;  %v446_v41 = vld [vmem:[%s1650_s11 + $0x290] sm:$0xff]  ;;  %443 = vst [vmem:[%s1655_s12 + $0x138] sm:$0xff] %v442_v39 }
  0x2b   : > { %445 = vst [vmem:[%s1655_s12 + $0x140] sm:$0xff] %v444_v40  ;;  %447 = vst [vmem:[%s1655_s12 + $0x148] sm:$0xff] %v446_v41  ;;  %v448_v42 = vld [vmem:[%s1650_s11 + $0x2a0] sm:$0xff]  ;;  %v450_v43 = vld [vmem:[%s1650_s11 + $0x2b0] sm:$0xff] }
  0x2c   : > { %v452_v44 = vld [vmem:[%s1650_s11 + $0x2c0] sm:$0xff]  ;;  %449 = vst [vmem:[%s1655_s12 + $0x150] sm:$0xff] %v448_v42  ;;  %451 = vst [vmem:[%s1655_s12 + $0x158] sm:$0xff] %v450_v43  ;;  %v454_v45 = vld [vmem:[%s1650_s11 + $0x2d0] sm:$0xff] }
  0x2d   : > { %453 = vst [vmem:[%s1655_s12 + $0x160] sm:$0xff] %v452_v44  ;;  %v456_v46 = vld [vmem:[%s1650_s11 + $0x2e0] sm:$0xff]  ;;  %v458_v47 = vld [vmem:[%s1650_s11 + $0x2f0] sm:$0xff]  ;;  %455 = vst [vmem:[%s1655_s12 + $0x168] sm:$0xff] %v454_v45 }
  0x2e   : > { %457 = vst [vmem:[%s1655_s12 + $0x170] sm:$0xff] %v456_v46  ;;  %459 = vst [vmem:[%s1655_s12 + $0x178] sm:$0xff] %v458_v47  ;;  %v460_v48 = vld [vmem:[%s1650_s11 + $0x300] sm:$0xff]  ;;  %v462_v49 = vld [vmem:[%s1650_s11 + $0x310] sm:$0xff] }
  0x2f   : > { %v464_v50 = vld [vmem:[%s1650_s11 + $0x320] sm:$0xff]  ;;  %461 = vst [vmem:[%s1655_s12 + $0x180] sm:$0xff] %v460_v48  ;;  %463 = vst [vmem:[%s1655_s12 + $0x188] sm:$0xff] %v462_v49  ;;  %v466_v51 = vld [vmem:[%s1650_s11 + $0x330] sm:$0xff] }
  0x30   : > { %465 = vst [vmem:[%s1655_s12 + $0x190] sm:$0xff] %v464_v50  ;;  %v468_v52 = vld [vmem:[%s1650_s11 + $0x340] sm:$0xff]  ;;  %v470_v53 = vld [vmem:[%s1650_s11 + $0x350] sm:$0xff]  ;;  %467 = vst [vmem:[%s1655_s12 + $0x198] sm:$0xff] %v466_v51 }
  0x31   : > { %469 = vst [vmem:[%s1655_s12 + $0x1a0] sm:$0xff] %v468_v52  ;;  %471 = vst [vmem:[%s1655_s12 + $0x1a8] sm:$0xff] %v470_v53  ;;  %v472_v54 = vld [vmem:[%s1650_s11 + $0x360] sm:$0xff]  ;;  %v474_v55 = vld [vmem:[%s1650_s11 + $0x370] sm:$0xff] }
  0x32   : > { %v476_v56 = vld [vmem:[%s1650_s11 + $0x380] sm:$0xff]  ;;  %473 = vst [vmem:[%s1655_s12 + $0x1b0] sm:$0xff] %v472_v54  ;;  %475 = vst [vmem:[%s1655_s12 + $0x1b8] sm:$0xff] %v474_v55  ;;  %v478_v57 = vld [vmem:[%s1650_s11 + $0x390] sm:$0xff] }
  0x33   : > { %477 = vst [vmem:[%s1655_s12 + $0x1c0] sm:$0xff] %v476_v56  ;;  %v480_v58 = vld [vmem:[%s1650_s11 + $0x3a0] sm:$0xff]  ;;  %v482_v59 = vld [vmem:[%s1650_s11 + $0x3b0] sm:$0xff]  ;;  %479 = vst [vmem:[%s1655_s12 + $0x1c8] sm:$0xff] %v478_v57 }
  0x34   : > { %481 = vst [vmem:[%s1655_s12 + $0x1d0] sm:$0xff] %v480_v58  ;;  %483 = vst [vmem:[%s1655_s12 + $0x1d8] sm:$0xff] %v482_v59  ;;  %v484_v60 = vld [vmem:[%s1650_s11 + $0x3c0] sm:$0xff]  ;;  %v486_v61 = vld [vmem:[%s1650_s11 + $0x3d0] sm:$0xff] }
  0x35   : > { %v488_v62 = vld [vmem:[%s1650_s11 + $0x3e0] sm:$0xff]  ;;  %485 = vst [vmem:[%s1655_s12 + $0x1e0] sm:$0xff] %v484_v60  ;;  %487 = vst [vmem:[%s1655_s12 + $0x1e8] sm:$0xff] %v486_v61  ;;  %v490_v63 = vld [vmem:[%s1650_s11 + $0x3f0] sm:$0xff] }
  0x36   : > { %489 = vst [vmem:[%s1655_s12 + $0x1f0] sm:$0xff] %v488_v62  ;;  %491 = vst [vmem:[%s1655_s12 + $0x1f8] sm:$0xff] %v490_v63 }
  0x37 PF: > { %p1270_p7 = scmp.ge.s32.totalorder %s1562_s21, 1  ;;  %p512_p8 = scmp.lt.s32.totalorder %s1562_s21, 19 }
  0x39   : > { %p513_p9 = pnand %p1270_p7, %p512_p8 }
  0x3a   : > { %s519_s13 = sand.u32 (!%p513_p9), 1, %s1538_s15   ;;  %s1272_s14 = sshll.u32 (!%p513_p9), %s1546_s17, 2 }
  0x3b   : > { %516 = sbr.rel (%p513_p9) target bundleno = 355 (0x163), region = 70  ;;  %s1271_s24 = sshll.u32 (!%p513_p9), %s519_s13, 9 }
  0x3c   : > { %p568_p10 = scmp.lt.s32.totalorder (!%p513_p9), %s1272_s14, 35  ;;  %s1274_s25 = sshll.u32 (!%p513_p9), %s1550_s18, 1 }
  0x3d   : > { %p578_p11 = scmp.lt.s32.totalorder (!%p513_p9), %s1274_s25, 3  ;;  %s1808_s13 = scalar_lea.vmem (!%p513_p9), [#allocation3], %s1271_s24 }
  0x3e   : > { %p1278_p12 = scmp.ne.s32.totalorder (!%p513_p9), %s1546_s17, 0 }
  0x40   : > { %s1929_s14 = smov (!%p568_p10, %s1272_s14), 35  ;;  %s1931_s25 = smov (!%p578_p11, %s1274_s25), 3 }
  0x41   : > { %s1273_s26 = sshll.u32 %s1929_s14, 2  ;;  %s580_s15 = scalar_lea.vmem %s1913_s2, %s1931_s25 }
  0x42   : > { %s1790_s30 = scalar_lea.vmem %s1911_s0, %s1273_s26  ;;  %s585_s18 = scalar_lea.vmem %s1914_s3, %s1931_s25 }
  0x43   : > { %s1277_s9 = sshll.u32 %s1931_s25, 3  ;;  %600 = sbr.rel (%p1278_p12) target bundleno = 74 (0x4a), region = 78 }
  0x44   : > { %s1806_s12 = scalar_lea.vmem %s1915_s4, %s1277_s9 }
  0x48   : > { %v1564_v0 = vmov 0.0  }
  0x49   : > { %601 = vst [vmem:[#allocation2] sm:$0xff] %v1564_v0  ;;  %602 = vst [vmem:[#allocation2 + $0x8] sm:$0xff] %v1564_v0 }
  0x4a PF: > { %v1408_v1 = vld [vmem:[%s1808_s13 + $0x74] ss:$8 sps:$4 sm:$0xff]   ;;  %v1412_v3 = vld [vmem:[%s1808_s13 + $0x70] ss:$8 sps:$4 sm:$0xff]   ;;  %v1414_v5 = vld [vmem:[%s1808_s13 + $0x64] ss:$8 sps:$4 sm:$0xff]  }
  0x4b   : > { %v1410_v2 = vld [vmem:[%s1808_s13 + $0x174] ss:$8 sps:$4 sm:$0xff]   ;;  %1005 = vmatprep.subr.bf16.mxu0 %v1408_v1  ;;  %v1413_v4 = vld [vmem:[%s1808_s13 + $0x170] ss:$8 sps:$4 sm:$0xff]   ;;  %v1416_v6 = vld [vmem:[%s1808_s13 + $0x164] ss:$8 sps:$4 sm:$0xff]  }
  0x4c   : > { %1046 = vmatprep.subr.bf16.mxu1 %v1410_v2  ;;  %1006 = vmatpush1.bf16.msra.mxu0 %v1412_v3  ;;  %v1418_v7 = vld [vmem:[%s1808_s13 + $0x60] ss:$8 sps:$4 sm:$0xff]   ;;  %v1420_v9 = vld [vmem:[%s1808_s13 + $0x54] ss:$8 sps:$4 sm:$0xff]   ;;  %v1424_v11 = vld [vmem:[%s1808_s13 + $0x50] ss:$8 sps:$4 sm:$0xff]  }
  0x4d   : > { %1047 = vmatpush1.bf16.msra.mxu1 %v1413_v4  ;;  %1007 = vmatprep.subr.bf16.mxu0 %v1414_v5  ;;  %v1419_v8 = vld [vmem:[%s1808_s13 + $0x160] ss:$8 sps:$4 sm:$0xff]   ;;  %v1422_v10 = vld [vmem:[%s1808_s13 + $0x154] ss:$8 sps:$4 sm:$0xff]   ;;  %v1425_v12 = vld [vmem:[%s1808_s13 + $0x150] ss:$8 sps:$4 sm:$0xff]  }
  0x4e   : > { %1048 = vmatprep.subr.bf16.mxu1 %v1416_v6  ;;  %v1426_v13 = vld [vmem:[%s1808_s13 + $0x44] ss:$8 sps:$4 sm:$0xff]   ;;  %v1430_v15 = vld [vmem:[%s1808_s13 + $0x40] ss:$8 sps:$4 sm:$0xff]   ;;  %v1432_v17 = vld [vmem:[%s1808_s13 + $0x34] ss:$8 sps:$4 sm:$0xff]  }
  0x4f   : > { %v1428_v14 = vld [vmem:[%s1808_s13 + $0x144] ss:$8 sps:$4 sm:$0xff]   ;;  %v1431_v16 = vld [vmem:[%s1808_s13 + $0x140] ss:$8 sps:$4 sm:$0xff]   ;;  %v1434_v18 = vld [vmem:[%s1808_s13 + $0x134] ss:$8 sps:$4 sm:$0xff]  }
  0x50   : > { %1008 = vmatpush1.bf16.msra.mxu0 %v1418_v7  ;;  %v1436_v19 = vld [vmem:[%s1808_s13 + $0x30] ss:$8 sps:$4 sm:$0xff]   ;;  %v1438_v21 = vld [vmem:[%s1808_s13 + $0x24] ss:$8 sps:$4 sm:$0xff]   ;;  %v1442_v23 = vld [vmem:[%s1808_s13 + $0x20] ss:$8 sps:$4 sm:$0xff]  }
  0x51   : > { %1049 = vmatpush1.bf16.msra.mxu1 %v1419_v8  ;;  %1009 = vmatprep.subr.bf16.mxu0 %v1420_v9  ;;  %v1437_v20 = vld [vmem:[%s1808_s13 + $0x130] ss:$8 sps:$4 sm:$0xff]   ;;  %v1440_v22 = vld [vmem:[%s1808_s13 + $0x124] ss:$8 sps:$4 sm:$0xff]   ;;  %v1443_v24 = vld [vmem:[%s1808_s13 + $0x120] ss:$8 sps:$4 sm:$0xff]  }
  0x52   : > { %1050 = vmatprep.subr.bf16.mxu1 %v1422_v10  ;;  %v1444_v25 = vld [vmem:[%s1808_s13 + $0x14] ss:$8 sps:$4 sm:$0xff]   ;;  %v1448_v27 = vld [vmem:[%s1808_s13 + $0x10] ss:$8 sps:$4 sm:$0xff]   ;;  %v1450_v29 = vld [vmem:[%s1808_s13 + $0x4] ss:$8 sps:$4 sm:$0xff]  }
  0x53   : > { %v1446_v26 = vld [vmem:[%s1808_s13 + $0x114] ss:$8 sps:$4 sm:$0xff]   ;;  %v1449_v28 = vld [vmem:[%s1808_s13 + $0x110] ss:$8 sps:$4 sm:$0xff]   ;;  %v1452_v30 = vld [vmem:[%s1808_s13 + $0x104] ss:$8 sps:$4 sm:$0xff]  }
  0x54   : > { %1010 = vmatpush1.bf16.msra.mxu0 %v1424_v11  ;;  %v1454_v31 = vld [vmem:[%s1808_s13] ss:$8 sps:$4 sm:$0xff]   ;;  %v1456_v33 = vld [vmem:[%s1808_s13 + $0xf4] ss:$8 sps:$4 sm:$0xff]   ;;  %v1460_v35 = vld [vmem:[%s1808_s13 + $0xf0] ss:$8 sps:$4 sm:$0xff]  }
  0x55   : > { %1051 = vmatpush1.bf16.msra.mxu1 %v1425_v12  ;;  %1011 = vmatprep.subr.bf16.mxu0 %v1426_v13  ;;  %v1455_v32 = vld [vmem:[%s1808_s13 + $0x100] ss:$8 sps:$4 sm:$0xff]   ;;  %v1458_v34 = vld [vmem:[%s1808_s13 + $0x1f4] ss:$8 sps:$4 sm:$0xff]   ;;  %v1461_v36 = vld [vmem:[%s1808_s13 + $0x1f0] ss:$8 sps:$4 sm:$0xff]  }
  0x56   : > { %1052 = vmatprep.subr.bf16.mxu1 %v1428_v14  ;;  %v1462_v37 = vld [vmem:[%s1808_s13 + $0xe4] ss:$8 sps:$4 sm:$0xff]   ;;  %v1466_v39 = vld [vmem:[%s1808_s13 + $0xe0] ss:$8 sps:$4 sm:$0xff]   ;;  %v1468_v41 = vld [vmem:[%s1808_s13 + $0xd4] ss:$8 sps:$4 sm:$0xff]  }
  0x57   : > { %v1464_v38 = vld [vmem:[%s1808_s13 + $0x1e4] ss:$8 sps:$4 sm:$0xff]   ;;  %v1467_v40 = vld [vmem:[%s1808_s13 + $0x1e0] ss:$8 sps:$4 sm:$0xff]   ;;  %v1470_v42 = vld [vmem:[%s1808_s13 + $0x1d4] ss:$8 sps:$4 sm:$0xff]  }
  0x58   : > { %1012 = vmatpush1.bf16.msra.mxu0 %v1430_v15  ;;  %v1472_v43 = vld [vmem:[%s1808_s13 + $0xd0] ss:$8 sps:$4 sm:$0xff]   ;;  %v1474_v45 = vld [vmem:[%s1808_s13 + $0xc4] ss:$8 sps:$4 sm:$0xff]   ;;  %v1478_v50 = vld [vmem:[%s1808_s13 + $0xc0] ss:$8 sps:$4 sm:$0xff]  }
  0x59   : > { %1053 = vmatpush1.bf16.msra.mxu1 %v1431_v16  ;;  %1013 = vmatprep.subr.bf16.mxu0 %v1432_v17  ;;  %v1473_v44 = vld [vmem:[%s1808_s13 + $0x1d0] ss:$8 sps:$4 sm:$0xff]   ;;  %v1476_v46 = vld [vmem:[%s1808_s13 + $0x1c4] ss:$8 sps:$4 sm:$0xff]   ;;  %v1479_v51 = vld [vmem:[%s1808_s13 + $0x1c0] ss:$8 sps:$4 sm:$0xff]  }
  0x5a   : > { %1054 = vmatprep.subr.bf16.mxu1 %v1434_v18  ;;  %v605_v47 = vld [vmem:[%s1790_s30] sm:$0xff]  ;;  %v606_v49 = vld [vmem:[%s1790_s30 + $0x8] sm:$0xff]  ;;  %v1486_v57 = vld [vmem:[%s1808_s13 + $0xa4] ss:$8 sps:$4 sm:$0xff]   ;;  %p1347_p13 = scmp.ne.s32.totalorder %s1546_s17, 8 }
  0x5b   : > { %v1280_v48 = vcombine.high %v605_v47, %v605_v47  ;;  %v1282_v52 = vcombine.high %v606_v49, %v606_v49  ;;  %v1480_v53 = vld [vmem:[%s1808_s13 + $0xb4] ss:$8 sps:$4 sm:$0xff]   ;;  %v1484_v55 = vld [vmem:[%s1808_s13 + $0xb0] ss:$8 sps:$4 sm:$0xff]   ;;  %v1488_v58 = vld [vmem:[%s1808_s13 + $0x1a4] ss:$8 sps:$4 sm:$0xff]   ;;  %v1279_v5 = vcombine.low %v605_v47, %v605_v47  ;;  %v1281_v6 = vcombine.low %v606_v49, %v606_v49 }
  0x5c   : > { %1014 = vmatpush1.bf16.msra.mxu0 %v1436_v19  ;;  %v1482_v54 = vld [vmem:[%s1808_s13 + $0x1b4] ss:$8 sps:$4 sm:$0xff]   ;;  %v1485_v56 = vld [vmem:[%s1808_s13 + $0x1b0] ss:$8 sps:$4 sm:$0xff]   ;;  %v1490_v59 = vld [vmem:[%s1808_s13 + $0xa0] ss:$8 sps:$4 sm:$0xff]  }
  0x5d   : > { %1055 = vmatpush1.bf16.msra.mxu1 %v1437_v20  ;;  %1015 = vmatprep.subr.bf16.mxu0 %v1438_v21  ;;  %v1491_v60 = vld [vmem:[%s1808_s13 + $0x1a0] ss:$8 sps:$4 sm:$0xff]   ;;  %v1492_v61 = vld [vmem:[%s1808_s13 + $0x94] ss:$8 sps:$4 sm:$0xff]   ;;  %v1496_v63 = vld [vmem:[%s1808_s13 + $0x90] ss:$8 sps:$4 sm:$0xff]  }
  0x5e   : > { %1056 = vmatprep.subr.bf16.mxu1 %v1440_v22  ;;  %1037 = vmatprep.mubr.bf16.mxu0 %v1280_v48  ;;  %v1494_v62 = vld [vmem:[%s1808_s13 + $0x194] ss:$8 sps:$4 sm:$0xff]   ;;  %v1497_v0 = vld [vmem:[%s1808_s13 + $0x190] ss:$8 sps:$4 sm:$0xff]   ;;  %v1498_v1 = vld [vmem:[%s1808_s13 + $0x84] ss:$8 sps:$4 sm:$0xff]  }
  0x5f   : > { %1078 = vmatprep.mubr.bf16.mxu1 %v1282_v52  ;;  %v1500_v2 = vld [vmem:[%s1808_s13 + $0x184] ss:$8 sps:$4 sm:$0xff]   ;;  %v1502_v3 = vld [vmem:[%s1808_s13 + $0x80] ss:$8 sps:$4 sm:$0xff]   ;;  %v603_v8 = vld [vmem:[#allocation2] sm:$0xff] }
  0x60   : > { %1016 = vmatpush1.bf16.msra.mxu0 %v1442_v23  ;;  %v1503_v4 = vld [vmem:[%s1808_s13 + $0x180] ss:$8 sps:$4 sm:$0xff]   ;;  %v604_v12 = vld [vmem:[#allocation2 + $0x8] sm:$0xff] }
  0x61   : > { %1057 = vmatpush1.bf16.msra.mxu1 %v1443_v24  ;;  %1017 = vmatprep.subr.bf16.mxu0 %v1444_v25 }
  0x62   : > { %1058 = vmatprep.subr.bf16.mxu1 %v1446_v26 }
  0x64   : > { %1018 = vmatpush1.bf16.msra.mxu0 %v1448_v27 }
  0x65   : > { %1059 = vmatpush1.bf16.msra.mxu1 %v1449_v28  ;;  %1019 = vmatprep.subr.bf16.mxu0 %v1450_v29 }
  0x66   : > { %1060 = vmatprep.subr.bf16.mxu1 %v1452_v30 }
  0x68   : > { %1020 = vmatpush1.bf16.msra.mxu0 %v1454_v31 }
  0x69   : > { %1061 = vmatpush1.bf16.msra.mxu1 %v1455_v32  ;;  %1021 = vmatprep.subr.bf16.mxu0 %v1456_v33 }
  0x6a   : > { %1062 = vmatprep.subr.bf16.mxu1 %v1458_v34 }
  0x6c   : > { %1022 = vmatpush2.bf16.msra.mxu0 %v1460_v35 }
  0x6d   : > { %1063 = vmatpush2.bf16.msra.mxu1 %v1461_v36  ;;  %1023 = vmatprep.subr.bf16.mxu0 %v1462_v37 }
  0x6e   : > { %1064 = vmatprep.subr.bf16.mxu1 %v1464_v38 }
  0x70   : > { %1024 = vmatpush2.bf16.msra.mxu0 %v1466_v39 }
  0x71   : > { %1065 = vmatpush2.bf16.msra.mxu1 %v1467_v40  ;;  %1025 = vmatprep.subr.bf16.mxu0 %v1468_v41 }
  0x72   : > { %1066 = vmatprep.subr.bf16.mxu1 %v1470_v42 }
  0x74   : > { %1026 = vmatpush2.bf16.msra.mxu0 %v1472_v43 }
  0x75   : > { %1067 = vmatpush2.bf16.msra.mxu1 %v1473_v44  ;;  %1027 = vmatprep.subr.bf16.mxu0 %v1474_v45 }
  0x76   : > { %1068 = vmatprep.subr.bf16.mxu1 %v1476_v46 }
  0x78   : > { %1028 = vmatpush2.bf16.msra.mxu0 %v1478_v50 }
  0x79   : > { %1069 = vmatpush2.bf16.msra.mxu1 %v1479_v51  ;;  %1029 = vmatprep.subr.bf16.mxu0 %v1480_v53 }
  0x7a   : > { %1070 = vmatprep.subr.bf16.mxu1 %v1482_v54 }
  0x7c   : > { %1030 = vmatpush2.bf16.msra.mxu0 %v1484_v55 }
  0x7d   : > { %1071 = vmatpush2.bf16.msra.mxu1 %v1485_v56  ;;  %1031 = vmatprep.subr.bf16.mxu0 %v1486_v57 }
  0x7e   : > { %1072 = vmatprep.subr.bf16.mxu1 %v1488_v58 }
  0x80   : > { %1032 = vmatpush2.bf16.msra.mxu0 %v1490_v59 }
  0x81   : > { %1073 = vmatpush2.bf16.msra.mxu1 %v1491_v60  ;;  %1033 = vmatprep.subr.bf16.mxu0 %v1492_v61 }
  0x82   : > { %1074 = vmatprep.subr.bf16.mxu1 %v1494_v62 }
  0x84   : > { %1034 = vmatpush2.bf16.msra.mxu0 %v1496_v63 }
  0x85   : > { %1075 = vmatpush2.bf16.msra.mxu1 %v1497_v0  ;;  %1035 = vmatprep.subr.bf16.mxu0 %v1498_v1 }
  0x86   : > { %1076 = vmatprep.subr.bf16.mxu1 %v1500_v2 }
  0x88   : > { %1036 = vmatpush2.bf16.msra.mxu0 %v1502_v3 }
  0x89   : > { %1077 = vmatpush2.bf16.msra.mxu1 %v1503_v4 }
  0x8b   : > { %1038 = vmatmul.mubr.bf16.vlgmr.msra.gmra.mxu0 %v1279_v5 }
  0x8c   : > { %1079 = vmatmul.mubr.bf16.vlgmr.msra.gmra.mxu1 %v1281_v6 }
 0x14b   : > { %v1039_v7 = vpop.f32.mrf.mxu0 }
 0x14c   : > { %v1080_v9 = vpop.f32.mrf.mxu1 }
 0x14d   : > { %v1081_v10 = vadd.f32 %v1080_v9, %v1039_v7  ;;  %v1041_v11 = vpop.f32.mrf.mxu0 }
 0x14e   : > { %v1082_v13 = vpop.f32.mrf.mxu1 }
 0x14f   : > { %v1087_v14 = vadd.f32 %v1081_v10, %v603_v8  ;;  %v1083_v15 = vadd.f32 %v1082_v13, %v1041_v11  ;;  %v1043_v16 = vpop.f32.mrf.mxu0  ;;  %1094 = sbr.rel (%p1347_p13) target bundleno = 355 (0x163), region = 82 }
 0x150   : > { %v1084_v17 = vpop.f32.mrf.mxu1 }
 0x151   : > { %1089 = vst [vmem:[#allocation2] sm:$0xff] %v1087_v14  ;;  %v1088_v18 = vadd.f32 %v1083_v15, %v604_v12  ;;  %v1044_v19 = vpop.f32.mrf.mxu0 }
 0x152   : > { %v1085_v20 = vpop.f32.mrf.mxu1 }
 0x153   : > { %1090 = vst [vmem:[#allocation2 + $0x8] sm:$0xff] %v1088_v18 }
 0x154   : > { %v1099_v21 = vlaneseq  ;;  %v1097_v23 = vld [vmem:[%s580_s15] sm:$0x3] }
 0x155   : > { %v1111_v24 = vld [vmem:[%s585_s18] sm:$0x3] }
 0x156   : > { %v1100_v22 = vshrl.u32 %v1099_v21, 7 }
 0x158   : > { %v1101_v25 = vsub.s32 0, %v1100_v22  ;;  %v1105_v26 = vsub.s32 1, %v1100_v22  ;;  %v1095_v27 = vld [vmem:[#allocation2] sm:$0xff] }
 0x15a   : > { %v1096_v28 = vld [vmem:[#allocation2 + $0x8] sm:$0xff]  ;;  %v1102_v29 = vrot.slane %v1097_v23, %v1101_v25  ;;  %v1116_v30 = vrot.slane %v1111_v24, %v1101_v25  ;;  %v1106_v31 = vrot.slane %v1097_v23, %v1105_v26  ;;  %v1120_v32 = vrot.slane %v1111_v24, %v1105_v26 }
 0x15c   : > { %v1109_v33 = vmul.f32 %v1102_v29, %v1095_v27  ;;  %v1110_v34 = vmul.f32 %v1106_v31, %v1096_v28 }
 0x15e   : > { %v1123_v35 = vadd.f32 %v1116_v30, %v1109_v33  ;;  %v1124_v36 = vadd.f32 %v1120_v32, %v1110_v34 }
 0x160   : > { %v1125_v37 = vmax.f32 %v1123_v35, 0.0  ;;  %v1126_v38 = vmax.f32 %v1124_v36, 0.0 }
 0x162   : > { %1127 = vst [vmem:[%s1806_s12] sm:$0xff] %v1125_v37  ;;  %1128 = vst [vmem:[%s1806_s12 + $0x8] sm:$0xff] %v1126_v38 }
 0x163 PF: > { %s14_s21 = sadd.s32 1, %s1562_s21   ;;  %s1916_s15 = smov %s1542_s16 }
 0x164   : > { %p11_p0 = scmp.ge.s32.totalorder %s14_s21, 20   ;;  %s1917_s16 = smov %s1641_s28 }
 0x165   : > { %s1918_s17 = smov %s1554_s19  ;;  %s1919_s18 = smov %s1558_s20 }
 0x166   : > { %s1920_s19 = smov %s1923_s22  ;;  %s1921_s20 = smov %s1927_s23 }
 0x167   :  { %13 = sbr.rel (!%p11_p0) target bundleno = 4 (0x4), region = 126 }

// kernel: _lambda_.37
= control target key start
LH: loop header
LB: loop body
LE: loop exit
PB: predicated region body
PF: predicated region fallthrough
CT: control target
= control target key end

     0   :  { %s1682_s18 = smov 0   ;;  %s1684_s19 = smov 0   ;;  %s2010_s0 = inlined_call_operand.vmem [shape: bf16[8,4608], index: 0, kind: input, shape index: {}]   ;;  %s2011_s1 = inlined_call_operand.vmem [shape: bf16[4608,512], index: 1, kind: input, shape index: {}]   ;;  %s2012_s2 = inlined_call_operand.vmem [shape: f32[1,512], index: 2, kind: input, shape index: {}]   ;;  %s2013_s3 = inlined_call_operand.vmem [shape: f32[1,512], index: 3, kind: input, shape index: {}]   ;;  %s2014_s4 = inlined_call_operand.vmem [shape: f32[8,512], index: 4, kind: input, shape index: {}]   ;;  %s2015_s5 = inlined_call_operand.vmem [shape: f32[8,512], index: 5, kind: output, shape index: {}]  }
   0x1   :  { %s1686_s20 = smov 0   ;;  %s1688_s21 = smov 0  }
   0x2   :  { %s1690_s22 = smov 0   ;;  %s1692_s23 = smov 0  }
   0x3   :  { %s1694_s24 = smov 0  }
   0x4 LB: > { %s27_s25 = sadd.s32 1, %s1641_s22  ;;  %s30_s26 = sadd.s32 1, %s1645_s23  ;;  %s1649_s24 = sphi %s1694_s24, %s15_s24   ;;  %s1645_s23 = sphi %s1692_s23, %s2021_s23   ;;  %s1641_s22 = sphi %s1690_s22, %s2020_s22   ;;  %s1637_s21 = sphi %s1688_s21, %s2019_s21   ;;  %s1633_s20 = sphi %s1686_s20, %s2018_s20   ;;  %s1629_s19 = sphi %s1684_s19, %s2017_s19   ;;  %s1625_s18 = sphi %s1682_s18, %s2016_s18  }
   0x5   : > { %p28_p0 = scmp.ge.s32.totalorder %s27_s25, 9  ;;  %p78_p1 = scmp.ne.s32.totalorder %s1629_s19, %s1625_s18 }
   0x6   : > { %p79_p2 = scmp.eq.s32.totalorder %s1649_s24, 0  ;;  %s71_s30 = sadd.s32 1, %s1629_s19 }
   0x7   : > { %s2023_s25 = smov (%p28_p0, %s27_s25), 0  ;;  %s2025_s26 = smov (!%p28_p0, %s30_s26), %s1645_s23 }
   0x8   : > { %p80_p3 = por %p79_p2, %p78_p1  ;;  %p32_p4 = scmp.ge.s32.totalorder %s2025_s26, 2 }
   0x9   : > { %s66_s27 = ssub.s32 %s1641_s22, %s2023_s25  ;;  %p1349_p6 = scmp.ge.s32.totalorder %s1649_s24, 18 }
   0xa   : > { %s2027_s26 = smov (%p32_p4, %s2025_s26), 0 }
   0xb   : > { %s67_s28 = ssub.s32 %s1645_s23, %s2027_s26  ;;  %212 = sbr.rel (%p1349_p6) target bundleno = 55 (0x37), region = 16 }
   0xc   : > { %s68_s29 = sor.u32 %s67_s28, %s66_s27 }
   0xd   : > { %p69_p5 = scmp.eq.s32.totalorder %s68_s29, 0 }
   0xf   : > { %s1733_s6 = scalar_select %p69_p5, %s1629_s19, %s71_s30  }
  0x10   : > { %228 = sbr.rel (!%p80_p3) target bundleno = 55 (0x37), region = 24  ;;  %s230_s7 = sand.u32 (%p80_p3), 1, %s1629_s19  }
  0x11   : > { %s1352_s8 = sshll.u32 (%p80_p3), %s1645_s23, 1  ;;  %s1350_s9 = sshll.u32 (%p80_p3), %s230_s7, 9 }
  0x12   : > { %s1437_s10 = sshll.u32 (%p80_p3), %s1641_s22, 8  ;;  %s1747_s16 = scalar_lea.vmem (%p80_p3), [#allocation3], %s1350_s9 }
  0x13   : > { %s236_s11 = sadd.s32 (%p80_p3), %s1437_s10, %s1352_s8 }
  0x14   : > { %s1354_s12 = sshll.u32 (%p80_p3), %s236_s11, 2 }
  0x15   : > { %s1742_s15 = scalar_lea.vmem %s2011_s1, %s1354_s12 }
  0x16   : > { %v393_v0 = vld [vmem:[%s1742_s15] sm:$0xff]  ;;  %v395_v1 = vld [vmem:[%s1742_s15 + $0x10] sm:$0xff] }
  0x17   : > { %v397_v2 = vld [vmem:[%s1742_s15 + $0x20] sm:$0xff]  ;;  %394 = vst [vmem:[%s1747_s16] sm:$0xff] %v393_v0  ;;  %396 = vst [vmem:[%s1747_s16 + $0x8] sm:$0xff] %v395_v1  ;;  %v399_v3 = vld [vmem:[%s1742_s15 + $0x30] sm:$0xff] }
  0x18   : > { %398 = vst [vmem:[%s1747_s16 + $0x10] sm:$0xff] %v397_v2  ;;  %v401_v4 = vld [vmem:[%s1742_s15 + $0x40] sm:$0xff]  ;;  %v403_v5 = vld [vmem:[%s1742_s15 + $0x50] sm:$0xff]  ;;  %400 = vst [vmem:[%s1747_s16 + $0x18] sm:$0xff] %v399_v3 }
  0x19   : > { %402 = vst [vmem:[%s1747_s16 + $0x20] sm:$0xff] %v401_v4  ;;  %404 = vst [vmem:[%s1747_s16 + $0x28] sm:$0xff] %v403_v5  ;;  %v405_v6 = vld [vmem:[%s1742_s15 + $0x60] sm:$0xff]  ;;  %v407_v7 = vld [vmem:[%s1742_s15 + $0x70] sm:$0xff] }
  0x1a   : > { %v409_v8 = vld [vmem:[%s1742_s15 + $0x80] sm:$0xff]  ;;  %406 = vst [vmem:[%s1747_s16 + $0x30] sm:$0xff] %v405_v6  ;;  %408 = vst [vmem:[%s1747_s16 + $0x38] sm:$0xff] %v407_v7  ;;  %v411_v9 = vld [vmem:[%s1742_s15 + $0x90] sm:$0xff] }
  0x1b   : > { %410 = vst [vmem:[%s1747_s16 + $0x40] sm:$0xff] %v409_v8  ;;  %v413_v10 = vld [vmem:[%s1742_s15 + $0xa0] sm:$0xff]  ;;  %v415_v11 = vld [vmem:[%s1742_s15 + $0xb0] sm:$0xff]  ;;  %412 = vst [vmem:[%s1747_s16 + $0x48] sm:$0xff] %v411_v9 }
  0x1c   : > { %414 = vst [vmem:[%s1747_s16 + $0x50] sm:$0xff] %v413_v10  ;;  %416 = vst [vmem:[%s1747_s16 + $0x58] sm:$0xff] %v415_v11  ;;  %v417_v12 = vld [vmem:[%s1742_s15 + $0xc0] sm:$0xff]  ;;  %v419_v13 = vld [vmem:[%s1742_s15 + $0xd0] sm:$0xff] }
  0x1d   : > { %v421_v14 = vld [vmem:[%s1742_s15 + $0xe0] sm:$0xff]  ;;  %418 = vst [vmem:[%s1747_s16 + $0x60] sm:$0xff] %v417_v12  ;;  %420 = vst [vmem:[%s1747_s16 + $0x68] sm:$0xff] %v419_v13  ;;  %v423_v15 = vld [vmem:[%s1742_s15 + $0xf0] sm:$0xff] }
  0x1e   : > { %422 = vst [vmem:[%s1747_s16 + $0x70] sm:$0xff] %v421_v14  ;;  %v425_v16 = vld [vmem:[%s1742_s15 + $0x100] sm:$0xff]  ;;  %v427_v17 = vld [vmem:[%s1742_s15 + $0x110] sm:$0xff]  ;;  %424 = vst [vmem:[%s1747_s16 + $0x78] sm:$0xff] %v423_v15 }
  0x1f   : > { %426 = vst [vmem:[%s1747_s16 + $0x80] sm:$0xff] %v425_v16  ;;  %428 = vst [vmem:[%s1747_s16 + $0x88] sm:$0xff] %v427_v17  ;;  %v429_v18 = vld [vmem:[%s1742_s15 + $0x120] sm:$0xff]  ;;  %v431_v19 = vld [vmem:[%s1742_s15 + $0x130] sm:$0xff] }
  0x20   : > { %v433_v20 = vld [vmem:[%s1742_s15 + $0x140] sm:$0xff]  ;;  %430 = vst [vmem:[%s1747_s16 + $0x90] sm:$0xff] %v429_v18  ;;  %432 = vst [vmem:[%s1747_s16 + $0x98] sm:$0xff] %v431_v19  ;;  %v435_v21 = vld [vmem:[%s1742_s15 + $0x150] sm:$0xff] }
  0x21   : > { %434 = vst [vmem:[%s1747_s16 + $0xa0] sm:$0xff] %v433_v20  ;;  %v437_v22 = vld [vmem:[%s1742_s15 + $0x160] sm:$0xff]  ;;  %v439_v23 = vld [vmem:[%s1742_s15 + $0x170] sm:$0xff]  ;;  %436 = vst [vmem:[%s1747_s16 + $0xa8] sm:$0xff] %v435_v21 }
  0x22   : > { %438 = vst [vmem:[%s1747_s16 + $0xb0] sm:$0xff] %v437_v22  ;;  %440 = vst [vmem:[%s1747_s16 + $0xb8] sm:$0xff] %v439_v23  ;;  %v441_v24 = vld [vmem:[%s1742_s15 + $0x180] sm:$0xff]  ;;  %v443_v25 = vld [vmem:[%s1742_s15 + $0x190] sm:$0xff] }
  0x23   : > { %v445_v26 = vld [vmem:[%s1742_s15 + $0x1a0] sm:$0xff]  ;;  %442 = vst [vmem:[%s1747_s16 + $0xc0] sm:$0xff] %v441_v24  ;;  %444 = vst [vmem:[%s1747_s16 + $0xc8] sm:$0xff] %v443_v25  ;;  %v447_v27 = vld [vmem:[%s1742_s15 + $0x1b0] sm:$0xff] }
  0x24   : > { %446 = vst [vmem:[%s1747_s16 + $0xd0] sm:$0xff] %v445_v26  ;;  %v449_v28 = vld [vmem:[%s1742_s15 + $0x1c0] sm:$0xff]  ;;  %v451_v29 = vld [vmem:[%s1742_s15 + $0x1d0] sm:$0xff]  ;;  %448 = vst [vmem:[%s1747_s16 + $0xd8] sm:$0xff] %v447_v27 }
  0x25   : > { %450 = vst [vmem:[%s1747_s16 + $0xe0] sm:$0xff] %v449_v28  ;;  %452 = vst [vmem:[%s1747_s16 + $0xe8] sm:$0xff] %v451_v29  ;;  %v453_v30 = vld [vmem:[%s1742_s15 + $0x1e0] sm:$0xff]  ;;  %v455_v31 = vld [vmem:[%s1742_s15 + $0x1f0] sm:$0xff] }
  0x26   : > { %v457_v32 = vld [vmem:[%s1742_s15 + $0x200] sm:$0xff]  ;;  %454 = vst [vmem:[%s1747_s16 + $0xf0] sm:$0xff] %v453_v30  ;;  %456 = vst [vmem:[%s1747_s16 + $0xf8] sm:$0xff] %v455_v31  ;;  %v459_v33 = vld [vmem:[%s1742_s15 + $0x210] sm:$0xff] }
  0x27   : > { %458 = vst [vmem:[%s1747_s16 + $0x100] sm:$0xff] %v457_v32  ;;  %v461_v34 = vld [vmem:[%s1742_s15 + $0x220] sm:$0xff]  ;;  %v463_v35 = vld [vmem:[%s1742_s15 + $0x230] sm:$0xff]  ;;  %460 = vst [vmem:[%s1747_s16 + $0x108] sm:$0xff] %v459_v33 }
  0x28   : > { %462 = vst [vmem:[%s1747_s16 + $0x110] sm:$0xff] %v461_v34  ;;  %464 = vst [vmem:[%s1747_s16 + $0x118] sm:$0xff] %v463_v35  ;;  %v465_v36 = vld [vmem:[%s1742_s15 + $0x240] sm:$0xff]  ;;  %v467_v37 = vld [vmem:[%s1742_s15 + $0x250] sm:$0xff] }
  0x29   : > { %v469_v38 = vld [vmem:[%s1742_s15 + $0x260] sm:$0xff]  ;;  %466 = vst [vmem:[%s1747_s16 + $0x120] sm:$0xff] %v465_v36  ;;  %468 = vst [vmem:[%s1747_s16 + $0x128] sm:$0xff] %v467_v37  ;;  %v471_v39 = vld [vmem:[%s1742_s15 + $0x270] sm:$0xff] }
  0x2a   : > { %470 = vst [vmem:[%s1747_s16 + $0x130] sm:$0xff] %v469_v38  ;;  %v473_v40 = vld [vmem:[%s1742_s15 + $0x280] sm:$0xff]  ;;  %v475_v41 = vld [vmem:[%s1742_s15 + $0x290] sm:$0xff]  ;;  %472 = vst [vmem:[%s1747_s16 + $0x138] sm:$0xff] %v471_v39 }
  0x2b   : > { %474 = vst [vmem:[%s1747_s16 + $0x140] sm:$0xff] %v473_v40  ;;  %476 = vst [vmem:[%s1747_s16 + $0x148] sm:$0xff] %v475_v41  ;;  %v477_v42 = vld [vmem:[%s1742_s15 + $0x2a0] sm:$0xff]  ;;  %v479_v43 = vld [vmem:[%s1742_s15 + $0x2b0] sm:$0xff] }
  0x2c   : > { %v481_v44 = vld [vmem:[%s1742_s15 + $0x2c0] sm:$0xff]  ;;  %478 = vst [vmem:[%s1747_s16 + $0x150] sm:$0xff] %v477_v42  ;;  %480 = vst [vmem:[%s1747_s16 + $0x158] sm:$0xff] %v479_v43  ;;  %v483_v45 = vld [vmem:[%s1742_s15 + $0x2d0] sm:$0xff] }
  0x2d   : > { %482 = vst [vmem:[%s1747_s16 + $0x160] sm:$0xff] %v481_v44  ;;  %v485_v46 = vld [vmem:[%s1742_s15 + $0x2e0] sm:$0xff]  ;;  %v487_v47 = vld [vmem:[%s1742_s15 + $0x2f0] sm:$0xff]  ;;  %484 = vst [vmem:[%s1747_s16 + $0x168] sm:$0xff] %v483_v45 }
  0x2e   : > { %486 = vst [vmem:[%s1747_s16 + $0x170] sm:$0xff] %v485_v46  ;;  %488 = vst [vmem:[%s1747_s16 + $0x178] sm:$0xff] %v487_v47  ;;  %v489_v48 = vld [vmem:[%s1742_s15 + $0x300] sm:$0xff]  ;;  %v491_v49 = vld [vmem:[%s1742_s15 + $0x310] sm:$0xff] }
  0x2f   : > { %v493_v50 = vld [vmem:[%s1742_s15 + $0x320] sm:$0xff]  ;;  %490 = vst [vmem:[%s1747_s16 + $0x180] sm:$0xff] %v489_v48  ;;  %492 = vst [vmem:[%s1747_s16 + $0x188] sm:$0xff] %v491_v49  ;;  %v495_v51 = vld [vmem:[%s1742_s15 + $0x330] sm:$0xff] }
  0x30   : > { %494 = vst [vmem:[%s1747_s16 + $0x190] sm:$0xff] %v493_v50  ;;  %v497_v52 = vld [vmem:[%s1742_s15 + $0x340] sm:$0xff]  ;;  %v499_v53 = vld [vmem:[%s1742_s15 + $0x350] sm:$0xff]  ;;  %496 = vst [vmem:[%s1747_s16 + $0x198] sm:$0xff] %v495_v51 }
  0x31   : > { %498 = vst [vmem:[%s1747_s16 + $0x1a0] sm:$0xff] %v497_v52  ;;  %500 = vst [vmem:[%s1747_s16 + $0x1a8] sm:$0xff] %v499_v53  ;;  %v501_v54 = vld [vmem:[%s1742_s15 + $0x360] sm:$0xff]  ;;  %v503_v55 = vld [vmem:[%s1742_s15 + $0x370] sm:$0xff] }
  0x32   : > { %v505_v56 = vld [vmem:[%s1742_s15 + $0x380] sm:$0xff]  ;;  %502 = vst [vmem:[%s1747_s16 + $0x1b0] sm:$0xff] %v501_v54  ;;  %504 = vst [vmem:[%s1747_s16 + $0x1b8] sm:$0xff] %v503_v55  ;;  %v507_v57 = vld [vmem:[%s1742_s15 + $0x390] sm:$0xff] }
  0x33   : > { %506 = vst [vmem:[%s1747_s16 + $0x1c0] sm:$0xff] %v505_v56  ;;  %v509_v58 = vld [vmem:[%s1742_s15 + $0x3a0] sm:$0xff]  ;;  %v511_v59 = vld [vmem:[%s1742_s15 + $0x3b0] sm:$0xff]  ;;  %508 = vst [vmem:[%s1747_s16 + $0x1c8] sm:$0xff] %v507_v57 }
  0x34   : > { %510 = vst [vmem:[%s1747_s16 + $0x1d0] sm:$0xff] %v509_v58  ;;  %512 = vst [vmem:[%s1747_s16 + $0x1d8] sm:$0xff] %v511_v59  ;;  %v513_v60 = vld [vmem:[%s1742_s15 + $0x3c0] sm:$0xff]  ;;  %v515_v61 = vld [vmem:[%s1742_s15 + $0x3d0] sm:$0xff] }
  0x35   : > { %v517_v62 = vld [vmem:[%s1742_s15 + $0x3e0] sm:$0xff]  ;;  %514 = vst [vmem:[%s1747_s16 + $0x1e0] sm:$0xff] %v513_v60  ;;  %516 = vst [vmem:[%s1747_s16 + $0x1e8] sm:$0xff] %v515_v61  ;;  %v519_v63 = vld [vmem:[%s1742_s15 + $0x3f0] sm:$0xff] }
  0x36   : > { %518 = vst [vmem:[%s1747_s16 + $0x1f0] sm:$0xff] %v517_v62  ;;  %520 = vst [vmem:[%s1747_s16 + $0x1f8] sm:$0xff] %v519_v63 }
  0x37 PF: > { %p1355_p7 = scmp.ge.s32.totalorder %s1649_s24, 1  ;;  %p554_p8 = scmp.lt.s32.totalorder %s1649_s24, 19 }
  0x39   : > { %p555_p9 = pnand %p1355_p7, %p554_p8 }
  0x3a   : > { %s561_s17 = sand.u32 (!%p555_p9), 1, %s1625_s18   ;;  %s1357_s27 = sshll.u32 (!%p555_p9), %s1633_s20, 2 }
  0x3b   : > { %558 = sbr.rel (%p555_p9) target bundleno = 357 (0x165), region = 74  ;;  %s1356_s28 = sshll.u32 (!%p555_p9), %s561_s17, 9 }
  0x3c   : > { %p621_p10 = scmp.lt.s32.totalorder (!%p555_p9), %s1357_s27, 35  ;;  %s1359_s29 = sshll.u32 (!%p555_p9), %s1637_s21, 1 }
  0x3d   : > { %p631_p11 = scmp.lt.s32.totalorder (!%p555_p9), %s1359_s29, 3  ;;  %s1905_s8 = scalar_lea.vmem (!%p555_p9), [#allocation3], %s1356_s28 }
  0x3e   : > { %p1365_p12 = scmp.ne.s32.totalorder (!%p555_p9), %s1633_s20, 0 }
  0x40   : > { %s2029_s27 = smov (!%p621_p10, %s1357_s27), 35  ;;  %s2031_s29 = smov (!%p631_p11, %s1359_s29), 3 }
  0x41   : > { %s1358_s30 = sshll.u32 %s2029_s27, 2  ;;  %s633_s18 = scalar_lea.vmem %s2012_s2, %s2031_s29 }
  0x42   : > { %s1882_s9 = scalar_lea.vmem %s2010_s0, %s1358_s30  ;;  %s638_s21 = scalar_lea.vmem %s2013_s3, %s2031_s29 }
  0x43   : > { %s1362_s14 = sshll.u32 %s2031_s29, 3  ;;  %663 = sbr.rel (%p1365_p12) target bundleno = 74 (0x4a), region = 82 }
  0x44   : > { %s1898_s17 = scalar_lea.vmem %s2014_s4, %s1362_s14  ;;  %s1903_s7 = scalar_lea.vmem %s2015_s5, %s1362_s14 }
  0x48   : > { %v1651_v0 = vmov 0.0  }
  0x49   : > { %664 = vst [vmem:[#allocation2] sm:$0xff] %v1651_v0  ;;  %665 = vst [vmem:[#allocation2 + $0x8] sm:$0xff] %v1651_v0 }
  0x4a PF: > { %v1495_v1 = vld [vmem:[%s1905_s8 + $0x74] ss:$8 sps:$4 sm:$0xff]   ;;  %v1499_v3 = vld [vmem:[%s1905_s8 + $0x70] ss:$8 sps:$4 sm:$0xff]   ;;  %v1501_v5 = vld [vmem:[%s1905_s8 + $0x64] ss:$8 sps:$4 sm:$0xff]  }
  0x4b   : > { %v1497_v2 = vld [vmem:[%s1905_s8 + $0x174] ss:$8 sps:$4 sm:$0xff]   ;;  %1068 = vmatprep.subr.bf16.mxu0 %v1495_v1  ;;  %v1500_v4 = vld [vmem:[%s1905_s8 + $0x170] ss:$8 sps:$4 sm:$0xff]   ;;  %v1503_v6 = vld [vmem:[%s1905_s8 + $0x164] ss:$8 sps:$4 sm:$0xff]  }
  0x4c   : > { %1109 = vmatprep.subr.bf16.mxu1 %v1497_v2  ;;  %1069 = vmatpush1.bf16.msra.mxu0 %v1499_v3  ;;  %v1505_v7 = vld [vmem:[%s1905_s8 + $0x60] ss:$8 sps:$4 sm:$0xff]   ;;  %v1507_v9 = vld [vmem:[%s1905_s8 + $0x54] ss:$8 sps:$4 sm:$0xff]   ;;  %v1511_v11 = vld [vmem:[%s1905_s8 + $0x50] ss:$8 sps:$4 sm:$0xff]  }
  0x4d   : > { %1110 = vmatpush1.bf16.msra.mxu1 %v1500_v4  ;;  %1070 = vmatprep.subr.bf16.mxu0 %v1501_v5  ;;  %v1506_v8 = vld [vmem:[%s1905_s8 + $0x160] ss:$8 sps:$4 sm:$0xff]   ;;  %v1509_v10 = vld [vmem:[%s1905_s8 + $0x154] ss:$8 sps:$4 sm:$0xff]   ;;  %v1512_v12 = vld [vmem:[%s1905_s8 + $0x150] ss:$8 sps:$4 sm:$0xff]  }
  0x4e   : > { %1111 = vmatprep.subr.bf16.mxu1 %v1503_v6  ;;  %v1513_v13 = vld [vmem:[%s1905_s8 + $0x44] ss:$8 sps:$4 sm:$0xff]   ;;  %v1517_v15 = vld [vmem:[%s1905_s8 + $0x40] ss:$8 sps:$4 sm:$0xff]   ;;  %v1519_v17 = vld [vmem:[%s1905_s8 + $0x34] ss:$8 sps:$4 sm:$0xff]  }
  0x4f   : > { %v1515_v14 = vld [vmem:[%s1905_s8 + $0x144] ss:$8 sps:$4 sm:$0xff]   ;;  %v1518_v16 = vld [vmem:[%s1905_s8 + $0x140] ss:$8 sps:$4 sm:$0xff]   ;;  %v1521_v18 = vld [vmem:[%s1905_s8 + $0x134] ss:$8 sps:$4 sm:$0xff]  }
  0x50   : > { %1071 = vmatpush1.bf16.msra.mxu0 %v1505_v7  ;;  %v1523_v19 = vld [vmem:[%s1905_s8 + $0x30] ss:$8 sps:$4 sm:$0xff]   ;;  %v1525_v21 = vld [vmem:[%s1905_s8 + $0x24] ss:$8 sps:$4 sm:$0xff]   ;;  %v1529_v23 = vld [vmem:[%s1905_s8 + $0x20] ss:$8 sps:$4 sm:$0xff]  }
  0x51   : > { %1112 = vmatpush1.bf16.msra.mxu1 %v1506_v8  ;;  %1072 = vmatprep.subr.bf16.mxu0 %v1507_v9  ;;  %v1524_v20 = vld [vmem:[%s1905_s8 + $0x130] ss:$8 sps:$4 sm:$0xff]   ;;  %v1527_v22 = vld [vmem:[%s1905_s8 + $0x124] ss:$8 sps:$4 sm:$0xff]   ;;  %v1530_v24 = vld [vmem:[%s1905_s8 + $0x120] ss:$8 sps:$4 sm:$0xff]  }
  0x52   : > { %1113 = vmatprep.subr.bf16.mxu1 %v1509_v10  ;;  %v1531_v25 = vld [vmem:[%s1905_s8 + $0x14] ss:$8 sps:$4 sm:$0xff]   ;;  %v1535_v27 = vld [vmem:[%s1905_s8 + $0x10] ss:$8 sps:$4 sm:$0xff]   ;;  %v1537_v29 = vld [vmem:[%s1905_s8 + $0x4] ss:$8 sps:$4 sm:$0xff]  }
  0x53   : > { %v1533_v26 = vld [vmem:[%s1905_s8 + $0x114] ss:$8 sps:$4 sm:$0xff]   ;;  %v1536_v28 = vld [vmem:[%s1905_s8 + $0x110] ss:$8 sps:$4 sm:$0xff]   ;;  %v1539_v30 = vld [vmem:[%s1905_s8 + $0x104] ss:$8 sps:$4 sm:$0xff]  }
  0x54   : > { %1073 = vmatpush1.bf16.msra.mxu0 %v1511_v11  ;;  %v1541_v31 = vld [vmem:[%s1905_s8] ss:$8 sps:$4 sm:$0xff]   ;;  %v1543_v33 = vld [vmem:[%s1905_s8 + $0xf4] ss:$8 sps:$4 sm:$0xff]   ;;  %v1547_v35 = vld [vmem:[%s1905_s8 + $0xf0] ss:$8 sps:$4 sm:$0xff]  }
  0x55   : > { %1114 = vmatpush1.bf16.msra.mxu1 %v1512_v12  ;;  %1074 = vmatprep.subr.bf16.mxu0 %v1513_v13  ;;  %v1542_v32 = vld [vmem:[%s1905_s8 + $0x100] ss:$8 sps:$4 sm:$0xff]   ;;  %v1545_v34 = vld [vmem:[%s1905_s8 + $0x1f4] ss:$8 sps:$4 sm:$0xff]   ;;  %v1548_v36 = vld [vmem:[%s1905_s8 + $0x1f0] ss:$8 sps:$4 sm:$0xff]  }
  0x56   : > { %1115 = vmatprep.subr.bf16.mxu1 %v1515_v14  ;;  %v1549_v37 = vld [vmem:[%s1905_s8 + $0xe4] ss:$8 sps:$4 sm:$0xff]   ;;  %v1553_v39 = vld [vmem:[%s1905_s8 + $0xe0] ss:$8 sps:$4 sm:$0xff]   ;;  %v1555_v41 = vld [vmem:[%s1905_s8 + $0xd4] ss:$8 sps:$4 sm:$0xff]  }
  0x57   : > { %v1551_v38 = vld [vmem:[%s1905_s8 + $0x1e4] ss:$8 sps:$4 sm:$0xff]   ;;  %v1554_v40 = vld [vmem:[%s1905_s8 + $0x1e0] ss:$8 sps:$4 sm:$0xff]   ;;  %v1557_v42 = vld [vmem:[%s1905_s8 + $0x1d4] ss:$8 sps:$4 sm:$0xff]  }
  0x58   : > { %1075 = vmatpush1.bf16.msra.mxu0 %v1517_v15  ;;  %v1559_v43 = vld [vmem:[%s1905_s8 + $0xd0] ss:$8 sps:$4 sm:$0xff]   ;;  %v1561_v45 = vld [vmem:[%s1905_s8 + $0xc4] ss:$8 sps:$4 sm:$0xff]   ;;  %v1565_v50 = vld [vmem:[%s1905_s8 + $0xc0] ss:$8 sps:$4 sm:$0xff]  }
  0x59   : > { %1116 = vmatpush1.bf16.msra.mxu1 %v1518_v16  ;;  %1076 = vmatprep.subr.bf16.mxu0 %v1519_v17  ;;  %v1560_v44 = vld [vmem:[%s1905_s8 + $0x1d0] ss:$8 sps:$4 sm:$0xff]   ;;  %v1563_v46 = vld [vmem:[%s1905_s8 + $0x1c4] ss:$8 sps:$4 sm:$0xff]   ;;  %v1566_v51 = vld [vmem:[%s1905_s8 + $0x1c0] ss:$8 sps:$4 sm:$0xff]  }
  0x5a   : > { %1117 = vmatprep.subr.bf16.mxu1 %v1521_v18  ;;  %v668_v47 = vld [vmem:[%s1882_s9] sm:$0xff]  ;;  %v669_v49 = vld [vmem:[%s1882_s9 + $0x8] sm:$0xff]  ;;  %v1573_v57 = vld [vmem:[%s1905_s8 + $0xa4] ss:$8 sps:$4 sm:$0xff]   ;;  %p1434_p13 = scmp.ne.s32.totalorder %s1633_s20, 8 }
  0x5b   : > { %v1367_v48 = vcombine.high %v668_v47, %v668_v47  ;;  %v1369_v52 = vcombine.high %v669_v49, %v669_v49  ;;  %v1567_v53 = vld [vmem:[%s1905_s8 + $0xb4] ss:$8 sps:$4 sm:$0xff]   ;;  %v1571_v55 = vld [vmem:[%s1905_s8 + $0xb0] ss:$8 sps:$4 sm:$0xff]   ;;  %v1575_v58 = vld [vmem:[%s1905_s8 + $0x1a4] ss:$8 sps:$4 sm:$0xff]   ;;  %v1366_v5 = vcombine.low %v668_v47, %v668_v47  ;;  %v1368_v6 = vcombine.low %v669_v49, %v669_v49 }
  0x5c   : > { %1077 = vmatpush1.bf16.msra.mxu0 %v1523_v19  ;;  %v1569_v54 = vld [vmem:[%s1905_s8 + $0x1b4] ss:$8 sps:$4 sm:$0xff]   ;;  %v1572_v56 = vld [vmem:[%s1905_s8 + $0x1b0] ss:$8 sps:$4 sm:$0xff]   ;;  %v1577_v59 = vld [vmem:[%s1905_s8 + $0xa0] ss:$8 sps:$4 sm:$0xff]  }
  0x5d   : > { %1118 = vmatpush1.bf16.msra.mxu1 %v1524_v20  ;;  %1078 = vmatprep.subr.bf16.mxu0 %v1525_v21  ;;  %v1578_v60 = vld [vmem:[%s1905_s8 + $0x1a0] ss:$8 sps:$4 sm:$0xff]   ;;  %v1579_v61 = vld [vmem:[%s1905_s8 + $0x94] ss:$8 sps:$4 sm:$0xff]   ;;  %v1583_v63 = vld [vmem:[%s1905_s8 + $0x90] ss:$8 sps:$4 sm:$0xff]  }
  0x5e   : > { %1119 = vmatprep.subr.bf16.mxu1 %v1527_v22  ;;  %1100 = vmatprep.mubr.bf16.mxu0 %v1367_v48  ;;  %v1581_v62 = vld [vmem:[%s1905_s8 + $0x194] ss:$8 sps:$4 sm:$0xff]   ;;  %v1584_v0 = vld [vmem:[%s1905_s8 + $0x190] ss:$8 sps:$4 sm:$0xff]   ;;  %v1585_v1 = vld [vmem:[%s1905_s8 + $0x84] ss:$8 sps:$4 sm:$0xff]  }
  0x5f   : > { %1141 = vmatprep.mubr.bf16.mxu1 %v1369_v52  ;;  %v1587_v2 = vld [vmem:[%s1905_s8 + $0x184] ss:$8 sps:$4 sm:$0xff]   ;;  %v1589_v3 = vld [vmem:[%s1905_s8 + $0x80] ss:$8 sps:$4 sm:$0xff]   ;;  %v666_v8 = vld [vmem:[#allocation2] sm:$0xff] }
  0x60   : > { %1079 = vmatpush1.bf16.msra.mxu0 %v1529_v23  ;;  %v1590_v4 = vld [vmem:[%s1905_s8 + $0x180] ss:$8 sps:$4 sm:$0xff]   ;;  %v667_v12 = vld [vmem:[#allocation2 + $0x8] sm:$0xff] }
  0x61   : > { %1120 = vmatpush1.bf16.msra.mxu1 %v1530_v24  ;;  %1080 = vmatprep.subr.bf16.mxu0 %v1531_v25 }
  0x62   : > { %1121 = vmatprep.subr.bf16.mxu1 %v1533_v26 }
  0x64   : > { %1081 = vmatpush1.bf16.msra.mxu0 %v1535_v27 }
  0x65   : > { %1122 = vmatpush1.bf16.msra.mxu1 %v1536_v28  ;;  %1082 = vmatprep.subr.bf16.mxu0 %v1537_v29 }
  0x66   : > { %1123 = vmatprep.subr.bf16.mxu1 %v1539_v30 }
  0x68   : > { %1083 = vmatpush1.bf16.msra.mxu0 %v1541_v31 }
  0x69   : > { %1124 = vmatpush1.bf16.msra.mxu1 %v1542_v32  ;;  %1084 = vmatprep.subr.bf16.mxu0 %v1543_v33 }
  0x6a   : > { %1125 = vmatprep.subr.bf16.mxu1 %v1545_v34 }
  0x6c   : > { %1085 = vmatpush2.bf16.msra.mxu0 %v1547_v35 }
  0x6d   : > { %1126 = vmatpush2.bf16.msra.mxu1 %v1548_v36  ;;  %1086 = vmatprep.subr.bf16.mxu0 %v1549_v37 }
  0x6e   : > { %1127 = vmatprep.subr.bf16.mxu1 %v1551_v38 }
  0x70   : > { %1087 = vmatpush2.bf16.msra.mxu0 %v1553_v39 }
  0x71   : > { %1128 = vmatpush2.bf16.msra.mxu1 %v1554_v40  ;;  %1088 = vmatprep.subr.bf16.mxu0 %v1555_v41 }
  0x72   : > { %1129 = vmatprep.subr.bf16.mxu1 %v1557_v42 }
  0x74   : > { %1089 = vmatpush2.bf16.msra.mxu0 %v1559_v43 }
  0x75   : > { %1130 = vmatpush2.bf16.msra.mxu1 %v1560_v44  ;;  %1090 = vmatprep.subr.bf16.mxu0 %v1561_v45 }
  0x76   : > { %1131 = vmatprep.subr.bf16.mxu1 %v1563_v46 }
  0x78   : > { %1091 = vmatpush2.bf16.msra.mxu0 %v1565_v50 }
  0x79   : > { %1132 = vmatpush2.bf16.msra.mxu1 %v1566_v51  ;;  %1092 = vmatprep.subr.bf16.mxu0 %v1567_v53 }
  0x7a   : > { %1133 = vmatprep.subr.bf16.mxu1 %v1569_v54 }
  0x7c   : > { %1093 = vmatpush2.bf16.msra.mxu0 %v1571_v55 }
  0x7d   : > { %1134 = vmatpush2.bf16.msra.mxu1 %v1572_v56  ;;  %1094 = vmatprep.subr.bf16.mxu0 %v1573_v57 }
  0x7e   : > { %1135 = vmatprep.subr.bf16.mxu1 %v1575_v58 }
  0x80   : > { %1095 = vmatpush2.bf16.msra.mxu0 %v1577_v59 }
  0x81   : > { %1136 = vmatpush2.bf16.msra.mxu1 %v1578_v60  ;;  %1096 = vmatprep.subr.bf16.mxu0 %v1579_v61 }
  0x82   : > { %1137 = vmatprep.subr.bf16.mxu1 %v1581_v62 }
  0x84   : > { %1097 = vmatpush2.bf16.msra.mxu0 %v1583_v63 }
  0x85   : > { %1138 = vmatpush2.bf16.msra.mxu1 %v1584_v0  ;;  %1098 = vmatprep.subr.bf16.mxu0 %v1585_v1 }
  0x86   : > { %1139 = vmatprep.subr.bf16.mxu1 %v1587_v2 }
  0x88   : > { %1099 = vmatpush2.bf16.msra.mxu0 %v1589_v3 }
  0x89   : > { %1140 = vmatpush2.bf16.msra.mxu1 %v1590_v4 }
  0x8b   : > { %1101 = vmatmul.mubr.bf16.vlgmr.msra.gmra.mxu0 %v1366_v5 }
  0x8c   : > { %1142 = vmatmul.mubr.bf16.vlgmr.msra.gmra.mxu1 %v1368_v6 }
 0x14b   : > { %v1102_v7 = vpop.f32.mrf.mxu0 }
 0x14c   : > { %v1143_v9 = vpop.f32.mrf.mxu1 }
 0x14d   : > { %v1144_v10 = vadd.f32 %v1143_v9, %v1102_v7  ;;  %v1104_v11 = vpop.f32.mrf.mxu0 }
 0x14e   : > { %v1145_v13 = vpop.f32.mrf.mxu1 }
 0x14f   : > { %v1150_v14 = vadd.f32 %v1144_v10, %v666_v8  ;;  %v1146_v15 = vadd.f32 %v1145_v13, %v1104_v11  ;;  %v1106_v16 = vpop.f32.mrf.mxu0  ;;  %1157 = sbr.rel (%p1434_p13) target bundleno = 357 (0x165), region = 86 }
 0x150   : > { %v1147_v17 = vpop.f32.mrf.mxu1 }
 0x151   : > { %1152 = vst [vmem:[#allocation2] sm:$0xff] %v1150_v14  ;;  %v1151_v18 = vadd.f32 %v1146_v15, %v667_v12  ;;  %v1107_v19 = vpop.f32.mrf.mxu0 }
 0x152   : > { %v1148_v20 = vpop.f32.mrf.mxu1 }
 0x153   : > { %1153 = vst [vmem:[#allocation2 + $0x8] sm:$0xff] %v1151_v18 }
 0x154   : > { %v1162_v21 = vlaneseq  ;;  %v1160_v23 = vld [vmem:[%s633_s18] sm:$0x3]  ;;  %v1189_v36 = vld [vmem:[%s1898_s17 + $0x8] sm:$0xff] }
 0x155   : > { %v1174_v24 = vld [vmem:[%s638_s21] sm:$0x3] }
 0x156   : > { %v1163_v22 = vshrl.u32 %v1162_v21, 7  ;;  %v1188_v35 = vld [vmem:[%s1898_s17] sm:$0xff] }
 0x158   : > { %v1164_v25 = vsub.s32 0, %v1163_v22  ;;  %v1168_v26 = vsub.s32 1, %v1163_v22  ;;  %v1158_v27 = vld [vmem:[#allocation2] sm:$0xff] }
 0x15a   : > { %v1159_v28 = vld [vmem:[#allocation2 + $0x8] sm:$0xff]  ;;  %v1165_v29 = vrot.slane %v1160_v23, %v1164_v25  ;;  %v1179_v30 = vrot.slane %v1174_v24, %v1164_v25  ;;  %v1169_v31 = vrot.slane %v1160_v23, %v1168_v26  ;;  %v1183_v32 = vrot.slane %v1174_v24, %v1168_v26 }
 0x15c   : > { %v1172_v33 = vmul.f32 %v1165_v29, %v1158_v27  ;;  %v1173_v34 = vmul.f32 %v1169_v31, %v1159_v28 }
 0x15e   : > { %v1186_v37 = vadd.f32 %v1179_v30, %v1172_v33  ;;  %v1187_v38 = vadd.f32 %v1183_v32, %v1173_v34 }
 0x160   : > { %v1190_v39 = vadd.f32 %v1188_v35, %v1186_v37  ;;  %v1191_v40 = vadd.f32 %v1189_v36, %v1187_v38 }
 0x162   : > { %v1192_v41 = vmax.f32 %v1190_v39, 0.0  ;;  %v1193_v42 = vmax.f32 %v1191_v40, 0.0 }
 0x164   : > { %1194 = vst [vmem:[%s1903_s7] sm:$0xff] %v1192_v41  ;;  %1195 = vst [vmem:[%s1903_s7 + $0x8] sm:$0xff] %v1193_v42 }
 0x165 PF: > { %s15_s24 = sadd.s32 1, %s1649_s24   ;;  %s2016_s18 = smov %s1629_s19 }
 0x166   : > { %p12_p0 = scmp.ge.s32.totalorder %s15_s24, 20   ;;  %s2017_s19 = smov %s1733_s6 }
 0x167   : > { %s2018_s20 = smov %s1641_s22  ;;  %s2019_s21 = smov %s1645_s23 }
 0x168   : > { %s2020_s22 = smov %s2023_s25  ;;  %s2021_s23 = smov %s2027_s26 }
 0x169   :  { %14 = sbr.rel (!%p12_p0) target bundleno = 4 (0x4), region = 133 }

// kernel: _lambda_.36
= control target key start
LH: loop header
LB: loop body
LE: loop exit
PB: predicated region body
PF: predicated region fallthrough
CT: control target
= control target key end

     0   :  { %s1386_s15 = smov 0   ;;  %s1388_s16 = smov 0   ;;  %s1659_s0 = inlined_call_operand.vmem [shape: bf16[8,2304], index: 0, kind: input, shape index: {}]   ;;  %s1660_s1 = inlined_call_operand.vmem [shape: bf16[2304,512], index: 1, kind: input, shape index: {}]   ;;  %s1661_s2 = inlined_call_operand.vmem [shape: f32[1,512], index: 2, kind: input, shape index: {}]   ;;  %s1662_s3 = inlined_call_operand.vmem [shape: f32[1,512], index: 3, kind: input, shape index: {}]   ;;  %s1663_s4 = inlined_call_operand.vmem [shape: f32[8,512], index: 4, kind: output, shape index: {}]  }
   0x1   :  { %s1390_s17 = smov 0   ;;  %s1392_s18 = smov 0  }
   0x2   :  { %s1394_s19 = smov 0   ;;  %s1396_s20 = smov 0  }
   0x3   :  { %s1398_s21 = smov 0  }
   0x4 LB: > { %s26_s22 = sadd.s32 1, %s1349_s19  ;;  %s29_s23 = sadd.s32 1, %s1353_s20  ;;  %s1357_s21 = sphi %s1398_s21, %s14_s21   ;;  %s1353_s20 = sphi %s1396_s20, %s1669_s20   ;;  %s1349_s19 = sphi %s1394_s19, %s1668_s19   ;;  %s1345_s18 = sphi %s1392_s18, %s1667_s18   ;;  %s1341_s17 = sphi %s1390_s17, %s1666_s17   ;;  %s1337_s16 = sphi %s1388_s16, %s1665_s16   ;;  %s1333_s15 = sphi %s1386_s15, %s1664_s15  }
   0x5   : > { %p27_p0 = scmp.ge.s32.totalorder %s26_s22, 6  ;;  %p77_p1 = scmp.ne.s32.totalorder %s1337_s16, %s1333_s15 }
   0x6   : > { %p78_p2 = scmp.eq.s32.totalorder %s1357_s21, 0  ;;  %s70_s27 = sadd.s32 1, %s1337_s16 }
   0x7   : > { %s1671_s22 = smov (%p27_p0, %s26_s22), 0  ;;  %s1673_s23 = smov (!%p27_p0, %s29_s23), %s1353_s20 }
   0x8   : > { %p79_p3 = por %p78_p2, %p77_p1  ;;  %p31_p4 = scmp.ge.s32.totalorder %s1673_s23, 2 }
   0x9   : > { %s65_s24 = ssub.s32 %s1349_s19, %s1671_s22  ;;  %p1102_p6 = scmp.ge.s32.totalorder %s1357_s21, 12 }
   0xa   : > { %s1675_s23 = smov (%p31_p4, %s1673_s23), 0 }
   0xb   : > { %s66_s25 = ssub.s32 %s1353_s20, %s1675_s23  ;;  %183 = sbr.rel (%p1102_p6) target bundleno = 48 (0x30), region = 16 }
   0xc   : > { %s67_s26 = sor.u32 %s66_s25, %s65_s24 }
   0xd   : > { %p68_p5 = scmp.eq.s32.totalorder %s67_s26, 0 }
   0xf   : > { %s1437_s28 = scalar_select %p68_p5, %s1337_s16, %s70_s27  }
  0x10   : > { %199 = sbr.rel (!%p79_p3) target bundleno = 48 (0x30), region = 24  ;;  %s201_s29 = sand.u32 (%p79_p3), 1, %s1337_s16  }
  0x11   : > { %s1168_s30 = smul.u32 (%p79_p3), 384, %s201_s29  ;;  %s1103_s5 = sshll.u32 (%p79_p3), %s1353_s20, 1 }
  0x12   : > { %s1167_s6 = smul.u32 (%p79_p3), 192, %s1349_s19 }
  0x13   : > { %s1451_s12 = scalar_lea.vmem (%p79_p3), [#allocation3], %s1168_s30 }
  0x14   : > { %s207_s7 = sadd.s32 (%p79_p3), %s1167_s6, %s1103_s5 }
  0x15   : > { %s1105_s8 = sshll.u32 %s207_s7, 2 }
  0x16   : > { %s1446_s11 = scalar_lea.vmem %s1660_s1, %s1105_s8 }
  0x17   : > { %v332_v0 = vld [vmem:[%s1446_s11] sm:$0xff]  ;;  %v334_v1 = vld [vmem:[%s1446_s11 + $0x10] sm:$0xff] }
  0x18   : > { %v336_v2 = vld [vmem:[%s1446_s11 + $0x20] sm:$0xff]  ;;  %333 = vst [vmem:[%s1451_s12] sm:$0xff] %v332_v0  ;;  %335 = vst [vmem:[%s1451_s12 + $0x8] sm:$0xff] %v334_v1  ;;  %v338_v3 = vld [vmem:[%s1446_s11 + $0x30] sm:$0xff] }
  0x19   : > { %337 = vst [vmem:[%s1451_s12 + $0x10] sm:$0xff] %v336_v2  ;;  %v340_v4 = vld [vmem:[%s1446_s11 + $0x40] sm:$0xff]  ;;  %v342_v5 = vld [vmem:[%s1446_s11 + $0x50] sm:$0xff]  ;;  %339 = vst [vmem:[%s1451_s12 + $0x18] sm:$0xff] %v338_v3 }
  0x1a   : > { %341 = vst [vmem:[%s1451_s12 + $0x20] sm:$0xff] %v340_v4  ;;  %343 = vst [vmem:[%s1451_s12 + $0x28] sm:$0xff] %v342_v5  ;;  %v344_v6 = vld [vmem:[%s1446_s11 + $0x60] sm:$0xff]  ;;  %v346_v7 = vld [vmem:[%s1446_s11 + $0x70] sm:$0xff] }
  0x1b   : > { %v348_v8 = vld [vmem:[%s1446_s11 + $0x80] sm:$0xff]  ;;  %345 = vst [vmem:[%s1451_s12 + $0x30] sm:$0xff] %v344_v6  ;;  %347 = vst [vmem:[%s1451_s12 + $0x38] sm:$0xff] %v346_v7  ;;  %v350_v9 = vld [vmem:[%s1446_s11 + $0x90] sm:$0xff] }
  0x1c   : > { %349 = vst [vmem:[%s1451_s12 + $0x40] sm:$0xff] %v348_v8  ;;  %v352_v10 = vld [vmem:[%s1446_s11 + $0xa0] sm:$0xff]  ;;  %v354_v11 = vld [vmem:[%s1446_s11 + $0xb0] sm:$0xff]  ;;  %351 = vst [vmem:[%s1451_s12 + $0x48] sm:$0xff] %v350_v9 }
  0x1d   : > { %353 = vst [vmem:[%s1451_s12 + $0x50] sm:$0xff] %v352_v10  ;;  %355 = vst [vmem:[%s1451_s12 + $0x58] sm:$0xff] %v354_v11  ;;  %v356_v12 = vld [vmem:[%s1446_s11 + $0xc0] sm:$0xff]  ;;  %v358_v13 = vld [vmem:[%s1446_s11 + $0xd0] sm:$0xff] }
  0x1e   : > { %v360_v14 = vld [vmem:[%s1446_s11 + $0xe0] sm:$0xff]  ;;  %357 = vst [vmem:[%s1451_s12 + $0x60] sm:$0xff] %v356_v12  ;;  %359 = vst [vmem:[%s1451_s12 + $0x68] sm:$0xff] %v358_v13  ;;  %v362_v15 = vld [vmem:[%s1446_s11 + $0xf0] sm:$0xff] }
  0x1f   : > { %361 = vst [vmem:[%s1451_s12 + $0x70] sm:$0xff] %v360_v14  ;;  %v364_v16 = vld [vmem:[%s1446_s11 + $0x100] sm:$0xff]  ;;  %v366_v17 = vld [vmem:[%s1446_s11 + $0x110] sm:$0xff]  ;;  %363 = vst [vmem:[%s1451_s12 + $0x78] sm:$0xff] %v362_v15 }
  0x20   : > { %365 = vst [vmem:[%s1451_s12 + $0x80] sm:$0xff] %v364_v16  ;;  %367 = vst [vmem:[%s1451_s12 + $0x88] sm:$0xff] %v366_v17  ;;  %v368_v18 = vld [vmem:[%s1446_s11 + $0x120] sm:$0xff]  ;;  %v370_v19 = vld [vmem:[%s1446_s11 + $0x130] sm:$0xff] }
  0x21   : > { %v372_v20 = vld [vmem:[%s1446_s11 + $0x140] sm:$0xff]  ;;  %369 = vst [vmem:[%s1451_s12 + $0x90] sm:$0xff] %v368_v18  ;;  %371 = vst [vmem:[%s1451_s12 + $0x98] sm:$0xff] %v370_v19  ;;  %v374_v21 = vld [vmem:[%s1446_s11 + $0x150] sm:$0xff] }
  0x22   : > { %373 = vst [vmem:[%s1451_s12 + $0xa0] sm:$0xff] %v372_v20  ;;  %v376_v22 = vld [vmem:[%s1446_s11 + $0x160] sm:$0xff]  ;;  %v378_v23 = vld [vmem:[%s1446_s11 + $0x170] sm:$0xff]  ;;  %375 = vst [vmem:[%s1451_s12 + $0xa8] sm:$0xff] %v374_v21 }
  0x23   : > { %377 = vst [vmem:[%s1451_s12 + $0xb0] sm:$0xff] %v376_v22  ;;  %379 = vst [vmem:[%s1451_s12 + $0xb8] sm:$0xff] %v378_v23  ;;  %v380_v24 = vld [vmem:[%s1446_s11 + $0x180] sm:$0xff]  ;;  %v382_v25 = vld [vmem:[%s1446_s11 + $0x190] sm:$0xff] }
  0x24   : > { %v384_v26 = vld [vmem:[%s1446_s11 + $0x1a0] sm:$0xff]  ;;  %381 = vst [vmem:[%s1451_s12 + $0xc0] sm:$0xff] %v380_v24  ;;  %383 = vst [vmem:[%s1451_s12 + $0xc8] sm:$0xff] %v382_v25  ;;  %v386_v27 = vld [vmem:[%s1446_s11 + $0x1b0] sm:$0xff] }
  0x25   : > { %385 = vst [vmem:[%s1451_s12 + $0xd0] sm:$0xff] %v384_v26  ;;  %v388_v28 = vld [vmem:[%s1446_s11 + $0x1c0] sm:$0xff]  ;;  %v390_v29 = vld [vmem:[%s1446_s11 + $0x1d0] sm:$0xff]  ;;  %387 = vst [vmem:[%s1451_s12 + $0xd8] sm:$0xff] %v386_v27 }
  0x26   : > { %389 = vst [vmem:[%s1451_s12 + $0xe0] sm:$0xff] %v388_v28  ;;  %391 = vst [vmem:[%s1451_s12 + $0xe8] sm:$0xff] %v390_v29  ;;  %v392_v30 = vld [vmem:[%s1446_s11 + $0x1e0] sm:$0xff]  ;;  %v394_v31 = vld [vmem:[%s1446_s11 + $0x1f0] sm:$0xff] }
  0x27   : > { %v396_v32 = vld [vmem:[%s1446_s11 + $0x200] sm:$0xff]  ;;  %393 = vst [vmem:[%s1451_s12 + $0xf0] sm:$0xff] %v392_v30  ;;  %395 = vst [vmem:[%s1451_s12 + $0xf8] sm:$0xff] %v394_v31  ;;  %v398_v33 = vld [vmem:[%s1446_s11 + $0x210] sm:$0xff] }
  0x28   : > { %397 = vst [vmem:[%s1451_s12 + $0x100] sm:$0xff] %v396_v32  ;;  %v400_v34 = vld [vmem:[%s1446_s11 + $0x220] sm:$0xff]  ;;  %v402_v35 = vld [vmem:[%s1446_s11 + $0x230] sm:$0xff]  ;;  %399 = vst [vmem:[%s1451_s12 + $0x108] sm:$0xff] %v398_v33 }
  0x29   : > { %401 = vst [vmem:[%s1451_s12 + $0x110] sm:$0xff] %v400_v34  ;;  %403 = vst [vmem:[%s1451_s12 + $0x118] sm:$0xff] %v402_v35  ;;  %v404_v36 = vld [vmem:[%s1446_s11 + $0x240] sm:$0xff]  ;;  %v406_v37 = vld [vmem:[%s1446_s11 + $0x250] sm:$0xff] }
  0x2a   : > { %v408_v38 = vld [vmem:[%s1446_s11 + $0x260] sm:$0xff]  ;;  %405 = vst [vmem:[%s1451_s12 + $0x120] sm:$0xff] %v404_v36  ;;  %407 = vst [vmem:[%s1451_s12 + $0x128] sm:$0xff] %v406_v37  ;;  %v410_v39 = vld [vmem:[%s1446_s11 + $0x270] sm:$0xff] }
  0x2b   : > { %409 = vst [vmem:[%s1451_s12 + $0x130] sm:$0xff] %v408_v38  ;;  %v412_v40 = vld [vmem:[%s1446_s11 + $0x280] sm:$0xff]  ;;  %v414_v41 = vld [vmem:[%s1446_s11 + $0x290] sm:$0xff]  ;;  %411 = vst [vmem:[%s1451_s12 + $0x138] sm:$0xff] %v410_v39 }
  0x2c   : > { %413 = vst [vmem:[%s1451_s12 + $0x140] sm:$0xff] %v412_v40  ;;  %415 = vst [vmem:[%s1451_s12 + $0x148] sm:$0xff] %v414_v41  ;;  %v416_v42 = vld [vmem:[%s1446_s11 + $0x2a0] sm:$0xff]  ;;  %v418_v43 = vld [vmem:[%s1446_s11 + $0x2b0] sm:$0xff] }
  0x2d   : > { %v420_v44 = vld [vmem:[%s1446_s11 + $0x2c0] sm:$0xff]  ;;  %417 = vst [vmem:[%s1451_s12 + $0x150] sm:$0xff] %v416_v42  ;;  %419 = vst [vmem:[%s1451_s12 + $0x158] sm:$0xff] %v418_v43  ;;  %v422_v45 = vld [vmem:[%s1446_s11 + $0x2d0] sm:$0xff] }
  0x2e   : > { %421 = vst [vmem:[%s1451_s12 + $0x160] sm:$0xff] %v420_v44  ;;  %v424_v46 = vld [vmem:[%s1446_s11 + $0x2e0] sm:$0xff]  ;;  %v426_v47 = vld [vmem:[%s1446_s11 + $0x2f0] sm:$0xff]  ;;  %423 = vst [vmem:[%s1451_s12 + $0x168] sm:$0xff] %v422_v45 }
  0x2f   : > { %425 = vst [vmem:[%s1451_s12 + $0x170] sm:$0xff] %v424_v46  ;;  %427 = vst [vmem:[%s1451_s12 + $0x178] sm:$0xff] %v426_v47 }
  0x30 PF: > { %p1106_p7 = scmp.ge.s32.totalorder %s1357_s21, 1  ;;  %p448_p8 = scmp.lt.s32.totalorder %s1357_s21, 13 }
  0x32   : > { %p449_p9 = pnand %p1106_p7, %p448_p8 }
  0x33   : > { %s455_s13 = sand.u32 (!%p449_p9), 1, %s1333_s15   ;;  %s501_s14 = smul.u32 (!%p449_p9), 3, %s1341_s17 }
  0x34   : > { %452 = sbr.rel (%p449_p9) target bundleno = 347 (0x15b), region = 70  ;;  %s1108_s25 = sshll.u32 (!%p449_p9), %s1345_s18, 1 }
  0x35   : > { %s1169_s24 = smul.u32 (!%p449_p9), 384, %s455_s13  ;;  %p504_p10 = scmp.lt.s32.totalorder (!%p449_p9), %s501_s14, 17 }
  0x36   : > { %p514_p11 = scmp.lt.s32.totalorder (!%p449_p9), %s1108_s25, 3  ;;  %p1112_p12 = scmp.ne.s32.totalorder (!%p449_p9), %s1341_s17, 0 }
  0x37   : > { %s1572_s13 = scalar_lea.vmem (!%p449_p9), [#allocation3], %s1169_s24 }
  0x39   : > { %s1677_s14 = smov (!%p504_p10, %s501_s14), 17  ;;  %s1679_s25 = smov (!%p514_p11, %s1108_s25), 3 }
  0x3a   : > { %s1107_s26 = sshll.u32 %s1677_s14, 2  ;;  %s516_s15 = scalar_lea.vmem %s1661_s2, %s1679_s25 }
  0x3b   : > { %s1556_s30 = scalar_lea.vmem %s1659_s0, %s1107_s26  ;;  %s521_s8 = scalar_lea.vmem %s1662_s3, %s1679_s25 }
  0x3c   : > { %s1111_s9 = sshll.u32 %s1679_s25, 3  ;;  %537 = sbr.rel (%p1112_p12) target bundleno = 67 (0x43), region = 78 }
  0x3d   : > { %s1570_s12 = scalar_lea.vmem %s1663_s4, %s1111_s9 }
  0x41   : > { %v1359_v48 = vmov 0.0  }
  0x42   : > { %538 = vst [vmem:[#allocation2] sm:$0xff] %v1359_v48  ;;  %539 = vst [vmem:[#allocation2 + $0x8] sm:$0xff] %v1359_v48 }
  0x43 PF: > { %v1228_v49 = vld [vmem:[%s1572_s13 + $0x74] ss:$8 sps:$4 sm:$0xff]   ;;  %v1230_v50 = vld [vmem:[%s1572_s13 + $0x70] ss:$8 sps:$4 sm:$0xff]   ;;  %v1360_v51 = vmov 0   ;;  %p1164_p13 = scmp.ne.s32.totalorder %s1341_s17, 5 }
  0x44   : > { %916 = vmatprep.mubr.bf16.mxu1 %v1360_v51  ;;  %843 = vmatprep.subr.bf16.mxu0 %v1228_v49  ;;  %v1231_v52 = vld [vmem:[%s1572_s13 + $0x64] ss:$8 sps:$4 sm:$0xff]   ;;  %v1233_v53 = vld [vmem:[%s1572_s13 + $0x60] ss:$8 sps:$4 sm:$0xff]   ;;  %v1234_v54 = vld [vmem:[%s1572_s13 + $0x54] ss:$8 sps:$4 sm:$0xff]  }
  0x45   : > { %844 = vmatpush1.bf16.msra.mxu0 %v1230_v50  ;;  %v1236_v55 = vld [vmem:[%s1572_s13 + $0x50] ss:$8 sps:$4 sm:$0xff]   ;;  %v1237_v56 = vld [vmem:[%s1572_s13 + $0x44] ss:$8 sps:$4 sm:$0xff]   ;;  %v1249_v57 = vld [vmem:[%s1572_s13 + $0x174] ss:$8 sps:$4 sm:$0xff]  }
  0x46   : > { %845 = vmatprep.subr.bf16.mxu0 %v1231_v52  ;;  %v1251_v58 = vld [vmem:[%s1572_s13 + $0x170] ss:$8 sps:$4 sm:$0xff]   ;;  %v1239_v59 = vld [vmem:[%s1572_s13 + $0x40] ss:$8 sps:$4 sm:$0xff]   ;;  %v1240_v60 = vld [vmem:[%s1572_s13 + $0x34] ss:$8 sps:$4 sm:$0xff]   ;;  %884 = vmatprep.subr.bf16.mxu1 %v1249_v57 }
  0x47   : > { %v1255_v61 = vld [vmem:[%s1572_s13 + $0x164] ss:$8 sps:$4 sm:$0xff]   ;;  %885 = vmatpush1.bf16.msra.mxu1 %v1251_v58  ;;  %v1257_v62 = vld [vmem:[%s1572_s13 + $0x160] ss:$8 sps:$4 sm:$0xff]   ;;  %v1242_v63 = vld [vmem:[%s1572_s13 + $0x30] ss:$8 sps:$4 sm:$0xff]  }
  0x48   : > { %886 = vmatprep.subr.bf16.mxu1 %v1255_v61  ;;  %v1261_v0 = vld [vmem:[%s1572_s13 + $0x154] ss:$8 sps:$4 sm:$0xff]   ;;  %v1243_v1 = vld [vmem:[%s1572_s13 + $0x24] ss:$8 sps:$4 sm:$0xff]   ;;  %v1263_v2 = vld [vmem:[%s1572_s13 + $0x150] ss:$8 sps:$4 sm:$0xff]  }
  0x49   : > { %846 = vmatpush1.bf16.msra.mxu0 %v1233_v53  ;;  %v1267_v3 = vld [vmem:[%s1572_s13 + $0x144] ss:$8 sps:$4 sm:$0xff]   ;;  %v1245_v4 = vld [vmem:[%s1572_s13 + $0x20] ss:$8 sps:$4 sm:$0xff]   ;;  %v1246_v5 = vld [vmem:[%s1572_s13 + $0x14] ss:$8 sps:$4 sm:$0xff]  }
  0x4a   : > { %847 = vmatprep.subr.bf16.mxu0 %v1234_v54  ;;  %v1269_v6 = vld [vmem:[%s1572_s13 + $0x140] ss:$8 sps:$4 sm:$0xff]   ;;  %v1273_v7 = vld [vmem:[%s1572_s13 + $0x134] ss:$8 sps:$4 sm:$0xff]   ;;  %v1248_v8 = vld [vmem:[%s1572_s13 + $0x10] ss:$8 sps:$4 sm:$0xff]  }
  0x4b   : > { %887 = vmatpush1.bf16.msra.mxu1 %v1257_v62  ;;  %v1252_v9 = vld [vmem:[%s1572_s13 + $0x4] ss:$8 sps:$4 sm:$0xff]   ;;  %v1275_v10 = vld [vmem:[%s1572_s13 + $0x130] ss:$8 sps:$4 sm:$0xff]   ;;  %v1254_v12 = vld [vmem:[%s1572_s13] ss:$8 sps:$4 sm:$0xff]  }
  0x4c   : > { %888 = vmatprep.subr.bf16.mxu1 %v1261_v0  ;;  %v1279_v11 = vld [vmem:[%s1572_s13 + $0x124] ss:$8 sps:$4 sm:$0xff]   ;;  %v1258_v13 = vld [vmem:[%s1572_s13 + $0xf4] ss:$8 sps:$4 sm:$0xff]   ;;  %v1281_v14 = vld [vmem:[%s1572_s13 + $0x120] ss:$8 sps:$4 sm:$0xff]  }
  0x4d   : > { %848 = vmatpush1.bf16.msra.mxu0 %v1236_v55  ;;  %v1285_v15 = vld [vmem:[%s1572_s13 + $0x114] ss:$8 sps:$4 sm:$0xff]   ;;  %v1260_v16 = vld [vmem:[%s1572_s13 + $0xf0] ss:$8 sps:$4 sm:$0xff]   ;;  %v1264_v17 = vld [vmem:[%s1572_s13 + $0xe4] ss:$8 sps:$4 sm:$0xff]  }
  0x4e   : > { %849 = vmatprep.subr.bf16.mxu0 %v1237_v56  ;;  %v542_v18 = vld [vmem:[%s1556_s30] sm:$0xff]  ;;  %v1291_v21 = vld [vmem:[%s1572_s13 + $0x104] ss:$8 sps:$4 sm:$0xff]   ;;  %v1266_v22 = vld [vmem:[%s1572_s13 + $0xe0] ss:$8 sps:$4 sm:$0xff]  }
  0x4f   : > { %889 = vmatpush1.bf16.msra.mxu1 %v1263_v2  ;;  %v1287_v19 = vld [vmem:[%s1572_s13 + $0x110] ss:$8 sps:$4 sm:$0xff]   ;;  %v1114_v20 = vcombine.high %v542_v18, %v542_v18  ;;  %v1270_v23 = vld [vmem:[%s1572_s13 + $0xd4] ss:$8 sps:$4 sm:$0xff]   ;;  %v1293_v24 = vld [vmem:[%s1572_s13 + $0x100] ss:$8 sps:$4 sm:$0xff]   ;;  %v1113_v37 = vcombine.low %v542_v18, %v542_v18 }
  0x50   : > { %890 = vmatprep.subr.bf16.mxu1 %v1267_v3  ;;  %v1272_v25 = vld [vmem:[%s1572_s13 + $0xd0] ss:$8 sps:$4 sm:$0xff]   ;;  %v1276_v26 = vld [vmem:[%s1572_s13 + $0xc4] ss:$8 sps:$4 sm:$0xff]   ;;  %v1278_v28 = vld [vmem:[%s1572_s13 + $0xc0] ss:$8 sps:$4 sm:$0xff]  }
  0x51   : > { %850 = vmatpush1.bf16.msra.mxu0 %v1239_v59  ;;  %875 = vmatprep.mubr.bf16.mxu0 %v1114_v20  ;;  %v1297_v27 = vld [vmem:[%s1556_s30 + $0x8] ss:$0 sps:$4 sm:$0xff]   ;;  %v1282_v29 = vld [vmem:[%s1572_s13 + $0xb4] ss:$8 sps:$4 sm:$0xff]   ;;  %v1288_v31 = vld [vmem:[%s1572_s13 + $0xa4] ss:$8 sps:$4 sm:$0xff]  }
  0x52   : > { %851 = vmatprep.subr.bf16.mxu0 %v1240_v60  ;;  %v1284_v30 = vld [vmem:[%s1572_s13 + $0xb0] ss:$8 sps:$4 sm:$0xff]   ;;  %v1290_v32 = vld [vmem:[%s1572_s13 + $0xa0] ss:$8 sps:$4 sm:$0xff]   ;;  %v1294_v33 = vld [vmem:[%s1572_s13 + $0x94] ss:$8 sps:$4 sm:$0xff]  }
  0x53   : > { %891 = vmatpush1.bf16.msra.mxu1 %v1269_v6  ;;  %v1296_v34 = vld [vmem:[%s1572_s13 + $0x90] ss:$8 sps:$4 sm:$0xff]   ;;  %v1298_v35 = vld [vmem:[%s1572_s13 + $0x84] ss:$8 sps:$4 sm:$0xff]   ;;  %v1300_v36 = vld [vmem:[%s1572_s13 + $0x80] ss:$8 sps:$4 sm:$0xff]  }
  0x54   : > { %892 = vmatprep.subr.bf16.mxu1 %v1273_v7  ;;  %v540_v42 = vld [vmem:[#allocation2] sm:$0xff]  ;;  %v541_v45 = vld [vmem:[#allocation2 + $0x8] sm:$0xff] }
  0x55   : > { %852 = vmatpush1.bf16.msra.mxu0 %v1242_v63 }
  0x56   : > { %853 = vmatprep.subr.bf16.mxu0 %v1243_v1 }
  0x57   : > { %893 = vmatpush1.bf16.msra.mxu1 %v1275_v10 }
  0x58   : > { %894 = vmatprep.subr.bf16.mxu1 %v1279_v11 }
  0x59   : > { %854 = vmatpush1.bf16.msra.mxu0 %v1245_v4 }
  0x5a   : > { %855 = vmatprep.subr.bf16.mxu0 %v1246_v5 }
  0x5b   : > { %895 = vmatpush1.bf16.msra.mxu1 %v1281_v14 }
  0x5c   : > { %896 = vmatprep.subr.bf16.mxu1 %v1285_v15 }
  0x5d   : > { %856 = vmatpush1.bf16.msra.mxu0 %v1248_v8 }
  0x5e   : > { %857 = vmatprep.subr.bf16.mxu0 %v1252_v9 }
  0x5f   : > { %897 = vmatpush1.bf16.msra.mxu1 %v1287_v19 }
  0x60   : > { %898 = vmatprep.subr.bf16.mxu1 %v1291_v21 }
  0x61   : > { %858 = vmatpush1.bf16.msra.mxu0 %v1254_v12 }
  0x62   : > { %859 = vmatprep.subr.bf16.mxu0 %v1258_v13 }
  0x63   : > { %899 = vmatpush1.bf16.msra.mxu1 %v1293_v24 }
  0x65   : > { %860 = vmatpush2.bf16.msra.mxu0 %v1260_v16 }
  0x66   : > { %861 = vmatprep.subr.bf16.mxu0 %v1264_v17  ;;  %917 = vmatmul.mubr.bf16.vlgmr.msra.gmra.mxu1 %v1297_v27 }
  0x69   : > { %862 = vmatpush2.bf16.msra.mxu0 %v1266_v22 }
  0x6a   : > { %863 = vmatprep.subr.bf16.mxu0 %v1270_v23 }
  0x6d   : > { %864 = vmatpush2.bf16.msra.mxu0 %v1272_v25 }
  0x6e   : > { %865 = vmatprep.subr.bf16.mxu0 %v1276_v26 }
  0x71   : > { %866 = vmatpush2.bf16.msra.mxu0 %v1278_v28 }
  0x72   : > { %867 = vmatprep.subr.bf16.mxu0 %v1282_v29 }
  0x75   : > { %868 = vmatpush2.bf16.msra.mxu0 %v1284_v30 }
  0x76   : > { %869 = vmatprep.subr.bf16.mxu0 %v1288_v31 }
  0x79   : > { %870 = vmatpush2.bf16.msra.mxu0 %v1290_v32 }
  0x7a   : > { %871 = vmatprep.subr.bf16.mxu0 %v1294_v33 }
  0x7d   : > { %872 = vmatpush2.bf16.msra.mxu0 %v1296_v34 }
  0x7e   : > { %873 = vmatprep.subr.bf16.mxu0 %v1298_v35 }
  0x81   : > { %874 = vmatpush2.bf16.msra.mxu0 %v1300_v36 }
  0x84   : > { %876 = vmatmul.mubr.bf16.vlgmr.msra.gmra.mxu0 %v1113_v37 }
 0x126   : > { %v918_v38 = vpop.f32.mrf.mxu1 }
 0x128   : > { %v920_v39 = vpop.f32.mrf.mxu1 }
 0x12a   : > { %v922_v40 = vpop.f32.mrf.mxu1 }
 0x12c   : > { %v923_v41 = vpop.f32.mrf.mxu1 }
 0x144   : > { %v877_v43 = vpop.f32.mrf.mxu0 }
 0x145   : > { %v919_v44 = vadd.f32 %v918_v38, %v877_v43 }
 0x146   : > { %v879_v46 = vpop.f32.mrf.mxu0 }
 0x147   : > { %v925_v47 = vadd.f32 %v919_v44, %v540_v42  ;;  %v921_v48 = vadd.f32 %v920_v39, %v879_v46  ;;  %932 = sbr.rel (%p1164_p13) target bundleno = 347 (0x15b), region = 82 }
 0x148   : > { %v881_v49 = vpop.f32.mrf.mxu0 }
 0x149   : > { %927 = vst [vmem:[#allocation2] sm:$0xff] %v925_v47  ;;  %v926_v50 = vadd.f32 %v921_v48, %v541_v45 }
 0x14a   : > { %v882_v51 = vpop.f32.mrf.mxu0 }
 0x14b   : > { %928 = vst [vmem:[#allocation2 + $0x8] sm:$0xff] %v926_v50 }
 0x14c   : > { %v937_v52 = vlaneseq  ;;  %v935_v54 = vld [vmem:[%s516_s15] sm:$0x3] }
 0x14d   : > { %v949_v55 = vld [vmem:[%s521_s8] sm:$0x3] }
 0x14e   : > { %v938_v53 = vshrl.u32 %v937_v52, 7 }
 0x150   : > { %v939_v56 = vsub.s32 0, %v938_v53  ;;  %v943_v57 = vsub.s32 1, %v938_v53  ;;  %v933_v58 = vld [vmem:[#allocation2] sm:$0xff] }
 0x152   : > { %v934_v59 = vld [vmem:[#allocation2 + $0x8] sm:$0xff]  ;;  %v940_v60 = vrot.slane %v935_v54, %v939_v56  ;;  %v954_v61 = vrot.slane %v949_v55, %v939_v56  ;;  %v944_v62 = vrot.slane %v935_v54, %v943_v57  ;;  %v958_v63 = vrot.slane %v949_v55, %v943_v57 }
 0x154   : > { %v947_v0 = vmul.f32 %v940_v60, %v933_v58  ;;  %v948_v1 = vmul.f32 %v944_v62, %v934_v59 }
 0x156   : > { %v961_v2 = vadd.f32 %v954_v61, %v947_v0  ;;  %v962_v3 = vadd.f32 %v958_v63, %v948_v1 }
 0x158   : > { %v963_v4 = vmax.f32 %v961_v2, 0.0  ;;  %v964_v5 = vmax.f32 %v962_v3, 0.0 }
 0x15a   : > { %965 = vst [vmem:[%s1570_s12] sm:$0xff] %v963_v4  ;;  %966 = vst [vmem:[%s1570_s12 + $0x8] sm:$0xff] %v964_v5 }
 0x15b PF: > { %s14_s21 = sadd.s32 1, %s1357_s21   ;;  %s1664_s15 = smov %s1337_s16 }
 0x15c   : > { %p11_p0 = scmp.ge.s32.totalorder %s14_s21, 14   ;;  %s1665_s16 = smov %s1437_s28 }
 0x15d   : > { %s1666_s17 = smov %s1349_s19  ;;  %s1667_s18 = smov %s1353_s20 }
 0x15e   : > { %s1668_s19 = smov %s1671_s22  ;;  %s1669_s20 = smov %s1675_s23 }
 0x15f   :  { %13 = sbr.rel (!%p11_p0) target bundleno = 4 (0x4), region = 126 }

// kernel: _lambda_.35
= control target key start
LH: loop header
LB: loop body
LE: loop exit
PB: predicated region body
PF: predicated region fallthrough
CT: control target
= control target key end

     0   :  { %s1095_s15 = smov 0   ;;  %s1097_s16 = smov 0   ;;  %s1277_s0 = inlined_call_operand.vmem [shape: bf16[8,256], index: 0, kind: input, shape index: {}]   ;;  %s1278_s1 = inlined_call_operand.vmem [shape: bf16[256,512], index: 1, kind: input, shape index: {}]   ;;  %s1279_s2 = inlined_call_operand.vmem [shape: f32[1,512], index: 2, kind: input, shape index: {}]   ;;  %s1280_s3 = inlined_call_operand.vmem [shape: f32[1,512], index: 3, kind: input, shape index: {}]   ;;  %s1281_s4 = inlined_call_operand.vmem [shape: f32[8,512], index: 4, kind: output, shape index: {}]  }
   0x1   :  { %s1099_s17 = smov 0   ;;  %s1101_s18 = smov 0  }
   0x2   :  { %s1103_s19 = smov 0  }
   0x3 LB: > { %s29_s20 = sadd.s32 1, %s1064_s18  ;;  %p77_p1 = scmp.ne.s32.totalorder %s1056_s16, %s1052_s15  ;;  %s1068_s19 = sphi %s1103_s19, %s14_s19   ;;  %s1064_s18 = sphi %s1101_s18, %s1285_s18   ;;  %s1060_s17 = sphi %s1099_s17, %s1284_s17   ;;  %s1056_s16 = sphi %s1097_s16, %s1283_s16   ;;  %s1052_s15 = sphi %s1095_s15, %s1282_s15  }
   0x4   : > { %p31_p0 = scmp.ge.s32.totalorder %s29_s20, 2  ;;  %p78_p2 = scmp.eq.s32.totalorder %s1068_s19, 0 }
   0x5   : > { %s70_s22 = sadd.s32 1, %s1056_s16  ;;  %p893_p5 = scmp.ge.s32.totalorder %s1068_s19, 2 }
   0x6   : > { %s1287_s20 = smov (%p31_p0, %s29_s20), 0  ;;  %p79_p3 = por %p78_p2, %p77_p1 }
   0x7   : > { %s66_s21 = ssub.s32 %s1064_s18, %s1287_s20  ;;  %196 = sbr.rel (%p893_p5) target bundleno = 32 (0x20), region = 20 }
   0x8   : > { %p68_p4 = scmp.eq.s32.totalorder %s66_s21, 0 }
   0xa   : > { %s1130_s23 = scalar_select %p68_p4, %s1056_s16, %s70_s22  }
   0xc   : > { %199 = sbr.rel (!%p79_p3) target bundleno = 32 (0x20), region = 24  ;;  %s201_s24 = sand.u32 (%p79_p3), 1, %s1056_s16  }
   0xd   : > { %s939_s25 = sshll.u32 (%p79_p3), %s1064_s18, 3  ;;  %s894_s26 = sshll.u32 (%p79_p3), %s201_s24, 8 }
   0xe   : > { %s1138_s29 = scalar_lea.vmem (%p79_p3), %s1278_s1, %s939_s25  ;;  %s1143_s30 = scalar_lea.vmem (%p79_p3), [#allocation3], %s894_s26 }
   0xf   : > { %v300_v0 = vld [vmem:[%s1138_s29] sm:$0xff] (%p79_p3)  ;;  %v302_v1 = vld [vmem:[%s1138_s29 + $0x10] sm:$0xff] (%p79_p3) }
  0x10   : > { %v304_v2 = vld [vmem:[%s1138_s29 + $0x20] sm:$0xff] (%p79_p3)  ;;  %301 = vst [vmem:[%s1143_s30] sm:$0xff] (%p79_p3), %v300_v0  ;;  %303 = vst [vmem:[%s1143_s30 + $0x8] sm:$0xff] (%p79_p3), %v302_v1  ;;  %v306_v3 = vld [vmem:[%s1138_s29 + $0x30] sm:$0xff] (%p79_p3) }
  0x11   : > { %305 = vst [vmem:[%s1143_s30 + $0x10] sm:$0xff] %v304_v2  ;;  %v308_v4 = vld [vmem:[%s1138_s29 + $0x40] sm:$0xff]  ;;  %v310_v5 = vld [vmem:[%s1138_s29 + $0x50] sm:$0xff]  ;;  %307 = vst [vmem:[%s1143_s30 + $0x18] sm:$0xff] %v306_v3 }
  0x12   : > { %309 = vst [vmem:[%s1143_s30 + $0x20] sm:$0xff] %v308_v4  ;;  %311 = vst [vmem:[%s1143_s30 + $0x28] sm:$0xff] %v310_v5  ;;  %v312_v6 = vld [vmem:[%s1138_s29 + $0x60] sm:$0xff]  ;;  %v314_v7 = vld [vmem:[%s1138_s29 + $0x70] sm:$0xff] }
  0x13   : > { %v316_v8 = vld [vmem:[%s1138_s29 + $0x80] sm:$0xff]  ;;  %313 = vst [vmem:[%s1143_s30 + $0x30] sm:$0xff] %v312_v6  ;;  %315 = vst [vmem:[%s1143_s30 + $0x38] sm:$0xff] %v314_v7  ;;  %v318_v9 = vld [vmem:[%s1138_s29 + $0x90] sm:$0xff] }
  0x14   : > { %317 = vst [vmem:[%s1143_s30 + $0x40] sm:$0xff] %v316_v8  ;;  %v320_v10 = vld [vmem:[%s1138_s29 + $0xa0] sm:$0xff]  ;;  %v322_v11 = vld [vmem:[%s1138_s29 + $0xb0] sm:$0xff]  ;;  %319 = vst [vmem:[%s1143_s30 + $0x48] sm:$0xff] %v318_v9 }
  0x15   : > { %321 = vst [vmem:[%s1143_s30 + $0x50] sm:$0xff] %v320_v10  ;;  %323 = vst [vmem:[%s1143_s30 + $0x58] sm:$0xff] %v322_v11  ;;  %v324_v12 = vld [vmem:[%s1138_s29 + $0xc0] sm:$0xff]  ;;  %v326_v13 = vld [vmem:[%s1138_s29 + $0xd0] sm:$0xff] }
  0x16   : > { %v328_v14 = vld [vmem:[%s1138_s29 + $0xe0] sm:$0xff]  ;;  %325 = vst [vmem:[%s1143_s30 + $0x60] sm:$0xff] %v324_v12  ;;  %327 = vst [vmem:[%s1143_s30 + $0x68] sm:$0xff] %v326_v13  ;;  %v330_v15 = vld [vmem:[%s1138_s29 + $0xf0] sm:$0xff] }
  0x17   : > { %329 = vst [vmem:[%s1143_s30 + $0x70] sm:$0xff] %v328_v14  ;;  %v332_v16 = vld [vmem:[%s1138_s29 + $0x100] sm:$0xff]  ;;  %v334_v17 = vld [vmem:[%s1138_s29 + $0x110] sm:$0xff]  ;;  %331 = vst [vmem:[%s1143_s30 + $0x78] sm:$0xff] %v330_v15 }
  0x18   : > { %333 = vst [vmem:[%s1143_s30 + $0x80] sm:$0xff] %v332_v16  ;;  %335 = vst [vmem:[%s1143_s30 + $0x88] sm:$0xff] %v334_v17  ;;  %v336_v18 = vld [vmem:[%s1138_s29 + $0x120] sm:$0xff]  ;;  %v338_v19 = vld [vmem:[%s1138_s29 + $0x130] sm:$0xff] }
  0x19   : > { %v340_v20 = vld [vmem:[%s1138_s29 + $0x140] sm:$0xff]  ;;  %337 = vst [vmem:[%s1143_s30 + $0x90] sm:$0xff] %v336_v18  ;;  %339 = vst [vmem:[%s1143_s30 + $0x98] sm:$0xff] %v338_v19  ;;  %v342_v21 = vld [vmem:[%s1138_s29 + $0x150] sm:$0xff] }
  0x1a   : > { %341 = vst [vmem:[%s1143_s30 + $0xa0] sm:$0xff] %v340_v20  ;;  %v344_v22 = vld [vmem:[%s1138_s29 + $0x160] sm:$0xff]  ;;  %v346_v23 = vld [vmem:[%s1138_s29 + $0x170] sm:$0xff]  ;;  %343 = vst [vmem:[%s1143_s30 + $0xa8] sm:$0xff] %v342_v21 }
  0x1b   : > { %345 = vst [vmem:[%s1143_s30 + $0xb0] sm:$0xff] %v344_v22  ;;  %347 = vst [vmem:[%s1143_s30 + $0xb8] sm:$0xff] %v346_v23  ;;  %v348_v24 = vld [vmem:[%s1138_s29 + $0x180] sm:$0xff]  ;;  %v350_v25 = vld [vmem:[%s1138_s29 + $0x190] sm:$0xff] }
  0x1c   : > { %v352_v26 = vld [vmem:[%s1138_s29 + $0x1a0] sm:$0xff]  ;;  %349 = vst [vmem:[%s1143_s30 + $0xc0] sm:$0xff] %v348_v24  ;;  %351 = vst [vmem:[%s1143_s30 + $0xc8] sm:$0xff] %v350_v25  ;;  %v354_v27 = vld [vmem:[%s1138_s29 + $0x1b0] sm:$0xff] }
  0x1d   : > { %353 = vst [vmem:[%s1143_s30 + $0xd0] sm:$0xff] %v352_v26  ;;  %v356_v28 = vld [vmem:[%s1138_s29 + $0x1c0] sm:$0xff]  ;;  %v358_v29 = vld [vmem:[%s1138_s29 + $0x1d0] sm:$0xff]  ;;  %355 = vst [vmem:[%s1143_s30 + $0xd8] sm:$0xff] %v354_v27 }
  0x1e   : > { %357 = vst [vmem:[%s1143_s30 + $0xe0] sm:$0xff] %v356_v28  ;;  %359 = vst [vmem:[%s1143_s30 + $0xe8] sm:$0xff] %v358_v29  ;;  %v360_v30 = vld [vmem:[%s1138_s29 + $0x1e0] sm:$0xff]  ;;  %v362_v31 = vld [vmem:[%s1138_s29 + $0x1f0] sm:$0xff] }
  0x1f   : > { %361 = vst [vmem:[%s1143_s30 + $0xf0] sm:$0xff] %v360_v30  ;;  %363 = vst [vmem:[%s1143_s30 + $0xf8] sm:$0xff] %v362_v31 }
  0x20 PF: > { %p897_p6 = scmp.ge.s32.totalorder %s1068_s19, 1  ;;  %p384_p7 = scmp.lt.s32.totalorder %s1068_s19, 3 }
  0x22   : > { %p385_p8 = pnand %p897_p6, %p384_p7 }
  0x23   : > { %s391_s5 = sand.u32 (!%p385_p8), 1, %s1052_s15   ;;  %s899_s10 = sshll.u32 (!%p385_p8), %s1060_s17, 1 }
  0x24   : > { %388 = sbr.rel (%p385_p8) target bundleno = 306 (0x132), region = 70  ;;  %s898_s8 = sshll.u32 (!%p385_p8), %s391_s5, 8 }
  0x25   : > { %s1216_s9 = scalar_lea.vmem (!%p385_p8), [#allocation3], %s898_s8  ;;  %p450_p9 = scmp.lt.s32.totalorder (!%p385_p8), %s899_s10, 3 }
  0x29   : > { %v1212_v32 = vld [vmem:[%s1277_s0] sm:$0xff]  ;;  %v980_v34 = vld [vmem:[%s1216_s9 + $0x74] ss:$8 sps:$4 sm:$0xff]   ;;  %v982_v35 = vld [vmem:[%s1216_s9 + $0x70] ss:$8 sps:$4 sm:$0xff]   ;;  %v729_v3 = vlaneseq  ;;  %s1289_s10 = smov (!%p450_p9, %s899_s10), 3 }
  0x2a   : > { %v904_v33 = vcombine.high %v1212_v32, %v1212_v32  ;;  %677 = vmatprep.subr.bf16.mxu0 %v980_v34  ;;  %v983_v36 = vld [vmem:[%s1216_s9 + $0x64] ss:$8 sps:$4 sm:$0xff]   ;;  %v985_v37 = vld [vmem:[%s1216_s9 + $0x60] ss:$8 sps:$4 sm:$0xff]   ;;  %v986_v38 = vld [vmem:[%s1216_s9 + $0x54] ss:$8 sps:$4 sm:$0xff]   ;;  %v903_v2 = vcombine.low %v1212_v32, %v1212_v32  ;;  %s452_s13 = scalar_lea.vmem %s1279_s2, %s1289_s10  ;;  %s457_s21 = scalar_lea.vmem %s1280_s3, %s1289_s10 }
  0x2b   : > { %678 = vmatpush1.bf16.msra.mxu0 %v982_v35  ;;  %v988_v39 = vld [vmem:[%s1216_s9 + $0x50] ss:$8 sps:$4 sm:$0xff]   ;;  %v989_v40 = vld [vmem:[%s1216_s9 + $0x44] ss:$8 sps:$4 sm:$0xff]   ;;  %v991_v41 = vld [vmem:[%s1216_s9 + $0x40] ss:$8 sps:$4 sm:$0xff]  }
  0x2c   : > { %709 = vmatprep.mubr.bf16.mxu0 %v904_v33  ;;  %679 = vmatprep.subr.bf16.mxu0 %v983_v36  ;;  %v992_v42 = vld [vmem:[%s1216_s9 + $0x34] ss:$8 sps:$4 sm:$0xff]   ;;  %v994_v43 = vld [vmem:[%s1216_s9 + $0x30] ss:$8 sps:$4 sm:$0xff]   ;;  %v995_v44 = vld [vmem:[%s1216_s9 + $0x24] ss:$8 sps:$4 sm:$0xff]  }
  0x2d   : > { %v997_v45 = vld [vmem:[%s1216_s9 + $0x20] ss:$8 sps:$4 sm:$0xff]   ;;  %v998_v46 = vld [vmem:[%s1216_s9 + $0x14] ss:$8 sps:$4 sm:$0xff]   ;;  %v1000_v47 = vld [vmem:[%s1216_s9 + $0x10] ss:$8 sps:$4 sm:$0xff]  }
  0x2e   : > { %v1001_v48 = vld [vmem:[%s1216_s9 + $0x4] ss:$8 sps:$4 sm:$0xff]   ;;  %v1003_v49 = vld [vmem:[%s1216_s9] ss:$8 sps:$4 sm:$0xff]   ;;  %v1004_v50 = vld [vmem:[%s1216_s9 + $0xf4] ss:$8 sps:$4 sm:$0xff]  }
  0x2f   : > { %680 = vmatpush1.bf16.msra.mxu0 %v985_v37  ;;  %v1006_v51 = vld [vmem:[%s1216_s9 + $0xf0] ss:$8 sps:$4 sm:$0xff]   ;;  %v1007_v52 = vld [vmem:[%s1216_s9 + $0xe4] ss:$8 sps:$4 sm:$0xff]   ;;  %v1009_v53 = vld [vmem:[%s1216_s9 + $0xe0] ss:$8 sps:$4 sm:$0xff]  }
  0x30   : > { %681 = vmatprep.subr.bf16.mxu0 %v986_v38  ;;  %v1010_v54 = vld [vmem:[%s1216_s9 + $0xd4] ss:$8 sps:$4 sm:$0xff]   ;;  %v1012_v55 = vld [vmem:[%s1216_s9 + $0xd0] ss:$8 sps:$4 sm:$0xff]   ;;  %v1013_v56 = vld [vmem:[%s1216_s9 + $0xc4] ss:$8 sps:$4 sm:$0xff]  }
  0x31   : > { %v1015_v57 = vld [vmem:[%s1216_s9 + $0xc0] ss:$8 sps:$4 sm:$0xff]   ;;  %v1016_v58 = vld [vmem:[%s1216_s9 + $0xb4] ss:$8 sps:$4 sm:$0xff]   ;;  %v1018_v59 = vld [vmem:[%s1216_s9 + $0xb0] ss:$8 sps:$4 sm:$0xff]  }
  0x32   : > { %v1019_v60 = vld [vmem:[%s1216_s9 + $0xa4] ss:$8 sps:$4 sm:$0xff]   ;;  %v1021_v61 = vld [vmem:[%s1216_s9 + $0xa0] ss:$8 sps:$4 sm:$0xff]   ;;  %v1022_v62 = vld [vmem:[%s1216_s9 + $0x94] ss:$8 sps:$4 sm:$0xff]  }
  0x33   : > { %682 = vmatpush1.bf16.msra.mxu0 %v988_v39  ;;  %v1024_v63 = vld [vmem:[%s1216_s9 + $0x90] ss:$8 sps:$4 sm:$0xff]   ;;  %v1025_v0 = vld [vmem:[%s1216_s9 + $0x84] ss:$8 sps:$4 sm:$0xff]   ;;  %v1027_v1 = vld [vmem:[%s1216_s9 + $0x80] ss:$8 sps:$4 sm:$0xff]  }
  0x34   : > { %683 = vmatprep.subr.bf16.mxu0 %v989_v40  ;;  %v730_v4 = vshrl.u32 %v729_v3, 7  ;;  %v727_v6 = vld [vmem:[%s452_s13] sm:$0x3]  ;;  %s902_s22 = sshll.u32 %s1289_s10, 3 }
  0x35   : > { %v741_v8 = vld [vmem:[%s457_s21] sm:$0x3]  ;;  %s467_s25 = scalar_lea.vmem %s1281_s4, %s902_s22 }
  0x36   : > { %v731_v5 = vsub.s32 0, %v730_v4  ;;  %v735_v7 = vsub.s32 1, %v730_v4 }
  0x37   : > { %684 = vmatpush1.bf16.msra.mxu0 %v991_v41 }
  0x38   : > { %685 = vmatprep.subr.bf16.mxu0 %v992_v42  ;;  %v732_v9 = vrot.slane %v727_v6, %v731_v5  ;;  %v746_v10 = vrot.slane %v741_v8, %v731_v5  ;;  %v736_v11 = vrot.slane %v727_v6, %v735_v7  ;;  %v750_v14 = vrot.slane %v741_v8, %v735_v7 }
  0x3b   : > { %686 = vmatpush1.bf16.msra.mxu0 %v994_v43 }
  0x3c   : > { %687 = vmatprep.subr.bf16.mxu0 %v995_v44 }
  0x3f   : > { %688 = vmatpush1.bf16.msra.mxu0 %v997_v45 }
  0x40   : > { %689 = vmatprep.subr.bf16.mxu0 %v998_v46 }
  0x43   : > { %690 = vmatpush1.bf16.msra.mxu0 %v1000_v47 }
  0x44   : > { %691 = vmatprep.subr.bf16.mxu0 %v1001_v48 }
  0x47   : > { %692 = vmatpush1.bf16.msra.mxu0 %v1003_v49 }
  0x48   : > { %693 = vmatprep.subr.bf16.mxu0 %v1004_v50 }
  0x4b   : > { %694 = vmatpush2.bf16.msra.mxu0 %v1006_v51 }
  0x4c   : > { %695 = vmatprep.subr.bf16.mxu0 %v1007_v52 }
  0x4f   : > { %696 = vmatpush2.bf16.msra.mxu0 %v1009_v53 }
  0x50   : > { %697 = vmatprep.subr.bf16.mxu0 %v1010_v54 }
  0x53   : > { %698 = vmatpush2.bf16.msra.mxu0 %v1012_v55 }
  0x54   : > { %699 = vmatprep.subr.bf16.mxu0 %v1013_v56 }
  0x57   : > { %700 = vmatpush2.bf16.msra.mxu0 %v1015_v57 }
  0x58   : > { %701 = vmatprep.subr.bf16.mxu0 %v1016_v58 }
  0x5b   : > { %702 = vmatpush2.bf16.msra.mxu0 %v1018_v59 }
  0x5c   : > { %703 = vmatprep.subr.bf16.mxu0 %v1019_v60 }
  0x5f   : > { %704 = vmatpush2.bf16.msra.mxu0 %v1021_v61 }
  0x60   : > { %705 = vmatprep.subr.bf16.mxu0 %v1022_v62 }
  0x63   : > { %706 = vmatpush2.bf16.msra.mxu0 %v1024_v63 }
  0x64   : > { %707 = vmatprep.subr.bf16.mxu0 %v1025_v0 }
  0x67   : > { %708 = vmatpush2.bf16.msra.mxu0 %v1027_v1 }
  0x6a   : > { %710 = vmatmul.mubr.bf16.vlgmr.msra.gmra.mxu0 %v903_v2 }
 0x12a   : > { %v711_v12 = vpop.f32.mrf.mxu0 }
 0x12b   : > { %v739_v13 = vmul.f32 %v732_v9, %v711_v12 }
 0x12c   : > { %v713_v15 = vpop.f32.mrf.mxu0 }
 0x12d   : > { %v753_v16 = vadd.f32 %v746_v10, %v739_v13  ;;  %v740_v17 = vmul.f32 %v736_v11, %v713_v15 }
 0x12e   : > { %v715_v18 = vpop.f32.mrf.mxu0 }
 0x12f   : > { %755 = vst [vmem:[%s467_s25] sm:$0xff] %v753_v16  ;;  %v754_v19 = vadd.f32 %v750_v14, %v740_v17 }
 0x130   : > { %v716_v20 = vpop.f32.mrf.mxu0 }
 0x131   : > { %756 = vst [vmem:[%s467_s25 + $0x8] sm:$0xff] %v754_v19 }
 0x132 PF: > { %s14_s19 = sadd.s32 1, %s1068_s19   ;;  %s1282_s15 = smov %s1056_s16 }
 0x133   : > { %p11_p10 = scmp.ge.s32.totalorder %s14_s19, 4   ;;  %s1283_s16 = smov %s1130_s23 }
 0x134   : > { %s1284_s17 = smov %s1064_s18  ;;  %s1285_s18 = smov %s1287_s20 }
 0x135   :  { %13 = sbr.rel (!%p11_p10) target bundleno = 3 (0x3), region = 126 }

</bundles_post_ra>
